<compile_context>
chip_gen: v7x
topology: tpu7x:2x2x1
jax: 0.10.0
libtpu: 0.0.40
codegen_flags: <defaults>
</compile_context>

<pallas_src>
import functools

import jax
import jax.numpy as jnp
from jax.experimental import pallas as pl
from jax.experimental.pallas import tpu as pltpu

SELU_ALPHA = 1.6732632423543772
SELU_SCALE = 1.0507009873554804


def _selu(x):
    # f32 SELU (v5e has no bf16 VPU/EUP; exp goes to the EUP slot).
    return SELU_SCALE * jnp.where(x > 0, x, SELU_ALPHA * (jnp.exp(x) - 1.0))


def _round_up(n, m):
    return ((n + m - 1) // m) * m


def autoppi_kernel(x_ref,
                   ew1, eb1, ew2, eb2, ew3, eb3,
                   dw1, db1, dw2, db2, dw3, db3,
                   out_ref, *, feature_size):
    F = feature_size
    TB = x_ref.shape[0]

    def mm(a, w_ref):
        # bf16 x bf16 on the MXU, f32 accumulate.
        return jnp.dot(a.astype(jnp.bfloat16), w_ref[...],
                       preferred_element_type=jnp.float32)

    # Fuse the two siamese branches along the sublane (batch) axis: [2*TB, F].
    # x arrives as bf16 from HBM, so this is a single half-width copy.
    xs = jnp.concatenate([x_ref[:, :F], x_ref[:, F:]], axis=0)

    # --- shared encoder (run once on the stacked batch) ---
    h = _selu(mm(xs, ew1) + eb1[...])
    h = _selu(mm(h, ew2) + eb2[...])
    z = _selu(mm(h, ew3) + eb3[...])          # [2*TB, MIN_P], padded lanes == 0

    # Decoder input: lane-adjacent concat([z, z1*z2]) as one [2*TB, 2*MIN_P]
    # bf16 tensor -> a single K=2*MIN_P matmul that fills the 256-deep MXU on
    # v6e/v7x.  (On v5e's 128-deep MXU a split matmul on TB rows would save
    # ~25% of this layer's MXU work, but the kernel is HBM-bound, so keep the
    # simpler fused form everywhere.)
    z_bf = z.astype(jnp.bfloat16)
    zmul_bf = (z[:TB] * z[TB:]).astype(jnp.bfloat16)      # [TB, MIN_P]
    dec_in = jnp.concatenate(
        [z_bf, jnp.concatenate([zmul_bf, zmul_bf], axis=0)], axis=-1)

    # --- shared decoder (run once) ---
    h = _selu(mm(dec_in, dw1) + db1[...])
    h = _selu(mm(h, dw2) + db2[...])
    y = mm(h, dw3) + db3[...]                 # [2*TB, F]; no activation on DecL3

    out_ref[:, :F] = y[:TB].astype(out_ref.dtype)
    out_ref[:, F:] = y[TB:].astype(out_ref.dtype)


def make_params(key, feature_size, reg_size, min_size, dtype=jnp.float32):
    """Deterministic synthetic parameters (weights stored as [in, out])."""
    dims = [
        ("EncL1", feature_size, reg_size),
        ("EncL2", reg_size, reg_size),
        ("EncL3", reg_size, min_size),
        ("DecL1", min_size * 2, reg_size),
        ("DecL2", reg_size, reg_size),
        ("DecL3", reg_size, feature_size),
    ]
    params = []
    for i, (_, fan_in, fan_out) in enumerate(dims):
        kw, kb = jax.random.split(jax.random.fold_in(key, i))
        bound = 1.0 / jnp.sqrt(fan_in)
        w = jax.random.uniform(kw, (fan_in, fan_out), dtype, -bound, bound)
        b = jax.random.uniform(kb, (1, fan_out), dtype, -bound, bound)
        params += [w, b]
    return params


def prepare_kernel_params(params, min_size):
    """Cast weights to bf16 and zero-pad minSize to a 128-lane multiple.

    DecL1's weight is re-stacked as [z-rows(padded); zmul-rows(padded)] so the
    kernel can run a single K = 2*MIN_P matmul on the lane-adjacent decoder
    input; the zero-padded lanes of z / zmul hit zero rows, so it is exact.
    """
    ew1, eb1, ew2, eb2, ew3, eb3, dw1, db1, dw2, db2, dw3, db3 = params
    min_p = _round_up(min_size, 128)
    pad = min_p - min_size

    ew3p = jnp.pad(ew3, ((0, 0), (0, pad)))
    eb3p = jnp.pad(eb3, ((0, 0), (0, pad)))
    dw1a = jnp.pad(dw1[:min_size], ((0, pad), (0, 0)))   # rows multiplying z
    dw1b = jnp.pad(dw1[min_size:], ((0, pad), (0, 0)))   # rows multiplying zmul
    dw1f = jnp.concatenate([dw1a, dw1b], axis=0)         # [2*MIN_P, REG]

    bf = lambda w: w.astype(jnp.bfloat16)
    return (bf(ew1), eb1, bf(ew2), eb2, bf(ew3p), eb3p,
            bf(dw1f), db1, bf(dw2), db2, bf(dw3), db3)


@functools.partial(jax.jit, static_argnames=("block_b",))
def autoppi_forward(x, kparams, *, block_b=512):
    B, F2 = x.shape
    F = F2 // 2
    reg = kparams[0].shape[1]     # EncL1 out features
    min_p = kparams[4].shape[1]   # padded bottleneck width

    # HBM traffic is the bottleneck: stream activations as bf16.  (Ideally the
    # producer already emits bf16; the matmul inputs were bf16 anyway, so the
    # numerics are identical to casting inside the kernel.)
    if x.dtype != jnp.bfloat16:
        x = x.astype(jnp.bfloat16)

    # Big batch tiles amortize per-step overhead.  No wrapper-side jnp.pad:
    # Pallas masks the ragged last block's load/store, and rows never mix
    # across the batch axis, so the garbage rows are simply discarded.
    bb = min(block_b, _round_up(B, 8))
    nb = pl.cdiv(B, bb)

    act_spec = pl.BlockSpec((bb, 2 * F), lambda i: (i, 0))
    # Constant-index weight/bias blocks: fetched once, resident across the grid.
    # TODO(synk): pipeline_mode=pl.Buffered(1) would drop their second buffer.
    param_specs = [pl.BlockSpec(p.shape, lambda i: (0, 0)) for p in kparams]

    # Advisory cost estimate (MACs for enc+dec on both branches, SELU exps,
    # bf16 activations in + f32 out + weights).
    macs = 2 * B * (F * reg + reg * reg + reg * min_p
                    + 2 * min_p * reg + reg * reg + reg * F)
    cost = pl.CostEstimate(
        flops=2 * macs,
        transcendentals=2 * B * (4 * reg + min_p),
        bytes_accessed=int(B * 2 * F * (2 + 4)
                           + sum(int(p.size) * p.dtype.itemsize
                                 for p in kparams)),
    )

    out = pl.pallas_call(
        functools.partial(autoppi_kernel, feature_size=F),
        out_shape=jax.ShapeDtypeStruct((B, 2 * F), jnp.float32),
        grid=(nb,),
        in_specs=[act_spec] + param_specs,
        out_specs=act_spec,
        compiler_params=pltpu.CompilerParams(
            # On v7x, substituting pltpu.CORE_PARALLEL shards batch tiles
            # across both TensorCores; "parallel" compiles on every generation.
            dimension_semantics=("parallel",),
            # Explicit cap: generous for block_b up to ~1024 at full module
            # sizes, and comfortably under v7x's 64 MiB physical VMEM.
            vmem_limit_bytes=48 * 1024 * 1024,
        ),
        cost_estimate=cost,
    )(x, *kparams)
    return out


def _reference_forward(x, params, feature_size):
    """Pure-JAX f32 reference matching the PyTorch module semantics."""
    ew1, eb1, ew2, eb2, ew3, eb3, dw1, db1, dw2, db2, dw3, db3 = params

    def selu(v):
        return SELU_SCALE * jnp.where(v > 0, v, SELU_ALPHA * (jnp.exp(v) - 1.0))

    def enc(h):
        h = selu(h @ ew1 + eb1)
        h = selu(h @ ew2 + eb2)
        h = selu(h @ ew3 + eb3)
        return h

    def dec(h):
        h = selu(h @ dw1 + db1)
        h = selu(h @ dw2 + db2)
        h = h @ dw3 + db3
        return h

    x1, x2 = x[:, :feature_size], x[:, feature_size:]
    z1, z2 = enc(x1), enc(x2)
    zm = z1 * z2
    y1 = dec(jnp.concatenate([z1, zm], axis=1))
    y2 = dec(jnp.concatenate([z2, zm], axis=1))
    return jnp.concatenate([y1, y2], axis=1)


if __name__ == "__main__":
    # Small shapes consistent with the module (featureSize > regSize > minSize).
    FEATURE, REG, MIN = 256, 128, 64
    BATCH = 600          # 3 grid steps at block_b=256; last block is ragged (88)

    key = jax.random.PRNGKey(0)
    k_x, k_p = jax.random.split(key)
    x = jax.random.normal(k_x, (BATCH, 2 * FEATURE), jnp.float32)

    params = make_params(k_p, FEATURE, REG, MIN)
    kparams = prepare_kernel_params(params, MIN)

    out = autoppi_forward(x, kparams, block_b=256)
    out = jax.block_until_ready(out)

    ref = _reference_forward(x, params, FEATURE)
    assert out.shape == (BATCH, 2 * FEATURE)
    rel = float(jnp.linalg.norm(out - ref) / jnp.linalg.norm(ref))
    err_max = float(jnp.max(jnp.abs(out - ref)))
    # bf16 matmul inputs (f32 accumulate) -> small, bounded numerical drift.
    assert rel < 3e-2 and err_max < 1e-1, (rel, err_max)

    print("KERNEL_OK")
</pallas_src>

<mosaic_0001>
module attributes {stable_mosaic.version = 11 : i64} {
  func.func @autoppi_kernel(%arg0: i32, %arg1: memref<256x512xbf16, #tpu.memory_space<vmem>>, %arg2: memref<256x128xbf16, #tpu.memory_space<vmem>>, %arg3: memref<1x128xf32, #tpu.memory_space<vmem>>, %arg4: memref<128x128xbf16, #tpu.memory_space<vmem>>, %arg5: memref<1x128xf32, #tpu.memory_space<vmem>>, %arg6: memref<128x128xbf16, #tpu.memory_space<vmem>>, %arg7: memref<1x128xf32, #tpu.memory_space<vmem>>, %arg8: memref<256x128xbf16, #tpu.memory_space<vmem>>, %arg9: memref<1x128xf32, #tpu.memory_space<vmem>>, %arg10: memref<128x128xbf16, #tpu.memory_space<vmem>>, %arg11: memref<1x128xf32, #tpu.memory_space<vmem>>, %arg12: memref<128x256xbf16, #tpu.memory_space<vmem>>, %arg13: memref<1x256xf32, #tpu.memory_space<vmem>>, %arg14: memref<256x512xf32, #tpu.memory_space<vmem>>) attributes {dimension_semantics = [#tpu.dimension_semantics<parallel>], iteration_bounds = array<i64: 3>, scalar_prefetch = 0 : i64, scratch_operands = 0 : i64, tpu.core_type = #tpu.core_type<tc>, window_params = [{transform_indices = @transform_0, window_bounds = array<i64: 256, 512>}, {pipeline_mode = #tpu.pipeline_mode<synchronous>, transform_indices = @transform_1, window_bounds = array<i64: 256, 128>}, {pipeline_mode = #tpu.pipeline_mode<synchronous>, transform_indices = @transform_2, window_bounds = array<i64: 1, 128>}, {pipeline_mode = #tpu.pipeline_mode<synchronous>, transform_indices = @transform_3, window_bounds = array<i64: 128, 128>}, {pipeline_mode = #tpu.pipeline_mode<synchronous>, transform_indices = @transform_4, window_bounds = array<i64: 1, 128>}, {pipeline_mode = #tpu.pipeline_mode<synchronous>, transform_indices = @transform_5, window_bounds = array<i64: 128, 128>}, {pipeline_mode = #tpu.pipeline_mode<synchronous>, transform_indices = @transform_6, window_bounds = array<i64: 1, 128>}, {pipeline_mode = #tpu.pipeline_mode<synchronous>, transform_indices = @transform_7, window_bounds = array<i64: 256, 128>}, {pipeline_mode = #tpu.pipeline_mode<synchronous>, transform_indices = @transform_8, window_bounds = array<i64: 1, 128>}, {pipeline_mode = #tpu.pipeline_mode<synchronous>, transform_indices = @transform_9, window_bounds = array<i64: 128, 128>}, {pipeline_mode = #tpu.pipeline_mode<synchronous>, transform_indices = @transform_10, window_bounds = array<i64: 1, 128>}, {pipeline_mode = #tpu.pipeline_mode<synchronous>, transform_indices = @transform_11, window_bounds = array<i64: 128, 256>}, {pipeline_mode = #tpu.pipeline_mode<synchronous>, transform_indices = @transform_12, window_bounds = array<i64: 1, 256>}, {transform_indices = @transform_13, window_bounds = array<i64: 256, 512>}]} {
    %c0 = arith.constant 0 : index
    %c0_0 = arith.constant 0 : index
    %0 = vector.load %arg1[%c0, %c0_0] : memref<256x512xbf16, #tpu.memory_space<vmem>>, vector<256x256xbf16>
    %c0_1 = arith.constant 0 : index
    %c256 = arith.constant 256 : index
    %1 = vector.load %arg1[%c0_1, %c256] : memref<256x512xbf16, #tpu.memory_space<vmem>>, vector<256x256xbf16>
    %2 = tpu.concatenate %0, %1 in 0 : vector<256x256xbf16>, vector<256x256xbf16> -> vector<512x256xbf16>
    %c0_2 = arith.constant 0 : index
    %c0_3 = arith.constant 0 : index
    %3 = vector.load %arg2[%c0_2, %c0_3] : memref<256x128xbf16, #tpu.memory_space<vmem>>, vector<256x128xbf16>
    %cst = arith.constant dense<0.000000e+00> : vector<512x128xf32>
    %4 = tpu.matmul %2, %3, %cst {dimension_numbers = #tpu.dot_dimension_numbers<[1], [0], [0], [1], [0, 0, 1, 1], [], []>} : vector<512x256xbf16>, vector<256x128xbf16>, vector<512x128xf32> -> vector<512x128xf32>
    %c0_4 = arith.constant 0 : index
    %c0_5 = arith.constant 0 : index
    %5 = vector.load %arg3[%c0_4, %c0_5] : memref<1x128xf32, #tpu.memory_space<vmem>>, vector<1x128xf32>
    %6 = vector.broadcast %5 : vector<1x128xf32> to vector<512x128xf32>
    %7 = arith.addf %4, %6 : vector<512x128xf32>
    %cst_6 = arith.constant 0.000000e+00 : f32
    %8 = vector.broadcast %cst_6 : f32 to vector<512x128xf32>
    %9 = arith.cmpf ogt, %7, %8 : vector<512x128xf32>
    %10 = math.exp %7 : vector<512x128xf32>
    %cst_7 = arith.constant 1.000000e+00 : f32
    %11 = vector.broadcast %cst_7 : f32 to vector<512x128xf32>
    %12 = arith.subf %10, %11 : vector<512x128xf32>
    %cst_8 = arith.constant 1.67326319 : f32
    %13 = vector.broadcast %cst_8 : f32 to vector<512x128xf32>
    %14 = arith.mulf %13, %12 : vector<512x128xf32>
    %15 = arith.select %9, %7, %14 : vector<512x128xi1>, vector<512x128xf32>
    %cst_9 = arith.constant 1.05070102 : f32
    %16 = vector.broadcast %cst_9 : f32 to vector<512x128xf32>
    %17 = arith.mulf %16, %15 : vector<512x128xf32>
    %18 = arith.truncf %17 : vector<512x128xf32> to vector<512x128xbf16>
    %c0_10 = arith.constant 0 : index
    %c0_11 = arith.constant 0 : index
    %19 = vector.load %arg4[%c0_10, %c0_11] : memref<128x128xbf16, #tpu.memory_space<vmem>>, vector<128x128xbf16>
    %cst_12 = arith.constant dense<0.000000e+00> : vector<512x128xf32>
    %20 = tpu.matmul %18, %19, %cst_12 {dimension_numbers = #tpu.dot_dimension_numbers<[1], [0], [0], [1], [0, 0, 1, 1], [], []>} : vector<512x128xbf16>, vector<128x128xbf16>, vector<512x128xf32> -> vector<512x128xf32>
    %c0_13 = arith.constant 0 : index
    %c0_14 = arith.constant 0 : index
    %21 = vector.load %arg5[%c0_13, %c0_14] : memref<1x128xf32, #tpu.memory_space<vmem>>, vector<1x128xf32>
    %22 = vector.broadcast %21 : vector<1x128xf32> to vector<512x128xf32>
    %23 = arith.addf %20, %22 : vector<512x128xf32>
    %cst_15 = arith.constant 0.000000e+00 : f32
    %24 = vector.broadcast %cst_15 : f32 to vector<512x128xf32>
    %25 = arith.cmpf ogt, %23, %24 : vector<512x128xf32>
    %26 = math.exp %23 : vector<512x128xf32>
    %cst_16 = arith.constant 1.000000e+00 : f32
    %27 = vector.broadcast %cst_16 : f32 to vector<512x128xf32>
    %28 = arith.subf %26, %27 : vector<512x128xf32>
    %cst_17 = arith.constant 1.67326319 : f32
    %29 = vector.broadcast %cst_17 : f32 to vector<512x128xf32>
    %30 = arith.mulf %29, %28 : vector<512x128xf32>
    %31 = arith.select %25, %23, %30 : vector<512x128xi1>, vector<512x128xf32>
    %cst_18 = arith.constant 1.05070102 : f32
    %32 = vector.broadcast %cst_18 : f32 to vector<512x128xf32>
    %33 = arith.mulf %32, %31 : vector<512x128xf32>
    %34 = arith.truncf %33 : vector<512x128xf32> to vector<512x128xbf16>
    %c0_19 = arith.constant 0 : index
    %c0_20 = arith.constant 0 : index
    %35 = vector.load %arg6[%c0_19, %c0_20] : memref<128x128xbf16, #tpu.memory_space<vmem>>, vector<128x128xbf16>
    %cst_21 = arith.constant dense<0.000000e+00> : vector<512x128xf32>
    %36 = tpu.matmul %34, %35, %cst_21 {dimension_numbers = #tpu.dot_dimension_numbers<[1], [0], [0], [1], [0, 0, 1, 1], [], []>} : vector<512x128xbf16>, vector<128x128xbf16>, vector<512x128xf32> -> vector<512x128xf32>
    %c0_22 = arith.constant 0 : index
    %c0_23 = arith.constant 0 : index
    %37 = vector.load %arg7[%c0_22, %c0_23] : memref<1x128xf32, #tpu.memory_space<vmem>>, vector<1x128xf32>
    %38 = vector.broadcast %37 : vector<1x128xf32> to vector<512x128xf32>
    %39 = arith.addf %36, %38 : vector<512x128xf32>
    %cst_24 = arith.constant 0.000000e+00 : f32
    %40 = vector.broadcast %cst_24 : f32 to vector<512x128xf32>
    %41 = arith.cmpf ogt, %39, %40 : vector<512x128xf32>
    %42 = math.exp %39 : vector<512x128xf32>
    %cst_25 = arith.constant 1.000000e+00 : f32
    %43 = vector.broadcast %cst_25 : f32 to vector<512x128xf32>
    %44 = arith.subf %42, %43 : vector<512x128xf32>
    %cst_26 = arith.constant 1.67326319 : f32
    %45 = vector.broadcast %cst_26 : f32 to vector<512x128xf32>
    %46 = arith.mulf %45, %44 : vector<512x128xf32>
    %47 = arith.select %41, %39, %46 : vector<512x128xi1>, vector<512x128xf32>
    %cst_27 = arith.constant 1.05070102 : f32
    %48 = vector.broadcast %cst_27 : f32 to vector<512x128xf32>
    %49 = arith.mulf %48, %47 : vector<512x128xf32>
    %50 = arith.truncf %49 : vector<512x128xf32> to vector<512x128xbf16>
    %51 = vector.extract_strided_slice %49 {offsets = [0, 0], sizes = [256, 128], strides = [1, 1]} : vector<512x128xf32> to vector<256x128xf32>
    %52 = vector.extract_strided_slice %49 {offsets = [256, 0], sizes = [256, 128], strides = [1, 1]} : vector<512x128xf32> to vector<256x128xf32>
    %53 = arith.mulf %51, %52 : vector<256x128xf32>
    %54 = arith.truncf %53 : vector<256x128xf32> to vector<256x128xbf16>
    %55 = tpu.concatenate %54, %54 in 0 : vector<256x128xbf16>, vector<256x128xbf16> -> vector<512x128xbf16>
    %56 = tpu.concatenate %50, %55 in 1 : vector<512x128xbf16>, vector<512x128xbf16> -> vector<512x256xbf16>
    %c0_28 = arith.constant 0 : index
    %c0_29 = arith.constant 0 : index
    %57 = vector.load %arg8[%c0_28, %c0_29] : memref<256x128xbf16, #tpu.memory_space<vmem>>, vector<256x128xbf16>
    %cst_30 = arith.constant dense<0.000000e+00> : vector<512x128xf32>
    %58 = tpu.matmul %56, %57, %cst_30 {dimension_numbers = #tpu.dot_dimension_numbers<[1], [0], [0], [1], [0, 0, 1, 1], [], []>} : vector<512x256xbf16>, vector<256x128xbf16>, vector<512x128xf32> -> vector<512x128xf32>
    %c0_31 = arith.constant 0 : index
    %c0_32 = arith.constant 0 : index
    %59 = vector.load %arg9[%c0_31, %c0_32] : memref<1x128xf32, #tpu.memory_space<vmem>>, vector<1x128xf32>
    %60 = vector.broadcast %59 : vector<1x128xf32> to vector<512x128xf32>
    %61 = arith.addf %58, %60 : vector<512x128xf32>
    %cst_33 = arith.constant 0.000000e+00 : f32
    %62 = vector.broadcast %cst_33 : f32 to vector<512x128xf32>
    %63 = arith.cmpf ogt, %61, %62 : vector<512x128xf32>
    %64 = math.exp %61 : vector<512x128xf32>
    %cst_34 = arith.constant 1.000000e+00 : f32
    %65 = vector.broadcast %cst_34 : f32 to vector<512x128xf32>
    %66 = arith.subf %64, %65 : vector<512x128xf32>
    %cst_35 = arith.constant 1.67326319 : f32
    %67 = vector.broadcast %cst_35 : f32 to vector<512x128xf32>
    %68 = arith.mulf %67, %66 : vector<512x128xf32>
    %69 = arith.select %63, %61, %68 : vector<512x128xi1>, vector<512x128xf32>
    %cst_36 = arith.constant 1.05070102 : f32
    %70 = vector.broadcast %cst_36 : f32 to vector<512x128xf32>
    %71 = arith.mulf %70, %69 : vector<512x128xf32>
    %72 = arith.truncf %71 : vector<512x128xf32> to vector<512x128xbf16>
    %c0_37 = arith.constant 0 : index
    %c0_38 = arith.constant 0 : index
    %73 = vector.load %arg10[%c0_37, %c0_38] : memref<128x128xbf16, #tpu.memory_space<vmem>>, vector<128x128xbf16>
    %cst_39 = arith.constant dense<0.000000e+00> : vector<512x128xf32>
    %74 = tpu.matmul %72, %73, %cst_39 {dimension_numbers = #tpu.dot_dimension_numbers<[1], [0], [0], [1], [0, 0, 1, 1], [], []>} : vector<512x128xbf16>, vector<128x128xbf16>, vector<512x128xf32> -> vector<512x128xf32>
    %c0_40 = arith.constant 0 : index
    %c0_41 = arith.constant 0 : index
    %75 = vector.load %arg11[%c0_40, %c0_41] : memref<1x128xf32, #tpu.memory_space<vmem>>, vector<1x128xf32>
    %76 = vector.broadcast %75 : vector<1x128xf32> to vector<512x128xf32>
    %77 = arith.addf %74, %76 : vector<512x128xf32>
    %cst_42 = arith.constant 0.000000e+00 : f32
    %78 = vector.broadcast %cst_42 : f32 to vector<512x128xf32>
    %79 = arith.cmpf ogt, %77, %78 : vector<512x128xf32>
    %80 = math.exp %77 : vector<512x128xf32>
    %cst_43 = arith.constant 1.000000e+00 : f32
    %81 = vector.broadcast %cst_43 : f32 to vector<512x128xf32>
    %82 = arith.subf %80, %81 : vector<512x128xf32>
    %cst_44 = arith.constant 1.67326319 : f32
    %83 = vector.broadcast %cst_44 : f32 to vector<512x128xf32>
    %84 = arith.mulf %83, %82 : vector<512x128xf32>
    %85 = arith.select %79, %77, %84 : vector<512x128xi1>, vector<512x128xf32>
    %cst_45 = arith.constant 1.05070102 : f32
    %86 = vector.broadcast %cst_45 : f32 to vector<512x128xf32>
    %87 = arith.mulf %86, %85 : vector<512x128xf32>
    %88 = arith.truncf %87 : vector<512x128xf32> to vector<512x128xbf16>
    %c0_46 = arith.constant 0 : index
    %c0_47 = arith.constant 0 : index
    %89 = vector.load %arg12[%c0_46, %c0_47] : memref<128x256xbf16, #tpu.memory_space<vmem>>, vector<128x256xbf16>
    %cst_48 = arith.constant dense<0.000000e+00> : vector<512x256xf32>
    %90 = tpu.matmul %88, %89, %cst_48 {dimension_numbers = #tpu.dot_dimension_numbers<[1], [0], [0], [1], [0, 0, 1, 1], [], []>} : vector<512x128xbf16>, vector<128x256xbf16>, vector<512x256xf32> -> vector<512x256xf32>
    %c0_49 = arith.constant 0 : index
    %c0_50 = arith.constant 0 : index
    %91 = vector.load %arg13[%c0_49, %c0_50] : memref<1x256xf32, #tpu.memory_space<vmem>>, vector<1x256xf32>
    %92 = vector.broadcast %91 : vector<1x256xf32> to vector<512x256xf32>
    %93 = arith.addf %90, %92 : vector<512x256xf32>
    %94 = vector.extract_strided_slice %93 {offsets = [0, 0], sizes = [256, 256], strides = [1, 1]} : vector<512x256xf32> to vector<256x256xf32>
    %c0_51 = arith.constant 0 : index
    %c0_52 = arith.constant 0 : index
    %95 = vector.load %arg14[%c0_51, %c0_52] : memref<256x512xf32, #tpu.memory_space<vmem>>, vector<256x256xf32>
    tpu.vector_store %arg14[%c0_51, %c0_52], %94 {strides = array<i32>} : memref<256x512xf32, #tpu.memory_space<vmem>>, vector<256x256xf32>,
    %96 = vector.extract_strided_slice %93 {offsets = [256, 0], sizes = [256, 256], strides = [1, 1]} : vector<512x256xf32> to vector<256x256xf32>
    %c0_53 = arith.constant 0 : index
    %c256_54 = arith.constant 256 : index
    %97 = vector.load %arg14[%c0_53, %c256_54] : memref<256x512xf32, #tpu.memory_space<vmem>>, vector<256x256xf32>
    tpu.vector_store %arg14[%c0_53, %c256_54], %96 {strides = array<i32>} : memref<256x512xf32, #tpu.memory_space<vmem>>, vector<256x256xf32>,
    return
  }
  func.func @transform_0(%arg0: i32) -> (i32, i32) {
    %c0_i32 = arith.constant 0 : i32
    %c0_i32_0 = arith.constant 0 : i32
    return %arg0, %c0_i32 : i32, i32
  }
  func.func @transform_1(%arg0: i32) -> (i32, i32) {
    %c0_i32 = arith.constant 0 : i32
    %c0_i32_0 = arith.constant 0 : i32
    %c0_i32_1 = arith.constant 0 : i32
    return %c0_i32, %c0_i32_0 : i32, i32
  }
  func.func @transform_2(%arg0: i32) -> (i32, i32) {
    %c0_i32 = arith.constant 0 : i32
    %c0_i32_0 = arith.constant 0 : i32
    %c0_i32_1 = arith.constant 0 : i32
    return %c0_i32, %c0_i32_0 : i32, i32
  }
  func.func @transform_3(%arg0: i32) -> (i32, i32) {
    %c0_i32 = arith.constant 0 : i32
    %c0_i32_0 = arith.constant 0 : i32
    %c0_i32_1 = arith.constant 0 : i32
    return %c0_i32, %c0_i32_0 : i32, i32
  }
  func.func @transform_4(%arg0: i32) -> (i32, i32) {
    %c0_i32 = arith.constant 0 : i32
    %c0_i32_0 = arith.constant 0 : i32
    %c0_i32_1 = arith.constant 0 : i32
    return %c0_i32, %c0_i32_0 : i32, i32
  }
  func.func @transform_5(%arg0: i32) -> (i32, i32) {
    %c0_i32 = arith.constant 0 : i32
    %c0_i32_0 = arith.constant 0 : i32
    %c0_i32_1 = arith.constant 0 : i32
    return %c0_i32, %c0_i32_0 : i32, i32
  }
  func.func @transform_6(%arg0: i32) -> (i32, i32) {
    %c0_i32 = arith.constant 0 : i32
    %c0_i32_0 = arith.constant 0 : i32
    %c0_i32_1 = arith.constant 0 : i32
    return %c0_i32, %c0_i32_0 : i32, i32
  }
  func.func @transform_7(%arg0: i32) -> (i32, i32) {
    %c0_i32 = arith.constant 0 : i32
    %c0_i32_0 = arith.constant 0 : i32
    %c0_i32_1 = arith.constant 0 : i32
    return %c0_i32, %c0_i32_0 : i32, i32
  }
  func.func @transform_8(%arg0: i32) -> (i32, i32) {
    %c0_i32 = arith.constant 0 : i32
    %c0_i32_0 = arith.constant 0 : i32
    %c0_i32_1 = arith.constant 0 : i32
    return %c0_i32, %c0_i32_0 : i32, i32
  }
  func.func @transform_9(%arg0: i32) -> (i32, i32) {
    %c0_i32 = arith.constant 0 : i32
    %c0_i32_0 = arith.constant 0 : i32
    %c0_i32_1 = arith.constant 0 : i32
    return %c0_i32, %c0_i32_0 : i32, i32
  }
  func.func @transform_10(%arg0: i32) -> (i32, i32) {
    %c0_i32 = arith.constant 0 : i32
    %c0_i32_0 = arith.constant 0 : i32
    %c0_i32_1 = arith.constant 0 : i32
    return %c0_i32, %c0_i32_0 : i32, i32
  }
  func.func @transform_11(%arg0: i32) -> (i32, i32) {
    %c0_i32 = arith.constant 0 : i32
    %c0_i32_0 = arith.constant 0 : i32
    %c0_i32_1 = arith.constant 0 : i32
    return %c0_i32, %c0_i32_0 : i32, i32
  }
  func.func @transform_12(%arg0: i32) -> (i32, i32) {
    %c0_i32 = arith.constant 0 : i32
    %c0_i32_0 = arith.constant 0 : i32
    %c0_i32_1 = arith.constant 0 : i32
    return %c0_i32, %c0_i32_0 : i32, i32
  }
  func.func @transform_13(%arg0: i32) -> (i32, i32) {
    %c0_i32 = arith.constant 0 : i32
    %c0_i32_0 = arith.constant 0 : i32
    return %arg0, %c0_i32 : i32, i32
  }
}

</mosaic_0001>

<bundles_post_ra>
// kernel: autoppi_forward.1
= control target key start
LH: loop header
LB: loop body
LE: loop exit
PB: predicated region body
PF: predicated region fallthrough
CT: control target
= control target key end

     0   :  { %18 = vsyncpa [#allocation3], 0  ;;  %s10214_s0 = inlined_call_operand.vmem [shape: bf16[600,512], index: 0, kind: input, shape index: {}]   ;;  %s10215_s1 = inlined_call_operand.vmem [shape: bf16[256,128], index: 1, kind: input, shape index: {}]   ;;  %s10216_s2 = inlined_call_operand.vmem [shape: f32[1,128], index: 2, kind: input, shape index: {}]   ;;  %s10217_s3 = inlined_call_operand.vmem [shape: bf16[128,128], index: 3, kind: input, shape index: {}]   ;;  %s10218_s4 = inlined_call_operand.vmem [shape: f32[1,128], index: 4, kind: input, shape index: {}]   ;;  %s10219_s5 = inlined_call_operand.vmem [shape: bf16[128,128], index: 5, kind: input, shape index: {}]   ;;  %s10220_s6 = inlined_call_operand.vmem [shape: f32[1,128], index: 6, kind: input, shape index: {}]   ;;  %s10221_s7 = inlined_call_operand.vmem [shape: bf16[256,128], index: 7, kind: input, shape index: {}]   ;;  %s10222_s8 = inlined_call_operand.vmem [shape: f32[1,128], index: 8, kind: input, shape index: {}]   ;;  %s10223_s9 = inlined_call_operand.vmem [shape: bf16[128,128], index: 9, kind: input, shape index: {}]   ;;  %s10224_s10 = inlined_call_operand.vmem [shape: f32[1,128], index: 10, kind: input, shape index: {}]   ;;  %s10225_s11 = inlined_call_operand.vmem [shape: bf16[128,256], index: 11, kind: input, shape index: {}]   ;;  %s10226_s12 = inlined_call_operand.vmem [shape: f32[1,256], index: 12, kind: input, shape index: {}]   ;;  %s10227_s13 = inlined_call_operand.hbm [shape: f32[600,512], index: 13, kind: output, shape index: {}]  }
   0x1   :  { %20 = vsyncpa [#allocation3 + $0x1], 0  ;;  %s7769_s25 = smov 0   ;;  %s7771_s26 = smov 0  }
   0x2   :  { %s7773_s27 = smov 0   ;;  %s7775_s28 = smov 0  }
   0x3 LB: > { %10239 = sst [smem:[#allocation5_spill]] %s7689_s27  ;;  %s7790_s29 = sadd.s32 4294967295, %s7693_s28   ;;  %s7693_s28 = sphi %s7775_s28, %s10283_s28   ;;  %s7689_s27 = sphi %s7773_s27, %s10285_s27   ;;  %s7685_s26 = sphi %s7771_s26, %s10287_s26   ;;  %s7681_s25 = sphi %s7769_s25, %s10286_s25  }
   0x4   : > { %s5909_s30 = sadd.s32 4294967294, %s7693_s28   ;;  %s7794_s14 = sadd.s32 1, %s7693_s28  }
   0x5   : > { %10240 = sst [smem:[#allocation6_spill]] %s7794_s14  ;;  %s311_s15 = sadd.s32 1, %s7689_s27 }
   0x6   : > { %s308_s16 = ssub.s32 %s7693_s28, %s7794_s14  ;;  %p321_p0 = scmp.ne.s32.totalorder %s7689_s27, %s7685_s26 }
   0x7   : > { %p309_p1 = scmp.eq.s32.totalorder %s308_s16, 0  ;;  %p322_p2 = scmp.eq.s32.totalorder %s7790_s29, 2 }
   0x8   : > { %p327_p3 = scmp.ne.s32.totalorder %s7685_s26, %s7681_s25  ;;  %p328_p4 = scmp.eq.s32.totalorder %s5909_s30, 2 }
   0x9   : > { %s7805_s17 = scalar_select %p309_p1, %s7689_s27, %s311_s15  }
   0xa   : > { %p7807_p5 = por %p322_p2, %p321_p0  ;;  %p7811_p6 = por %p328_p4, %p327_p3 }
   0xb   : > { %10241 = sst [smem:[#allocation7_spill]] %s7805_s17  ;;  %p5912_p7 = scmp.ge.s32.totalorder %s7693_s28, 1 }
   0xc   : > { %p402_p8 = scmp.lt.s32.totalorder %s7693_s28, 4 }
   0xe   : > { %p403_p9 = pnand %p5912_p7, %p402_p8 }
  0x10   : > { %406 = sbr.rel (%p403_p9) target bundleno = 1929 (0x789), region = 72 }
  0x17   : > { %v6810_v0 = vld [vmem:[%s10215_s1] sm:$0xff]   ;;  %v10231_v1 = vmov 0   ;;  %s7822_s22 = sshll.u32 %s7790_s29, 5  ;;  %v6811_v2 = vld [vmem:[%s10215_s1 + $0x8] sm:$0xff]   ;;  %v6812_v3 = vld [vmem:[%s10215_s1 + $0x10] sm:$0xff]   ;;  %s449_s15 = sand.u32 1, %s7685_s26  }
  0x18   : > { %995 = vmatprep.subr.bf16.mxu0 %v10231_v1  ;;  %p458_p10 = scmp.lt.s32.totalorder %s7822_s22, 74  ;;  %v6813_v4 = vld [vmem:[%s10215_s1 + $0x18] sm:$0xff]   ;;  %v6814_v5 = vld [vmem:[%s10215_s1 + $0x20] sm:$0xff]   ;;  %v6815_v7 = vld [vmem:[%s10215_s1 + $0x28] sm:$0xff]   ;;  %s5913_s20 = sshll.u32 %s449_s15, 10 }
  0x19   : > { %996 = vmatpush1.bf16.msra.mxu0 %v6810_v0  ;;  %v6816_v8 = vld [vmem:[%s10215_s1 + $0x30] sm:$0xff]   ;;  %v6817_v9 = vld [vmem:[%s10215_s1 + $0x38] sm:$0xff]   ;;  %v6818_v10 = vld [vmem:[%s10215_s1 + $0x40] sm:$0xff]   ;;  %s9858_s17 = scalar_lea.vmem [#allocation2], %s5913_s20 }
  0x1a   : > { %997 = vmatprep.subr.bf16.mxu0 %v10231_v1  ;;  %s459_s16 = scalar_select %p458_p10, %s7822_s22, 74  ;;  %v6819_v11 = vld [vmem:[%s10215_s1 + $0x48] sm:$0xff]   ;;  %v6820_v12 = vld [vmem:[%s10215_s1 + $0x50] sm:$0xff]   ;;  %v6821_v13 = vld [vmem:[%s10215_s1 + $0x58] sm:$0xff]  }
  0x1b   : > { %v6822_v14 = vld [vmem:[%s10215_s1 + $0x60] sm:$0xff]   ;;  %v6823_v15 = vld [vmem:[%s10215_s1 + $0x68] sm:$0xff]   ;;  %v6824_v16 = vld [vmem:[%s10215_s1 + $0x70] sm:$0xff]  }
  0x1c   : > { %s6389_s23 = sshll.u32 %s459_s16, 4  ;;  %v6825_v17 = vld [vmem:[%s10215_s1 + $0x78] sm:$0xff]   ;;  %v6907_v41 = vld [vmem:[%s10217_s3] sm:$0xff]   ;;  %v6911_v43 = vld [vmem:[%s10217_s3 + $0x8] sm:$0xff]   ;;  %s10153_s16 = scalar_lea.sflag [#allocation3], %s449_s15 }
  0x1d   : > { %998 = vmatpush1.bf16.msra.mxu0 %v6811_v2  ;;  %s7844_s30 = scalar_lea.vmem %s10214_s0, %s6389_s23  ;;  %6513 = vmatprep.subr.bf16.mxu1 %v6907_v41  ;;  %v6912_v45 = vld [vmem:[%s10217_s3 + $0x10] sm:$0xff]   ;;  %v6916_v47 = vld [vmem:[%s10217_s3 + $0x18] sm:$0xff]   ;;  %v6917_v49 = vld [vmem:[%s10217_s3 + $0x20] sm:$0xff]  }
  0x1e   : > { %999 = vmatprep.subr.bf16.mxu0 %v10231_v1  ;;  %v6828_v6 = vld [vmem:[%s7844_s30 + $0x4] ss:$16 sps:$4 sm:$0xff]   ;;  %v6826_v18 = vld [vmem:[%s7844_s30] ss:$16 sps:$4 sm:$0xff]   ;;  %6514 = vmatpush3.bf16.msra.mxu1 %v6907_v41  ;;  %v6921_v51 = vld [vmem:[%s10217_s3 + $0x28] sm:$0xff]  }
  0x1f   : > { %1027 = vmatprep.mubr.bf16.mxu0 %v6828_v6  ;;  %v6829_v19 = vld [vmem:[%s7844_s30 + $0x24] ss:$16 sps:$4 sm:$0xff]   ;;  %v6831_v20 = vld [vmem:[%s7844_s30 + $0x20] ss:$16 sps:$4 sm:$0xff]   ;;  %6515 = vmatprep.subr.bf16.mxu1 %v6911_v43  ;;  %v6926_v55 = vld [vmem:[%s10217_s3 + $0x38] sm:$0xff]  }
  0x20   : > { %v6832_v21 = vld [vmem:[%s7844_s30 + $0x44] ss:$16 sps:$4 sm:$0xff]   ;;  %v6834_v22 = vld [vmem:[%s7844_s30 + $0x40] ss:$16 sps:$4 sm:$0xff]   ;;  %v6874_v57 = vld [vmem:[%s7844_s30 + $0xc] ss:$16 sps:$4 sm:$0xff]  }
  0x21   : > { %1000 = vmatpush1.bf16.msra.mxu0 %v6812_v3  ;;  %v6835_v23 = vld [vmem:[%s7844_s30 + $0x64] ss:$16 sps:$4 sm:$0xff]   ;;  %v6837_v24 = vld [vmem:[%s7844_s30 + $0x60] ss:$16 sps:$4 sm:$0xff]   ;;  %v6876_v58 = vld [vmem:[%s7844_s30 + $0x8] ss:$16 sps:$4 sm:$0xff]  }
  0x22   : > { %1001 = vmatprep.subr.bf16.mxu0 %v10231_v1  ;;  %v6838_v25 = vld [vmem:[%s7844_s30 + $0x84] ss:$16 sps:$4 sm:$0xff]   ;;  %v6840_v26 = vld [vmem:[%s7844_s30 + $0x80] ss:$16 sps:$4 sm:$0xff]   ;;  %6516 = vmatpush3.bf16.msra.mxu1 %v6911_v43  ;;  %v6877_v59 = vld [vmem:[%s7844_s30 + $0x2c] ss:$16 sps:$4 sm:$0xff]  }
  0x23   : > { %v6841_v27 = vld [vmem:[%s7844_s30 + $0xa4] ss:$16 sps:$4 sm:$0xff]   ;;  %v6843_v28 = vld [vmem:[%s7844_s30 + $0xa0] ss:$16 sps:$4 sm:$0xff]   ;;  %6517 = vmatprep.subr.bf16.mxu1 %v6912_v45  ;;  %v6879_v60 = vld [vmem:[%s7844_s30 + $0x28] ss:$16 sps:$4 sm:$0xff]  }
  0x24   : > { %v6844_v29 = vld [vmem:[%s7844_s30 + $0xc4] ss:$16 sps:$4 sm:$0xff]   ;;  %v6846_v30 = vld [vmem:[%s7844_s30 + $0xc0] ss:$16 sps:$4 sm:$0xff]   ;;  %v6880_v61 = vld [vmem:[%s7844_s30 + $0x4c] ss:$16 sps:$4 sm:$0xff]  }
  0x25   : > { %1002 = vmatpush1.bf16.msra.mxu0 %v6813_v4  ;;  %v6847_v31 = vld [vmem:[%s7844_s30 + $0xe4] ss:$16 sps:$4 sm:$0xff]   ;;  %v6849_v32 = vld [vmem:[%s7844_s30 + $0xe0] ss:$16 sps:$4 sm:$0xff]   ;;  %v6882_v62 = vld [vmem:[%s7844_s30 + $0x48] ss:$16 sps:$4 sm:$0xff]  }
  0x26   : > { %1003 = vmatprep.subr.bf16.mxu0 %v10231_v1  ;;  %v6850_v33 = vld [vmem:[%s7844_s30 + $0x104] ss:$16 sps:$4 sm:$0xff]   ;;  %v6852_v34 = vld [vmem:[%s7844_s30 + $0x100] ss:$16 sps:$4 sm:$0xff]   ;;  %6518 = vmatpush3.bf16.msra.mxu1 %v6912_v45  ;;  %v6883_v63 = vld [vmem:[%s7844_s30 + $0x6c] ss:$16 sps:$4 sm:$0xff]  }
  0x27   : > { %v6853_v35 = vld [vmem:[%s7844_s30 + $0x124] ss:$16 sps:$4 sm:$0xff]   ;;  %v6855_v36 = vld [vmem:[%s7844_s30 + $0x120] ss:$16 sps:$4 sm:$0xff]   ;;  %6519 = vmatprep.subr.bf16.mxu1 %v6916_v47  ;;  %v6885_v0 = vld [vmem:[%s7844_s30 + $0x68] ss:$16 sps:$4 sm:$0xff]  }
  0x28   : > { %v6856_v37 = vld [vmem:[%s7844_s30 + $0x144] ss:$16 sps:$4 sm:$0xff]   ;;  %v6858_v38 = vld [vmem:[%s7844_s30 + $0x140] ss:$16 sps:$4 sm:$0xff]   ;;  %v6886_v2 = vld [vmem:[%s7844_s30 + $0x8c] ss:$16 sps:$4 sm:$0xff]  }
  0x29   : > { %1004 = vmatpush1.bf16.msra.mxu0 %v6814_v5  ;;  %v6859_v39 = vld [vmem:[%s7844_s30 + $0x164] ss:$16 sps:$4 sm:$0xff]   ;;  %v6861_v40 = vld [vmem:[%s7844_s30 + $0x160] ss:$16 sps:$4 sm:$0xff]   ;;  %v6888_v3 = vld [vmem:[%s7844_s30 + $0x88] ss:$16 sps:$4 sm:$0xff]  }
  0x2a   : > { %1005 = vmatprep.subr.bf16.mxu0 %v10231_v1  ;;  %v6862_v42 = vld [vmem:[%s7844_s30 + $0x184] ss:$16 sps:$4 sm:$0xff]   ;;  %v6864_v44 = vld [vmem:[%s7844_s30 + $0x180] ss:$16 sps:$4 sm:$0xff]   ;;  %6520 = vmatpush3.bf16.msra.mxu1 %v6916_v47  ;;  %v6889_v4 = vld [vmem:[%s7844_s30 + $0xac] ss:$16 sps:$4 sm:$0xff]  }
  0x2b   : > { %v6865_v46 = vld [vmem:[%s7844_s30 + $0x1a4] ss:$16 sps:$4 sm:$0xff]   ;;  %v6867_v48 = vld [vmem:[%s7844_s30 + $0x1a0] ss:$16 sps:$4 sm:$0xff]   ;;  %6521 = vmatprep.subr.bf16.mxu1 %v6917_v49  ;;  %v6891_v5 = vld [vmem:[%s7844_s30 + $0xa8] ss:$16 sps:$4 sm:$0xff]  }
  0x2c   : > { %v6868_v50 = vld [vmem:[%s7844_s30 + $0x1c4] ss:$16 sps:$4 sm:$0xff]   ;;  %v6870_v52 = vld [vmem:[%s7844_s30 + $0x1c0] ss:$16 sps:$4 sm:$0xff]   ;;  %v6892_v6 = vld [vmem:[%s7844_s30 + $0xcc] ss:$16 sps:$4 sm:$0xff]  }
  0x2d   : > { %1006 = vmatpush1.bf16.msra.mxu0 %v6815_v7  ;;  %v6922_v53 = vld [vmem:[%s10217_s3 + $0x30] sm:$0xff]   ;;  %v6894_v7 = vld [vmem:[%s7844_s30 + $0xc8] ss:$16 sps:$4 sm:$0xff]  }
  0x2e   : > { %1007 = vmatprep.subr.bf16.mxu0 %v10231_v1  ;;  %6522 = vmatpush3.bf16.msra.mxu1 %v6917_v49  ;;  %v6871_v54 = vld [vmem:[%s7844_s30 + $0x1e4] ss:$16 sps:$4 sm:$0xff]   ;;  %v6873_v56 = vld [vmem:[%s7844_s30 + $0x1e0] ss:$16 sps:$4 sm:$0xff]  }
  0x2f   : > { %6523 = vmatprep.subr.bf16.mxu1 %v6921_v51 }
  0x31   : > { %1008 = vmatpush1.bf16.msra.mxu0 %v6816_v8  ;;  %v6895_v8 = vld [vmem:[%s7844_s30 + $0xec] ss:$16 sps:$4 sm:$0xff]  }
  0x32   : > { %1009 = vmatprep.subr.bf16.mxu0 %v10231_v1  ;;  %6524 = vmatpush3.bf16.msra.mxu1 %v6921_v51 }
  0x33   : > { %6525 = vmatprep.subr.bf16.mxu1 %v6922_v53 }
  0x35   : > { %1010 = vmatpush1.bf16.msra.mxu0 %v6817_v9  ;;  %v6897_v9 = vld [vmem:[%s7844_s30 + $0xe8] ss:$16 sps:$4 sm:$0xff]  }
  0x36   : > { %1011 = vmatprep.subr.bf16.mxu0 %v10231_v1  ;;  %6526 = vmatpush3.bf16.msra.mxu1 %v6922_v53 }
  0x37   : > { %6527 = vmatprep.subr.bf16.mxu1 %v6926_v55 }
  0x39   : > { %1012 = vmatpush1.bf16.msra.mxu0 %v6818_v10  ;;  %v6898_v10 = vld [vmem:[%s7844_s30 + $0x10c] ss:$16 sps:$4 sm:$0xff]  }
  0x3a   : > { %1013 = vmatprep.subr.bf16.mxu0 %v10231_v1  ;;  %6528 = vmatpush3.bf16.msra.mxu1 %v6926_v55 }
  0x3d   : > { %1014 = vmatpush1.bf16.msra.mxu0 %v6819_v11  ;;  %v6900_v11 = vld [vmem:[%s7844_s30 + $0x108] ss:$16 sps:$4 sm:$0xff]  }
  0x3e   : > { %1015 = vmatprep.subr.bf16.mxu0 %v10231_v1 }
  0x41   : > { %1016 = vmatpush1.bf16.msra.mxu0 %v6820_v12  ;;  %v6901_v12 = vld [vmem:[%s7844_s30 + $0x12c] ss:$16 sps:$4 sm:$0xff]  }
  0x42   : > { %1017 = vmatprep.subr.bf16.mxu0 %v10231_v1 }
  0x45   : > { %1018 = vmatpush1.bf16.msra.mxu0 %v6821_v13  ;;  %v6903_v13 = vld [vmem:[%s7844_s30 + $0x128] ss:$16 sps:$4 sm:$0xff]  }
  0x46   : > { %1019 = vmatprep.subr.bf16.mxu0 %v10231_v1 }
  0x49   : > { %1020 = vmatpush1.bf16.msra.mxu0 %v6822_v14  ;;  %v6904_v14 = vld [vmem:[%s7844_s30 + $0x14c] ss:$16 sps:$4 sm:$0xff]  }
  0x4a   : > { %1021 = vmatprep.subr.bf16.mxu0 %v10231_v1 }
  0x4d   : > { %1022 = vmatpush1.bf16.msra.mxu0 %v6823_v15  ;;  %v6906_v15 = vld [vmem:[%s7844_s30 + $0x148] ss:$16 sps:$4 sm:$0xff]  }
  0x4e   : > { %1023 = vmatprep.subr.bf16.mxu0 %v10231_v1 }
  0x51   : > { %1024 = vmatpush1.bf16.msra.mxu0 %v6824_v16  ;;  %v6908_v16 = vld [vmem:[%s7844_s30 + $0x16c] ss:$16 sps:$4 sm:$0xff]  }
  0x52   : > { %1025 = vmatprep.subr.bf16.mxu0 %v10231_v1 }
  0x55   : > { %1026 = vmatpush1.bf16.msra.mxu0 %v6825_v17  ;;  %v7973_v17 = vld [vmem:[%s10216_s2] ss:$0 sm:$0xff] }
  0x58   : > { %1028 = vmatmul.mubr.bf16.vlgmr.msra.gmra.mrb[0].mxu0 %v6826_v18 }
  0x59   : > { %1035 = vmatprep.mubr.bf16.mxu0 %v6829_v19 }
  0x60   : > { %1036 = vmatmul.mubr.bf16.gmra.mrb[4].mxu0 %v6831_v20 }
  0x61   : > { %1043 = vmatprep.mubr.bf16.mxu0 %v6832_v21  ;;  %v6910_v21 = vld [vmem:[%s7844_s30 + $0x168] ss:$16 sps:$4 sm:$0xff]  }
  0x68   : > { %1044 = vmatmul.mubr.bf16.gmra.mrb[8].mxu0 %v6834_v22 }
  0x69   : > { %1051 = vmatprep.mubr.bf16.mxu0 %v6835_v23  ;;  %v6913_v23 = vld [vmem:[%s7844_s30 + $0x18c] ss:$16 sps:$4 sm:$0xff]  }
  0x70   : > { %1052 = vmatmul.mubr.bf16.gmra.mrb[12].mxu0 %v6837_v24 }
  0x71   : > { %1059 = vmatprep.mubr.bf16.mxu0 %v6838_v25 }
  0x78   : > { %1060 = vmatmul.mubr.bf16.gmra.mrb[16].mxu0 %v6840_v26 }
  0x79   : > { %1067 = vmatprep.mubr.bf16.mxu0 %v6841_v27 }
  0x80   : > { %1068 = vmatmul.mubr.bf16.gmra.mrb[20].mxu0 %v6843_v28 }
  0x81   : > { %1075 = vmatprep.mubr.bf16.mxu0 %v6844_v29 }
  0x88   : > { %1076 = vmatmul.mubr.bf16.gmra.mrb[24].mxu0 %v6846_v30 }
  0x89   : > { %1083 = vmatprep.mubr.bf16.mxu0 %v6847_v31  ;;  %v6915_v31 = vld [vmem:[%s7844_s30 + $0x188] ss:$16 sps:$4 sm:$0xff]  }
  0x90   : > { %1084 = vmatmul.mubr.bf16.gmra.mrb[28].mxu0 %v6849_v32 }
  0x91   : > { %1091 = vmatprep.mubr.bf16.mxu0 %v6850_v33  ;;  %v6918_v33 = vld [vmem:[%s7844_s30 + $0x1ac] ss:$16 sps:$4 sm:$0xff]  }
  0x98   : > { %1092 = vmatmul.mubr.bf16.gmra.mrb[32].mxu0 %v6852_v34 }
  0x99   : > { %1099 = vmatprep.mubr.bf16.mxu0 %v6853_v35 }
  0xa0   : > { %1100 = vmatmul.mubr.bf16.gmra.mrb[36].mxu0 %v6855_v36 }
  0xa1   : > { %1107 = vmatprep.mubr.bf16.mxu0 %v6856_v37 }
  0xa8   : > { %1108 = vmatmul.mubr.bf16.gmra.mrb[40].mxu0 %v6858_v38 }
  0xa9   : > { %1115 = vmatprep.mubr.bf16.mxu0 %v6859_v39 }
  0xb0   : > { %1116 = vmatmul.mubr.bf16.gmra.mrb[44].mxu0 %v6861_v40 }
  0xb1   : > { %1123 = vmatprep.mubr.bf16.mxu0 %v6862_v42 }
  0xb8   : > { %1124 = vmatmul.mubr.bf16.gmra.mrb[48].mxu0 %v6864_v44  ;;  %v6920_v44 = vld [vmem:[%s7844_s30 + $0x1a8] ss:$16 sps:$4 sm:$0xff]  }
  0xb9   : > { %1131 = vmatprep.mubr.bf16.mxu0 %v6865_v46 }
  0xc0   : > { %1132 = vmatmul.mubr.bf16.gmra.mrb[52].mxu0 %v6867_v48  ;;  %v6923_v48 = vld [vmem:[%s7844_s30 + $0x1cc] ss:$16 sps:$4 sm:$0xff]  }
  0xc1   : > { %1139 = vmatprep.mubr.bf16.mxu0 %v6868_v50 }
  0xc8   : > { %1140 = vmatmul.mubr.bf16.gmra.mrb[56].mxu0 %v6870_v52 }
  0xc9   : > { %1147 = vmatprep.mubr.bf16.mxu0 %v6871_v54 }
  0xd0   : > { %1148 = vmatmul.mubr.bf16.gmra.mrb[60].mxu0 %v6873_v56 }
  0xd1   : > { %1155 = vmatprep.mubr.bf16.mxu0 %v6874_v57 }
  0xd8   : > { %1156 = vmatmul.mubr.bf16.gmra.mrb[64].mxu0 %v6876_v58 }
  0xd9   : > { %1163 = vmatprep.mubr.bf16.mxu0 %v6877_v59 }
  0xe0   : > { %1164 = vmatmul.mubr.bf16.gmra.mrb[68].mxu0 %v6879_v60 }
  0xe1   : > { %1171 = vmatprep.mubr.bf16.mxu0 %v6880_v61 }
  0xe8   : > { %1172 = vmatmul.mubr.bf16.gmra.mrb[72].mxu0 %v6882_v62 }
  0xe9   : > { %1179 = vmatprep.mubr.bf16.mxu0 %v6883_v63 }
  0xf0   : > { %1180 = vmatmul.mubr.bf16.gmra.mrb[76].mxu0 %v6885_v0 }
  0xf1   : > { %1187 = vmatprep.mubr.bf16.mxu0 %v6886_v2  ;;  %v6925_v2 = vld [vmem:[%s7844_s30 + $0x1c8] ss:$16 sps:$4 sm:$0xff]  }
  0xf8   : > { %1188 = vmatmul.mubr.bf16.gmra.mrb[80].mxu0 %v6888_v3 }
  0xf9   : > { %1195 = vmatprep.mubr.bf16.mxu0 %v6889_v4 }
 0x100   : > { %1196 = vmatmul.mubr.bf16.gmra.mrb[84].mxu0 %v6891_v5 }
 0x101   : > { %1203 = vmatprep.mubr.bf16.mxu0 %v6892_v6  ;;  %v6927_v6 = vld [vmem:[%s7844_s30 + $0x1ec] ss:$16 sps:$4 sm:$0xff]  }
 0x108   : > { %1204 = vmatmul.mubr.bf16.gmra.mrb[88].mxu0 %v6894_v7 }
 0x109   : > { %1211 = vmatprep.mubr.bf16.mxu0 %v6895_v8 }
 0x110   : > { %1212 = vmatmul.mubr.bf16.gmra.mrb[92].mxu0 %v6897_v9 }
 0x111   : > { %1219 = vmatprep.mubr.bf16.mxu0 %v6898_v10 }
 0x118   : > { %1220 = vmatmul.mubr.bf16.gmra.mrb[96].mxu0 %v6900_v11 }
 0x119   : > { %1227 = vmatprep.mubr.bf16.mxu0 %v6901_v12 }
 0x120   : > { %1228 = vmatmul.mubr.bf16.gmra.mrb[100].mxu0 %v6903_v13 }
 0x121   : > { %1235 = vmatprep.mubr.bf16.mxu0 %v6904_v14 }
 0x128   : > { %1236 = vmatmul.mubr.bf16.gmra.mrb[104].mxu0 %v6906_v15 }
 0x129   : > { %1243 = vmatprep.mubr.bf16.mxu0 %v6908_v16 }
 0x12b   : > { %v1029_v18 = vpop.f32.mrb[0].mxu0 }
 0x12c   : > { %v1030_v19 = vadd.f32 %v7973_v17, %v1029_v18  ;;  %v1031_v20 = vpop.f32.mrb[1].mxu0 }
 0x12d   : > { %v1032_v22 = vpop.f32.mrb[2].mxu0 }
 0x12e   : > { %v1348_v24 = vmul.f32 1.442695, %v1030_v19  ;;  %v1033_v25 = vadd.f32 %v7973_v17, %v1032_v22  ;;  %v1034_v26 = vpop.f32.mrb[3].mxu0  ;;  %vm1284_vm0 = vcmp.gt.f32.partialorder %v1030_v19, 0.0 }
 0x130   : > { %6986 = vpow2.f32 %v1348_v24  ;;  %v1350_v27 = vmul.f32 1.442695, %v1033_v25  ;;  %1244 = vmatmul.mubr.bf16.gmra.mrb[108].mxu0 %v6910_v21  ;;  %vm1285_vm1 = vcmp.gt.f32.partialorder %v1033_v25, 0.0  ;;  %v6929_v24 = vld [vmem:[%s7844_s30 + $0x1e8] ss:$16 sps:$4 sm:$0xff]   ;;  %s5834_s30 = ssub.s32 (%p7807_p5), 75, %s7822_s22 }
 0x131   : > { %1251 = vmatprep.mubr.bf16.mxu0 %v6913_v23  ;;  %p5835_p11 = scmp.lt.s32.totalorder (%p7807_p5), %s5834_s30, 32 }
 0x132   : > { %6988 = vpow2.f32 %v1350_v27 }
 0x133   : > { %v1037_v28 = vpop.f32.mrb[4].mxu0 }
 0x134   : > { %v1038_v29 = vadd.f32 %v7973_v17, %v1037_v28  ;;  %v1039_v30 = vpop.f32.mrb[5].mxu0 }
 0x135   : > { %v1040_v32 = vpop.f32.mrb[6].mxu0 }
 0x136   : > { %v1352_v34 = vmul.f32 1.442695, %v1038_v29  ;;  %v1041_v35 = vadd.f32 %v7973_v17, %v1040_v32  ;;  %v1042_v36 = vpop.f32.mrb[7].mxu0  ;;  %vm1286_vm2 = vcmp.gt.f32.partialorder %v1038_v29, 0.0 }
 0x138   : > { %6990 = vpow2.f32 %v1352_v34  ;;  %v1354_v37 = vmul.f32 1.442695, %v1041_v35  ;;  %1252 = vmatmul.mubr.bf16.gmra.mrb[112].mxu0 %v6915_v31  ;;  %vm1287_vm3 = vcmp.gt.f32.partialorder %v1041_v35, 0.0 }
 0x139   : > { %1259 = vmatprep.mubr.bf16.mxu0 %v6918_v33 }
 0x13a   : > { %v6987_v38 = vpop.eup %6986  ;;  %6992 = vpow2.f32 %v1354_v37 }
 0x13b   : > { %v1045_v39 = vpop.f32.mrb[8].mxu0  ;;  %v5998_v40 = vadd.f32 -1.0, %v6987_v38 }
 0x13c   : > { %v6989_v41 = vpop.eup %6988  ;;  %v7984_v42 = vadd.f32 %v7973_v17, %v1045_v39  ;;  %v1047_v43 = vpop.f32.mrb[9].mxu0 }
 0x13d   : > { %v1048_v45 = vpop.f32.mrb[10].mxu0  ;;  %v5999_v46 = vadd.f32 -1.0, %v6989_v41  ;;  %v1540_v47 = vmul.f32 1.6732632, %v5998_v40 }
 0x13e   : > { %v1356_v49 = vmul.f32 1.442695, %v7984_v42  ;;  %v7990_v50 = vadd.f32 %v7973_v17, %v1048_v45  ;;  %v1050_v51 = vpop.f32.mrb[11].mxu0  ;;  %vm1288_vm4 = vcmp.gt.f32.partialorder %v7984_v42, 0.0 }
 0x13f   : > { %v1541_v52 = vmul.f32 1.6732632, %v5999_v46  ;;  %v1604_v53 = vsel %vm1284_vm0, %v1030_v19, %v1540_v47 }
 0x140   : > { %6994 = vpow2.f32 %v1356_v49  ;;  %v1358_v54 = vmul.f32 1.442695, %v7990_v50  ;;  %1260 = vmatmul.mubr.bf16.gmra.mrb[116].mxu0 %v6920_v44  ;;  %v1668_v57 = vmul.f32 1.050701, %v1604_v53  ;;  %vm1289_vm5 = vcmp.gt.f32.partialorder %v7990_v50, 0.0 }
 0x141   : > { %v1605_v55 = vsel %vm1285_vm1, %v1033_v25, %v1541_v52  ;;  %1267 = vmatprep.mubr.bf16.mxu0 %v6923_v48 }
 0x142   : > { %v6991_v56 = vpop.eup %6990  ;;  %6996 = vpow2.f32 %v1358_v54  ;;  %v1669_v58 = vmul.f32 1.050701, %v1605_v55 }
 0x143   : > { %v1053_v59 = vpop.f32.mrb[12].mxu0  ;;  %v6000_v60 = vadd.f32 -1.0, %v6991_v56 }
 0x144   : > { %v6993_v61 = vpop.eup %6992  ;;  %v7994_v62 = vadd.f32 %v7973_v17, %v1053_v59  ;;  %v1055_v63 = vpop.f32.mrb[13].mxu0  ;;  %v1732_v0 = vpack.c.bf16 %v1669_v58, %v1668_v57 }
 0x145   : > { %v1056_v3 = vpop.f32.mrb[14].mxu0  ;;  %v6001_v4 = vadd.f32 -1.0, %v6993_v61  ;;  %v1542_v5 = vmul.f32 1.6732632, %v6000_v60 }
 0x146   : > { %v1360_v7 = vmul.f32 1.442695, %v7994_v62  ;;  %v1057_v8 = vadd.f32 %v7973_v17, %v1056_v3  ;;  %v1058_v9 = vpop.f32.mrb[15].mxu0  ;;  %6529 = vmatprep.mubr.bf16.mxu1 %v1732_v0  ;;  %vm1290_vm6 = vcmp.gt.f32.partialorder %v7994_v62, 0.0 }
 0x147   : > { %v1543_v10 = vmul.f32 1.6732632, %v6001_v4  ;;  %v1606_v11 = vsel %vm1286_vm2, %v1038_v29, %v1542_v5 }
 0x148   : > { %6998 = vpow2.f32 %v1360_v7  ;;  %v1362_v12 = vmul.f32 1.442695, %v1057_v8  ;;  %1268 = vmatmul.mubr.bf16.gmra.mrb[120].mxu0 %v6925_v2  ;;  %v1670_v15 = vmul.f32 1.050701, %v1606_v11  ;;  %vm1291_vm7 = vcmp.gt.f32.partialorder %v1057_v8, 0.0 }
 0x149   : > { %v1607_v13 = vsel %vm1287_vm3, %v1041_v35, %v1543_v10  ;;  %1275 = vmatprep.mubr.bf16.mxu0 %v6927_v6 }
 0x14a   : > { %v6995_v14 = vpop.eup %6994  ;;  %7000 = vpow2.f32 %v1362_v12  ;;  %v1671_v16 = vmul.f32 1.050701, %v1607_v13 }
 0x14b   : > { %v1061_v18 = vpop.f32.mrb[16].mxu0  ;;  %v6002_v19 = vadd.f32 -1.0, %v6995_v14 }
 0x14c   : > { %v6997_v20 = vpop.eup %6996  ;;  %v8001_v21 = vadd.f32 %v7973_v17, %v1061_v18  ;;  %v1063_v22 = vpop.f32.mrb[17].mxu0  ;;  %v1733_v23 = vpack.c.bf16 %v1671_v16, %v1670_v15 }
 0x14d   : > { %v1064_v25 = vpop.f32.mrb[18].mxu0  ;;  %v6003_v26 = vadd.f32 -1.0, %v6997_v20  ;;  %v1544_v27 = vmul.f32 1.6732632, %v6002_v19 }
 0x14e   : > { %v1364_v28 = vmul.f32 1.442695, %v8001_v21  ;;  %v1065_v29 = vadd.f32 %v7973_v17, %v1064_v25  ;;  %v1066_v30 = vpop.f32.mrb[19].mxu0  ;;  %6530 = vmatmul.mubr.bf16.vlgmr.msra.gmra.mrb[0].mxu1 %v1733_v23  ;;  %vm1292_vm8 = vcmp.gt.f32.partialorder %v8001_v21, 0.0 }
 0x14f   : > { %v1545_v31 = vmul.f32 1.6732632, %v6003_v26  ;;  %v1608_v32 = vsel %vm1288_vm4, %v7984_v42, %v1544_v27 }
 0x150   : > { %7002 = vpow2.f32 %v1364_v28  ;;  %v1366_v33 = vmul.f32 1.442695, %v1065_v29  ;;  %1276 = vmatmul.mubr.bf16.gmra.mrb[124].mxu0 %v6929_v24  ;;  %v1672_v36 = vmul.f32 1.050701, %v1608_v32  ;;  %vm1293_vm9 = vcmp.gt.f32.partialorder %v1065_v29, 0.0 }
 0x151   : > { %v1609_v34 = vsel %vm1289_vm5, %v7990_v50, %v1545_v31 }
 0x152   : > { %v6999_v35 = vpop.eup %6998  ;;  %7004 = vpow2.f32 %v1366_v33  ;;  %v1673_v37 = vmul.f32 1.050701, %v1609_v34 }
 0x153   : > { %v1069_v38 = vpop.f32.mrb[20].mxu0  ;;  %v6004_v39 = vadd.f32 -1.0, %v6999_v35 }
 0x154   : > { %v7001_v40 = vpop.eup %7000  ;;  %v1070_v41 = vadd.f32 %v7973_v17, %v1069_v38  ;;  %v1071_v43 = vpop.f32.mrb[21].mxu0  ;;  %v1734_v44 = vpack.c.bf16 %v1673_v37, %v1672_v36 }
 0x155   : > { %v1072_v45 = vpop.f32.mrb[22].mxu0  ;;  %v6005_v42 = vadd.f32 -1.0, %v7001_v40  ;;  %v1546_v46 = vmul.f32 1.6732632, %v6004_v39 }
 0x156   : > { %v1368_v47 = vmul.f32 1.442695, %v1070_v41  ;;  %v1073_v48 = vadd.f32 %v7973_v17, %v1072_v45  ;;  %v1074_v49 = vpop.f32.mrb[23].mxu0  ;;  %6533 = vmatprep.mubr.bf16.mxu1 %v1734_v44  ;;  %vm1294_vm10 = vcmp.gt.f32.partialorder %v1070_v41, 0.0 }
 0x157   : > { %v1547_v50 = vmul.f32 1.6732632, %v6005_v42  ;;  %v1610_v51 = vsel %vm1290_vm6, %v7994_v62, %v1546_v46 }
 0x158   : > { %7006 = vpow2.f32 %v1368_v47  ;;  %v1370_v52 = vmul.f32 1.442695, %v1073_v48  ;;  %v1674_v55 = vmul.f32 1.050701, %v1610_v51  ;;  %vm1295_vm11 = vcmp.gt.f32.partialorder %v1073_v48, 0.0 }
 0x159   : > { %v1611_v53 = vsel %vm1291_vm7, %v1057_v8, %v1547_v50 }
 0x15a   : > { %v7003_v54 = vpop.eup %7002  ;;  %7008 = vpow2.f32 %v1370_v52  ;;  %v1675_v56 = vmul.f32 1.050701, %v1611_v53 }
 0x15b   : > { %v1077_v57 = vpop.f32.mrb[24].mxu0  ;;  %v6006_v58 = vadd.f32 -1.0, %v7003_v54 }
 0x15c   : > { %v7005_v59 = vpop.eup %7004  ;;  %v1078_v60 = vadd.f32 %v7973_v17, %v1077_v57  ;;  %v1079_v61 = vpop.f32.mrb[25].mxu0  ;;  %v1735_v63 = vpack.c.bf16 %v1675_v56, %v1674_v55 }
 0x15d   : > { %v1080_v0 = vpop.f32.mrb[26].mxu0  ;;  %v6007_v2 = vadd.f32 -1.0, %v7005_v59  ;;  %v1548_v3 = vmul.f32 1.6732632, %v6006_v58 }
 0x15e   : > { %v1372_v62 = vmul.f32 1.442695, %v1078_v60  ;;  %v1081_v4 = vadd.f32 %v7973_v17, %v1080_v0  ;;  %v1082_v5 = vpop.f32.mrb[27].mxu0  ;;  %6534 = vmatmul.mubr.bf16.gmra.mrb[4].mxu1 %v1735_v63  ;;  %vm1296_vm12 = vcmp.gt.f32.partialorder %v1078_v60, 0.0 }
 0x15f   : > { %v1549_v6 = vmul.f32 1.6732632, %v6007_v2  ;;  %v1612_v7 = vsel %vm1292_vm8, %v8001_v21, %v1548_v3 }
 0x160   : > { %7010 = vpow2.f32 %v1372_v62  ;;  %v1374_v8 = vmul.f32 1.442695, %v1081_v4  ;;  %v1676_v11 = vmul.f32 1.050701, %v1612_v7  ;;  %vm1297_vm13 = vcmp.gt.f32.partialorder %v1081_v4, 0.0 }
 0x161   : > { %v1613_v9 = vsel %vm1293_vm9, %v1065_v29, %v1549_v6 }
 0x162   : > { %v7007_v10 = vpop.eup %7006  ;;  %7012 = vpow2.f32 %v1374_v8  ;;  %v1677_v12 = vmul.f32 1.050701, %v1613_v9 }
 0x163   : > { %v1085_v13 = vpop.f32.mrb[28].mxu0  ;;  %v6008_v14 = vadd.f32 -1.0, %v7007_v10 }
 0x164   : > { %v7009_v15 = vpop.eup %7008  ;;  %v1086_v16 = vadd.f32 %v7973_v17, %v1085_v13  ;;  %v1087_v18 = vpop.f32.mrb[29].mxu0  ;;  %v1736_v19 = vpack.c.bf16 %v1677_v12, %v1676_v11 }
 0x165   : > { %v1088_v20 = vpop.f32.mrb[30].mxu0  ;;  %v6009_v22 = vadd.f32 -1.0, %v7009_v15  ;;  %v1550_v23 = vmul.f32 1.6732632, %v6008_v14 }
 0x166   : > { %v1376_v21 = vmul.f32 1.442695, %v1086_v16  ;;  %v1089_v24 = vadd.f32 %v7973_v17, %v1088_v20  ;;  %v1090_v25 = vpop.f32.mrb[31].mxu0  ;;  %6537 = vmatprep.mubr.bf16.mxu1 %v1736_v19  ;;  %vm1298_vm14 = vcmp.gt.f32.partialorder %v1086_v16, 0.0 }
 0x167   : > { %v1551_v26 = vmul.f32 1.6732632, %v6009_v22  ;;  %v1614_v27 = vsel %vm1294_vm10, %v1070_v41, %v1550_v23 }
 0x168   : > { %7014 = vpow2.f32 %v1376_v21  ;;  %v1378_v28 = vmul.f32 1.442695, %v1089_v24  ;;  %v1678_v31 = vmul.f32 1.050701, %v1614_v27  ;;  %vm1299_vm15 = vcmp.gt.f32.partialorder %v1089_v24, 0.0 }
 0x169   : > { %v1615_v29 = vsel %vm1295_vm11, %v1073_v48, %v1551_v26 }
 0x16a   : > { %v7011_v30 = vpop.eup %7010  ;;  %7016 = vpow2.f32 %v1378_v28  ;;  %v1679_v32 = vmul.f32 1.050701, %v1615_v29 }
 0x16b   : > { %v6010_v33 = vadd.f32 -1.0, %v7011_v30  ;;  %v1093_v34 = vpop.f32.mrb[32].mxu0 }
 0x16c   : > { %v7013_v35 = vpop.eup %7012  ;;  %v1094_v36 = vadd.f32 %v7973_v17, %v1093_v34  ;;  %v1095_v37 = vpop.f32.mrb[33].mxu0  ;;  %v1737_v38 = vpack.c.bf16 %v1679_v32, %v1678_v31 }
 0x16d   : > { %v1552_v39 = vmul.f32 1.6732632, %v6010_v33  ;;  %v6011_v40 = vadd.f32 -1.0, %v7013_v35  ;;  %v1096_v43 = vpop.f32.mrb[34].mxu0 }
 0x16e   : > { %v1380_v41 = vmul.f32 1.442695, %v1094_v36  ;;  %v1097_v44 = vadd.f32 %v7973_v17, %v1096_v43  ;;  %v1098_v45 = vpop.f32.mrb[35].mxu0  ;;  %6538 = vmatmul.mubr.bf16.gmra.mrb[8].mxu1 %v1737_v38  ;;  %vm1300_vm0 = vcmp.gt.f32.partialorder %v1094_v36, 0.0 }
 0x16f   : > { %v1616_v42 = vsel %vm1296_vm12, %v1078_v60, %v1552_v39  ;;  %v1553_v46 = vmul.f32 1.6732632, %v6011_v40 }
 0x170   : > { %7018 = vpow2.f32 %v1380_v41  ;;  %v1382_v47 = vmul.f32 1.442695, %v1097_v44  ;;  %v1680_v50 = vmul.f32 1.050701, %v1616_v42  ;;  %vm1301_vm1 = vcmp.gt.f32.partialorder %v1097_v44, 0.0 }
 0x171   : > { %v1617_v48 = vsel %vm1297_vm13, %v1081_v4, %v1553_v46 }
 0x172   : > { %v7015_v49 = vpop.eup %7014  ;;  %v1681_v51 = vmul.f32 1.050701, %v1617_v48  ;;  %7020 = vpow2.f32 %v1382_v47 }
 0x173   : > { %v6012_v52 = vadd.f32 -1.0, %v7015_v49  ;;  %v1101_v53 = vpop.f32.mrb[36].mxu0 }
 0x174   : > { %v7017_v54 = vpop.eup %7016  ;;  %v1102_v55 = vadd.f32 %v7973_v17, %v1101_v53  ;;  %v1103_v56 = vpop.f32.mrb[37].mxu0  ;;  %v1738_v57 = vpack.c.bf16 %v1681_v51, %v1680_v50 }
 0x175   : > { %v1554_v58 = vmul.f32 1.6732632, %v6012_v52  ;;  %v6013_v59 = vadd.f32 -1.0, %v7017_v54  ;;  %v1104_v61 = vpop.f32.mrb[38].mxu0 }
 0x176   : > { %v1384_v60 = vmul.f32 1.442695, %v1102_v55  ;;  %v1105_v63 = vadd.f32 %v7973_v17, %v1104_v61  ;;  %v1106_v0 = vpop.f32.mrb[39].mxu0  ;;  %6541 = vmatprep.mubr.bf16.mxu1 %v1738_v57  ;;  %vm1302_vm2 = vcmp.gt.f32.partialorder %v1102_v55, 0.0 }
 0x177   : > { %v1618_v2 = vsel %vm1298_vm14, %v1086_v16, %v1554_v58  ;;  %v1555_v3 = vmul.f32 1.6732632, %v6013_v59 }
 0x178   : > { %7022 = vpow2.f32 %v1384_v60  ;;  %v1386_v62 = vmul.f32 1.442695, %v1105_v63  ;;  %v1682_v6 = vmul.f32 1.050701, %v1618_v2  ;;  %vm1303_vm3 = vcmp.gt.f32.partialorder %v1105_v63, 0.0 }
 0x179   : > { %v1619_v4 = vsel %vm1299_vm15, %v1089_v24, %v1555_v3 }
 0x17a   : > { %v7019_v5 = vpop.eup %7018  ;;  %v1683_v7 = vmul.f32 1.050701, %v1619_v4  ;;  %7024 = vpow2.f32 %v1386_v62  ;;  %v6930_v62 = vld [vmem:[%s10219_s5] sm:$0xff]  }
 0x17b   : > { %v6014_v8 = vadd.f32 -1.0, %v7019_v5  ;;  %v1109_v9 = vpop.f32.mrb[40].mxu0  ;;  %6593 = vmatprep.subr.bf16.mxu1 %v6930_v62 }
 0x17c   : > { %v7021_v10 = vpop.eup %7020  ;;  %v1110_v11 = vadd.f32 %v7973_v17, %v1109_v9  ;;  %v1111_v12 = vpop.f32.mrb[41].mxu0  ;;  %v1739_v13 = vpack.c.bf16 %v1683_v7, %v1682_v6  ;;  %6594 = vmatpush3.bf16.msra.mxu1 %v6930_v62 }
 0x17d   : > { %v1556_v14 = vmul.f32 1.6732632, %v6014_v8  ;;  %v6015_v15 = vadd.f32 -1.0, %v7021_v10  ;;  %v1112_v18 = vpop.f32.mrb[42].mxu0 }
 0x17e   : > { %v1388_v16 = vmul.f32 1.442695, %v1110_v11  ;;  %v1113_v19 = vadd.f32 %v7973_v17, %v1112_v18  ;;  %v1114_v20 = vpop.f32.mrb[43].mxu0  ;;  %6542 = vmatmul.mubr.bf16.gmra.mrb[12].mxu1 %v1739_v13  ;;  %vm1304_vm4 = vcmp.gt.f32.partialorder %v1110_v11, 0.0 }
 0x17f   : > { %v1620_v22 = vsel %vm1300_vm0, %v1094_v36, %v1556_v14  ;;  %v1557_v23 = vmul.f32 1.6732632, %v6015_v15 }
 0x180   : > { %7026 = vpow2.f32 %v1388_v16  ;;  %v1390_v21 = vmul.f32 1.442695, %v1113_v19  ;;  %v1684_v26 = vmul.f32 1.050701, %v1620_v22  ;;  %vm1305_vm5 = vcmp.gt.f32.partialorder %v1113_v19, 0.0 }
 0x181   : > { %v1621_v24 = vsel %vm1301_vm1, %v1097_v44, %v1557_v23 }
 0x182   : > { %v7023_v25 = vpop.eup %7022  ;;  %v1685_v27 = vmul.f32 1.050701, %v1621_v24  ;;  %7028 = vpow2.f32 %v1390_v21 }
 0x183   : > { %v6016_v28 = vadd.f32 -1.0, %v7023_v25  ;;  %v1117_v29 = vpop.f32.mrb[44].mxu0 }
 0x184   : > { %v7025_v30 = vpop.eup %7024  ;;  %v8027_v31 = vadd.f32 %v7973_v17, %v1117_v29  ;;  %v1119_v32 = vpop.f32.mrb[45].mxu0  ;;  %v1740_v33 = vpack.c.bf16 %v1685_v27, %v1684_v26 }
 0x185   : > { %v1558_v34 = vmul.f32 1.6732632, %v6016_v28  ;;  %v6017_v35 = vadd.f32 -1.0, %v7025_v30  ;;  %v1120_v36 = vpop.f32.mrb[46].mxu0 }
 0x186   : > { %v1392_v37 = vmul.f32 1.442695, %v8027_v31  ;;  %v1121_v38 = vadd.f32 %v7973_v17, %v1120_v36  ;;  %v1122_v39 = vpop.f32.mrb[47].mxu0  ;;  %6545 = vmatprep.mubr.bf16.mxu1 %v1740_v33  ;;  %vm1306_vm6 = vcmp.gt.f32.partialorder %v8027_v31, 0.0 }
 0x187   : > { %v1622_v40 = vsel %vm1302_vm2, %v1102_v55, %v1558_v34  ;;  %v1559_v43 = vmul.f32 1.6732632, %v6017_v35 }
 0x188   : > { %7030 = vpow2.f32 %v1392_v37  ;;  %v1394_v41 = vmul.f32 1.442695, %v1121_v38  ;;  %v1686_v42 = vmul.f32 1.050701, %v1622_v40  ;;  %vm1307_vm7 = vcmp.gt.f32.partialorder %v1121_v38, 0.0 }
 0x189   : > { %v1623_v44 = vsel %vm1303_vm3, %v1105_v63, %v1559_v43 }
 0x18a   : > { %v7027_v45 = vpop.eup %7026  ;;  %v1687_v46 = vmul.f32 1.050701, %v1623_v44  ;;  %7032 = vpow2.f32 %v1394_v41  ;;  %v6931_v44 = vld [vmem:[%s10219_s5 + $0x8] sm:$0xff]  }
 0x18b   : > { %v6018_v47 = vadd.f32 -1.0, %v7027_v45  ;;  %v1125_v48 = vpop.f32.mrb[48].mxu0  ;;  %6595 = vmatprep.subr.bf16.mxu1 %v6931_v44 }
 0x18c   : > { %v7029_v49 = vpop.eup %7028  ;;  %v8032_v50 = vadd.f32 %v7973_v17, %v1125_v48  ;;  %v1127_v51 = vpop.f32.mrb[49].mxu0  ;;  %v1741_v52 = vpack.c.bf16 %v1687_v46, %v1686_v42  ;;  %6596 = vmatpush3.bf16.msra.mxu1 %v6931_v44 }
 0x18d   : > { %v1560_v53 = vmul.f32 1.6732632, %v6018_v47  ;;  %v6019_v54 = vadd.f32 -1.0, %v7029_v49  ;;  %v1128_v55 = vpop.f32.mrb[50].mxu0 }
 0x18e   : > { %v1396_v56 = vmul.f32 1.442695, %v8032_v50  ;;  %v1129_v57 = vadd.f32 %v7973_v17, %v1128_v55  ;;  %v1130_v58 = vpop.f32.mrb[51].mxu0  ;;  %6546 = vmatmul.mubr.bf16.gmra.mrb[16].mxu1 %v1741_v52  ;;  %vm1308_vm8 = vcmp.gt.f32.partialorder %v8032_v50, 0.0 }
 0x18f   : > { %v1624_v59 = vsel %vm1304_vm4, %v1110_v11, %v1560_v53  ;;  %v1561_v61 = vmul.f32 1.6732632, %v6019_v54 }
 0x190   : > { %7034 = vpow2.f32 %v1396_v56  ;;  %v1398_v60 = vmul.f32 1.442695, %v1129_v57  ;;  %v1688_v2 = vmul.f32 1.050701, %v1624_v59  ;;  %vm1309_vm9 = vcmp.gt.f32.partialorder %v1129_v57, 0.0 }
 0x191   : > { %v1625_v63 = vsel %vm1305_vm5, %v1113_v19, %v1561_v61 }
 0x192   : > { %v7031_v0 = vpop.eup %7030  ;;  %v1689_v3 = vmul.f32 1.050701, %v1625_v63  ;;  %7036 = vpow2.f32 %v1398_v60 }
 0x193   : > { %v6020_v4 = vadd.f32 -1.0, %v7031_v0  ;;  %v1133_v5 = vpop.f32.mrb[52].mxu0 }
 0x194   : > { %v7033_v6 = vpop.eup %7032  ;;  %v8040_v7 = vadd.f32 %v7973_v17, %v1133_v5  ;;  %v1135_v8 = vpop.f32.mrb[53].mxu0  ;;  %v1742_v9 = vpack.c.bf16 %v1689_v3, %v1688_v2 }
 0x195   : > { %v1562_v10 = vmul.f32 1.6732632, %v6020_v4  ;;  %v6021_v11 = vadd.f32 -1.0, %v7033_v6  ;;  %v1136_v12 = vpop.f32.mrb[54].mxu0  ;;  %v6932_v6 = vld [vmem:[%s10219_s5 + $0x10] sm:$0xff]  }
 0x196   : > { %v1400_v13 = vmul.f32 1.442695, %v8040_v7  ;;  %v1137_v14 = vadd.f32 %v7973_v17, %v1136_v12  ;;  %v1138_v15 = vpop.f32.mrb[55].mxu0  ;;  %6549 = vmatprep.mubr.bf16.mxu1 %v1742_v9  ;;  %vm1310_vm10 = vcmp.gt.f32.partialorder %v8040_v7, 0.0  ;;  %6597 = vmatprep.subr.bf16.mxu1 %v6932_v6 }
 0x197   : > { %v1626_v18 = vsel %vm1306_vm6, %v8027_v31, %v1562_v10  ;;  %v1563_v16 = vmul.f32 1.6732632, %v6021_v11  ;;  %6598 = vmatpush3.bf16.msra.mxu1 %v6932_v6 }
 0x198   : > { %7038 = vpow2.f32 %v1400_v13  ;;  %v1402_v19 = vmul.f32 1.442695, %v1137_v14  ;;  %v1690_v23 = vmul.f32 1.050701, %v1626_v18  ;;  %vm1311_vm11 = vcmp.gt.f32.partialorder %v1137_v14, 0.0 }
 0x199   : > { %v1627_v20 = vsel %vm1307_vm7, %v1121_v38, %v1563_v16 }
 0x19a   : > { %v7035_v22 = vpop.eup %7034  ;;  %v1691_v21 = vmul.f32 1.050701, %v1627_v20  ;;  %7040 = vpow2.f32 %v1402_v19 }
 0x19b   : > { %v6022_v24 = vadd.f32 -1.0, %v7035_v22  ;;  %v1141_v25 = vpop.f32.mrb[56].mxu0 }
 0x19c   : > { %v7037_v26 = vpop.eup %7036  ;;  %v8047_v27 = vadd.f32 %v7973_v17, %v1141_v25  ;;  %v1143_v28 = vpop.f32.mrb[57].mxu0  ;;  %v1743_v29 = vpack.c.bf16 %v1691_v21, %v1690_v23 }
 0x19d   : > { %v1564_v30 = vmul.f32 1.6732632, %v6022_v24  ;;  %v6023_v32 = vadd.f32 -1.0, %v7037_v26  ;;  %v1144_v31 = vpop.f32.mrb[58].mxu0 }
 0x19e   : > { %v1404_v33 = vmul.f32 1.442695, %v8047_v27  ;;  %v8052_v34 = vadd.f32 %v7973_v17, %v1144_v31  ;;  %v1146_v35 = vpop.f32.mrb[59].mxu0  ;;  %6550 = vmatmul.mubr.bf16.gmra.mrb[20].mxu1 %v1743_v29  ;;  %vm1312_vm12 = vcmp.gt.f32.partialorder %v8047_v27, 0.0 }
 0x19f   : > { %v1628_v36 = vsel %vm1308_vm8, %v8032_v50, %v1564_v30  ;;  %v1565_v37 = vmul.f32 1.6732632, %v6023_v32  ;;  %v6933_v30 = vld [vmem:[%s10219_s5 + $0x18] sm:$0xff]  }
 0x1a0   : > { %7042 = vpow2.f32 %v1404_v33  ;;  %v1406_v38 = vmul.f32 1.442695, %v8052_v34  ;;  %v1692_v43 = vmul.f32 1.050701, %v1628_v36  ;;  %vm1313_vm13 = vcmp.gt.f32.partialorder %v8052_v34, 0.0  ;;  %6599 = vmatprep.subr.bf16.mxu1 %v6933_v30 }
 0x1a1   : > { %v1629_v39 = vsel %vm1309_vm9, %v1129_v57, %v1565_v37  ;;  %6600 = vmatpush3.bf16.msra.mxu1 %v6933_v30 }
 0x1a2   : > { %v7039_v40 = vpop.eup %7038  ;;  %v1693_v41 = vmul.f32 1.050701, %v1629_v39  ;;  %7044 = vpow2.f32 %v1406_v38  ;;  %v6934_v38 = vld [vmem:[%s10219_s5 + $0x20] sm:$0xff]  }
 0x1a3   : > { %v6024_v45 = vadd.f32 -1.0, %v7039_v40  ;;  %v1149_v42 = vpop.f32.mrb[60].mxu0  ;;  %6601 = vmatprep.subr.bf16.mxu1 %v6934_v38 }
 0x1a4   : > { %v7041_v46 = vpop.eup %7040  ;;  %v8060_v47 = vadd.f32 %v7973_v17, %v1149_v42  ;;  %v1151_v48 = vpop.f32.mrb[61].mxu0  ;;  %v1744_v49 = vpack.c.bf16 %v1693_v41, %v1692_v43 }
 0x1a5   : > { %v1566_v50 = vmul.f32 1.6732632, %v6024_v45  ;;  %v6025_v51 = vadd.f32 -1.0, %v7041_v46  ;;  %v1152_v52 = vpop.f32.mrb[62].mxu0  ;;  %6602 = vmatpush3.bf16.msra.mxu1 %v6934_v38 }
 0x1a6   : > { %v1408_v53 = vmul.f32 1.442695, %v8060_v47  ;;  %v8065_v54 = vadd.f32 %v7973_v17, %v1152_v52  ;;  %v1154_v55 = vpop.f32.mrb[63].mxu0  ;;  %6553 = vmatprep.mubr.bf16.mxu1 %v1744_v49  ;;  %vm1314_vm14 = vcmp.gt.f32.partialorder %v8060_v47, 0.0 }
 0x1a7   : > { %v1630_v56 = vsel %vm1310_vm10, %v8040_v7, %v1566_v50  ;;  %v1567_v57 = vmul.f32 1.6732632, %v6025_v51  ;;  %v6935_v51 = vld [vmem:[%s10219_s5 + $0x28] sm:$0xff]  }
 0x1a8   : > { %7046 = vpow2.f32 %v1408_v53  ;;  %v1410_v58 = vmul.f32 1.442695, %v8065_v54  ;;  %v1694_v60 = vmul.f32 1.050701, %v1630_v56  ;;  %vm1315_vm15 = vcmp.gt.f32.partialorder %v8065_v54, 0.0  ;;  %6603 = vmatprep.subr.bf16.mxu1 %v6935_v51 }
 0x1a9   : > { %v1631_v59 = vsel %vm1311_vm11, %v1137_v14, %v1567_v57  ;;  %6604 = vmatpush3.bf16.msra.mxu1 %v6935_v51 }
 0x1aa   : > { %v7043_v61 = vpop.eup %7042  ;;  %v1695_v63 = vmul.f32 1.050701, %v1631_v59  ;;  %7048 = vpow2.f32 %v1410_v58  ;;  %v6936_v59 = vld [vmem:[%s10219_s5 + $0x30] sm:$0xff]  }
 0x1ab   : > { %v6026_v0 = vadd.f32 -1.0, %v7043_v61  ;;  %v1157_v2 = vpop.f32.mrb[64].mxu0  ;;  %6605 = vmatprep.subr.bf16.mxu1 %v6936_v59 }
 0x1ac   : > { %v7045_v3 = vpop.eup %7044  ;;  %v8070_v62 = vadd.f32 %v7973_v17, %v1157_v2  ;;  %v1159_v4 = vpop.f32.mrb[65].mxu0  ;;  %v1745_v5 = vpack.c.bf16 %v1695_v63, %v1694_v60 }
 0x1ad   : > { %v1568_v7 = vmul.f32 1.6732632, %v6026_v0  ;;  %v6027_v8 = vadd.f32 -1.0, %v7045_v3  ;;  %v1160_v9 = vpop.f32.mrb[66].mxu0  ;;  %6606 = vmatpush3.bf16.msra.mxu1 %v6936_v59 }
 0x1ae   : > { %v1412_v10 = vmul.f32 1.442695, %v8070_v62  ;;  %v8078_v11 = vadd.f32 %v7973_v17, %v1160_v9  ;;  %v1162_v12 = vpop.f32.mrb[67].mxu0  ;;  %6554 = vmatmul.mubr.bf16.gmra.mrb[24].mxu1 %v1745_v5  ;;  %vm1316_vm0 = vcmp.gt.f32.partialorder %v8070_v62, 0.0 }
 0x1af   : > { %v1632_v13 = vsel %vm1312_vm12, %v8047_v27, %v1568_v7  ;;  %v1569_v14 = vmul.f32 1.6732632, %v6027_v8  ;;  %v6937_v12 = vld [vmem:[%s10219_s5 + $0x38] sm:$0xff]  }
 0x1b0   : > { %7050 = vpow2.f32 %v1412_v10  ;;  %v1414_v15 = vmul.f32 1.442695, %v8078_v11  ;;  %v1696_v19 = vmul.f32 1.050701, %v1632_v13  ;;  %vm1317_vm1 = vcmp.gt.f32.partialorder %v8078_v11, 0.0  ;;  %6607 = vmatprep.subr.bf16.mxu1 %v6937_v12 }
 0x1b1   : > { %v1633_v18 = vsel %vm1313_vm13, %v8052_v34, %v1569_v14  ;;  %6608 = vmatpush3.bf16.msra.mxu1 %v6937_v12 }
 0x1b2   : > { %v7047_v16 = vpop.eup %7046  ;;  %v1697_v20 = vmul.f32 1.050701, %v1633_v18  ;;  %7052 = vpow2.f32 %v1414_v15  ;;  %3627 = vmatprep.subr.bf16.mxu1 %v10231_v1 }
 0x1b3   : > { %v6028_v22 = vadd.f32 -1.0, %v7047_v16  ;;  %v1165_v23 = vpop.f32.mrb[68].mxu0 }
 0x1b4   : > { %v7049_v21 = vpop.eup %7048  ;;  %v8085_v24 = vadd.f32 %v7973_v17, %v1165_v23  ;;  %v1167_v25 = vpop.f32.mrb[69].mxu0  ;;  %v1746_v26 = vpack.c.bf16 %v1697_v20, %v1696_v19 }
 0x1b5   : > { %v1570_v27 = vmul.f32 1.6732632, %v6028_v22  ;;  %v6029_v28 = vadd.f32 -1.0, %v7049_v21  ;;  %v1168_v29 = vpop.f32.mrb[70].mxu0 }
 0x1b6   : > { %v1416_v32 = vmul.f32 1.442695, %v8085_v24  ;;  %v8093_v31 = vadd.f32 %v7973_v17, %v1168_v29  ;;  %v1170_v33 = vpop.f32.mrb[71].mxu0  ;;  %6557 = vmatprep.mubr.bf16.mxu1 %v1746_v26  ;;  %vm1318_vm2 = vcmp.gt.f32.partialorder %v8085_v24, 0.0 }
 0x1b7   : > { %v1634_v34 = vsel %vm1314_vm14, %v8060_v47, %v1570_v27  ;;  %v1571_v35 = vmul.f32 1.6732632, %v6029_v28 }
 0x1b8   : > { %7054 = vpow2.f32 %v1416_v32  ;;  %v1418_v36 = vmul.f32 1.442695, %v8093_v31  ;;  %v1698_v40 = vmul.f32 1.050701, %v1634_v34  ;;  %vm1319_vm3 = vcmp.gt.f32.partialorder %v8093_v31, 0.0 }
 0x1b9   : > { %v1635_v37 = vsel %vm1315_vm15, %v8065_v54, %v1571_v35 }
 0x1ba   : > { %v7051_v39 = vpop.eup %7050  ;;  %v1699_v43 = vmul.f32 1.050701, %v1635_v37  ;;  %7056 = vpow2.f32 %v1418_v36 }
 0x1bb   : > { %v6030_v41 = vadd.f32 -1.0, %v7051_v39  ;;  %v1173_v44 = vpop.f32.mrb[72].mxu0 }
 0x1bc   : > { %v7053_v45 = vpop.eup %7052  ;;  %v8103_v42 = vadd.f32 %v7973_v17, %v1173_v44  ;;  %v1175_v46 = vpop.f32.mrb[73].mxu0  ;;  %v1747_v47 = vpack.c.bf16 %v1699_v43, %v1698_v40 }
 0x1bd   : > { %v1572_v48 = vmul.f32 1.6732632, %v6030_v41  ;;  %v6031_v49 = vadd.f32 -1.0, %v7053_v45  ;;  %v1176_v50 = vpop.f32.mrb[74].mxu0 }
 0x1be   : > { %v1420_v52 = vmul.f32 1.442695, %v8103_v42  ;;  %v8111_v53 = vadd.f32 %v7973_v17, %v1176_v50  ;;  %v1178_v54 = vpop.f32.mrb[75].mxu0  ;;  %6558 = vmatmul.mubr.bf16.gmra.mrb[28].mxu1 %v1747_v47  ;;  %vm1320_vm4 = vcmp.gt.f32.partialorder %v8103_v42, 0.0 }
 0x1bf   : > { %v1636_v55 = vsel %vm1316_vm0, %v8070_v62, %v1572_v48  ;;  %v1573_v56 = vmul.f32 1.6732632, %v6031_v49 }
 0x1c0   : > { %7058 = vpow2.f32 %v1420_v52  ;;  %v1422_v57 = vmul.f32 1.442695, %v8111_v53  ;;  %v1700_v60 = vmul.f32 1.050701, %v1636_v55  ;;  %vm1321_vm5 = vcmp.gt.f32.partialorder %v8111_v53, 0.0 }
 0x1c1   : > { %v1637_v58 = vsel %vm1317_vm1, %v8078_v11, %v1573_v56 }
 0x1c2   : > { %v7055_v61 = vpop.eup %7054  ;;  %v1701_v63 = vmul.f32 1.050701, %v1637_v58  ;;  %7060 = vpow2.f32 %v1422_v57 }
 0x1c3   : > { %v6032_v0 = vadd.f32 -1.0, %v7055_v61  ;;  %v1181_v2 = vpop.f32.mrb[76].mxu0 }
 0x1c4   : > { %v7057_v3 = vpop.eup %7056  ;;  %v8121_v62 = vadd.f32 %v7973_v17, %v1181_v2  ;;  %v1183_v4 = vpop.f32.mrb[77].mxu0  ;;  %v1748_v5 = vpack.c.bf16 %v1701_v63, %v1700_v60 }
 0x1c5   : > { %v1574_v6 = vmul.f32 1.6732632, %v6032_v0  ;;  %v6033_v7 = vadd.f32 -1.0, %v7057_v3  ;;  %v1184_v8 = vpop.f32.mrb[78].mxu0 }
 0x1c6   : > { %v1424_v9 = vmul.f32 1.442695, %v8121_v62  ;;  %v1185_v10 = vadd.f32 %v7973_v17, %v1184_v8  ;;  %v1186_v11 = vpop.f32.mrb[79].mxu0  ;;  %6561 = vmatprep.mubr.bf16.mxu1 %v1748_v5  ;;  %vm1322_vm6 = vcmp.gt.f32.partialorder %v8121_v62, 0.0 }
 0x1c7   : > { %v1638_v13 = vsel %vm1318_vm2, %v8085_v24, %v1574_v6  ;;  %v1575_v14 = vmul.f32 1.6732632, %v6033_v7 }
 0x1c8   : > { %7062 = vpow2.f32 %v1424_v9  ;;  %v1426_v15 = vmul.f32 1.442695, %v1185_v10  ;;  %v1702_v19 = vmul.f32 1.050701, %v1638_v13  ;;  %vm1323_vm7 = vcmp.gt.f32.partialorder %v1185_v10, 0.0 }
 0x1c9   : > { %v1639_v18 = vsel %vm1319_vm3, %v8093_v31, %v1575_v14 }
 0x1ca   : > { %v7059_v16 = vpop.eup %7058  ;;  %v1703_v20 = vmul.f32 1.050701, %v1639_v18  ;;  %7064 = vpow2.f32 %v1426_v15 }
 0x1cb   : > { %v6034_v22 = vadd.f32 -1.0, %v7059_v16  ;;  %v1189_v23 = vpop.f32.mrb[80].mxu0 }
 0x1cc   : > { %v7061_v21 = vpop.eup %7060  ;;  %v1190_v24 = vadd.f32 %v7973_v17, %v1189_v23  ;;  %v1191_v25 = vpop.f32.mrb[81].mxu0  ;;  %v1749_v26 = vpack.c.bf16 %v1703_v20, %v1702_v19 }
 0x1cd   : > { %v1576_v27 = vmul.f32 1.6732632, %v6034_v22  ;;  %v6035_v28 = vadd.f32 -1.0, %v7061_v21  ;;  %v1192_v29 = vpop.f32.mrb[82].mxu0 }
 0x1ce   : > { %v1428_v30 = vmul.f32 1.442695, %v1190_v24  ;;  %v1193_v32 = vadd.f32 %v7973_v17, %v1192_v29  ;;  %v1194_v31 = vpop.f32.mrb[83].mxu0  ;;  %6562 = vmatmul.mubr.bf16.gmra.mrb[32].mxu1 %v1749_v26  ;;  %v8142_v17 = vld [vmem:[%s10216_s2] ss:$0 sm:$0xff]  ;;  %vm1324_vm8 = vcmp.gt.f32.partialorder %v1190_v24, 0.0 }
 0x1cf   : > { %v1640_v33 = vsel %vm1320_vm4, %v8103_v42, %v1576_v27  ;;  %v1577_v34 = vmul.f32 1.6732632, %v6035_v28 }
 0x1d0   : > { %7066 = vpow2.f32 %v1428_v30  ;;  %v1430_v35 = vmul.f32 1.442695, %v1193_v32  ;;  %v1704_v38 = vmul.f32 1.050701, %v1640_v33  ;;  %vm1325_vm9 = vcmp.gt.f32.partialorder %v1193_v32, 0.0 }
 0x1d1   : > { %v1641_v36 = vsel %vm1321_vm5, %v8111_v53, %v1577_v34 }
 0x1d2   : > { %v7063_v37 = vpop.eup %7062  ;;  %v1705_v39 = vmul.f32 1.050701, %v1641_v36  ;;  %7068 = vpow2.f32 %v1430_v35 }
 0x1d3   : > { %v6036_v40 = vadd.f32 -1.0, %v7063_v37  ;;  %v1197_v43 = vpop.f32.mrb[84].mxu0 }
 0x1d4   : > { %v7065_v41 = vpop.eup %7064  ;;  %v1198_v44 = vadd.f32 %v8142_v17, %v1197_v43  ;;  %v1199_v45 = vpop.f32.mrb[85].mxu0  ;;  %v1750_v42 = vpack.c.bf16 %v1705_v39, %v1704_v38 }
 0x1d5   : > { %v1578_v46 = vmul.f32 1.6732632, %v6036_v40  ;;  %v6037_v47 = vadd.f32 -1.0, %v7065_v41  ;;  %v1200_v48 = vpop.f32.mrb[86].mxu0 }
 0x1d6   : > { %v1432_v49 = vmul.f32 1.442695, %v1198_v44  ;;  %v1201_v50 = vadd.f32 %v8142_v17, %v1200_v48  ;;  %v1202_v51 = vpop.f32.mrb[87].mxu0  ;;  %6565 = vmatprep.mubr.bf16.mxu1 %v1750_v42  ;;  %vm1326_vm10 = vcmp.gt.f32.partialorder %v1198_v44, 0.0 }
 0x1d7   : > { %v1642_v52 = vsel %vm1322_vm6, %v8121_v62, %v1578_v46  ;;  %v1579_v53 = vmul.f32 1.6732632, %v6037_v47 }
 0x1d8   : > { %7070 = vpow2.f32 %v1432_v49  ;;  %v1434_v54 = vmul.f32 1.442695, %v1201_v50  ;;  %v1706_v57 = vmul.f32 1.050701, %v1642_v52  ;;  %vm1327_vm11 = vcmp.gt.f32.partialorder %v1201_v50, 0.0 }
 0x1d9   : > { %v1643_v55 = vsel %vm1323_vm7, %v1185_v10, %v1579_v53 }
 0x1da   : > { %v7067_v56 = vpop.eup %7066  ;;  %v1707_v58 = vmul.f32 1.050701, %v1643_v55  ;;  %7072 = vpow2.f32 %v1434_v54 }
 0x1db   : > { %v6038_v59 = vadd.f32 -1.0, %v7067_v56  ;;  %v1205_v61 = vpop.f32.mrb[88].mxu0 }
 0x1dc   : > { %v7069_v60 = vpop.eup %7068  ;;  %v1206_v63 = vadd.f32 %v8142_v17, %v1205_v61  ;;  %v1207_v0 = vpop.f32.mrb[89].mxu0  ;;  %v1751_v2 = vpack.c.bf16 %v1707_v58, %v1706_v57 }
 0x1dd   : > { %v1580_v3 = vmul.f32 1.6732632, %v6038_v59  ;;  %v6039_v4 = vadd.f32 -1.0, %v7069_v60  ;;  %v1208_v5 = vpop.f32.mrb[90].mxu0 }
 0x1de   : > { %v1436_v62 = vmul.f32 1.442695, %v1206_v63  ;;  %v1209_v6 = vadd.f32 %v8142_v17, %v1208_v5  ;;  %v1210_v7 = vpop.f32.mrb[91].mxu0  ;;  %6566 = vmatmul.mubr.bf16.gmra.mrb[36].mxu1 %v1751_v2  ;;  %vm1328_vm12 = vcmp.gt.f32.partialorder %v1206_v63, 0.0 }
 0x1df   : > { %v1644_v8 = vsel %vm1324_vm8, %v1190_v24, %v1580_v3  ;;  %v1581_v9 = vmul.f32 1.6732632, %v6039_v4 }
 0x1e0   : > { %7074 = vpow2.f32 %v1436_v62  ;;  %v1438_v10 = vmul.f32 1.442695, %v1209_v6  ;;  %v1708_v13 = vmul.f32 1.050701, %v1644_v8  ;;  %vm1329_vm13 = vcmp.gt.f32.partialorder %v1209_v6, 0.0 }
 0x1e1   : > { %v1645_v11 = vsel %vm1325_vm9, %v1193_v32, %v1581_v9 }
 0x1e2   : > { %v7071_v12 = vpop.eup %7070  ;;  %v1709_v14 = vmul.f32 1.050701, %v1645_v11  ;;  %7076 = vpow2.f32 %v1438_v10 }
 0x1e3   : > { %v6040_v15 = vadd.f32 -1.0, %v7071_v12  ;;  %v1213_v18 = vpop.f32.mrb[92].mxu0 }
 0x1e4   : > { %v7073_v16 = vpop.eup %7072  ;;  %v1214_v19 = vadd.f32 %v8142_v17, %v1213_v18  ;;  %v1215_v20 = vpop.f32.mrb[93].mxu0  ;;  %v1752_v22 = vpack.c.bf16 %v1709_v14, %v1708_v13 }
 0x1e5   : > { %v1582_v23 = vmul.f32 1.6732632, %v6040_v15  ;;  %v6041_v21 = vadd.f32 -1.0, %v7073_v16  ;;  %v1216_v25 = vpop.f32.mrb[94].mxu0 }
 0x1e6   : > { %v1440_v24 = vmul.f32 1.442695, %v1214_v19  ;;  %v1217_v26 = vadd.f32 %v8142_v17, %v1216_v25  ;;  %v1218_v27 = vpop.f32.mrb[95].mxu0  ;;  %6569 = vmatprep.mubr.bf16.mxu1 %v1752_v22  ;;  %vm1330_vm14 = vcmp.gt.f32.partialorder %v1214_v19, 0.0 }
 0x1e7   : > { %v1646_v28 = vsel %vm1326_vm10, %v1198_v44, %v1582_v23  ;;  %v1583_v29 = vmul.f32 1.6732632, %v6041_v21 }
 0x1e8   : > { %7078 = vpow2.f32 %v1440_v24  ;;  %v1442_v30 = vmul.f32 1.442695, %v1217_v26  ;;  %v1710_v33 = vmul.f32 1.050701, %v1646_v28  ;;  %vm1331_vm15 = vcmp.gt.f32.partialorder %v1217_v26, 0.0 }
 0x1e9   : > { %v1647_v32 = vsel %vm1327_vm11, %v1201_v50, %v1583_v29 }
 0x1ea   : > { %v7075_v31 = vpop.eup %7074  ;;  %v1711_v34 = vmul.f32 1.050701, %v1647_v32  ;;  %7080 = vpow2.f32 %v1442_v30 }
 0x1eb   : > { %v6042_v35 = vadd.f32 -1.0, %v7075_v31  ;;  %v1221_v36 = vpop.f32.mrb[96].mxu0 }
 0x1ec   : > { %v7077_v37 = vpop.eup %7076  ;;  %v1222_v38 = vadd.f32 %v8142_v17, %v1221_v36  ;;  %v1223_v39 = vpop.f32.mrb[97].mxu0  ;;  %v1753_v40 = vpack.c.bf16 %v1711_v34, %v1710_v33 }
 0x1ed   : > { %v1584_v43 = vmul.f32 1.6732632, %v6042_v35  ;;  %v6043_v41 = vadd.f32 -1.0, %v7077_v37  ;;  %v1224_v45 = vpop.f32.mrb[98].mxu0 }
 0x1ee   : > { %v1444_v44 = vmul.f32 1.442695, %v1222_v38  ;;  %v1225_v42 = vadd.f32 %v8142_v17, %v1224_v45  ;;  %v1226_v46 = vpop.f32.mrb[99].mxu0  ;;  %6570 = vmatmul.mubr.bf16.gmra.mrb[40].mxu1 %v1753_v40  ;;  %vm1332_vm0 = vcmp.gt.f32.partialorder %v1222_v38, 0.0 }
 0x1ef   : > { %v1648_v47 = vsel %vm1328_vm12, %v1206_v63, %v1584_v43  ;;  %v1585_v48 = vmul.f32 1.6732632, %v6043_v41 }
 0x1f0   : > { %7082 = vpow2.f32 %v1444_v44  ;;  %v1446_v49 = vmul.f32 1.442695, %v1225_v42  ;;  %v1712_v52 = vmul.f32 1.050701, %v1648_v47  ;;  %vm1333_vm1 = vcmp.gt.f32.partialorder %v1225_v42, 0.0 }
 0x1f1   : > { %v1649_v50 = vsel %vm1329_vm13, %v1209_v6, %v1585_v48 }
 0x1f2   : > { %v7079_v51 = vpop.eup %7078  ;;  %v1713_v53 = vmul.f32 1.050701, %v1649_v50  ;;  %7084 = vpow2.f32 %v1446_v49 }
 0x1f3   : > { %v6044_v54 = vadd.f32 -1.0, %v7079_v51  ;;  %v1229_v55 = vpop.f32.mrb[100].mxu0 }
 0x1f4   : > { %v7081_v56 = vpop.eup %7080  ;;  %v1230_v57 = vadd.f32 %v8142_v17, %v1229_v55  ;;  %v1231_v58 = vpop.f32.mrb[101].mxu0  ;;  %v1754_v59 = vpack.c.bf16 %v1713_v53, %v1712_v52 }
 0x1f5   : > { %v1586_v61 = vmul.f32 1.6732632, %v6044_v54  ;;  %v6045_v60 = vadd.f32 -1.0, %v7081_v56  ;;  %v1232_v0 = vpop.f32.mrb[102].mxu0 }
 0x1f6   : > { %v1448_v63 = vmul.f32 1.442695, %v1230_v57  ;;  %v1233_v2 = vadd.f32 %v8142_v17, %v1232_v0  ;;  %v1234_v3 = vpop.f32.mrb[103].mxu0  ;;  %6573 = vmatprep.mubr.bf16.mxu1 %v1754_v59  ;;  %vm1334_vm2 = vcmp.gt.f32.partialorder %v1230_v57, 0.0 }
 0x1f7   : > { %v1650_v4 = vsel %vm1330_vm14, %v1214_v19, %v1586_v61  ;;  %v1587_v5 = vmul.f32 1.6732632, %v6045_v60 }
 0x1f8   : > { %7086 = vpow2.f32 %v1448_v63  ;;  %v1450_v62 = vmul.f32 1.442695, %v1233_v2  ;;  %v1714_v8 = vmul.f32 1.050701, %v1650_v4  ;;  %vm1335_vm3 = vcmp.gt.f32.partialorder %v1233_v2, 0.0 }
 0x1f9   : > { %v1651_v6 = vsel %vm1331_vm15, %v1217_v26, %v1587_v5 }
 0x1fa   : > { %v7083_v7 = vpop.eup %7082  ;;  %v1715_v9 = vmul.f32 1.050701, %v1651_v6  ;;  %7088 = vpow2.f32 %v1450_v62 }
 0x1fb   : > { %v6046_v10 = vadd.f32 -1.0, %v7083_v7  ;;  %v1237_v11 = vpop.f32.mrb[104].mxu0 }
 0x1fc   : > { %v7085_v12 = vpop.eup %7084  ;;  %v1238_v13 = vadd.f32 %v8142_v17, %v1237_v11  ;;  %v1239_v14 = vpop.f32.mrb[105].mxu0  ;;  %v1755_v15 = vpack.c.bf16 %v1715_v9, %v1714_v8 }
 0x1fd   : > { %v1588_v18 = vmul.f32 1.6732632, %v6046_v10  ;;  %v6047_v16 = vadd.f32 -1.0, %v7085_v12  ;;  %v1240_v20 = vpop.f32.mrb[106].mxu0 }
 0x1fe   : > { %v1452_v19 = vmul.f32 1.442695, %v1238_v13  ;;  %v1241_v22 = vadd.f32 %v8142_v17, %v1240_v20  ;;  %v1242_v23 = vpop.f32.mrb[107].mxu0  ;;  %6574 = vmatmul.mubr.bf16.gmra.mrb[44].mxu1 %v1755_v15  ;;  %vm1336_vm4 = vcmp.gt.f32.partialorder %v1238_v13, 0.0 }
 0x1ff   : > { %v1652_v21 = vsel %vm1332_vm0, %v1222_v38, %v1588_v18  ;;  %v1589_v25 = vmul.f32 1.6732632, %v6047_v16 }
 0x200   : > { %7090 = vpow2.f32 %v1452_v19  ;;  %v1454_v24 = vmul.f32 1.442695, %v1241_v22  ;;  %v1716_v28 = vmul.f32 1.050701, %v1652_v21  ;;  %vm1337_vm5 = vcmp.gt.f32.partialorder %v1241_v22, 0.0 }
 0x201   : > { %v1653_v26 = vsel %vm1333_vm1, %v1225_v42, %v1589_v25 }
 0x202   : > { %v7087_v27 = vpop.eup %7086  ;;  %v1717_v29 = vmul.f32 1.050701, %v1653_v26  ;;  %7092 = vpow2.f32 %v1454_v24 }
 0x203   : > { %v6048_v30 = vadd.f32 -1.0, %v7087_v27  ;;  %v1245_v32 = vpop.f32.mrb[108].mxu0 }
 0x204   : > { %v7089_v31 = vpop.eup %7088  ;;  %v1246_v33 = vadd.f32 %v8142_v17, %v1245_v32  ;;  %v1247_v34 = vpop.f32.mrb[109].mxu0  ;;  %v1756_v35 = vpack.c.bf16 %v1717_v29, %v1716_v28 }
 0x205   : > { %v1590_v36 = vmul.f32 1.6732632, %v6048_v30  ;;  %v6049_v37 = vadd.f32 -1.0, %v7089_v31  ;;  %v1248_v39 = vpop.f32.mrb[110].mxu0 }
 0x206   : > { %v1456_v38 = vmul.f32 1.442695, %v1246_v33  ;;  %v1249_v40 = vadd.f32 %v8142_v17, %v1248_v39  ;;  %v1250_v43 = vpop.f32.mrb[111].mxu0  ;;  %6577 = vmatprep.mubr.bf16.mxu1 %v1756_v35  ;;  %vm1338_vm6 = vcmp.gt.f32.partialorder %v1246_v33, 0.0  ;;  %v8183_v39 = vld [vmem:[%s10218_s4] ss:$0 sm:$0xff] }
 0x207   : > { %v1654_v41 = vsel %vm1334_vm2, %v1230_v57, %v1590_v36  ;;  %v1591_v45 = vmul.f32 1.6732632, %v6049_v37 }
 0x208   : > { %7094 = vpow2.f32 %v1456_v38  ;;  %v1458_v44 = vmul.f32 1.442695, %v1249_v40  ;;  %v1718_v47 = vmul.f32 1.050701, %v1654_v41  ;;  %vm1339_vm7 = vcmp.gt.f32.partialorder %v1249_v40, 0.0 }
 0x209   : > { %v1655_v42 = vsel %vm1335_vm3, %v1233_v2, %v1591_v45 }
 0x20a   : > { %v7091_v46 = vpop.eup %7090  ;;  %v1719_v48 = vmul.f32 1.050701, %v1655_v42  ;;  %7096 = vpow2.f32 %v1458_v44 }
 0x20b   : > { %v6050_v49 = vadd.f32 -1.0, %v7091_v46  ;;  %v1253_v50 = vpop.f32.mrb[112].mxu0 }
 0x20c   : > { %v7093_v51 = vpop.eup %7092  ;;  %v8161_v52 = vadd.f32 %v8142_v17, %v1253_v50  ;;  %v1255_v53 = vpop.f32.mrb[113].mxu0  ;;  %v1757_v54 = vpack.c.bf16 %v1719_v48, %v1718_v47 }
 0x20d   : > { %v1592_v55 = vmul.f32 1.6732632, %v6050_v49  ;;  %v6051_v56 = vadd.f32 -1.0, %v7093_v51  ;;  %v1256_v57 = vpop.f32.mrb[114].mxu0 }
 0x20e   : > { %v1460_v58 = vmul.f32 1.442695, %v8161_v52  ;;  %v1257_v59 = vadd.f32 %v8142_v17, %v1256_v57  ;;  %v1258_v61 = vpop.f32.mrb[115].mxu0  ;;  %6578 = vmatmul.mubr.bf16.gmra.mrb[48].mxu1 %v1757_v54  ;;  %vm1340_vm9 = vcmp.gt.f32.partialorder %v8161_v52, 0.0 }
 0x20f   : > { %v1656_v60 = vsel %vm1336_vm4, %v1238_v13, %v1592_v55  ;;  %v1593_v0 = vmul.f32 1.6732632, %v6051_v56 }
 0x210   : > { %7098 = vpow2.f32 %v1460_v58  ;;  %v1462_v63 = vmul.f32 1.442695, %v1257_v59  ;;  %v1720_v4 = vmul.f32 1.050701, %v1656_v60  ;;  %vm1341_vm8 = vcmp.gt.f32.partialorder %v1257_v59, 0.0 }
 0x211   : > { %v1657_v2 = vsel %vm1337_vm5, %v1241_v22, %v1593_v0 }
 0x212   : > { %v7095_v3 = vpop.eup %7094  ;;  %v1721_v5 = vmul.f32 1.050701, %v1657_v2  ;;  %7100 = vpow2.f32 %v1462_v63 }
 0x213   : > { %v6052_v62 = vadd.f32 -1.0, %v7095_v3  ;;  %v1261_v6 = vpop.f32.mrb[116].mxu0 }
 0x214   : > { %v7097_v7 = vpop.eup %7096  ;;  %v8166_v8 = vadd.f32 %v8142_v17, %v1261_v6  ;;  %v1263_v9 = vpop.f32.mrb[117].mxu0  ;;  %v1758_v10 = vpack.c.bf16 %v1721_v5, %v1720_v4 }
 0x215   : > { %v1594_v11 = vmul.f32 1.6732632, %v6052_v62  ;;  %v6053_v12 = vadd.f32 -1.0, %v7097_v7  ;;  %v1264_v13 = vpop.f32.mrb[118].mxu0 }
 0x216   : > { %v1464_v14 = vmul.f32 1.442695, %v8166_v8  ;;  %v8170_v15 = vadd.f32 %v8142_v17, %v1264_v13  ;;  %v1266_v18 = vpop.f32.mrb[119].mxu0  ;;  %6581 = vmatprep.mubr.bf16.mxu1 %v1758_v10  ;;  %vm1342_vm10 = vcmp.gt.f32.partialorder %v8166_v8, 0.0 }
 0x217   : > { %v1658_v16 = vsel %vm1338_vm6, %v1246_v33, %v1594_v11  ;;  %v1595_v20 = vmul.f32 1.6732632, %v6053_v12 }
 0x218   : > { %7102 = vpow2.f32 %v1464_v14  ;;  %v1466_v19 = vmul.f32 1.442695, %v8170_v15  ;;  %v1722_v21 = vmul.f32 1.050701, %v1658_v16  ;;  %vm1343_vm11 = vcmp.gt.f32.partialorder %v8170_v15, 0.0 }
 0x219   : > { %v1659_v22 = vsel %vm1339_vm7, %v1249_v40, %v1595_v20 }
 0x21a   : > { %v7099_v23 = vpop.eup %7098  ;;  %v1723_v25 = vmul.f32 1.050701, %v1659_v22  ;;  %7104 = vpow2.f32 %v1466_v19 }
 0x21b   : > { %v6054_v24 = vadd.f32 -1.0, %v7099_v23  ;;  %v1269_v26 = vpop.f32.mrb[120].mxu0 }
 0x21c   : > { %v7101_v27 = vpop.eup %7100  ;;  %v8174_v28 = vadd.f32 %v8142_v17, %v1269_v26  ;;  %v1271_v29 = vpop.f32.mrb[121].mxu0  ;;  %v1759_v30 = vpack.c.bf16 %v1723_v25, %v1722_v21 }
 0x21d   : > { %v6055_v32 = vadd.f32 -1.0, %v7101_v27  ;;  %v1272_v31 = vpop.f32.mrb[122].mxu0  ;;  %v1596_v36 = vmul.f32 1.6732632, %v6054_v24 }
 0x21e   : > { %v1468_v33 = vmul.f32 1.442695, %v8174_v28  ;;  %v8178_v34 = vadd.f32 %v8142_v17, %v1272_v31  ;;  %v1274_v35 = vpop.f32.mrb[123].mxu0  ;;  %6582 = vmatmul.mubr.bf16.gmra.mrb[52].mxu1 %v1759_v30  ;;  %vm1344_vm13 = vcmp.gt.f32.partialorder %v8174_v28, 0.0 }
 0x21f   : > { %v1597_v37 = vmul.f32 1.6732632, %v6055_v32  ;;  %v1660_v42 = vsel %vm1340_vm9, %v8161_v52, %v1596_v36 }
 0x220   : > { %7106 = vpow2.f32 %v1468_v33  ;;  %v1470_v38 = vmul.f32 1.442695, %v8178_v34  ;;  %v1724_v61 = vmul.f32 1.050701, %v1660_v42  ;;  %vm1345_vm12 = vcmp.gt.f32.partialorder %v8178_v34, 0.0 }
 0x221   : > { %v1661_v40 = vsel %vm1341_vm8, %v1257_v59, %v1597_v37  ;;  %v6531_v43 = vpop.f32.mrb[0].mxu1 }
 0x222   : > { %v7103_v41 = vpop.eup %7102  ;;  %7108 = vpow2.f32 %v1470_v38  ;;  %v8188_v45 = vadd.f32 %v6531_v43, %v8183_v39  ;;  %v1869_v44 = vpop.f32.mrb[1].mxu1  ;;  %v1725_v51 = vmul.f32 1.050701, %v1661_v40 }
 0x223   : > { %v6056_v46 = vadd.f32 -1.0, %v7103_v41  ;;  %v8192_v47 = vadd.f32 %v8183_v39, %v1869_v44  ;;  %v1277_v48 = vpop.f32.mrb[124].mxu0  ;;  %v6532_v49 = vpop.f32.mrb[2].mxu1 }
 0x224   : > { %v7105_v50 = vpop.eup %7104  ;;  %v2192_v53 = vmul.f32 1.442695, %v8188_v45  ;;  %v8196_v54 = vadd.f32 %v8142_v17, %v1277_v48  ;;  %v8199_v55 = vadd.f32 %v6532_v49, %v8183_v39  ;;  %v1279_v56 = vpop.f32.mrb[125].mxu0  ;;  %v1760_v7 = vpack.c.bf16 %v1725_v51, %v1724_v61 }
 0x225   : > { %v1872_v57 = vpop.f32.mrb[3].mxu1  ;;  %v1598_v58 = vmul.f32 1.6732632, %v6056_v46  ;;  %v6057_v52 = vadd.f32 -1.0, %v7105_v50  ;;  %v2188_v59 = vmul.f32 1.442695, %v8192_v47 }
 0x226   : > { %7110 = vpow2.f32 %v2192_v53  ;;  %v1472_v60 = vmul.f32 1.442695, %v8196_v54  ;;  %v1280_v0 = vpop.f32.mrb[126].mxu0  ;;  %v2194_v3 = vmul.f32 1.442695, %v8199_v55  ;;  %v8208_v5 = vadd.f32 %v8183_v39, %v1872_v57  ;;  %6585 = vmatprep.mubr.bf16.mxu1 %v1760_v7 }
 0x227   : > { %v1662_v63 = vsel %vm1342_vm10, %v8166_v8, %v1598_v58  ;;  %v1599_v2 = vmul.f32 1.6732632, %v6057_v52  ;;  %7112 = vpow2.f32 %v2188_v59  ;;  %v1282_v4 = vpop.f32.mrb[127].mxu0  ;;  %v8211_v62 = vadd.f32 %v8142_v17, %v1280_v0 }
 0x228   : > { %7114 = vpow2.f32 %v1472_v60  ;;  %v1726_v8 = vmul.f32 1.050701, %v1662_v63  ;;  %v2190_v11 = vmul.f32 1.442695, %v8208_v5  ;;  %vm2126_vm14 = vcmp.gt.f32.partialorder %v8188_v45, 0.0 }
 0x229   : > { %v1663_v6 = vsel %vm1343_vm11, %v8170_v15, %v1599_v2  ;;  %7116 = vpow2.f32 %v2194_v3  ;;  %v1474_v13 = vmul.f32 1.442695, %v8211_v62  ;;  %vm2127_vm15 = vcmp.gt.f32.partialorder %v8199_v55, 0.0 }
 0x22a   : > { %v7107_v9 = vpop.eup %7106  ;;  %v1727_v10 = vmul.f32 1.050701, %v1663_v6  ;;  %7118 = vpow2.f32 %v2190_v11  ;;  %vm1346_vm0 = vcmp.gt.f32.partialorder %v8196_v54, 0.0  ;;  %vm2124_vm1 = vcmp.gt.f32.partialorder %v8192_v47, 0.0 }
 0x22b   : > { %v6058_v12 = vadd.f32 -1.0, %v7107_v9  ;;  %7120 = vpow2.f32 %v1474_v13  ;;  %vm1347_vm2 = vcmp.gt.f32.partialorder %v8211_v62, 0.0  ;;  %vm2125_vm3 = vcmp.gt.f32.partialorder %v8208_v5, 0.0 }
 0x22c   : > { %v7109_v14 = vpop.eup %7108  ;;  %v1761_v18 = vpack.c.bf16 %v1727_v10, %v1726_v8 }
 0x22d   : > { %v6059_v16 = vadd.f32 -1.0, %v7109_v14  ;;  %v1600_v17 = vmul.f32 1.6732632, %v6058_v12 }
 0x22e   : > { %6586 = vmatmul.mubr.bf16.gmra.mrb[56].mxu1 %v1761_v18 }
 0x22f   : > { %v1601_v20 = vmul.f32 1.6732632, %v6059_v16  ;;  %v1664_v24 = vsel %vm1344_vm13, %v8174_v28, %v1600_v17 }
 0x230   : > { %v7111_v15 = vpop.eup %7110  ;;  %v1728_v28 = vmul.f32 1.050701, %v1664_v24 }
 0x231   : > { %v7113_v19 = vpop.eup %7112  ;;  %v1665_v22 = vsel %vm1345_vm12, %v8178_v34, %v1601_v20  ;;  %v6073_v23 = vadd.f32 -1.0, %v7111_v15  ;;  %v6535_v21 = vpop.f32.mrb[4].mxu1 }
 0x232   : > { %v7115_v25 = vpop.eup %7114  ;;  %v8221_v26 = vadd.f32 %v6535_v21, %v8183_v39  ;;  %v1885_v27 = vpop.f32.mrb[5].mxu1  ;;  %v1729_v35 = vmul.f32 1.050701, %v1665_v22  ;;  %v6071_v43 = vadd.f32 -1.0, %v7113_v19 }
 0x233   : > { %v7117_v29 = vpop.eup %7116  ;;  %v2382_v30 = vmul.f32 1.6732632, %v6073_v23  ;;  %v6060_v32 = vadd.f32 -1.0, %v7115_v25  ;;  %v8224_v31 = vadd.f32 %v8183_v39, %v1885_v27  ;;  %v6536_v33 = vpop.f32.mrb[6].mxu1 }
 0x234   : > { %v6074_v36 = vadd.f32 -1.0, %v7117_v29  ;;  %v2200_v34 = vmul.f32 1.442695, %v8221_v26  ;;  %v8228_v37 = vadd.f32 %v6536_v33, %v8183_v39  ;;  %v1888_v38 = vpop.f32.mrb[7].mxu1  ;;  %v7119_v41 = vpop.eup %7118  ;;  %v1762_v56 = vpack.c.bf16 %v1729_v35, %v1728_v28 }
 0x235   : > { %v2196_v40 = vmul.f32 1.442695, %v8224_v31  ;;  %v2446_v44 = vsel %vm2126_vm14, %v8188_v45, %v2382_v30  ;;  %v1602_v42 = vmul.f32 1.6732632, %v6060_v32  ;;  %v7121_v48 = vpop.eup %7120  ;;  %v8236_v50 = vadd.f32 %v8183_v39, %v1888_v38 }
 0x236   : > { %v2383_v46 = vmul.f32 1.6732632, %v6074_v36  ;;  %7122 = vpow2.f32 %v2200_v34  ;;  %v2202_v49 = vmul.f32 1.442695, %v8228_v37  ;;  %v6061_v53 = vadd.f32 -1.0, %v7121_v48  ;;  %6589 = vmatprep.mubr.bf16.mxu1 %v1762_v56 }
 0x237   : > { %7124 = vpow2.f32 %v2196_v40  ;;  %v2510_v57 = vmul.f32 1.050701, %v2446_v44  ;;  %v2198_v58 = vmul.f32 1.442695, %v8236_v50  ;;  %v1666_v52 = vsel %vm1346_vm0, %v8196_v54, %v1602_v42 }
 0x238   : > { %v2447_v51 = vsel %vm2127_vm15, %v8199_v55, %v2383_v46  ;;  %7126 = vpow2.f32 %v2202_v49  ;;  %v1603_v59 = vmul.f32 1.6732632, %v6061_v53  ;;  %v6072_v61 = vadd.f32 -1.0, %v7119_v41 }
 0x239   : > { %v2511_v45 = vmul.f32 1.050701, %v2447_v51  ;;  %v2380_v60 = vmul.f32 1.6732632, %v6071_v43  ;;  %7128 = vpow2.f32 %v2198_v58  ;;  %v1730_v3 = vmul.f32 1.050701, %v1666_v52 }
 0x23a   : > { %v1667_v55 = vsel %vm1347_vm2, %v8211_v62, %v1603_v59  ;;  %v2381_v63 = vmul.f32 1.6732632, %v6072_v61  ;;  %vm2128_vm4 = vcmp.gt.f32.partialorder %v8224_v31, 0.0  ;;  %vm2130_vm5 = vcmp.gt.f32.partialorder %v8221_v26, 0.0 }
 0x23b   : > { %v2573_v0 = vpack.c.bf16 %v2511_v45, %v2510_v57  ;;  %v2444_v2 = vsel %vm2124_vm1, %v8192_v47, %v2380_v60  ;;  %v1731_v4 = vmul.f32 1.050701, %v1667_v55  ;;  %vm2131_vm6 = vcmp.gt.f32.partialorder %v8228_v37, 0.0 }
 0x23c   : > { %v2445_v54 = vsel %vm2125_vm3, %v8208_v5, %v2381_v63  ;;  %v2508_v7 = vmul.f32 1.050701, %v2444_v2  ;;  %vm2129_vm7 = vcmp.gt.f32.partialorder %v8236_v50, 0.0 }
 0x23d   : > { %v1763_v6 = vpack.c.bf16 %v1731_v4, %v1730_v3  ;;  %v2509_v9 = vmul.f32 1.050701, %v2445_v54 }
 0x23f   : > { %6590 = vmatmul.mubr.bf16.gmra.mrb[60].mxu1 %v1763_v6  ;;  %v2572_v11 = vpack.c.bf16 %v2509_v9, %v2508_v7 }
 0x240   : > { %v7123_v8 = vpop.eup %7122 }
 0x241   : > { %v7125_v10 = vpop.eup %7124  ;;  %v6539_v12 = vpop.f32.mrb[8].mxu1  ;;  %v6077_v13 = vadd.f32 -1.0, %v7123_v8  ;;  %6609 = vmatprep.mubr.bf16.mxu1 %v2572_v11 }
 0x242   : > { %v8249_v62 = vadd.f32 %v6539_v12, %v8183_v39  ;;  %v1901_v14 = vpop.f32.mrb[9].mxu1  ;;  %v6075_v47 = vadd.f32 -1.0, %v7125_v10  ;;  %v7127_v18 = vpop.eup %7126 }
 0x243   : > { %v8252_v16 = vadd.f32 %v8183_v39, %v1901_v14  ;;  %v6540_v5 = vpop.f32.mrb[10].mxu1  ;;  %v7129_v22 = vpop.eup %7128  ;;  %v6078_v25 = vadd.f32 -1.0, %v7127_v18  ;;  %v2386_v24 = vmul.f32 1.6732632, %v6077_v13 }
 0x244   : > { %v2208_v17 = vmul.f32 1.442695, %v8249_v62  ;;  %v8256_v20 = vadd.f32 %v6540_v5, %v8183_v39  ;;  %v1904_v15 = vpop.f32.mrb[11].mxu1  ;;  %v2384_v19 = vmul.f32 1.6732632, %v6075_v47  ;;  %v6076_v29 = vadd.f32 -1.0, %v7129_v22 }
 0x245   : > { %v2204_v23 = vmul.f32 1.442695, %v8252_v16  ;;  %v1905_v21 = vadd.f32 %v8183_v39, %v1904_v15  ;;  %v2387_v35 = vmul.f32 1.6732632, %v6078_v25  ;;  %v2450_v36 = vsel %vm2130_vm5, %v8221_v26, %v2386_v24 }
 0x246   : > { %7130 = vpow2.f32 %v2208_v17  ;;  %v2210_v27 = vmul.f32 1.442695, %v8256_v20  ;;  %v2448_v32 = vsel %vm2128_vm4, %v8224_v31, %v2384_v19  ;;  %v2385_v33 = vmul.f32 1.6732632, %v6076_v29 }
 0x247   : > { %7132 = vpow2.f32 %v2204_v23  ;;  %v2206_v30 = vmul.f32 1.442695, %v1905_v21  ;;  %6610 = vmatmul.mubr.bf16.vlgmr.msra.gmra.mrb[64].mxu1 %v2573_v0  ;;  %v2512_v38 = vmul.f32 1.050701, %v2448_v32  ;;  %v2451_v28 = vsel %vm2131_vm6, %v8228_v37, %v2387_v35 }
 0x248   : > { %7134 = vpow2.f32 %v2210_v27  ;;  %v2449_v34 = vsel %vm2129_vm7, %v8236_v50, %v2385_v33  ;;  %v2514_v31 = vmul.f32 1.050701, %v2450_v36  ;;  %v2515_v43 = vmul.f32 1.050701, %v2451_v28 }
 0x249   : > { %7136 = vpow2.f32 %v2206_v30  ;;  %v2513_v40 = vmul.f32 1.050701, %v2449_v34  ;;  %vm2134_vm8 = vcmp.gt.f32.partialorder %v8249_v62, 0.0  ;;  %vm2132_vm9 = vcmp.gt.f32.partialorder %v8252_v16, 0.0 }
 0x24a   : > { %v2575_v44 = vpack.c.bf16 %v2515_v43, %v2514_v31  ;;  %vm2133_vm10 = vcmp.gt.f32.partialorder %v1905_v21, 0.0  ;;  %vm2135_vm11 = vcmp.gt.f32.partialorder %v8256_v20, 0.0 }
 0x24b   : > { %v2574_v41 = vpack.c.bf16 %v2513_v40, %v2512_v38 }
 0x24d   : > { %6613 = vmatprep.mubr.bf16.mxu1 %v2574_v41 }
 0x24f   : > { %6614 = vmatmul.mubr.bf16.gmra.mrb[68].mxu1 %v2575_v44 }
 0x250   : > { %v7131_v42 = vpop.eup %7130 }
 0x251   : > { %v7133_v46 = vpop.eup %7132  ;;  %v6543_v48 = vpop.f32.mrb[12].mxu1  ;;  %v6081_v49 = vadd.f32 -1.0, %v7131_v42 }
 0x252   : > { %v7135_v51 = vpop.eup %7134  ;;  %v8270_v53 = vadd.f32 %v6543_v48, %v8183_v39  ;;  %v1917_v26 = vpop.f32.mrb[13].mxu1  ;;  %v6079_v50 = vadd.f32 -1.0, %v7133_v46 }
 0x253   : > { %v7137_v56 = vpop.eup %7136  ;;  %v8274_v37 = vadd.f32 %v8183_v39, %v1917_v26  ;;  %v6544_v57 = vpop.f32.mrb[14].mxu1  ;;  %v6082_v61 = vadd.f32 -1.0, %v7135_v51  ;;  %v2390_v63 = vmul.f32 1.6732632, %v6081_v49 }
 0x254   : > { %v2216_v45 = vmul.f32 1.442695, %v8270_v53  ;;  %v8278_v58 = vadd.f32 %v6544_v57, %v8183_v39  ;;  %v1920_v52 = vpop.f32.mrb[15].mxu1  ;;  %v6080_v59 = vadd.f32 -1.0, %v7137_v56  ;;  %v2388_v55 = vmul.f32 1.6732632, %v6079_v50 }
 0x255   : > { %v2212_v60 = vmul.f32 1.442695, %v8274_v37  ;;  %v1921_v0 = vadd.f32 %v8183_v39, %v1920_v52  ;;  %v2391_v7 = vmul.f32 1.6732632, %v6082_v61  ;;  %v2454_v10 = vsel %vm2134_vm8, %v8249_v62, %v2390_v63 }
 0x256   : > { %7138 = vpow2.f32 %v2216_v45  ;;  %v2218_v2 = vmul.f32 1.442695, %v8278_v58  ;;  %v2389_v3 = vmul.f32 1.6732632, %v6080_v59  ;;  %v2452_v54 = vsel %vm2132_vm9, %v8252_v16, %v2388_v55 }
 0x257   : > { %7140 = vpow2.f32 %v2212_v60  ;;  %v2214_v4 = vmul.f32 1.442695, %v1921_v0  ;;  %v2516_v9 = vmul.f32 1.050701, %v2452_v54  ;;  %v2455_v11 = vsel %vm2135_vm11, %v8256_v20, %v2391_v7 }
 0x258   : > { %7142 = vpow2.f32 %v2218_v2  ;;  %v2453_v6 = vsel %vm2133_vm10, %v1905_v21, %v2389_v3  ;;  %v2518_v13 = vmul.f32 1.050701, %v2454_v10  ;;  %v2519_v14 = vmul.f32 1.050701, %v2455_v11 }
 0x259   : > { %7144 = vpow2.f32 %v2214_v4  ;;  %v2517_v8 = vmul.f32 1.050701, %v2453_v6  ;;  %vm2138_vm12 = vcmp.gt.f32.partialorder %v8270_v53, 0.0  ;;  %vm2136_vm13 = vcmp.gt.f32.partialorder %v8274_v37, 0.0 }
 0x25a   : > { %v2577_v47 = vpack.c.bf16 %v2519_v14, %v2518_v13  ;;  %vm2137_vm14 = vcmp.gt.f32.partialorder %v1921_v0, 0.0  ;;  %vm2139_vm15 = vcmp.gt.f32.partialorder %v8278_v58, 0.0 }
 0x25b   : > { %v2576_v12 = vpack.c.bf16 %v2517_v8, %v2516_v9 }
 0x25d   : > { %6617 = vmatprep.mubr.bf16.mxu1 %v2576_v12 }
 0x25e   : > { %6618 = vmatmul.mubr.bf16.gmra.mrb[72].mxu1 %v2577_v47 }
 0x260   : > { %v7139_v18 = vpop.eup %7138 }
 0x261   : > { %v7141_v16 = vpop.eup %7140  ;;  %v6547_v5 = vpop.f32.mrb[16].mxu1  ;;  %v6085_v17 = vadd.f32 -1.0, %v7139_v18 }
 0x262   : > { %v7143_v15 = vpop.eup %7142  ;;  %v8291_v19 = vadd.f32 %v6547_v5, %v8183_v39  ;;  %v1933_v22 = vpop.f32.mrb[17].mxu1  ;;  %v6083_v23 = vadd.f32 -1.0, %v7141_v16 }
 0x263   : > { %v7145_v21 = vpop.eup %7144  ;;  %v8295_v62 = vadd.f32 %v8183_v39, %v1933_v22  ;;  %v6548_v20 = vpop.f32.mrb[18].mxu1  ;;  %v6086_v30 = vadd.f32 -1.0, %v7143_v15  ;;  %v2394_v36 = vmul.f32 1.6732632, %v6085_v17 }
 0x264   : > { %v2224_v25 = vmul.f32 1.442695, %v8291_v19  ;;  %v8299_v24 = vadd.f32 %v6548_v20, %v8183_v39  ;;  %v1936_v27 = vpop.f32.mrb[19].mxu1  ;;  %v6084_v29 = vadd.f32 -1.0, %v7145_v21  ;;  %v2392_v35 = vmul.f32 1.6732632, %v6083_v23 }
 0x265   : > { %v2220_v32 = vmul.f32 1.442695, %v8295_v62  ;;  %v1937_v33 = vadd.f32 %v8183_v39, %v1936_v27  ;;  %v2395_v43 = vmul.f32 1.6732632, %v6086_v30  ;;  %v2458_v42 = vsel %vm2138_vm12, %v8270_v53, %v2394_v36 }
 0x266   : > { %7146 = vpow2.f32 %v2224_v25  ;;  %v2226_v34 = vmul.f32 1.442695, %v8299_v24  ;;  %v2393_v38 = vmul.f32 1.6732632, %v6084_v29  ;;  %v2456_v40 = vsel %vm2136_vm13, %v8274_v37, %v2392_v35 }
 0x267   : > { %7148 = vpow2.f32 %v2220_v32  ;;  %v2222_v28 = vmul.f32 1.442695, %v1937_v33  ;;  %v2520_v41 = vmul.f32 1.050701, %v2456_v40  ;;  %v2459_v46 = vsel %vm2139_vm15, %v8278_v58, %v2395_v43 }
 0x268   : > { %7150 = vpow2.f32 %v2226_v34  ;;  %v2457_v31 = vsel %vm2137_vm14, %v1921_v0, %v2393_v38  ;;  %v2522_v49 = vmul.f32 1.050701, %v2458_v42  ;;  %v2523_v51 = vmul.f32 1.050701, %v2459_v46 }
 0x269   : > { %7152 = vpow2.f32 %v2222_v28  ;;  %v2521_v44 = vmul.f32 1.050701, %v2457_v31  ;;  %vm2142_vm0 = vcmp.gt.f32.partialorder %v8291_v19, 0.0  ;;  %vm2140_vm1 = vcmp.gt.f32.partialorder %v8295_v62, 0.0 }
 0x26a   : > { %v2579_v26 = vpack.c.bf16 %v2523_v51, %v2522_v49  ;;  %vm2141_vm2 = vcmp.gt.f32.partialorder %v1937_v33, 0.0  ;;  %vm2143_vm3 = vcmp.gt.f32.partialorder %v8299_v24, 0.0 }
 0x26b   : > { %v2578_v48 = vpack.c.bf16 %v2521_v44, %v2520_v41 }
 0x26d   : > { %6621 = vmatprep.mubr.bf16.mxu1 %v2578_v48 }
 0x26e   : > { %6622 = vmatmul.mubr.bf16.gmra.mrb[76].mxu1 %v2579_v26 }
 0x270   : > { %v7147_v50 = vpop.eup %7146 }
 0x271   : > { %v7149_v56 = vpop.eup %7148  ;;  %v6551_v37 = vpop.f32.mrb[20].mxu1  ;;  %v6089_v57 = vadd.f32 -1.0, %v7147_v50 }
 0x272   : > { %v7151_v45 = vpop.eup %7150  ;;  %v8312_v52 = vadd.f32 %v6551_v37, %v8183_v39  ;;  %v1949_v59 = vpop.f32.mrb[21].mxu1  ;;  %v6087_v61 = vadd.f32 -1.0, %v7149_v56 }
 0x273   : > { %v7153_v60 = vpop.eup %7152  ;;  %v8316_v53 = vadd.f32 %v8183_v39, %v1949_v59  ;;  %v6552_v58 = vpop.f32.mrb[22].mxu1  ;;  %v6090_v3 = vadd.f32 -1.0, %v7151_v45  ;;  %v2398_v7 = vmul.f32 1.6732632, %v6089_v57 }
 0x274   : > { %v2232_v0 = vmul.f32 1.442695, %v8312_v52  ;;  %v8320_v55 = vadd.f32 %v6552_v58, %v8183_v39  ;;  %v1952_v63 = vpop.f32.mrb[23].mxu1  ;;  %v6088_v2 = vadd.f32 -1.0, %v7153_v60  ;;  %v2396_v6 = vmul.f32 1.6732632, %v6087_v61 }
 0x275   : > { %v2228_v4 = vmul.f32 1.442695, %v8316_v53  ;;  %v1953_v54 = vadd.f32 %v8183_v39, %v1952_v63  ;;  %v2399_v13 = vmul.f32 1.6732632, %v6090_v3  ;;  %v2462_v18 = vsel %vm2142_vm0, %v8291_v19, %v2398_v7 }
 0x276   : > { %7154 = vpow2.f32 %v2232_v0  ;;  %v2234_v9 = vmul.f32 1.442695, %v8320_v55  ;;  %v2397_v8 = vmul.f32 1.6732632, %v6088_v2  ;;  %v2460_v11 = vsel %vm2140_vm1, %v8295_v62, %v2396_v6 }
 0x277   : > { %7156 = vpow2.f32 %v2228_v4  ;;  %v2230_v10 = vmul.f32 1.442695, %v1953_v54  ;;  %v2524_v14 = vmul.f32 1.050701, %v2460_v11  ;;  %v2463_v16 = vsel %vm2143_vm3, %v8299_v24, %v2399_v13 }
 0x278   : > { %7158 = vpow2.f32 %v2234_v9  ;;  %v2461_v12 = vsel %vm2141_vm2, %v1937_v33, %v2397_v8  ;;  %v2526_v17 = vmul.f32 1.050701, %v2462_v18  ;;  %v2527_v15 = vmul.f32 1.050701, %v2463_v16 }
 0x279   : > { %7160 = vpow2.f32 %v2230_v10  ;;  %v2525_v47 = vmul.f32 1.050701, %v2461_v12  ;;  %vm2146_vm4 = vcmp.gt.f32.partialorder %v8312_v52, 0.0  ;;  %vm2144_vm5 = vcmp.gt.f32.partialorder %v8316_v53, 0.0 }
 0x27a   : > { %v2581_v22 = vpack.c.bf16 %v2527_v15, %v2526_v17  ;;  %vm2145_vm6 = vcmp.gt.f32.partialorder %v1953_v54, 0.0  ;;  %vm2147_vm7 = vcmp.gt.f32.partialorder %v8320_v55, 0.0 }
 0x27b   : > { %v2580_v5 = vpack.c.bf16 %v2525_v47, %v2524_v14 }
 0x27d   : > { %6625 = vmatprep.mubr.bf16.mxu1 %v2580_v5 }
 0x27e   : > { %6626 = vmatmul.mubr.bf16.gmra.mrb[80].mxu1 %v2581_v22 }
 0x280   : > { %v7155_v23 = vpop.eup %7154 }
 0x281   : > { %v7157_v21 = vpop.eup %7156  ;;  %v6555_v62 = vpop.f32.mrb[24].mxu1  ;;  %v6093_v20 = vadd.f32 -1.0, %v7155_v23 }
 0x282   : > { %v7159_v25 = vpop.eup %7158  ;;  %v8333_v27 = vadd.f32 %v6555_v62, %v8183_v39  ;;  %v1965_v29 = vpop.f32.mrb[25].mxu1  ;;  %v6091_v30 = vadd.f32 -1.0, %v7157_v21 }
 0x283   : > { %v7161_v32 = vpop.eup %7160  ;;  %v8337_v19 = vadd.f32 %v8183_v39, %v1965_v29  ;;  %v6556_v24 = vpop.f32.mrb[26].mxu1  ;;  %v6094_v38 = vadd.f32 -1.0, %v7159_v25  ;;  %v2402_v43 = vmul.f32 1.6732632, %v6093_v20 }
 0x284   : > { %v2240_v33 = vmul.f32 1.442695, %v8333_v27  ;;  %v8341_v35 = vadd.f32 %v6556_v24, %v8183_v39  ;;  %v1968_v36 = vpop.f32.mrb[27].mxu1  ;;  %v6092_v34 = vadd.f32 -1.0, %v7161_v32  ;;  %v2400_v31 = vmul.f32 1.6732632, %v6091_v30 }
 0x285   : > { %v2236_v28 = vmul.f32 1.442695, %v8337_v19  ;;  %v1969_v40 = vadd.f32 %v8183_v39, %v1968_v36  ;;  %v2403_v49 = vmul.f32 1.6732632, %v6094_v38  ;;  %v2466_v50 = vsel %vm2146_vm4, %v8312_v52, %v2402_v43 }
 0x286   : > { %7162 = vpow2.f32 %v2240_v33  ;;  %v2242_v41 = vmul.f32 1.442695, %v8341_v35  ;;  %v2401_v44 = vmul.f32 1.6732632, %v6092_v34  ;;  %v2464_v46 = vsel %vm2144_vm5, %v8316_v53, %v2400_v31 }
 0x287   : > { %7164 = vpow2.f32 %v2236_v28  ;;  %v2238_v42 = vmul.f32 1.442695, %v1969_v40  ;;  %v2528_v51 = vmul.f32 1.050701, %v2464_v46  ;;  %v2467_v56 = vsel %vm2147_vm7, %v8320_v55, %v2403_v49 }
 0x288   : > { %7166 = vpow2.f32 %v2242_v41  ;;  %v2465_v48 = vsel %vm2145_vm6, %v1953_v54, %v2401_v44  ;;  %v2530_v57 = vmul.f32 1.050701, %v2466_v50  ;;  %v2531_v45 = vmul.f32 1.050701, %v2467_v56 }
 0x289   : > { %7168 = vpow2.f32 %v2238_v42  ;;  %v2529_v26 = vmul.f32 1.050701, %v2465_v48  ;;  %vm2150_vm8 = vcmp.gt.f32.partialorder %v8333_v27, 0.0  ;;  %vm2148_vm9 = vcmp.gt.f32.partialorder %v8337_v19, 0.0 }
 0x28a   : > { %v2583_v59 = vpack.c.bf16 %v2531_v45, %v2530_v57  ;;  %vm2149_vm10 = vcmp.gt.f32.partialorder %v1969_v40, 0.0  ;;  %vm2151_vm11 = vcmp.gt.f32.partialorder %v8341_v35, 0.0 }
 0x28b   : > { %v2582_v37 = vpack.c.bf16 %v2529_v26, %v2528_v51 }
 0x28d   : > { %6629 = vmatprep.mubr.bf16.mxu1 %v2582_v37 }
 0x28e   : > { %6630 = vmatmul.mubr.bf16.gmra.mrb[84].mxu1 %v2583_v59 }
 0x290   : > { %v7163_v61 = vpop.eup %7162 }
 0x291   : > { %v7165_v60 = vpop.eup %7164  ;;  %v6559_v53 = vpop.f32.mrb[28].mxu1  ;;  %v6097_v58 = vadd.f32 -1.0, %v7163_v61 }
 0x292   : > { %v7167_v0 = vpop.eup %7166  ;;  %v8354_v63 = vadd.f32 %v6559_v53, %v8183_v39  ;;  %v1981_v2 = vpop.f32.mrb[29].mxu1  ;;  %v6095_v3 = vadd.f32 -1.0, %v7165_v60 }
 0x293   : > { %v7169_v4 = vpop.eup %7168  ;;  %v8358_v52 = vadd.f32 %v8183_v39, %v1981_v2  ;;  %v6560_v55 = vpop.f32.mrb[30].mxu1  ;;  %v6098_v8 = vadd.f32 -1.0, %v7167_v0  ;;  %v2406_v13 = vmul.f32 1.6732632, %v6097_v58 }
 0x294   : > { %v2248_v54 = vmul.f32 1.442695, %v8354_v63  ;;  %v8362_v6 = vadd.f32 %v6560_v55, %v8183_v39  ;;  %v1984_v7 = vpop.f32.mrb[31].mxu1  ;;  %v6096_v9 = vadd.f32 -1.0, %v7169_v4  ;;  %v2404_v12 = vmul.f32 1.6732632, %v6095_v3 }
 0x295   : > { %v2244_v10 = vmul.f32 1.442695, %v8358_v52  ;;  %v1985_v11 = vadd.f32 %v8183_v39, %v1984_v7  ;;  %v2407_v17 = vmul.f32 1.6732632, %v6098_v8  ;;  %v2470_v23 = vsel %vm2150_vm8, %v8333_v27, %v2406_v13 }
 0x296   : > { %7170 = vpow2.f32 %v2248_v54  ;;  %v2250_v14 = vmul.f32 1.442695, %v8362_v6  ;;  %v2405_v47 = vmul.f32 1.6732632, %v6096_v9  ;;  %v2468_v16 = vsel %vm2148_vm9, %v8337_v19, %v2404_v12 }
 0x297   : > { %7172 = vpow2.f32 %v2244_v10  ;;  %v2246_v18 = vmul.f32 1.442695, %v1985_v11  ;;  %v2532_v15 = vmul.f32 1.050701, %v2468_v16  ;;  %v2471_v21 = vsel %vm2151_vm11, %v8341_v35, %v2407_v17 }
 0x298   : > { %7174 = vpow2.f32 %v2250_v14  ;;  %v2469_v5 = vsel %vm2149_vm10, %v1969_v40, %v2405_v47  ;;  %v2534_v20 = vmul.f32 1.050701, %v2470_v23  ;;  %v2535_v25 = vmul.f32 1.050701, %v2471_v21 }
 0x299   : > { %7176 = vpow2.f32 %v2246_v18  ;;  %v2533_v22 = vmul.f32 1.050701, %v2469_v5  ;;  %vm2154_vm12 = vcmp.gt.f32.partialorder %v8354_v63, 0.0  ;;  %vm2152_vm13 = vcmp.gt.f32.partialorder %v8358_v52, 0.0 }
 0x29a   : > { %v2585_v29 = vpack.c.bf16 %v2535_v25, %v2534_v20  ;;  %vm2153_vm14 = vcmp.gt.f32.partialorder %v1985_v11, 0.0  ;;  %vm2155_vm15 = vcmp.gt.f32.partialorder %v8362_v6, 0.0 }
 0x29b   : > { %v2584_v62 = vpack.c.bf16 %v2533_v22, %v2532_v15 }
 0x29d   : > { %6633 = vmatprep.mubr.bf16.mxu1 %v2584_v62 }
 0x29e   : > { %6634 = vmatmul.mubr.bf16.gmra.mrb[88].mxu1 %v2585_v29 }
 0x2a0   : > { %v7171_v30 = vpop.eup %7170 }
 0x2a1   : > { %v7173_v32 = vpop.eup %7172  ;;  %v6563_v19 = vpop.f32.mrb[32].mxu1  ;;  %v6101_v24 = vadd.f32 -1.0, %v7171_v30 }
 0x2a2   : > { %v7175_v33 = vpop.eup %7174  ;;  %v8375_v36 = vadd.f32 %v6563_v19, %v8183_v39  ;;  %v1997_v34 = vpop.f32.mrb[33].mxu1  ;;  %v6099_v38 = vadd.f32 -1.0, %v7173_v32 }
 0x2a3   : > { %v7177_v28 = vpop.eup %7176  ;;  %v8379_v27 = vadd.f32 %v8183_v39, %v1997_v34  ;;  %v6564_v35 = vpop.f32.mrb[34].mxu1  ;;  %v6102_v44 = vadd.f32 -1.0, %v7175_v33  ;;  %v2410_v49 = vmul.f32 1.6732632, %v6101_v24 }
 0x2a4   : > { %v2256_v40 = vmul.f32 1.442695, %v8375_v36  ;;  %v8383_v31 = vadd.f32 %v6564_v35, %v8183_v39  ;;  %v2000_v43 = vpop.f32.mrb[35].mxu1  ;;  %v6100_v41 = vadd.f32 -1.0, %v7177_v28  ;;  %v2408_v48 = vmul.f32 1.6732632, %v6099_v38 }
 0x2a5   : > { %v2252_v42 = vmul.f32 1.442695, %v8379_v27  ;;  %v2001_v46 = vadd.f32 %v8183_v39, %v2000_v43  ;;  %v2411_v57 = vmul.f32 1.6732632, %v6102_v44  ;;  %v2474_v61 = vsel %vm2154_vm12, %v8354_v63, %v2410_v49 }
 0x2a6   : > { %7178 = vpow2.f32 %v2256_v40  ;;  %v2258_v51 = vmul.f32 1.442695, %v8383_v31  ;;  %v2409_v26 = vmul.f32 1.6732632, %v6100_v41  ;;  %v2472_v56 = vsel %vm2152_vm13, %v8358_v52, %v2408_v48  ;;  %v6938_v40 = vld [vmem:[%s10221_s7] sm:$0xff]  }
 0x2a7   : > { %7180 = vpow2.f32 %v2252_v42  ;;  %v2254_v50 = vmul.f32 1.442695, %v2001_v46  ;;  %v2536_v45 = vmul.f32 1.050701, %v2472_v56  ;;  %v2475_v60 = vsel %vm2155_vm15, %v8362_v6, %v2411_v57  ;;  %3628 = vmatpush1.bf16.msra.mxu1 %v6938_v40 }
 0x2a8   : > { %7182 = vpow2.f32 %v2258_v51  ;;  %v2473_v37 = vsel %vm2153_vm14, %v1985_v11, %v2409_v26  ;;  %v2538_v58 = vmul.f32 1.050701, %v2474_v61  ;;  %v2539_v0 = vmul.f32 1.050701, %v2475_v60  ;;  %3629 = vmatprep.subr.bf16.mxu1 %v10231_v1 }
 0x2a9   : > { %7184 = vpow2.f32 %v2254_v50  ;;  %v2537_v59 = vmul.f32 1.050701, %v2473_v37  ;;  %vm2158_vm0 = vcmp.gt.f32.partialorder %v8375_v36, 0.0  ;;  %vm2156_vm1 = vcmp.gt.f32.partialorder %v8379_v27, 0.0 }
 0x2aa   : > { %v2587_v2 = vpack.c.bf16 %v2539_v0, %v2538_v58  ;;  %vm2157_vm2 = vcmp.gt.f32.partialorder %v2001_v46, 0.0  ;;  %vm2159_vm3 = vcmp.gt.f32.partialorder %v8383_v31, 0.0 }
 0x2ab   : > { %v2586_v53 = vpack.c.bf16 %v2537_v59, %v2536_v45 }
 0x2ad   : > { %6637 = vmatprep.mubr.bf16.mxu1 %v2586_v53 }
 0x2ae   : > { %6638 = vmatmul.mubr.bf16.gmra.mrb[92].mxu1 %v2587_v2 }
 0x2b0   : > { %v7179_v3 = vpop.eup %7178 }
 0x2b1   : > { %v7181_v4 = vpop.eup %7180  ;;  %v6567_v52 = vpop.f32.mrb[36].mxu1  ;;  %v6105_v55 = vadd.f32 -1.0, %v7179_v3 }
 0x2b2   : > { %v7183_v54 = vpop.eup %7182  ;;  %v8396_v7 = vadd.f32 %v6567_v52, %v8183_v39  ;;  %v2013_v9 = vpop.f32.mrb[37].mxu1  ;;  %v6103_v8 = vadd.f32 -1.0, %v7181_v4 }
 0x2b3   : > { %v7185_v10 = vpop.eup %7184  ;;  %v8400_v63 = vadd.f32 %v8183_v39, %v2013_v9  ;;  %v6568_v6 = vpop.f32.mrb[38].mxu1  ;;  %v6106_v47 = vadd.f32 -1.0, %v7183_v54  ;;  %v2414_v17 = vmul.f32 1.6732632, %v6105_v55 }
 0x2b4   : > { %v2264_v11 = vmul.f32 1.442695, %v8396_v7  ;;  %v8404_v12 = vadd.f32 %v6568_v6, %v8183_v39  ;;  %v2016_v13 = vpop.f32.mrb[39].mxu1  ;;  %v6104_v14 = vadd.f32 -1.0, %v7185_v10  ;;  %v2412_v5 = vmul.f32 1.6732632, %v6103_v8 }
 0x2b5   : > { %v2260_v18 = vmul.f32 1.442695, %v8400_v63  ;;  %v2017_v16 = vadd.f32 %v8183_v39, %v2016_v13  ;;  %v2415_v20 = vmul.f32 1.6732632, %v6106_v47  ;;  %v2478_v30 = vsel %vm2158_vm0, %v8375_v36, %v2414_v17  ;;  %v6939_v8 = vld [vmem:[%s10221_s7 + $0x8] sm:$0xff]  }
 0x2b6   : > { %7186 = vpow2.f32 %v2264_v11  ;;  %v2266_v15 = vmul.f32 1.442695, %v8404_v12  ;;  %v2413_v22 = vmul.f32 1.6732632, %v6104_v14  ;;  %v2476_v21 = vsel %vm2156_vm1, %v8379_v27, %v2412_v5  ;;  %3630 = vmatpush1.bf16.msra.mxu1 %v6939_v8  ;;  %v8454_v14 = vld [vmem:[%s10218_s4] ss:$0 sm:$0xff] }
 0x2b7   : > { %7188 = vpow2.f32 %v2260_v18  ;;  %v2262_v23 = vmul.f32 1.442695, %v2017_v16  ;;  %v2540_v25 = vmul.f32 1.050701, %v2476_v21  ;;  %v2479_v32 = vsel %vm2159_vm3, %v8383_v31, %v2415_v20  ;;  %3631 = vmatprep.subr.bf16.mxu1 %v10231_v1 }
 0x2b8   : > { %7190 = vpow2.f32 %v2266_v15  ;;  %v2477_v62 = vsel %vm2157_vm2, %v2001_v46, %v2413_v22  ;;  %v2542_v24 = vmul.f32 1.050701, %v2478_v30  ;;  %v2543_v33 = vmul.f32 1.050701, %v2479_v32 }
 0x2b9   : > { %7192 = vpow2.f32 %v2262_v23  ;;  %v2541_v29 = vmul.f32 1.050701, %v2477_v62  ;;  %vm2162_vm4 = vcmp.gt.f32.partialorder %v8396_v7, 0.0  ;;  %vm2160_vm5 = vcmp.gt.f32.partialorder %v8400_v63, 0.0 }
 0x2ba   : > { %v2589_v34 = vpack.c.bf16 %v2543_v33, %v2542_v24  ;;  %vm2161_vm6 = vcmp.gt.f32.partialorder %v2017_v16, 0.0  ;;  %vm2163_vm7 = vcmp.gt.f32.partialorder %v8404_v12, 0.0 }
 0x2bb   : > { %v2588_v19 = vpack.c.bf16 %v2541_v29, %v2540_v25 }
 0x2bd   : > { %6641 = vmatprep.mubr.bf16.mxu1 %v2588_v19 }
 0x2be   : > { %6642 = vmatmul.mubr.bf16.gmra.mrb[96].mxu1 %v2589_v34 }
 0x2c0   : > { %v7187_v38 = vpop.eup %7186 }
 0x2c1   : > { %v7189_v28 = vpop.eup %7188  ;;  %v6571_v27 = vpop.f32.mrb[40].mxu1  ;;  %v6109_v35 = vadd.f32 -1.0, %v7187_v38 }
 0x2c2   : > { %v7191_v43 = vpop.eup %7190  ;;  %v8420_v41 = vadd.f32 %v6571_v27, %v8183_v39  ;;  %v2029_v36 = vpop.f32.mrb[41].mxu1  ;;  %v6107_v31 = vadd.f32 -1.0, %v7189_v28 }
 0x2c3   : > { %v7193_v44 = vpop.eup %7192  ;;  %v8424_v42 = vadd.f32 %v8183_v39, %v2029_v36  ;;  %v6572_v46 = vpop.f32.mrb[42].mxu1  ;;  %v6110_v50 = vadd.f32 -1.0, %v7191_v43  ;;  %v2418_v45 = vmul.f32 1.6732632, %v6109_v35 }
 0x2c4   : > { %v2272_v48 = vmul.f32 1.442695, %v8420_v41  ;;  %v8428_v49 = vadd.f32 %v6572_v46, %v8183_v39  ;;  %v2032_v51 = vpop.f32.mrb[43].mxu1  ;;  %v6108_v26 = vadd.f32 -1.0, %v7193_v44  ;;  %v2416_v57 = vmul.f32 1.6732632, %v6107_v31 }
 0x2c5   : > { %v2268_v56 = vmul.f32 1.442695, %v8424_v42  ;;  %v8433_v37 = vadd.f32 %v8183_v39, %v2032_v51  ;;  %v2419_v39 = vmul.f32 1.6732632, %v6110_v50  ;;  %v2482_v3 = vsel %vm2162_vm4, %v8396_v7, %v2418_v45  ;;  %v6941_v44 = vld [vmem:[%s10221_s7 + $0x18] sm:$0xff]  }
 0x2c6   : > { %7194 = vpow2.f32 %v2272_v48  ;;  %v2274_v59 = vmul.f32 1.442695, %v8428_v49  ;;  %v2417_v61 = vmul.f32 1.6732632, %v6108_v26  ;;  %v2480_v53 = vsel %vm2160_vm5, %v8400_v63, %v2416_v57  ;;  %v6940_v63 = vld [vmem:[%s10221_s7 + $0x10] sm:$0xff]  }
 0x2c7   : > { %7196 = vpow2.f32 %v2268_v56  ;;  %v2270_v60 = vmul.f32 1.442695, %v8433_v37  ;;  %v2544_v0 = vmul.f32 1.050701, %v2480_v53  ;;  %v2483_v4 = vsel %vm2163_vm7, %v8404_v12, %v2419_v39  ;;  %3632 = vmatpush1.bf16.msra.mxu1 %v6940_v63 }
 0x2c8   : > { %7198 = vpow2.f32 %v2274_v59  ;;  %v2481_v58 = vsel %vm2161_vm6, %v2017_v16, %v2417_v61  ;;  %v2546_v55 = vmul.f32 1.050701, %v2482_v3  ;;  %v2547_v54 = vmul.f32 1.050701, %v2483_v4  ;;  %3633 = vmatprep.subr.bf16.mxu1 %v10231_v1 }
 0x2c9   : > { %7200 = vpow2.f32 %v2270_v60  ;;  %v2545_v2 = vmul.f32 1.050701, %v2481_v58  ;;  %vm2166_vm8 = vcmp.gt.f32.partialorder %v8420_v41, 0.0  ;;  %vm2164_vm9 = vcmp.gt.f32.partialorder %v8424_v42, 0.0 }
 0x2ca   : > { %v2591_v9 = vpack.c.bf16 %v2547_v54, %v2546_v55  ;;  %vm2167_vm10 = vcmp.gt.f32.partialorder %v8428_v49, 0.0  ;;  %vm2165_vm11 = vcmp.gt.f32.partialorder %v8433_v37, 0.0 }
 0x2cb   : > { %v2590_v52 = vpack.c.bf16 %v2545_v2, %v2544_v0  ;;  %3634 = vmatpush1.bf16.msra.mxu1 %v6941_v44 }
 0x2cc   : > { %3635 = vmatprep.subr.bf16.mxu1 %v10231_v1 }
 0x2cd   : > { %6645 = vmatprep.mubr.bf16.mxu1 %v2590_v52 }
 0x2ce   : > { %6646 = vmatmul.mubr.bf16.gmra.mrb[100].mxu1 %v2591_v9 }
 0x2d0   : > { %v7195_v10 = vpop.eup %7194 }
 0x2d1   : > { %v7197_v6 = vpop.eup %7196  ;;  %v6113_v7 = vadd.f32 -1.0, %v7195_v10  ;;  %v6575_v11 = vpop.f32.mrb[44].mxu1 }
 0x2d2   : > { %v7199_v12 = vpop.eup %7198  ;;  %v6111_v13 = vadd.f32 -1.0, %v7197_v6  ;;  %v8457_v47 = vadd.f32 %v8454_v14, %v6575_v11  ;;  %v2045_v18 = vpop.f32.mrb[45].mxu1 }
 0x2d3   : > { %v7201_v16 = vpop.eup %7200  ;;  %v2422_v5 = vmul.f32 1.6732632, %v6113_v7  ;;  %v6114_v17 = vadd.f32 -1.0, %v7199_v12  ;;  %v8460_v15 = vadd.f32 %v8454_v14, %v2045_v18  ;;  %v6576_v22 = vpop.f32.mrb[46].mxu1  ;;  %v6943_v18 = vld [vmem:[%s10221_s7 + $0x28] sm:$0xff]  }
 0x2d4   : > { %v2420_v23 = vmul.f32 1.6732632, %v6111_v13  ;;  %v6112_v21 = vadd.f32 -1.0, %v7201_v16  ;;  %v2280_v62 = vmul.f32 1.442695, %v8457_v47  ;;  %v2048_v30 = vpop.f32.mrb[47].mxu1  ;;  %v2057_v33 = vadd.f32 %v8454_v14, %v6576_v22 }
 0x2d5   : > { %v2486_v20 = vsel %vm2166_vm8, %v8420_v41, %v2422_v5  ;;  %v2423_v25 = vmul.f32 1.6732632, %v6114_v17  ;;  %v2276_v29 = vmul.f32 1.442695, %v8460_v15  ;;  %v2049_v27 = vadd.f32 %v8454_v14, %v2048_v30  ;;  %v6944_v5 = vld [vmem:[%s10221_s7 + $0x30] sm:$0xff]  }
 0x2d6   : > { %v2484_v32 = vsel %vm2164_vm9, %v8424_v42, %v2420_v23  ;;  %v2421_v19 = vmul.f32 1.6732632, %v6112_v21  ;;  %7202 = vpow2.f32 %v2280_v62  ;;  %v2550_v34 = vmul.f32 1.050701, %v2486_v20  ;;  %v6942_v42 = vld [vmem:[%s10221_s7 + $0x20] sm:$0xff]  }
 0x2d7   : > { %v2487_v24 = vsel %vm2167_vm10, %v8428_v49, %v2423_v25  ;;  %7204 = vpow2.f32 %v2276_v29  ;;  %v2548_v35 = vmul.f32 1.050701, %v2484_v32  ;;  %v2282_v43 = vmul.f32 1.442695, %v2057_v33  ;;  %3636 = vmatpush1.bf16.msra.mxu1 %v6942_v42 }
 0x2d8   : > { %v2551_v38 = vmul.f32 1.050701, %v2487_v24  ;;  %v2485_v28 = vsel %vm2165_vm11, %v8433_v37, %v2421_v19  ;;  %v2278_v41 = vmul.f32 1.442695, %v2049_v27  ;;  %3637 = vmatprep.subr.bf16.mxu1 %v10231_v1  ;;  %vm2170_vm12 = vcmp.gt.f32.partialorder %v8457_v47, 0.0 }
 0x2d9   : > { %v2549_v40 = vmul.f32 1.050701, %v2485_v28  ;;  %7206 = vpow2.f32 %v2282_v43  ;;  %vm2168_vm13 = vcmp.gt.f32.partialorder %v8460_v15, 0.0  ;;  %vm2171_vm14 = vcmp.gt.f32.partialorder %v2057_v33, 0.0 }
 0x2da   : > { %v2593_v36 = vpack.c.bf16 %v2551_v38, %v2550_v34  ;;  %7208 = vpow2.f32 %v2278_v41  ;;  %vm2169_vm15 = vcmp.gt.f32.partialorder %v2049_v27, 0.0 }
 0x2db   : > { %v2592_v31 = vpack.c.bf16 %v2549_v40, %v2548_v35  ;;  %3638 = vmatpush1.bf16.msra.mxu1 %v6943_v18 }
 0x2dc   : > { %3639 = vmatprep.subr.bf16.mxu1 %v10231_v1 }
 0x2dd   : > { %6649 = vmatprep.mubr.bf16.mxu1 %v2592_v31 }
 0x2de   : > { %6650 = vmatmul.mubr.bf16.gmra.mrb[104].mxu1 %v2593_v36 }
 0x2df   : > { %3640 = vmatpush1.bf16.msra.mxu1 %v6944_v5 }
 0x2e0   : > { %v7203_v46 = vpop.eup %7202  ;;  %3641 = vmatprep.subr.bf16.mxu1 %v10231_v1 }
 0x2e1   : > { %v7205_v48 = vpop.eup %7204  ;;  %v6117_v49 = vadd.f32 -1.0, %v7203_v46  ;;  %v6579_v51 = vpop.f32.mrb[48].mxu1 }
 0x2e2   : > { %v6115_v26 = vadd.f32 -1.0, %v7205_v48  ;;  %v8483_v50 = vadd.f32 %v8454_v14, %v6579_v51  ;;  %v2061_v56 = vpop.f32.mrb[49].mxu1 }
 0x2e3   : > { %v8486_v37 = vadd.f32 %v8454_v14, %v2061_v56  ;;  %v6580_v57 = vpop.f32.mrb[50].mxu1  ;;  %v2426_v45 = vmul.f32 1.6732632, %v6117_v49  ;;  %v7207_v53 = vpop.eup %7206 }
 0x2e4   : > { %v2288_v59 = vmul.f32 1.442695, %v8483_v50  ;;  %v8490_v61 = vadd.f32 %v8454_v14, %v6580_v57  ;;  %v2064_v60 = vpop.f32.mrb[51].mxu1  ;;  %v2424_v58 = vmul.f32 1.6732632, %v6115_v26  ;;  %v7209_v2 = vpop.eup %7208  ;;  %v6118_v3 = vadd.f32 -1.0, %v7207_v53 }
 0x2e5   : > { %v2284_v39 = vmul.f32 1.442695, %v8486_v37  ;;  %v8495_v0 = vadd.f32 %v8454_v14, %v2064_v60  ;;  %v6116_v4 = vadd.f32 -1.0, %v7209_v2  ;;  %v2490_v52 = vsel %vm2170_vm12, %v8457_v47, %v2426_v45  ;;  %v6945_v57 = vld [vmem:[%s10221_s7 + $0x38] sm:$0xff]   ;;  %v6946_v45 = vld [vmem:[%s10221_s7 + $0x40] sm:$0xff]  }
 0x2e6   : > { %7210 = vpow2.f32 %v2288_v59  ;;  %v2427_v55 = vmul.f32 1.6732632, %v6118_v3  ;;  %v2290_v54 = vmul.f32 1.442695, %v8490_v61  ;;  %v2488_v9 = vsel %vm2168_vm13, %v8460_v15, %v2424_v58  ;;  %3642 = vmatpush1.bf16.msra.mxu1 %v6945_v57 }
 0x2e7   : > { %7212 = vpow2.f32 %v2284_v39  ;;  %v2425_v8 = vmul.f32 1.6732632, %v6116_v4  ;;  %v2286_v10 = vmul.f32 1.442695, %v8495_v0  ;;  %v2554_v6 = vmul.f32 1.050701, %v2490_v52  ;;  %3643 = vmatprep.subr.bf16.mxu1 %v10231_v1 }
 0x2e8   : > { %v2491_v63 = vsel %vm2171_vm14, %v2057_v33, %v2427_v55  ;;  %7214 = vpow2.f32 %v2290_v54  ;;  %v2552_v12 = vmul.f32 1.050701, %v2488_v9  ;;  %vm2174_vm0 = vcmp.gt.f32.partialorder %v8483_v50, 0.0 }
 0x2e9   : > { %v2555_v7 = vmul.f32 1.050701, %v2491_v63  ;;  %v2489_v11 = vsel %vm2169_vm15, %v2049_v27, %v2425_v8  ;;  %7216 = vpow2.f32 %v2286_v10  ;;  %vm2172_vm1 = vcmp.gt.f32.partialorder %v8486_v37, 0.0 }
 0x2ea   : > { %v2553_v13 = vmul.f32 1.050701, %v2489_v11  ;;  %vm2175_vm2 = vcmp.gt.f32.partialorder %v8490_v61, 0.0  ;;  %vm2173_vm3 = vcmp.gt.f32.partialorder %v8495_v0, 0.0  ;;  %3644 = vmatpush1.bf16.msra.mxu1 %v6946_v45 }
 0x2eb   : > { %v2595_v47 = vpack.c.bf16 %v2555_v7, %v2554_v6  ;;  %3645 = vmatprep.subr.bf16.mxu1 %v10231_v1 }
 0x2ec   : > { %v2594_v16 = vpack.c.bf16 %v2553_v13, %v2552_v12 }
 0x2ee   : > { %6653 = vmatprep.mubr.bf16.mxu1 %v2594_v16 }
 0x2ef   : > { %6654 = vmatmul.mubr.bf16.gmra.mrb[108].mxu1 %v2595_v47 }
 0x2f0   : > { %v7211_v17 = vpop.eup %7210 }
 0x2f1   : > { %v7213_v15 = vpop.eup %7212  ;;  %v6121_v22 = vadd.f32 -1.0, %v7211_v17  ;;  %v6583_v23 = vpop.f32.mrb[52].mxu1 }
 0x2f2   : > { %v6119_v21 = vadd.f32 -1.0, %v7213_v15  ;;  %v8511_v62 = vadd.f32 %v8454_v14, %v6583_v23  ;;  %v2077_v20 = vpop.f32.mrb[53].mxu1  ;;  %v7215_v32 = vpop.eup %7214 }
 0x2f3   : > { %v2430_v25 = vmul.f32 1.6732632, %v6121_v22  ;;  %v8514_v29 = vadd.f32 %v8454_v14, %v2077_v20  ;;  %v6584_v30 = vpop.f32.mrb[54].mxu1  ;;  %v7217_v38 = vpop.eup %7216  ;;  %v6122_v28 = vadd.f32 -1.0, %v7215_v32  ;;  %v6948_v32 = vld [vmem:[%s10221_s7 + $0x50] sm:$0xff]  }
 0x2f4   : > { %v2428_v19 = vmul.f32 1.6732632, %v6119_v21  ;;  %v2296_v24 = vmul.f32 1.442695, %v8511_v62  ;;  %v8518_v33 = vadd.f32 %v8454_v14, %v6584_v30  ;;  %v2080_v34 = vpop.f32.mrb[55].mxu1  ;;  %v6120_v35 = vadd.f32 -1.0, %v7217_v38 }
 0x2f5   : > { %v2292_v27 = vmul.f32 1.442695, %v8514_v29  ;;  %v2494_v40 = vsel %vm2174_vm0, %v8483_v50, %v2430_v25  ;;  %v2431_v43 = vmul.f32 1.6732632, %v6122_v28  ;;  %v2081_v44 = vadd.f32 %v8454_v14, %v2080_v34  ;;  %v6947_v25 = vld [vmem:[%s10221_s7 + $0x48] sm:$0xff]  }
 0x2f6   : > { %7218 = vpow2.f32 %v2296_v24  ;;  %v2492_v41 = vsel %vm2172_vm1, %v8486_v37, %v2428_v19  ;;  %v2429_v36 = vmul.f32 1.6732632, %v6120_v35  ;;  %v2298_v31 = vmul.f32 1.442695, %v8518_v33  ;;  %3646 = vmatpush1.bf16.msra.mxu1 %v6947_v25 }
 0x2f7   : > { %7220 = vpow2.f32 %v2292_v27  ;;  %v2495_v42 = vsel %vm2175_vm2, %v8490_v61, %v2431_v43  ;;  %v2558_v46 = vmul.f32 1.050701, %v2494_v40  ;;  %v2556_v51 = vmul.f32 1.050701, %v2492_v41  ;;  %3647 = vmatprep.subr.bf16.mxu1 %v10231_v1 }
 0x2f8   : > { %v2559_v48 = vmul.f32 1.050701, %v2495_v42  ;;  %v2493_v49 = vsel %vm2173_vm3, %v8495_v0, %v2429_v36  ;;  %7222 = vpow2.f32 %v2298_v31  ;;  %v2294_v50 = vmul.f32 1.442695, %v2081_v44 }
 0x2f9   : > { %v2557_v26 = vmul.f32 1.050701, %v2493_v49  ;;  %vm2178_vm4 = vcmp.gt.f32.partialorder %v8511_v62, 0.0  ;;  %vm2179_vm5 = vcmp.gt.f32.partialorder %v8518_v33, 0.0  ;;  %vm2176_vm6 = vcmp.gt.f32.partialorder %v8514_v29, 0.0 }
 0x2fa   : > { %v2597_v56 = vpack.c.bf16 %v2559_v48, %v2558_v46  ;;  %7224 = vpow2.f32 %v2294_v50  ;;  %vm2177_vm7 = vcmp.gt.f32.partialorder %v2081_v44, 0.0  ;;  %3648 = vmatpush1.bf16.msra.mxu1 %v6948_v32 }
 0x2fb   : > { %v2596_v37 = vpack.c.bf16 %v2557_v26, %v2556_v51  ;;  %3649 = vmatprep.subr.bf16.mxu1 %v10231_v1 }
 0x2fd   : > { %6657 = vmatprep.mubr.bf16.mxu1 %v2596_v37 }
 0x2fe   : > { %6658 = vmatmul.mubr.bf16.gmra.mrb[112].mxu1 %v2597_v56 }
 0x300   : > { %v7219_v59 = vpop.eup %7218 }
 0x301   : > { %v7221_v61 = vpop.eup %7220  ;;  %v6125_v60 = vadd.f32 -1.0, %v7219_v59  ;;  %v6587_v53 = vpop.f32.mrb[56].mxu1 }
 0x302   : > { %v6123_v58 = vadd.f32 -1.0, %v7221_v61  ;;  %v2102_v39 = vadd.f32 %v8454_v14, %v6587_v53  ;;  %v2093_v0 = vpop.f32.mrb[57].mxu1  ;;  %v7223_v52 = vpop.eup %7222 }
 0x303   : > { %v2434_v2 = vmul.f32 1.6732632, %v6125_v60  ;;  %v8541_v3 = vadd.f32 %v8454_v14, %v2093_v0  ;;  %v6588_v4 = vpop.f32.mrb[58].mxu1  ;;  %v6126_v8 = vadd.f32 -1.0, %v7223_v52  ;;  %v8581_v60 = vld [vmem:[%s10220_s6] ss:$0 sm:$0xff] }
 0x304   : > { %v2304_v55 = vmul.f32 1.442695, %v2102_v39  ;;  %v2105_v54 = vadd.f32 %v8454_v14, %v6588_v4  ;;  %v2096_v9 = vpop.f32.mrb[59].mxu1  ;;  %v2432_v63 = vmul.f32 1.6732632, %v6123_v58  ;;  %v7225_v6 = vpop.eup %7224  ;;  %vm2182_vm8 = vcmp.gt.f32.partialorder %v2102_v39, 0.0 }
 0x305   : > { %v2300_v10 = vmul.f32 1.442695, %v8541_v3  ;;  %v2498_v7 = vsel %vm2178_vm4, %v8511_v62, %v2434_v2  ;;  %v2435_v11 = vmul.f32 1.6732632, %v6126_v8  ;;  %v6124_v13 = vadd.f32 -1.0, %v7225_v6  ;;  %v6950_v6 = vld [vmem:[%s10221_s7 + $0x60] sm:$0xff]  }
 0x306   : > { %7226 = vpow2.f32 %v2304_v55  ;;  %v2306_v12 = vmul.f32 1.442695, %v2105_v54  ;;  %v2097_v47 = vadd.f32 %v8454_v14, %v2096_v9  ;;  %v2562_v16 = vmul.f32 1.050701, %v2498_v7 }
 0x307   : > { %7228 = vpow2.f32 %v2300_v10  ;;  %v2499_v18 = vsel %vm2179_vm5, %v8518_v33, %v2435_v11  ;;  %v2496_v5 = vsel %vm2176_vm6, %v8514_v29, %v2432_v63  ;;  %v2433_v15 = vmul.f32 1.6732632, %v6124_v13 }
 0x308   : > { %7230 = vpow2.f32 %v2306_v12  ;;  %v2563_v17 = vmul.f32 1.050701, %v2499_v18  ;;  %v2302_v22 = vmul.f32 1.442695, %v2097_v47  ;;  %v2560_v62 = vmul.f32 1.050701, %v2496_v5 }
 0x309   : > { %v2497_v23 = vsel %vm2177_vm7, %v2081_v44, %v2433_v15  ;;  %vm2183_vm9 = vcmp.gt.f32.partialorder %v2105_v54, 0.0  ;;  %vm2180_vm10 = vcmp.gt.f32.partialorder %v8541_v3, 0.0  ;;  %vm2181_vm11 = vcmp.gt.f32.partialorder %v2097_v47, 0.0 }
 0x30a   : > { %v2599_v21 = vpack.c.bf16 %v2563_v17, %v2562_v16  ;;  %v2561_v20 = vmul.f32 1.050701, %v2497_v23  ;;  %7232 = vpow2.f32 %v2302_v22 }
 0x30c   : > { %v2598_v30 = vpack.c.bf16 %v2561_v20, %v2560_v62 }
 0x30e   : > { %6661 = vmatprep.mubr.bf16.mxu1 %v2598_v30 }
 0x30f   : > { %6662 = vmatmul.mubr.bf16.gmra.mrb[116].mxu1 %v2599_v21 }
 0x310   : > { %v7227_v29 = vpop.eup %7226 }
 0x311   : > { %v7229_v19 = vpop.eup %7228  ;;  %v6129_v24 = vadd.f32 -1.0, %v7227_v29 }
 0x312   : > { %v6127_v33 = vadd.f32 -1.0, %v7229_v19  ;;  %v7231_v34 = vpop.eup %7230  ;;  %v6591_v27 = vpop.f32.mrb[60].mxu1 }
 0x313   : > { %v2438_v38 = vmul.f32 1.6732632, %v6129_v24  ;;  %v6130_v28 = vadd.f32 -1.0, %v7231_v34  ;;  %v8562_v35 = vadd.f32 %v8454_v14, %v6591_v27  ;;  %v2109_v40 = vpop.f32.mrb[61].mxu1 }
 0x314   : > { %v2436_v41 = vmul.f32 1.6732632, %v6127_v33  ;;  %v8565_v31 = vadd.f32 %v8454_v14, %v2109_v40  ;;  %v6592_v44 = vpop.f32.mrb[62].mxu1  ;;  %v7233_v42 = vpop.eup %7232 }
 0x315   : > { %v2502_v43 = vsel %vm2182_vm8, %v2102_v39, %v2438_v38  ;;  %v2439_v36 = vmul.f32 1.6732632, %v6130_v28  ;;  %v2312_v46 = vmul.f32 1.442695, %v8562_v35  ;;  %v8569_v48 = vadd.f32 %v8454_v14, %v6592_v44  ;;  %v2112_v49 = vpop.f32.mrb[63].mxu1 }
 0x316   : > { %v6128_v26 = vadd.f32 -1.0, %v7233_v42  ;;  %v2308_v50 = vmul.f32 1.442695, %v8565_v31  ;;  %v2566_v56 = vmul.f32 1.050701, %v2502_v43  ;;  %v2500_v45 = vsel %vm2180_vm10, %v8541_v3, %v2436_v41 }
 0x317   : > { %v2503_v51 = vsel %vm2183_vm9, %v2105_v54, %v2439_v36  ;;  %7234 = vpow2.f32 %v2312_v46  ;;  %v2314_v57 = vmul.f32 1.442695, %v8569_v48  ;;  %v8576_v61 = vadd.f32 %v8454_v14, %v2112_v49  ;;  %v6949_v14 = vld [vmem:[%s10221_s7 + $0x58] sm:$0xff]  }
 0x318   : > { %v2567_v37 = vmul.f32 1.050701, %v2503_v51  ;;  %v2437_v59 = vmul.f32 1.6732632, %v6128_v26  ;;  %7236 = vpow2.f32 %v2308_v50  ;;  %v2564_v2 = vmul.f32 1.050701, %v2500_v45  ;;  %3650 = vmatpush1.bf16.msra.mxu1 %v6949_v14 }
 0x319   : > { %7238 = vpow2.f32 %v2314_v57  ;;  %v2310_v39 = vmul.f32 1.442695, %v8576_v61  ;;  %3651 = vmatprep.subr.bf16.mxu1 %v10231_v1  ;;  %vm2186_vm12 = vcmp.gt.f32.partialorder %v8562_v35, 0.0  ;;  %vm2184_vm13 = vcmp.gt.f32.partialorder %v8565_v31, 0.0 }
 0x31a   : > { %v2601_v53 = vpack.c.bf16 %v2567_v37, %v2566_v56  ;;  %v2501_v58 = vsel %vm2181_vm11, %v2097_v47, %v2437_v59  ;;  %v6611_v0 = vpop.f32.mrb[64].mxu1  ;;  %vm2187_vm14 = vcmp.gt.f32.partialorder %v8569_v48, 0.0  ;;  %vm2185_vm15 = vcmp.gt.f32.partialorder %v8576_v61, 0.0 }
 0x31b   : > { %v2565_v4 = vmul.f32 1.050701, %v2501_v58  ;;  %v8585_v3 = vadd.f32 %v6611_v0, %v8581_v60  ;;  %v2709_v52 = vpop.f32.mrb[65].mxu1  ;;  %7240 = vpow2.f32 %v2310_v39 }
 0x31c   : > { %v8591_v55 = vadd.f32 %v8581_v60, %v2709_v52  ;;  %v6612_v54 = vpop.f32.mrb[66].mxu1  ;;  %3652 = vmatpush1.bf16.msra.mxu1 %v6950_v6 }
 0x31d   : > { %v3032_v9 = vmul.f32 1.442695, %v8585_v3  ;;  %v8595_v8 = vadd.f32 %v6612_v54, %v8581_v60  ;;  %v2712_v10 = vpop.f32.mrb[67].mxu1  ;;  %v2600_v63 = vpack.c.bf16 %v2565_v4, %v2564_v2  ;;  %3653 = vmatprep.subr.bf16.mxu1 %v10231_v1  ;;  %vm2966_vm2 = vcmp.gt.f32.partialorder %v8585_v3, 0.0 }
 0x31e   : > { %v3028_v7 = vmul.f32 1.442695, %v8591_v55  ;;  %v8602_v11 = vadd.f32 %v8581_v60, %v2712_v10  ;;  %vm2964_vm0 = vcmp.gt.f32.partialorder %v8591_v55, 0.0 }
 0x31f   : > { %7242 = vpow2.f32 %v3032_v9  ;;  %v3034_v12 = vmul.f32 1.442695, %v8595_v8  ;;  %6665 = vmatprep.mubr.bf16.mxu1 %v2600_v63  ;;  %vm2967_vm1 = vcmp.gt.f32.partialorder %v8595_v8, 0.0 }
 0x320   : > { %7244 = vpow2.f32 %v3028_v7  ;;  %v3030_v13 = vmul.f32 1.442695, %v8602_v11  ;;  %6666 = vmatmul.mubr.bf16.gmra.mrb[120].mxu1 %v2601_v53  ;;  %v6952_v53 = vld [vmem:[%s10221_s7 + $0x70] sm:$0xff]   ;;  %vm2965_vm3 = vcmp.gt.f32.partialorder %v8602_v11, 0.0 }
 0x321   : > { %v7235_v47 = vpop.eup %7234  ;;  %7246 = vpow2.f32 %v3034_v12 }
 0x322   : > { %v7237_v18 = vpop.eup %7236  ;;  %v6133_v16 = vadd.f32 -1.0, %v7235_v47  ;;  %7248 = vpow2.f32 %v3030_v13  ;;  %v6615_v5 = vpop.f32.mrb[68].mxu1 }
 0x323   : > { %v7239_v17 = vpop.eup %7238  ;;  %v6131_v15 = vadd.f32 -1.0, %v7237_v18  ;;  %v8609_v22 = vadd.f32 %v6615_v5, %v8581_v60  ;;  %v2725_v23 = vpop.f32.mrb[69].mxu1 }
 0x324   : > { %v2442_v21 = vmul.f32 1.6732632, %v6133_v16  ;;  %v6134_v62 = vadd.f32 -1.0, %v7239_v17  ;;  %v8612_v20 = vadd.f32 %v8581_v60, %v2725_v23  ;;  %v6616_v25 = vpop.f32.mrb[70].mxu1 }
 0x325   : > { %v2440_v30 = vmul.f32 1.6732632, %v6131_v15  ;;  %v3040_v32 = vmul.f32 1.442695, %v8609_v22  ;;  %v8616_v29 = vadd.f32 %v6616_v25, %v8581_v60  ;;  %v2728_v19 = vpop.f32.mrb[71].mxu1  ;;  %v7241_v24 = vpop.eup %7240  ;;  %vm2970_vm4 = vcmp.gt.f32.partialorder %v8609_v22, 0.0 }
 0x326   : > { %v2443_v33 = vmul.f32 1.6732632, %v6134_v62  ;;  %v3036_v34 = vmul.f32 1.442695, %v8612_v20  ;;  %v2506_v38 = vsel %vm2186_vm12, %v8562_v35, %v2442_v21  ;;  %v6132_v28 = vadd.f32 -1.0, %v7241_v24 }
 0x327   : > { %7250 = vpow2.f32 %v3040_v32  ;;  %v2504_v27 = vsel %vm2184_vm13, %v8565_v31, %v2440_v30  ;;  %v3042_v44 = vmul.f32 1.442695, %v8616_v29  ;;  %v8627_v42 = vadd.f32 %v8581_v60, %v2728_v19  ;;  %v6951_v31 = vld [vmem:[%s10221_s7 + $0x68] sm:$0xff]  }
 0x328   : > { %v2507_v40 = vsel %vm2187_vm14, %v8569_v48, %v2443_v33  ;;  %7252 = vpow2.f32 %v3036_v34  ;;  %v2441_v36 = vmul.f32 1.6732632, %v6132_v28  ;;  %v2570_v49 = vmul.f32 1.050701, %v2506_v38  ;;  %3654 = vmatpush1.bf16.msra.mxu1 %v6951_v31 }
 0x329   : > { %v7243_v43 = vpop.eup %7242  ;;  %v2571_v41 = vmul.f32 1.050701, %v2507_v40  ;;  %v2568_v48 = vmul.f32 1.050701, %v2504_v27  ;;  %7254 = vpow2.f32 %v3042_v44  ;;  %v3038_v0 = vmul.f32 1.442695, %v8627_v42  ;;  %3655 = vmatprep.subr.bf16.mxu1 %v10231_v1 }
 0x32a   : > { %v7245_v46 = vpop.eup %7244  ;;  %v6146_v35 = vadd.f32 -1.0, %v7243_v43  ;;  %v2505_v26 = vsel %vm2185_vm15, %v8576_v61, %v2441_v36  ;;  %vm2971_vm5 = vcmp.gt.f32.partialorder %v8616_v29, 0.0  ;;  %vm2968_vm6 = vcmp.gt.f32.partialorder %v8612_v20, 0.0 }
 0x32b   : > { %v7247_v51 = vpop.eup %7246  ;;  %v6144_v50 = vadd.f32 -1.0, %v7245_v46  ;;  %v2569_v37 = vmul.f32 1.050701, %v2505_v26  ;;  %v2603_v59 = vpack.c.bf16 %v2571_v41, %v2570_v49  ;;  %7256 = vpow2.f32 %v3038_v0 }
 0x32c   : > { %v7249_v56 = vpop.eup %7248  ;;  %v3222_v57 = vmul.f32 1.6732632, %v6146_v35  ;;  %v6147_v45 = vadd.f32 -1.0, %v7247_v51  ;;  %3656 = vmatpush1.bf16.msra.mxu1 %v6952_v53  ;;  %vm2969_vm7 = vcmp.gt.f32.partialorder %v8627_v42, 0.0 }
 0x32d   : > { %v3220_v58 = vmul.f32 1.6732632, %v6144_v50  ;;  %v6145_v39 = vadd.f32 -1.0, %v7249_v56  ;;  %v2602_v2 = vpack.c.bf16 %v2569_v37, %v2568_v48  ;;  %3657 = vmatprep.subr.bf16.mxu1 %v10231_v1 }
 0x32e   : > { %v3223_v61 = vmul.f32 1.6732632, %v6147_v45  ;;  %v3286_v10 = vsel %vm2966_vm2, %v8585_v3, %v3222_v57 }
 0x32f   : > { %v3284_v4 = vsel %vm2964_vm0, %v8591_v55, %v3220_v58  ;;  %v3221_v52 = vmul.f32 1.6732632, %v6145_v39  ;;  %6669 = vmatprep.mubr.bf16.mxu1 %v2602_v2  ;;  %v8670_v30 = vmul.f32 1.050701, %v3286_v10 }
 0x330   : > { %v3287_v14 = vsel %vm2967_vm1, %v8595_v8, %v3223_v61  ;;  %6670 = vmatmul.mubr.bf16.gmra.mrb[124].mxu1 %v2603_v59  ;;  %v6954_v8 = vld [vmem:[%s10221_s7 + $0x78] sm:$0xff]   ;;  %v8654_v12 = vmul.f32 1.050701, %v3284_v4 }
 0x331   : > { %v6619_v54 = vpop.f32.mrb[72].mxu1  ;;  %v7251_v9 = vpop.eup %7250  ;;  %v3285_v63 = vsel %vm2965_vm3, %v8602_v11, %v3221_v52  ;;  %v8661_v18 = vmul.f32 1.050701, %v3287_v14  ;;  %3658 = vmatpush1.bf16.msra.mxu1 %v6954_v8 }
 0x332   : > { %v8648_v55 = vadd.f32 %v6619_v54, %v8581_v60  ;;  %v2741_v6 = vpop.f32.mrb[73].mxu1  ;;  %v7253_v7 = vpop.eup %7252  ;;  %v8656_v13 = vmul.f32 1.050701, %v3285_v63  ;;  %v6150_v47 = vadd.f32 -1.0, %v7251_v9 }
 0x333   : > { %v8659_v3 = vadd.f32 %v8581_v60, %v2741_v6  ;;  %v6620_v11 = vpop.f32.mrb[74].mxu1  ;;  %v6148_v21 = vadd.f32 -1.0, %v7253_v7  ;;  %v7255_v25 = vpop.eup %7254  ;;  %v3413_v33 = vpack.c.bf16 %v8661_v18, %v8670_v30 }
 0x334   : > { %v3048_v16 = vmul.f32 1.442695, %v8648_v55  ;;  %v8665_v5 = vadd.f32 %v6620_v11, %v8581_v60  ;;  %v2744_v17 = vpop.f32.mrb[75].mxu1  ;;  %v3412_v15 = vpack.c.bf16 %v8656_v13, %v8654_v12  ;;  %v3226_v23 = vmul.f32 1.6732632, %v6150_v47 }
 0x335   : > { %v3044_v62 = vmul.f32 1.442695, %v8659_v3  ;;  %v6151_v19 = vadd.f32 -1.0, %v7255_v25  ;;  %v8674_v24 = vadd.f32 %v8581_v60, %v2744_v17  ;;  %v3224_v38 = vmul.f32 1.6732632, %v6148_v21  ;;  %v7257_v27 = vpop.eup %7256 }
 0x336   : > { %7258 = vpow2.f32 %v3048_v16  ;;  %v3050_v32 = vmul.f32 1.442695, %v8665_v5  ;;  %v3290_v34 = vsel %vm2970_vm4, %v8609_v22, %v3226_v23  ;;  %v6149_v41 = vadd.f32 -1.0, %v7257_v27  ;;  %v8691_v22 = vld [vmem:[%s10223_s9] sm:$0xff]  }
 0x337   : > { %7260 = vpow2.f32 %v3044_v62  ;;  %v3227_v28 = vmul.f32 1.6732632, %v6151_v19  ;;  %v3046_v40 = vmul.f32 1.442695, %v8674_v24  ;;  %v8683_v36 = vmul.f32 1.050701, %v3290_v34  ;;  %6673 = vmatprep.subr.bf16.mxu0 %v8691_v22  ;;  %6753 = vmatprep.subr.bf16.mxu1 %v8691_v22 }
 0x338   : > { %7262 = vpow2.f32 %v3050_v32  ;;  %v3288_v46 = vsel %vm2968_vm6, %v8612_v20, %v3224_v38  ;;  %v3225_v49 = vmul.f32 1.6732632, %v6149_v41  ;;  %6674 = vmatpush3.bf16.msra.mxu0 %v8691_v22  ;;  %vm2974_vm8 = vcmp.gt.f32.partialorder %v8648_v55, 0.0 }
 0x339   : > { %v3291_v43 = vsel %vm2971_vm5, %v8616_v29, %v3227_v28  ;;  %7264 = vpow2.f32 %v3046_v40  ;;  %v8701_v51 = vmul.f32 1.050701, %v3288_v46  ;;  %vm2975_vm9 = vcmp.gt.f32.partialorder %v8665_v5, 0.0 }
 0x33a   : > { %v8686_v44 = vmul.f32 1.050701, %v3291_v43  ;;  %v3289_v35 = vsel %vm2969_vm7, %v8627_v42, %v3225_v49  ;;  %vm2972_vm10 = vcmp.gt.f32.partialorder %v8659_v3, 0.0  ;;  %vm2973_vm11 = vcmp.gt.f32.partialorder %v8674_v24, 0.0 }
 0x33b   : > { %v8703_v48 = vmul.f32 1.050701, %v3289_v35 }
 0x33d   : > { %v3414_v59 = vpack.c.bf16 %v8703_v48, %v8701_v51 }
 0x340   : > { %v7259_v31 = vpop.eup %7258 }
 0x341   : > { %v7261_v20 = vpop.eup %7260  ;;  %v6154_v26 = vadd.f32 -1.0, %v7259_v31  ;;  %v6623_v50 = vpop.f32.mrb[76].mxu1 }
 0x342   : > { %v7263_v56 = vpop.eup %7262  ;;  %v6152_v37 = vadd.f32 -1.0, %v7261_v20  ;;  %v2766_v57 = vadd.f32 %v6623_v50, %v8581_v60  ;;  %v2757_v45 = vpop.f32.mrb[77].mxu1 }
 0x343   : > { %v3230_v53 = vmul.f32 1.6732632, %v6154_v26  ;;  %v6155_v42 = vadd.f32 -1.0, %v7263_v56  ;;  %v2758_v58 = vadd.f32 %v8581_v60, %v2757_v45  ;;  %v6624_v39 = vpop.f32.mrb[78].mxu1  ;;  %v7265_v9 = vpop.eup %7264 }
 0x344   : > { %v3056_v0 = vmul.f32 1.442695, %v2766_v57  ;;  %v2769_v61 = vadd.f32 %v6624_v39, %v8581_v60  ;;  %v2760_v2 = vpop.f32.mrb[79].mxu1  ;;  %v3228_v52 = vmul.f32 1.6732632, %v6152_v37  ;;  %v6153_v63 = vadd.f32 -1.0, %v7265_v9 }
 0x345   : > { %v3294_v4 = vsel %vm2974_vm8, %v8648_v55, %v3230_v53  ;;  %v3231_v14 = vmul.f32 1.6732632, %v6155_v42  ;;  %v3052_v54 = vmul.f32 1.442695, %v2758_v58  ;;  %v2761_v55 = vadd.f32 %v8581_v60, %v2760_v2  ;;  %v8752_v9 = vld [vmem:[%s10223_s9 + $0x8] sm:$0xff]  }
 0x346   : > { %7266 = vpow2.f32 %v3056_v0  ;;  %v8715_v6 = vmul.f32 1.050701, %v3294_v4  ;;  %v3058_v7 = vmul.f32 1.442695, %v2769_v61  ;;  %v3292_v47 = vsel %vm2972_vm10, %v8659_v3, %v3228_v52  ;;  %6675 = vmatprep.subr.bf16.mxu0 %v8752_v9 }
 0x347   : > { %v3295_v10 = vsel %vm2975_vm9, %v8665_v5, %v3231_v14  ;;  %7268 = vpow2.f32 %v3052_v54  ;;  %v3229_v11 = vmul.f32 1.6732632, %v6153_v63  ;;  %v3054_v16 = vmul.f32 1.442695, %v2761_v55  ;;  %6676 = vmatpush3.bf16.msra.mxu0 %v8752_v9 }
 0x348   : > { %v8717_v8 = vmul.f32 1.050701, %v3295_v10  ;;  %7270 = vpow2.f32 %v3058_v7  ;;  %v8725_v23 = vmul.f32 1.050701, %v3292_v47  ;;  %vm2978_vm12 = vcmp.gt.f32.partialorder %v2766_v57, 0.0 }
 0x349   : > { %v3293_v5 = vsel %vm2973_vm11, %v8674_v24, %v3229_v11  ;;  %7272 = vpow2.f32 %v3054_v16  ;;  %vm2976_vm13 = vcmp.gt.f32.partialorder %v2758_v58, 0.0  ;;  %vm2979_vm14 = vcmp.gt.f32.partialorder %v2769_v61, 0.0 }
 0x34a   : > { %v8727_v21 = vmul.f32 1.050701, %v3293_v5  ;;  %vm2977_vm15 = vcmp.gt.f32.partialorder %v2761_v55, 0.0 }
 0x350   : > { %v7267_v25 = vpop.eup %7266 }
 0x351   : > { %v7269_v3 = vpop.eup %7268  ;;  %v6158_v32 = vadd.f32 -1.0, %v7267_v25  ;;  %v6627_v19 = vpop.f32.mrb[80].mxu1 }
 0x352   : > { %v6156_v34 = vadd.f32 -1.0, %v7269_v3  ;;  %v2782_v38 = vadd.f32 %v6627_v19, %v8581_v60  ;;  %v2773_v28 = vpop.f32.mrb[81].mxu1  ;;  %v7271_v43 = vpop.eup %7270 }
 0x353   : > { %v3234_v27 = vmul.f32 1.6732632, %v6158_v32  ;;  %v8733_v40 = vadd.f32 %v8581_v60, %v2773_v28  ;;  %v6628_v24 = vpop.f32.mrb[82].mxu1  ;;  %v6159_v31 = vadd.f32 -1.0, %v7271_v43  ;;  %v7273_v26 = vpop.eup %7272 }
 0x354   : > { %v3064_v41 = vmul.f32 1.442695, %v2782_v38  ;;  %v8736_v46 = vadd.f32 %v6628_v24, %v8581_v60  ;;  %v2776_v49 = vpop.f32.mrb[83].mxu1  ;;  %v3232_v35 = vmul.f32 1.6732632, %v6156_v34  ;;  %v6157_v37 = vadd.f32 -1.0, %v7273_v26 }
 0x355   : > { %v3060_v20 = vmul.f32 1.442695, %v8733_v40  ;;  %v3298_v50 = vsel %vm2978_vm12, %v2766_v57, %v3234_v27  ;;  %v3235_v56 = vmul.f32 1.6732632, %v6159_v31  ;;  %v2777_v53 = vadd.f32 %v8581_v60, %v2776_v49 }
 0x356   : > { %7274 = vpow2.f32 %v3064_v41  ;;  %v3066_v45 = vmul.f32 1.442695, %v8736_v46  ;;  %v3296_v42 = vsel %vm2976_vm13, %v2758_v58, %v3232_v35  ;;  %v3233_v0 = vmul.f32 1.6732632, %v6157_v37 }
 0x357   : > { %7276 = vpow2.f32 %v3060_v20  ;;  %v3299_v39 = vsel %vm2979_vm14, %v2769_v61, %v3235_v56  ;;  %v8741_v2 = vmul.f32 1.050701, %v3298_v50  ;;  %v3062_v52 = vmul.f32 1.442695, %v2777_v53 }
 0x358   : > { %v8743_v4 = vmul.f32 1.050701, %v3299_v39  ;;  %7278 = vpow2.f32 %v3066_v45  ;;  %v3297_v57 = vsel %vm2977_vm15, %v2761_v55, %v3233_v0  ;;  %v8745_v14 = vmul.f32 1.050701, %v3296_v42 }
 0x359   : > { %v8747_v54 = vmul.f32 1.050701, %v3297_v57  ;;  %7280 = vpow2.f32 %v3062_v52  ;;  %vm2982_vm0 = vcmp.gt.f32.partialorder %v2782_v38, 0.0  ;;  %vm2980_vm1 = vcmp.gt.f32.partialorder %v8733_v40, 0.0 }
 0x35a   : > { %vm2983_vm2 = vcmp.gt.f32.partialorder %v8736_v46, 0.0  ;;  %vm2981_vm3 = vcmp.gt.f32.partialorder %v2777_v53, 0.0 }
 0x360   : > { %v7275_v10 = vpop.eup %7274 }
 0x361   : > { %v7277_v63 = vpop.eup %7276  ;;  %v6162_v7 = vadd.f32 -1.0, %v7275_v10  ;;  %v6631_v55 = vpop.f32.mrb[84].mxu1 }
 0x362   : > { %v6160_v47 = vadd.f32 -1.0, %v7277_v63  ;;  %v2798_v11 = vadd.f32 %v6631_v55, %v8581_v60  ;;  %v2789_v16 = vpop.f32.mrb[85].mxu1  ;;  %v7279_v32 = vpop.eup %7278 }
 0x363   : > { %v3238_v5 = vmul.f32 1.6732632, %v6162_v7  ;;  %v8762_v25 = vadd.f32 %v8581_v60, %v2789_v16  ;;  %v6632_v3 = vpop.f32.mrb[86].mxu1  ;;  %v6163_v24 = vadd.f32 -1.0, %v7279_v32  ;;  %v7281_v41 = vpop.eup %7280 }
 0x364   : > { %v3072_v19 = vmul.f32 1.442695, %v2798_v11  ;;  %v2801_v34 = vadd.f32 %v6632_v3, %v8581_v60  ;;  %v2792_v28 = vpop.f32.mrb[87].mxu1  ;;  %v3236_v27 = vmul.f32 1.6732632, %v6160_v47  ;;  %v6161_v31 = vadd.f32 -1.0, %v7281_v41 }
 0x365   : > { %v3068_v43 = vmul.f32 1.442695, %v8762_v25  ;;  %v3302_v49 = vsel %vm2982_vm0, %v2782_v38, %v3238_v5  ;;  %v3239_v35 = vmul.f32 1.6732632, %v6163_v24  ;;  %v2793_v26 = vadd.f32 %v8581_v60, %v2792_v28 }
 0x366   : > { %7282 = vpow2.f32 %v3072_v19  ;;  %v3074_v20 = vmul.f32 1.442695, %v2801_v34  ;;  %v3300_v50 = vsel %vm2980_vm1, %v8733_v40, %v3236_v27  ;;  %v3237_v37 = vmul.f32 1.6732632, %v6161_v31 }
 0x367   : > { %7284 = vpow2.f32 %v3068_v43  ;;  %v3303_v56 = vsel %vm2983_vm2, %v8736_v46, %v3239_v35  ;;  %v8771_v45 = vmul.f32 1.050701, %v3302_v49  ;;  %v3070_v38 = vmul.f32 1.442695, %v2793_v26 }
 0x368   : > { %v8773_v42 = vmul.f32 1.050701, %v3303_v56  ;;  %7286 = vpow2.f32 %v3074_v20  ;;  %v3301_v39 = vsel %vm2981_vm3, %v2777_v53, %v3237_v37  ;;  %v8775_v0 = vmul.f32 1.050701, %v3300_v50 }
 0x369   : > { %v8777_v52 = vmul.f32 1.050701, %v3301_v39  ;;  %7288 = vpow2.f32 %v3070_v38  ;;  %vm2986_vm4 = vcmp.gt.f32.partialorder %v2798_v11, 0.0  ;;  %vm2984_vm5 = vcmp.gt.f32.partialorder %v8762_v25, 0.0 }
 0x36a   : > { %vm2987_vm6 = vcmp.gt.f32.partialorder %v2801_v34, 0.0  ;;  %vm2985_vm7 = vcmp.gt.f32.partialorder %v2793_v26, 0.0 }
 0x370   : > { %v7283_v46 = vpop.eup %7282 }
 0x371   : > { %v7285_v10 = vpop.eup %7284  ;;  %v6166_v63 = vadd.f32 -1.0, %v7283_v46  ;;  %v6635_v7 = vpop.f32.mrb[88].mxu1 }
 0x372   : > { %v6164_v55 = vadd.f32 -1.0, %v7285_v10  ;;  %v2814_v47 = vadd.f32 %v6635_v7, %v8581_v60  ;;  %v2805_v16 = vpop.f32.mrb[89].mxu1  ;;  %v7287_v32 = vpop.eup %7286 }
 0x373   : > { %v3242_v53 = vmul.f32 1.6732632, %v6166_v63  ;;  %v8785_v5 = vadd.f32 %v8581_v60, %v2805_v16  ;;  %v6636_v3 = vpop.f32.mrb[90].mxu1  ;;  %v6167_v43 = vadd.f32 -1.0, %v7287_v32  ;;  %v7289_v49 = vpop.eup %7288 }
 0x374   : > { %v3080_v19 = vmul.f32 1.442695, %v2814_v47  ;;  %v8788_v28 = vadd.f32 %v6636_v3, %v8581_v60  ;;  %v2808_v27 = vpop.f32.mrb[91].mxu1  ;;  %v3240_v24 = vmul.f32 1.6732632, %v6164_v55  ;;  %v6165_v20 = vadd.f32 -1.0, %v7289_v49 }
 0x375   : > { %v3076_v41 = vmul.f32 1.442695, %v8785_v5  ;;  %v3306_v35 = vsel %vm2986_vm4, %v2798_v11, %v3242_v53  ;;  %v3243_v31 = vmul.f32 1.6732632, %v6167_v43  ;;  %v2809_v56 = vadd.f32 %v8581_v60, %v2808_v27 }
 0x376   : > { %7290 = vpow2.f32 %v3080_v19  ;;  %v3082_v50 = vmul.f32 1.442695, %v8788_v28  ;;  %v3304_v37 = vsel %vm2984_vm5, %v8762_v25, %v3240_v24  ;;  %v3241_v39 = vmul.f32 1.6732632, %v6165_v20  ;;  %v8808_v25 = vld [vmem:[%s10223_s9 + $0x10] sm:$0xff]  }
 0x377   : > { %7292 = vpow2.f32 %v3076_v41  ;;  %v3307_v38 = vsel %vm2987_vm6, %v2801_v34, %v3243_v31  ;;  %v8795_v46 = vmul.f32 1.050701, %v3306_v35  ;;  %v3078_v11 = vmul.f32 1.442695, %v2809_v56  ;;  %6677 = vmatprep.subr.bf16.mxu0 %v8808_v25 }
 0x378   : > { %v8797_v10 = vmul.f32 1.050701, %v3307_v38  ;;  %7294 = vpow2.f32 %v3082_v50  ;;  %v3305_v63 = vsel %vm2985_vm7, %v2793_v26, %v3241_v39  ;;  %v8799_v7 = vmul.f32 1.050701, %v3304_v37  ;;  %6678 = vmatpush3.bf16.msra.mxu0 %v8808_v25 }
 0x379   : > { %v8801_v55 = vmul.f32 1.050701, %v3305_v63  ;;  %7296 = vpow2.f32 %v3078_v11  ;;  %vm2990_vm8 = vcmp.gt.f32.partialorder %v2814_v47, 0.0  ;;  %vm2988_vm9 = vcmp.gt.f32.partialorder %v8785_v5, 0.0 }
 0x37a   : > { %vm2991_vm10 = vcmp.gt.f32.partialorder %v8788_v28, 0.0  ;;  %vm2989_vm11 = vcmp.gt.f32.partialorder %v2809_v56, 0.0 }
 0x380   : > { %v7291_v53 = vpop.eup %7290 }
 0x381   : > { %v7293_v26 = vpop.eup %7292  ;;  %v6170_v3 = vadd.f32 -1.0, %v7291_v53  ;;  %v6639_v32 = vpop.f32.mrb[92].mxu1 }
 0x382   : > { %v6168_v19 = vadd.f32 -1.0, %v7293_v26  ;;  %v2830_v27 = vadd.f32 %v6639_v32, %v8581_v60  ;;  %v2821_v24 = vpop.f32.mrb[93].mxu1  ;;  %v7295_v35 = vpop.eup %7294 }
 0x383   : > { %v3246_v43 = vmul.f32 1.6732632, %v6170_v3  ;;  %v8816_v41 = vadd.f32 %v8581_v60, %v2821_v24  ;;  %v6640_v49 = vpop.f32.mrb[94].mxu1  ;;  %v6171_v38 = vadd.f32 -1.0, %v7295_v35  ;;  %v7297_v11 = vpop.eup %7296 }
 0x384   : > { %v3088_v31 = vmul.f32 1.442695, %v2830_v27  ;;  %v2833_v20 = vadd.f32 %v6640_v49, %v8581_v60  ;;  %v2824_v50 = vpop.f32.mrb[95].mxu1  ;;  %v3244_v37 = vmul.f32 1.6732632, %v6168_v19  ;;  %v6169_v26 = vadd.f32 -1.0, %v7297_v11 }
 0x385   : > { %v3084_v39 = vmul.f32 1.442695, %v8816_v41  ;;  %v3310_v63 = vsel %vm2990_vm8, %v2814_v47, %v3246_v43  ;;  %v3247_v53 = vmul.f32 1.6732632, %v6171_v38  ;;  %v2825_v32 = vadd.f32 %v8581_v60, %v2824_v50 }
 0x386   : > { %7298 = vpow2.f32 %v3088_v31  ;;  %v3090_v3 = vmul.f32 1.442695, %v2833_v20  ;;  %v3308_v24 = vsel %vm2988_vm9, %v8785_v5, %v3244_v37  ;;  %v3245_v49 = vmul.f32 1.6732632, %v6169_v26 }
 0x387   : > { %7300 = vpow2.f32 %v3084_v39  ;;  %v3311_v19 = vsel %vm2991_vm10, %v8788_v28, %v3247_v53  ;;  %v8825_v35 = vmul.f32 1.050701, %v3310_v63  ;;  %v3086_v47 = vmul.f32 1.442695, %v2825_v32 }
 0x388   : > { %v8827_v31 = vmul.f32 1.050701, %v3311_v19  ;;  %7302 = vpow2.f32 %v3090_v3  ;;  %v3309_v43 = vsel %vm2989_vm11, %v2809_v56, %v3245_v49  ;;  %v8829_v38 = vmul.f32 1.050701, %v3308_v24 }
 0x389   : > { %v8831_v39 = vmul.f32 1.050701, %v3309_v43  ;;  %7304 = vpow2.f32 %v3086_v47  ;;  %vm2994_vm12 = vcmp.gt.f32.partialorder %v2830_v27, 0.0  ;;  %vm2992_vm13 = vcmp.gt.f32.partialorder %v8816_v41, 0.0 }
 0x38a   : > { %vm2995_vm14 = vcmp.gt.f32.partialorder %v2833_v20, 0.0  ;;  %vm2993_vm15 = vcmp.gt.f32.partialorder %v2825_v32, 0.0 }
 0x390   : > { %v7299_v28 = vpop.eup %7298 }
 0x391   : > { %v7301_v37 = vpop.eup %7300  ;;  %v6174_v11 = vadd.f32 -1.0, %v7299_v28  ;;  %v6643_v63 = vpop.f32.mrb[96].mxu1 }
 0x392   : > { %v6172_v53 = vadd.f32 -1.0, %v7301_v37  ;;  %v2846_v26 = vadd.f32 %v6643_v63, %v8581_v60  ;;  %v2837_v3 = vpop.f32.mrb[97].mxu1  ;;  %v7303_v49 = vpop.eup %7302 }
 0x393   : > { %v3250_v56 = vmul.f32 1.6732632, %v6174_v11  ;;  %v2838_v24 = vadd.f32 %v8581_v60, %v2837_v3  ;;  %v6644_v19 = vpop.f32.mrb[98].mxu1  ;;  %v6175_v5 = vadd.f32 -1.0, %v7303_v49  ;;  %v7305_v34 = vpop.eup %7304 }
 0x394   : > { %v3096_v47 = vmul.f32 1.442695, %v2846_v26  ;;  %v8840_v43 = vadd.f32 %v6644_v19, %v8581_v60  ;;  %v2840_v1 = vpop.f32.mrb[99].mxu1  ;;  %v3248_v50 = vmul.f32 1.6732632, %v6172_v53  ;;  %v6173_v63 = vadd.f32 -1.0, %v7305_v34 }
 0x395   : > { %v3092_v16 = vmul.f32 1.442695, %v2838_v24  ;;  %v3314_v28 = vsel %vm2994_vm12, %v2830_v27, %v3250_v56  ;;  %v3251_v37 = vmul.f32 1.6732632, %v6175_v5  ;;  %v2841_v3 = vadd.f32 %v8581_v60, %v2840_v1 }
 0x396   : > { %7306 = vpow2.f32 %v3096_v47  ;;  %v3098_v11 = vmul.f32 1.442695, %v8840_v43  ;;  %v3312_v19 = vsel %vm2992_vm13, %v8816_v41, %v3248_v50  ;;  %v3249_v53 = vmul.f32 1.6732632, %v6173_v63 }
 0x397   : > { %7308 = vpow2.f32 %v3092_v16  ;;  %v3315_v57 = vsel %vm2995_vm14, %v2833_v20, %v3251_v37  ;;  %v8846_v49 = vmul.f32 1.050701, %v3314_v28  ;;  %v3094_v27 = vmul.f32 1.442695, %v2841_v3  ;;  %v8861_v20 = vld [vmem:[%s10223_s9 + $0x18] sm:$0xff]  }
 0x398   : > { %v8848_v40 = vmul.f32 1.050701, %v3315_v57  ;;  %7310 = vpow2.f32 %v3098_v11  ;;  %v3313_v34 = vsel %vm2993_vm15, %v2825_v32, %v3249_v53  ;;  %v8850_v16 = vmul.f32 1.050701, %v3312_v19  ;;  %6679 = vmatprep.subr.bf16.mxu0 %v8861_v20 }
 0x399   : > { %v8852_v5 = vmul.f32 1.050701, %v3313_v34  ;;  %7312 = vpow2.f32 %v3094_v27  ;;  %6680 = vmatpush3.bf16.msra.mxu0 %v8861_v20  ;;  %vm2998_vm0 = vcmp.gt.f32.partialorder %v2846_v26, 0.0  ;;  %vm2996_vm1 = vcmp.gt.f32.partialorder %v2838_v24, 0.0 }
 0x39a   : > { %vm2999_vm2 = vcmp.gt.f32.partialorder %v8840_v43, 0.0  ;;  %vm2997_vm3 = vcmp.gt.f32.partialorder %v2841_v3, 0.0 }
 0x3a0   : > { %v7307_v57 = vpop.eup %7306 }
 0x3a1   : > { %v7309_v50 = vpop.eup %7308  ;;  %v6178_v56 = vadd.f32 -1.0, %v7307_v57  ;;  %v6647_v32 = vpop.f32.mrb[100].mxu1 }
 0x3a2   : > { %v6176_v47 = vadd.f32 -1.0, %v7309_v50  ;;  %v8865_v28 = vadd.f32 %v6647_v32, %v8581_v60  ;;  %v2853_v37 = vpop.f32.mrb[101].mxu1  ;;  %v7311_v53 = vpop.eup %7310 }
 0x3a3   : > { %v3254_v63 = vmul.f32 1.6732632, %v6178_v56  ;;  %v8869_v11 = vadd.f32 %v8581_v60, %v2853_v37  ;;  %v6648_v19 = vpop.f32.mrb[102].mxu1  ;;  %v6179_v32 = vadd.f32 -1.0, %v7311_v53  ;;  %v7313_v58 = vpop.eup %7312 }
 0x3a4   : > { %v3252_v27 = vmul.f32 1.6732632, %v6176_v47  ;;  %v3104_v34 = vmul.f32 1.442695, %v8865_v28  ;;  %v8873_v57 = vadd.f32 %v6648_v19, %v8581_v60  ;;  %v2856_v50 = vpop.f32.mrb[103].mxu1  ;;  %v6177_v47 = vadd.f32 -1.0, %v7313_v58 }
 0x3a5   : > { %v3318_v1 = vsel %vm2998_vm0, %v2846_v26, %v3254_v63  ;;  %v3100_v41 = vmul.f32 1.442695, %v8869_v11  ;;  %v3255_v17 = vmul.f32 1.6732632, %v6179_v32  ;;  %v8883_v19 = vld [vmem:[%s10223_s9 + $0x20] sm:$0xff]   ;;  %v8888_v63 = vadd.f32 %v8581_v60, %v2856_v50 }
 0x3a6   : > { %v8876_v56 = vmul.f32 1.050701, %v3318_v1  ;;  %v3316_v37 = vsel %vm2996_vm1, %v2838_v24, %v3252_v27  ;;  %7314 = vpow2.f32 %v3104_v34  ;;  %v3106_v26 = vmul.f32 1.442695, %v8873_v57  ;;  %6681 = vmatprep.subr.bf16.mxu0 %v8883_v19 }
 0x3a7   : > { %v8878_v61 = vmul.f32 1.050701, %v3316_v37  ;;  %7316 = vpow2.f32 %v3100_v41  ;;  %v3319_v1 = vsel %vm2999_vm2, %v8840_v43, %v3255_v17  ;;  %v3253_v53 = vmul.f32 1.6732632, %v6177_v47  ;;  %6682 = vmatpush3.bf16.msra.mxu0 %v8883_v19 }
 0x3a8   : > { %v3446_v24 = vmul.f32 %v8876_v56, %v8670_v30  ;;  %v8896_v41 = vmul.f32 1.050701, %v3319_v1  ;;  %7318 = vpow2.f32 %v3106_v26  ;;  %v3102_v27 = vmul.f32 1.442695, %v8888_v63 }
 0x3a9   : > { %v3444_v58 = vmul.f32 %v8878_v61, %v8654_v12  ;;  %v3317_v34 = vsel %vm2997_vm3, %v2841_v3, %v3253_v53  ;;  %vm3002_vm4 = vcmp.gt.f32.partialorder %v8865_v28, 0.0  ;;  %vm3000_vm5 = vcmp.gt.f32.partialorder %v8869_v11, 0.0 }
 0x3aa   : > { %v8900_v50 = vmul.f32 1.050701, %v3317_v34  ;;  %7320 = vpow2.f32 %v3102_v27  ;;  %v3447_v17 = vmul.f32 %v8896_v41, %v8661_v18  ;;  %vm3003_vm6 = vcmp.gt.f32.partialorder %v8873_v57, 0.0 }
 0x3ab   : > { %vm3001_vm7 = vcmp.gt.f32.partialorder %v8888_v63, 0.0 }
 0x3ac   : > { %v3445_v32 = vmul.f32 %v8900_v50, %v8656_v13  ;;  %v8908_v37 = vpack.c.bf16 %v3447_v17, %v3446_v24 }
 0x3ae   : > { %v8912_v1 = vpack.c.bf16 %v3445_v32, %v3444_v58 }
 0x3b0   : > { %v7315_v26 = vpop.eup %7314  ;;  %3659 = vmatprep.mubr.bf16.mxu1 %v8912_v1 }
 0x3b1   : > { %v6651_v3 = vpop.f32.mrb[104].mxu1  ;;  %v7317_v53 = vpop.eup %7316  ;;  %v6182_v27 = vadd.f32 -1.0, %v7315_v26  ;;  %3660 = vmatmul.mubr.bf16.vlgmr.msra.gmra.mrb[128].mxu1 %v3412_v15 }
 0x3b2   : > { %v8915_v34 = vadd.f32 %v6651_v3, %v8581_v60  ;;  %v2869_v62 = vpop.f32.mrb[105].mxu1  ;;  %v6180_v29 = vadd.f32 -1.0, %v7317_v53  ;;  %v7319_v3 = vpop.eup %7318  ;;  %3667 = vmatprep.mubr.bf16.mxu1 %v8908_v37  ;;  %6761 = vmatpush3.bf16.msra.mxu1 %v8691_v22 }
 0x3b3   : > { %v8919_v43 = vadd.f32 %v8581_v60, %v2869_v62  ;;  %v6652_v24 = vpop.f32.mrb[106].mxu1  ;;  %v3258_v17 = vmul.f32 1.6732632, %v6182_v27  ;;  %v6183_v13 = vadd.f32 -1.0, %v7319_v3  ;;  %6754 = vmatprep.subr.bf16.mxu1 %v8752_v9 }
 0x3b4   : > { %v3112_v58 = vmul.f32 1.442695, %v8915_v34  ;;  %v8926_v32 = vadd.f32 %v6652_v24, %v8581_v60  ;;  %v2872_v26 = vpop.f32.mrb[107].mxu1  ;;  %v3256_v53 = vmul.f32 1.6732632, %v6180_v29  ;;  %v7321_v15 = vpop.eup %7320  ;;  %vm3006_vm8 = vcmp.gt.f32.partialorder %v8915_v34, 0.0 }
 0x3b5   : > { %v3108_v62 = vmul.f32 1.442695, %v8919_v43  ;;  %v8932_v27 = vadd.f32 %v8581_v60, %v2872_v26  ;;  %v3322_v12 = vsel %vm3002_vm4, %v8865_v28, %v3258_v17  ;;  %v3259_v26 = vmul.f32 1.6732632, %v6183_v13 }
 0x3b6   : > { %7322 = vpow2.f32 %v3112_v58  ;;  %v8938_v24 = vmul.f32 1.050701, %v3322_v12  ;;  %v3320_v29 = vsel %vm3000_vm5, %v8869_v11, %v3256_v53  ;;  %v3114_v47 = vmul.f32 1.442695, %v8926_v32  ;;  %6762 = vmatpush3.bf16.msra.mxu1 %v8752_v9 }
 0x3b7   : > { %7324 = vpow2.f32 %v3108_v62  ;;  %v8942_v60 = vmul.f32 1.050701, %v3320_v29  ;;  %v6181_v22 = vadd.f32 -1.0, %v7321_v15  ;;  %v3110_v28 = vmul.f32 1.442695, %v8932_v27  ;;  %6755 = vmatprep.subr.bf16.mxu1 %v8808_v25 }
 0x3b8   : > { %7326 = vpow2.f32 %v3114_v47  ;;  %v3450_v17 = vmul.f32 %v8938_v24, %v8683_v36  ;;  %v3323_v58 = vsel %vm3003_vm6, %v8873_v57, %v3259_v26  ;;  %vm3004_vm9 = vcmp.gt.f32.partialorder %v8919_v43, 0.0 }
 0x3b9   : > { %v3257_v11 = vmul.f32 1.6732632, %v6181_v22  ;;  %v3448_v3 = vmul.f32 %v8942_v60, %v8701_v51  ;;  %v8953_v53 = vmul.f32 1.050701, %v3323_v58  ;;  %7328 = vpow2.f32 %v3110_v28  ;;  %3668 = vmatmul.mubr.bf16.gmra.mrb[132].mxu1 %v3413_v33 }
 0x3ba   : > { %6763 = vmatpush3.bf16.msra.mxu1 %v8808_v25  ;;  %vm3007_vm10 = vcmp.gt.f32.partialorder %v8926_v32, 0.0  ;;  %vm3005_vm11 = vcmp.gt.f32.partialorder %v8932_v27, 0.0 }
 0x3bb   : > { %v3321_v47 = vsel %vm3001_vm7, %v8888_v63, %v3257_v11  ;;  %v3451_v57 = vmul.f32 %v8953_v53, %v8686_v44  ;;  %6756 = vmatprep.subr.bf16.mxu1 %v8861_v20 }
 0x3bc   : > { %v8960_v9 = vmul.f32 1.050701, %v3321_v47 }
 0x3bd   : > { %v8970_v63 = vpack.c.bf16 %v3451_v57, %v3450_v17 }
 0x3be   : > { %v3449_v12 = vmul.f32 %v8960_v9, %v8703_v48  ;;  %6764 = vmatpush3.bf16.msra.mxu1 %v8861_v20  ;;  %v8988_v20 = vld [vmem:[%s10220_s6] ss:$0 sm:$0xff] }
 0x3bf   : > { %6757 = vmatprep.subr.bf16.mxu1 %v8883_v19 }
 0x3c0   : > { %v7323_v30 = vpop.eup %7322  ;;  %v8974_v15 = vpack.c.bf16 %v3449_v12, %v3448_v3 }
 0x3c1   : > { %v7325_v33 = vpop.eup %7324  ;;  %v6186_v13 = vadd.f32 -1.0, %v7323_v30 }
 0x3c2   : > { %v6184_v25 = vadd.f32 -1.0, %v7325_v33  ;;  %v7327_v29 = vpop.eup %7326  ;;  %3675 = vmatprep.mubr.bf16.mxu1 %v8974_v15  ;;  %v6655_v17 = vpop.f32.mrb[108].mxu1  ;;  %6765 = vmatpush3.bf16.msra.mxu1 %v8883_v19 }
 0x3c3   : > { %v3262_v26 = vmul.f32 1.6732632, %v6186_v13  ;;  %v6187_v28 = vadd.f32 -1.0, %v7327_v29  ;;  %3676 = vmatmul.mubr.bf16.gmra.mrb[136].mxu1 %v3414_v59  ;;  %v7329_v58 = vpop.eup %7328  ;;  %v8991_v3 = vadd.f32 %v8988_v20, %v6655_v17  ;;  %v2885_v47 = vpop.f32.mrb[109].mxu1 }
 0x3c4   : > { %v3260_v22 = vmul.f32 1.6732632, %v6184_v25  ;;  %3683 = vmatprep.mubr.bf16.mxu1 %v8970_v63  ;;  %v6656_v57 = vpop.f32.mrb[110].mxu1  ;;  %v2886_v33 = vadd.f32 %v8988_v20, %v2885_v47 }
 0x3c5   : > { %v3326_v11 = vsel %vm3006_vm8, %v8915_v34, %v3262_v26  ;;  %v3263_v59 = vmul.f32 1.6732632, %v6187_v28  ;;  %v6185_v34 = vadd.f32 -1.0, %v7329_v58  ;;  %v3120_v30 = vmul.f32 1.442695, %v8991_v3  ;;  %v2888_v13 = vpop.f32.mrb[111].mxu1 }
 0x3c6   : > { %v8995_v51 = vmul.f32 1.050701, %v3326_v11  ;;  %v3324_v48 = vsel %vm3004_vm9, %v8919_v43, %v3260_v22  ;;  %v9005_v19 = vadd.f32 %v8988_v20, %v6656_v57  ;;  %v9008_v43 = vadd.f32 %v8988_v20, %v2888_v13  ;;  %v6959_v26 = vld [vmem:[%s10223_s9 + $0x28] sm:$0xff]  }
 0x3c7   : > { %v8998_v12 = vmul.f32 1.050701, %v3324_v48  ;;  %v3327_v25 = vsel %vm3007_vm10, %v8926_v32, %v3263_v59  ;;  %v3261_v29 = vmul.f32 1.6732632, %v6185_v34  ;;  %7330 = vpow2.f32 %v3120_v30  ;;  %6683 = vmatprep.subr.bf16.mxu0 %v6959_v26  ;;  %6758 = vmatprep.subr.bf16.mxu1 %v6959_v26 }
 0x3c8   : > { %10244 = vst [vmem:[#allocation8_spill] sm:$0xff] %v8995_v51  ;;  %v9013_v22 = vmul.f32 1.050701, %v3327_v25  ;;  %v3116_v28 = vmul.f32 1.442695, %v2886_v33  ;;  %6684 = vmatpush3.bf16.msra.mxu0 %v6959_v26  ;;  %6766 = vmatpush3.bf16.msra.mxu1 %v6959_v26  ;;  %v10245_v48 = vpack.c.bf16 %v8686_v44, %v8683_v36  ;;  %v10246_v26 = vpack.c.bf16 %v8727_v21, %v8725_v23 }
 0x3c9   : > { %v3325_v17 = vsel %vm3005_vm11, %v8932_v27, %v3261_v29  ;;  %v3122_v32 = vmul.f32 1.442695, %v9005_v19  ;;  %v3118_v11 = vmul.f32 1.442695, %v9008_v43  ;;  %v3452_v47 = vmul.f32 %v8998_v12, %v8725_v23 }
 0x3ca   : > { %v9018_v58 = vmul.f32 1.050701, %v3325_v17  ;;  %7332 = vpow2.f32 %v3116_v28  ;;  %v3454_v27 = vmul.f32 %v8995_v51, %v8715_v6  ;;  %v3455_v59 = vmul.f32 %v9013_v22, %v8717_v8 }
 0x3cb   : > { %7334 = vpow2.f32 %v3122_v32  ;;  %3684 = vmatmul.mubr.bf16.gmra.mrb[140].mxu1 %v10245_v48  ;;  %vm3010_vm12 = vcmp.gt.f32.partialorder %v8991_v3, 0.0  ;;  %vm3008_vm13 = vcmp.gt.f32.partialorder %v2886_v33, 0.0  ;;  %vm3011_vm14 = vcmp.gt.f32.partialorder %v9005_v19, 0.0 }
 0x3cc   : > { %7336 = vpow2.f32 %v3118_v11  ;;  %v3453_v57 = vmul.f32 %v9018_v58, %v8727_v21  ;;  %v9036_v13 = vpack.c.bf16 %v3455_v59, %v3454_v27  ;;  %vm3009_vm15 = vcmp.gt.f32.partialorder %v9008_v43, 0.0 }
 0x3ce   : > { %v9038_v36 = vpack.c.bf16 %v3453_v57, %v3452_v47 }
 0x3d0   : > { %3691 = vmatprep.mubr.bf16.mxu1 %v9038_v36 }
 0x3d1   : > { %v7331_v44 = vpop.eup %7330  ;;  %v6659_v25 = vpop.f32.mrb[112].mxu1 }
 0x3d2   : > { %v6190_v29 = vadd.f32 -1.0, %v7331_v44  ;;  %v2910_v28 = vadd.f32 %v8988_v20, %v6659_v25  ;;  %v2901_v17 = vpop.f32.mrb[113].mxu1 }
 0x3d3   : > { %3692 = vmatmul.mubr.bf16.gmra.mrb[144].mxu1 %v10246_v26  ;;  %v9047_v11 = vadd.f32 %v8988_v20, %v2901_v17  ;;  %v6660_v47 = vpop.f32.mrb[114].mxu1 }
 0x3d4   : > { %v7333_v32 = vpop.eup %7332  ;;  %3699 = vmatprep.mubr.bf16.mxu1 %v9036_v13  ;;  %v3266_v27 = vmul.f32 1.6732632, %v6190_v29  ;;  %v3128_v57 = vmul.f32 1.442695, %v2910_v28  ;;  %v9052_v25 = vadd.f32 %v8988_v20, %v6660_v47  ;;  %v2904_v26 = vpop.f32.mrb[115].mxu1  ;;  %vm3014_vm0 = vcmp.gt.f32.partialorder %v2910_v28, 0.0 }
 0x3d5   : > { %v7335_v48 = vpop.eup %7334  ;;  %v6188_v59 = vadd.f32 -1.0, %v7333_v32  ;;  %v3124_v21 = vmul.f32 1.442695, %v9047_v11  ;;  %v9060_v51 = vadd.f32 %v8988_v20, %v2904_v26  ;;  %vm3012_vm1 = vcmp.gt.f32.partialorder %v9047_v11, 0.0 }
 0x3d6   : > { %v7337_v44 = vpop.eup %7336  ;;  %v6191_v23 = vadd.f32 -1.0, %v7335_v48  ;;  %v3330_v34 = vsel %vm3010_vm12, %v8991_v3, %v3266_v27  ;;  %7338 = vpow2.f32 %v3128_v57  ;;  %v3130_v48 = vmul.f32 1.442695, %v9052_v25 }
 0x3d7   : > { %v3264_v17 = vmul.f32 1.6732632, %v6188_v59  ;;  %v6189_v30 = vadd.f32 -1.0, %v7337_v44  ;;  %v9055_v62 = vmul.f32 1.050701, %v3330_v34  ;;  %7340 = vpow2.f32 %v3124_v21 }
 0x3d8   : > { %v3267_v29 = vmul.f32 1.6732632, %v6191_v23  ;;  %7342 = vpow2.f32 %v3130_v48  ;;  %v3126_v57 = vmul.f32 1.442695, %v9060_v51  ;;  %vm3015_vm2 = vcmp.gt.f32.partialorder %v9052_v25, 0.0 }
 0x3d9   : > { %v3328_v32 = vsel %vm3008_vm13, %v2886_v33, %v3264_v17  ;;  %v3265_v18 = vmul.f32 1.6732632, %v6189_v30  ;;  %v3458_v34 = vmul.f32 %v9055_v62, %v8741_v2  ;;  %v10247_v33 = vpack.c.bf16 %v8717_v8, %v8715_v6 }
 0x3da   : > { %v9062_v47 = vmul.f32 1.050701, %v3328_v32  ;;  %v3331_v3 = vsel %vm3011_vm14, %v9005_v19, %v3267_v29  ;;  %7344 = vpow2.f32 %v3126_v57  ;;  %v10248_v32 = vpack.c.bf16 %v8747_v54, %v8745_v14 }
 0x3db   : > { %v9068_v27 = vmul.f32 1.050701, %v3331_v3  ;;  %v3329_v59 = vsel %vm3009_vm15, %v9008_v43, %v3265_v18  ;;  %3700 = vmatmul.mubr.bf16.gmra.mrb[148].mxu1 %v10247_v33  ;;  %vm3013_vm3 = vcmp.gt.f32.partialorder %v9060_v51, 0.0 }
 0x3dc   : > { %v9074_v30 = vmul.f32 1.050701, %v3329_v59  ;;  %v3456_v19 = vmul.f32 %v9062_v47, %v8745_v14 }
 0x3dd   : > { %v3459_v44 = vmul.f32 %v9068_v27, %v8743_v4 }
 0x3de   : > { %v3457_v18 = vmul.f32 %v9074_v30, %v8747_v54 }
 0x3df   : > { %v9087_v8 = vpack.c.bf16 %v3459_v44, %v3458_v34 }
 0x3e0   : > { %v9089_v43 = vpack.c.bf16 %v3457_v18, %v3456_v19  ;;  %v7339_v21 = vpop.eup %7338 }
 0x3e1   : > { %v7341_v26 = vpop.eup %7340  ;;  %v6194_v17 = vadd.f32 -1.0, %v7339_v21 }
 0x3e2   : > { %3707 = vmatprep.mubr.bf16.mxu1 %v9089_v43  ;;  %v6192_v29 = vadd.f32 -1.0, %v7341_v26  ;;  %v6663_v3 = vpop.f32.mrb[116].mxu1  ;;  %v7343_v59 = vpop.eup %7342 }
 0x3e3   : > { %3708 = vmatmul.mubr.bf16.gmra.mrb[152].mxu1 %v10248_v32  ;;  %v3270_v48 = vmul.f32 1.6732632, %v6194_v17  ;;  %v9097_v33 = vadd.f32 %v8988_v20, %v6663_v3  ;;  %v2917_v57 = vpop.f32.mrb[117].mxu1  ;;  %v6195_v44 = vadd.f32 -1.0, %v7343_v59  ;;  %v6960_v3 = vld [vmem:[%s10223_s9 + $0x30] sm:$0xff]  }
 0x3e4   : > { %3715 = vmatprep.mubr.bf16.mxu1 %v9087_v8  ;;  %v3268_v34 = vmul.f32 1.6732632, %v6192_v29  ;;  %v9101_v18 = vadd.f32 %v8988_v20, %v2917_v57  ;;  %v6664_v14 = vpop.f32.mrb[118].mxu1  ;;  %v7345_v29 = vpop.eup %7344  ;;  %6685 = vmatprep.subr.bf16.mxu0 %v6960_v3 }
 0x3e5   : > { %v3334_v19 = vsel %vm3014_vm0, %v2910_v28, %v3270_v48  ;;  %v3136_v26 = vmul.f32 1.442695, %v9097_v33  ;;  %v2920_v17 = vpop.f32.mrb[119].mxu1  ;;  %v3271_v28 = vmul.f32 1.6732632, %v6195_v44  ;;  %v9111_v48 = vadd.f32 %v8988_v20, %v6664_v14  ;;  %6759 = vmatprep.subr.bf16.mxu1 %v6960_v3  ;;  %6686 = vmatpush3.bf16.msra.mxu0 %v6960_v3 }
 0x3e6   : > { %v9103_v54 = vmul.f32 1.050701, %v3334_v19  ;;  %v3332_v21 = vsel %vm3012_vm1, %v9047_v11, %v3268_v34  ;;  %v6193_v59 = vadd.f32 -1.0, %v7345_v29  ;;  %v3132_v11 = vmul.f32 1.442695, %v9101_v18  ;;  %6767 = vmatpush3.bf16.msra.mxu1 %v6960_v3 }
 0x3e7   : > { %v9107_v32 = vmul.f32 1.050701, %v3332_v21  ;;  %7346 = vpow2.f32 %v3136_v26  ;;  %v9118_v34 = vadd.f32 %v8988_v20, %v2920_v17  ;;  %v3335_v57 = vsel %vm3015_vm2, %v9052_v25, %v3271_v28 }
 0x3e8   : > { %10249 = vst [vmem:[#allocation9_spill] sm:$0xff] %v9103_v54  ;;  %v3138_v19 = vmul.f32 1.442695, %v9111_v48  ;;  %v9124_v14 = vmul.f32 1.050701, %v3335_v57  ;;  %7348 = vpow2.f32 %v3132_v11  ;;  %v10251_v26 = vpack.c.bf16 %v8743_v4, %v8741_v2 }
 0x3e9   : > { %v3460_v44 = vmul.f32 %v9107_v32, %v8775_v0  ;;  %v3269_v21 = vmul.f32 1.6732632, %v6193_v59  ;;  %v3134_v25 = vmul.f32 1.442695, %v9118_v34  ;;  %v3462_v17 = vmul.f32 %v9103_v54, %v8771_v45 }
 0x3ea   : > { %10250 = vst [vmem:[#allocation10_spill] sm:$0xff] %v9124_v14  ;;  %7350 = vpow2.f32 %v3138_v19  ;;  %v3463_v28 = vmul.f32 %v9124_v14, %v8773_v42  ;;  %vm3018_vm4 = vcmp.gt.f32.partialorder %v9097_v33, 0.0  ;;  %vm3016_vm5 = vcmp.gt.f32.partialorder %v9101_v18, 0.0 }
 0x3eb   : > { %3716 = vmatmul.mubr.bf16.gmra.mrb[156].mxu1 %v10251_v26  ;;  %v3333_v29 = vsel %vm3013_vm3, %v9060_v51, %v3269_v21  ;;  %7352 = vpow2.f32 %v3134_v25  ;;  %vm3019_vm6 = vcmp.gt.f32.partialorder %v9111_v48, 0.0  ;;  %vm3017_vm7 = vcmp.gt.f32.partialorder %v9118_v34, 0.0 }
 0x3ec   : > { %v9138_v2 = vmul.f32 1.050701, %v3333_v29  ;;  %v9140_v4 = vpack.c.bf16 %v3463_v28, %v3462_v17  ;;  %v10253_v29 = vpack.c.bf16 %v8777_v52, %v8775_v0 }
 0x3ee   : > { %10252 = vst [vmem:[#allocation11_spill] sm:$0xff] %v9140_v4  ;;  %v3461_v11 = vmul.f32 %v9138_v2, %v8777_v52 }
 0x3f0   : > { %v9146_v3 = vpack.c.bf16 %v3461_v11, %v3460_v44 }
 0x3f1   : > { %v7347_v51 = vpop.eup %7346 }
 0x3f2   : > { %v6198_v19 = vadd.f32 -1.0, %v7347_v51  ;;  %3723 = vmatprep.mubr.bf16.mxu1 %v9146_v3  ;;  %v7349_v26 = vpop.eup %7348 }
 0x3f3   : > { %v6667_v21 = vpop.f32.mrb[120].mxu1  ;;  %3724 = vmatmul.mubr.bf16.gmra.mrb[160].mxu1 %v10253_v29  ;;  %v6196_v23 = vadd.f32 -1.0, %v7349_v26 }
 0x3f4   : > { %v9153_v25 = vadd.f32 %v8988_v20, %v6667_v21  ;;  %v2933_v17 = vpop.f32.mrb[121].mxu1  ;;  %v7351_v28 = vpop.eup %7350  ;;  %v3274_v59 = vmul.f32 1.6732632, %v6198_v19  ;;  %3731 = vmatprep.mubr.bf16.mxu1 %v9140_v4 }
 0x3f5   : > { %v9157_v44 = vadd.f32 %v8988_v20, %v2933_v17  ;;  %v6668_v11 = vpop.f32.mrb[122].mxu1  ;;  %v6199_v51 = vadd.f32 -1.0, %v7351_v28  ;;  %v7353_v21 = vpop.eup %7352  ;;  %v3272_v19 = vmul.f32 1.6732632, %v6196_v23 }
 0x3f6   : > { %v3144_v57 = vmul.f32 1.442695, %v9153_v25  ;;  %v9162_v0 = vadd.f32 %v8988_v20, %v6668_v11  ;;  %v2936_v52 = vpop.f32.mrb[123].mxu1  ;;  %v3338_v29 = vsel %vm3018_vm4, %v9097_v33, %v3274_v59  ;;  %v6197_v54 = vadd.f32 -1.0, %v7353_v21 }
 0x3f7   : > { %v3140_v26 = vmul.f32 1.442695, %v9157_v44  ;;  %v9167_v17 = vmul.f32 1.050701, %v3338_v29  ;;  %v3275_v6 = vmul.f32 1.6732632, %v6199_v51  ;;  %v3336_v28 = vsel %vm3016_vm5, %v9101_v18, %v3272_v19 }
 0x3f8   : > { %7354 = vpow2.f32 %v3144_v57  ;;  %v3146_v11 = vmul.f32 1.442695, %v9162_v0  ;;  %v9172_v14 = vmul.f32 1.050701, %v3336_v28  ;;  %v3273_v59 = vmul.f32 1.6732632, %v6197_v54 }
 0x3f9   : > { %10254 = vst [vmem:[#allocation12_spill] sm:$0xff] %v9167_v17  ;;  %7356 = vpow2.f32 %v3140_v26  ;;  %v3339_v33 = vsel %vm3019_vm6, %v9111_v48, %v3275_v6  ;;  %v2937_v23 = vadd.f32 %v8988_v20, %v2936_v52  ;;  %v3466_v18 = vmul.f32 %v9167_v17, %v8795_v46 }
 0x3fa   : > { %v9176_v4 = vmul.f32 1.050701, %v3339_v33  ;;  %7358 = vpow2.f32 %v3146_v11  ;;  %v3337_v57 = vsel %vm3017_vm7, %v9118_v34, %v3273_v59  ;;  %v10256_v21 = vpack.c.bf16 %v8773_v42, %v8771_v45 }
 0x3fb   : > { %v3142_v51 = vmul.f32 1.442695, %v2937_v23  ;;  %v3464_v6 = vmul.f32 %v9172_v14, %v8799_v7  ;;  %v9187_v54 = vmul.f32 1.050701, %v3337_v57  ;;  %v10257_v33 = vpack.c.bf16 %v8801_v55, %v8799_v7 }
 0x3fc   : > { %10255 = vst [vmem:[#allocation13_spill] sm:$0xff] %v9176_v4  ;;  %3732 = vmatmul.mubr.bf16.gmra.mrb[164].mxu1 %v10256_v21  ;;  %v3467_v48 = vmul.f32 %v9176_v4, %v8797_v10  ;;  %vm3022_vm8 = vcmp.gt.f32.partialorder %v9153_v25, 0.0  ;;  %vm3020_vm9 = vcmp.gt.f32.partialorder %v9157_v44, 0.0  ;;  %vm3023_vm10 = vcmp.gt.f32.partialorder %v9162_v0, 0.0 }
 0x3fd   : > { %7360 = vpow2.f32 %v3142_v51  ;;  %v3465_v34 = vmul.f32 %v9187_v54, %v8801_v55  ;;  %vm3021_vm11 = vcmp.gt.f32.partialorder %v2937_v23, 0.0 }
 0x3fe   : > { %v9195_v29 = vpack.c.bf16 %v3467_v48, %v3466_v18 }
 0x3ff   : > { %v9199_v42 = vpack.c.bf16 %v3465_v34, %v3464_v6 }
 0x401   : > { %3739 = vmatprep.mubr.bf16.mxu1 %v9199_v42 }
 0x402   : > { %v7355_v19 = vpop.eup %7354 }
 0x403   : > { %v7357_v26 = vpop.eup %7356  ;;  %v6202_v28 = vadd.f32 -1.0, %v7355_v19  ;;  %v6671_v59 = vpop.f32.mrb[124].mxu1 }
 0x404   : > { %v6200_v11 = vadd.f32 -1.0, %v7357_v26  ;;  %3740 = vmatmul.mubr.bf16.gmra.mrb[168].mxu1 %v10257_v33  ;;  %v7359_v57 = vpop.eup %7358  ;;  %v2958_v18 = vadd.f32 %v8988_v20, %v6671_v59  ;;  %v2949_v21 = vpop.f32.mrb[125].mxu1 }
 0x405   : > { %v3278_v51 = vmul.f32 1.6732632, %v6202_v28  ;;  %3747 = vmatprep.mubr.bf16.mxu1 %v9195_v29  ;;  %v6203_v48 = vadd.f32 -1.0, %v7359_v57  ;;  %v2950_v34 = vadd.f32 %v8988_v20, %v2949_v21  ;;  %v6672_v19 = vpop.f32.mrb[126].mxu1 }
 0x406   : > { %v3276_v6 = vmul.f32 1.6732632, %v6200_v11  ;;  %v3152_v7 = vmul.f32 1.442695, %v2958_v18  ;;  %v2961_v55 = vadd.f32 %v8988_v20, %v6672_v19  ;;  %v2952_v28 = vpop.f32.mrb[127].mxu1  ;;  %vm3026_vm12 = vcmp.gt.f32.partialorder %v2958_v18, 0.0 }
 0x407   : > { %v3342_v26 = vsel %vm3022_vm8, %v9153_v25, %v3278_v51  ;;  %v7361_v33 = vpop.eup %7360  ;;  %v3279_v11 = vmul.f32 1.6732632, %v6203_v48  ;;  %v3148_v45 = vmul.f32 1.442695, %v2950_v34  ;;  %v2953_v17 = vadd.f32 %v8988_v20, %v2952_v28 }
 0x408   : > { %v9212_v59 = vmul.f32 1.050701, %v3342_v26  ;;  %v3340_v52 = vsel %vm3020_vm9, %v9157_v44, %v3276_v6  ;;  %v6201_v21 = vadd.f32 -1.0, %v7361_v33  ;;  %7362 = vpow2.f32 %v3152_v7 }
 0x409   : > { %v9216_v57 = vmul.f32 1.050701, %v3340_v52  ;;  %v3343_v25 = vsel %vm3023_vm10, %v9162_v0, %v3279_v11  ;;  %v3154_v51 = vmul.f32 1.442695, %v2961_v55  ;;  %7364 = vpow2.f32 %v3148_v45 }
 0x40a   : > { %v9220_v19 = vmul.f32 1.050701, %v3343_v25  ;;  %v3277_v4 = vmul.f32 1.6732632, %v6201_v21  ;;  %v3150_v6 = vmul.f32 1.442695, %v2953_v17  ;;  %v10258_v52 = vpack.c.bf16 %v8797_v10, %v8795_v46 }
 0x40b   : > { %v3468_v44 = vmul.f32 %v9216_v57, %v8829_v38  ;;  %7366 = vpow2.f32 %v3154_v51  ;;  %v3470_v0 = vmul.f32 %v9212_v59, %v8825_v35  ;;  %v10259_v11 = vpack.c.bf16 %v8831_v39, %v8829_v38 }
 0x40c   : > { %3748 = vmatmul.mubr.bf16.gmra.mrb[172].mxu1 %v10258_v52  ;;  %v3341_v48 = vsel %vm3021_vm11, %v2937_v23, %v3277_v4  ;;  %v3471_v20 = vmul.f32 %v9220_v19, %v8827_v31  ;;  %7368 = vpow2.f32 %v3150_v6  ;;  %vm3024_vm13 = vcmp.gt.f32.partialorder %v2950_v34, 0.0 }
 0x40d   : > { %v9233_v26 = vmul.f32 1.050701, %v3341_v48  ;;  %vm3027_vm14 = vcmp.gt.f32.partialorder %v2961_v55, 0.0  ;;  %vm3025_vm15 = vcmp.gt.f32.partialorder %v2953_v17, 0.0 }
 0x40e   : > { %v9235_v7 = vpack.c.bf16 %v3471_v20, %v3470_v0 }
 0x40f   : > { %v3469_v28 = vmul.f32 %v9233_v26, %v8831_v39  ;;  %v3440_v46 = vpack.c.bf16 %v9233_v26, %v9216_v57 }
 0x411   : > { %v9241_v10 = vpack.c.bf16 %v3469_v28, %v3468_v44 }
 0x412   : > { %v7363_v4 = vpop.eup %7362 }
 0x413   : > { %v6206_v23 = vadd.f32 -1.0, %v7363_v4  ;;  %3755 = vmatprep.mubr.bf16.mxu1 %v9241_v10  ;;  %v7365_v33 = vpop.eup %7364 }
 0x414   : > { %3756 = vmatmul.mubr.bf16.gmra.mrb[176].mxu1 %v10259_v11  ;;  %v6204_v51 = vadd.f32 -1.0, %v7365_v33 }
 0x415   : > { %v7367_v21 = vpop.eup %7366  ;;  %v3282_v25 = vmul.f32 1.6732632, %v6206_v23  ;;  %3763 = vmatprep.mubr.bf16.mxu1 %v9235_v7 }
 0x416   : > { %v6207_v6 = vadd.f32 -1.0, %v7367_v21  ;;  %v7369_v52 = vpop.eup %7368  ;;  %v3280_v44 = vmul.f32 1.6732632, %v6204_v51  ;;  %v10260_v21 = vpack.c.bf16 %v8827_v31, %v8825_v35 }
 0x417   : > { %v3346_v0 = vsel %vm3026_vm12, %v2958_v18, %v3282_v25  ;;  %v6205_v28 = vadd.f32 -1.0, %v7369_v52  ;;  %v6961_v18 = vld [vmem:[%s10223_s9 + $0x38] sm:$0xff]   ;;  %v10261_v52 = vpack.c.bf16 %v8852_v5, %v8850_v16 }
 0x418   : > { %v9248_v48 = vmul.f32 1.050701, %v3346_v0  ;;  %v3283_v20 = vmul.f32 1.6732632, %v6207_v6  ;;  %v3344_v4 = vsel %vm3024_vm13, %v2950_v34, %v3280_v44  ;;  %6687 = vmatprep.subr.bf16.mxu0 %v6961_v18  ;;  %6760 = vmatprep.subr.bf16.mxu1 %v6961_v18  ;;  %v10262_v0 = vpack.c.bf16 %v8848_v40, %v8846_v49 }
 0x419   : > { %v9250_v45 = vmul.f32 1.050701, %v3344_v4  ;;  %v3281_v39 = vmul.f32 1.6732632, %v6205_v28  ;;  %6688 = vmatpush3.bf16.msra.mxu0 %v6961_v18  ;;  %6768 = vmatpush3.bf16.msra.mxu1 %v6961_v18  ;;  %v10263_v44 = vpack.c.bf16 %v8900_v50, %v8878_v61  ;;  %v10267_v61 = vpack.c.bf16 %v9018_v58, %v8998_v12 }
 0x41a   : > { %v3347_v38 = vsel %vm3027_vm14, %v2961_v55, %v3283_v20  ;;  %v3474_v23 = vmul.f32 %v9248_v48, %v8846_v49  ;;  %v10264_v20 = vpack.c.bf16 %v8896_v41, %v8876_v56  ;;  %v10268_v49 = vld [vmem:[#allocation8_spill] sm:$0xff]  ;;  %v10270_v56 = vpack.c.bf16 %v9074_v30, %v9062_v47  ;;  %v10278_v47 = vld [vmem:[#allocation13_spill] sm:$0xff] }
 0x41b   : > { %v9254_v33 = vmul.f32 1.050701, %v3347_v38  ;;  %v3345_v11 = vsel %vm3025_vm15, %v2953_v17, %v3281_v39  ;;  %v3472_v34 = vmul.f32 %v9250_v45, %v8850_v16  ;;  %v10265_v16 = vpack.c.bf16 %v8960_v9, %v8942_v60 }
 0x41c   : > { %3764 = vmatmul.mubr.bf16.gmra.mrb[180].mxu1 %v10260_v21  ;;  %v9264_v55 = vmul.f32 1.050701, %v3345_v11  ;;  %v10271_v41 = vpack.c.bf16 %v9068_v27, %v9055_v62  ;;  %v10272_v50 = vpack.c.bf16 %v9138_v2, %v9107_v32  ;;  %v10277_v9 = vpack.c.bf16 %v9187_v54, %v9172_v14  ;;  %v10279_v27 = vld [vmem:[#allocation12_spill] sm:$0xff] }
 0x41d   : > { %v3475_v25 = vmul.f32 %v9254_v33, %v8848_v40  ;;  %v3443_v51 = vpack.c.bf16 %v9254_v33, %v9248_v48  ;;  %v10266_v40 = vpack.c.bf16 %v8953_v53, %v8938_v24  ;;  %v10275_v24 = vld [vmem:[#allocation9_spill] sm:$0xff]  ;;  %v9330_v53 = vld [vmem:[%s10222_s8] ss:$0 sm:$0xff]  ;;  %v10280_v30 = vpack.c.bf16 %v10278_v47, %v10279_v27 }
 0x41e   : > { %v3473_v17 = vmul.f32 %v9264_v55, %v8852_v5  ;;  %v3442_v31 = vpack.c.bf16 %v9264_v55, %v9250_v45  ;;  %v10269_v5 = vpack.c.bf16 %v9013_v22, %v10268_v49 }
 0x41f   : > { %v9272_v35 = vpack.c.bf16 %v3475_v25, %v3474_v23 }
 0x420   : > { %v9276_v6 = vpack.c.bf16 %v3473_v17, %v3472_v34 }
 0x422   : > { %3771 = vmatprep.mubr.bf16.mxu1 %v9276_v6 }
 0x424   : > { %3772 = vmatmul.mubr.bf16.gmra.mrb[184].mxu1 %v10261_v52 }
 0x425   : > { %3779 = vmatprep.mubr.bf16.mxu1 %v9272_v35 }
 0x42c   : > { %3780 = vmatmul.mubr.bf16.gmra.mrb[188].mxu1 %v10262_v0 }
 0x42d   : > { %3787 = vmatprep.mubr.bf16.mxu1 %v8912_v1  ;;  %v10274_v1 = vld [vmem:[#allocation10_spill] sm:$0xff] }
 0x42e   : > { %v10276_v60 = vpack.c.bf16 %v10274_v1, %v10275_v24 }
 0x434   : > { %3788 = vmatmul.mubr.bf16.gmra.mrb[192].mxu1 %v10263_v44 }
 0x435   : > { %3795 = vmatprep.mubr.bf16.mxu1 %v8908_v37  ;;  %v10273_v37 = vld [vmem:[#allocation11_spill] sm:$0xff] }
 0x43c   : > { %3796 = vmatmul.mubr.bf16.gmra.mrb[196].mxu1 %v10264_v20  ;;  %v10281_v20 = vpack.c.bf16 %v9220_v19, %v9212_v59 }
 0x43d   : > { %3803 = vmatprep.mubr.bf16.mxu1 %v8974_v15 }
 0x444   : > { %3804 = vmatmul.mubr.bf16.gmra.mrb[200].mxu1 %v10265_v16 }
 0x445   : > { %3811 = vmatprep.mubr.bf16.mxu1 %v8970_v63 }
 0x44c   : > { %3812 = vmatmul.mubr.bf16.gmra.mrb[204].mxu1 %v10266_v40 }
 0x44d   : > { %3819 = vmatprep.mubr.bf16.mxu1 %v9038_v36 }
 0x454   : > { %3820 = vmatmul.mubr.bf16.gmra.mrb[208].mxu1 %v10267_v61 }
 0x455   : > { %3827 = vmatprep.mubr.bf16.mxu1 %v9036_v13 }
 0x45c   : > { %3828 = vmatmul.mubr.bf16.gmra.mrb[212].mxu1 %v10269_v5 }
 0x45d   : > { %3835 = vmatprep.mubr.bf16.mxu1 %v9089_v43 }
 0x464   : > { %3836 = vmatmul.mubr.bf16.gmra.mrb[216].mxu1 %v10270_v56 }
 0x465   : > { %3843 = vmatprep.mubr.bf16.mxu1 %v9087_v8 }
 0x46c   : > { %3844 = vmatmul.mubr.bf16.gmra.mrb[220].mxu1 %v10271_v41 }
 0x46d   : > { %3851 = vmatprep.mubr.bf16.mxu1 %v9146_v3 }
 0x474   : > { %3852 = vmatmul.mubr.bf16.gmra.mrb[224].mxu1 %v10272_v50 }
 0x475   : > { %3859 = vmatprep.mubr.bf16.mxu1 %v10273_v37 }
 0x47c   : > { %3860 = vmatmul.mubr.bf16.gmra.mrb[228].mxu1 %v10276_v60 }
 0x47d   : > { %3867 = vmatprep.mubr.bf16.mxu1 %v9199_v42 }
 0x484   : > { %3868 = vmatmul.mubr.bf16.gmra.mrb[232].mxu1 %v10277_v9  ;;  %v3661_v62 = vpop.f32.mrb[128].mxu1 }
 0x485   : > { %3875 = vmatprep.mubr.bf16.mxu1 %v9195_v29  ;;  %v3662_v63 = vadd.f32 %v9330_v53, %v3661_v62  ;;  %v3663_v15 = vpop.f32.mrb[129].mxu1 }
 0x486   : > { %v3664_v12 = vpop.f32.mrb[130].mxu1 }
 0x487   : > { %v3980_v22 = vmul.f32 1.442695, %v3662_v63  ;;  %v3665_v58 = vadd.f32 %v9330_v53, %v3664_v12  ;;  %v3666_v13 = vpop.f32.mrb[131].mxu1  ;;  %vm3916_vm0 = vcmp.gt.f32.partialorder %v3662_v63, 0.0 }
 0x489   : > { %7370 = vpow2.f32 %v3980_v22  ;;  %v3982_v36 = vmul.f32 1.442695, %v3665_v58  ;;  %vm3917_vm1 = vcmp.gt.f32.partialorder %v3665_v58, 0.0 }
 0x48b   : > { %7372 = vpow2.f32 %v3982_v36 }
 0x48c   : > { %3876 = vmatmul.mubr.bf16.gmra.mrb[236].mxu1 %v10280_v30  ;;  %v3669_v8 = vpop.f32.mrb[132].mxu1 }
 0x48d   : > { %3883 = vmatprep.mubr.bf16.mxu1 %v9241_v10  ;;  %v3670_v43 = vadd.f32 %v9330_v53, %v3669_v8  ;;  %v3671_v32 = vpop.f32.mrb[133].mxu1 }
 0x48e   : > { %v3672_v14 = vpop.f32.mrb[134].mxu1 }
 0x48f   : > { %v3984_v2 = vmul.f32 1.442695, %v3670_v43  ;;  %v3673_v3 = vadd.f32 %v9330_v53, %v3672_v14  ;;  %v3674_v54 = vpop.f32.mrb[135].mxu1  ;;  %vm3918_vm2 = vcmp.gt.f32.partialorder %v3670_v43, 0.0 }
 0x491   : > { %7374 = vpow2.f32 %v3984_v2  ;;  %v3986_v29 = vmul.f32 1.442695, %v3673_v3  ;;  %vm3919_vm3 = vcmp.gt.f32.partialorder %v3673_v3, 0.0 }
 0x493   : > { %v7371_v42 = vpop.eup %7370  ;;  %7376 = vpow2.f32 %v3986_v29 }
 0x494   : > { %v6225_v28 = vadd.f32 -1.0, %v7371_v42  ;;  %3884 = vmatmul.mubr.bf16.gmra.mrb[240].mxu1 %v3440_v46 }
 0x495   : > { %v7373_v38 = vpop.eup %7372  ;;  %3891 = vmatprep.mubr.bf16.mxu1 %v9235_v7 }
 0x496   : > { %v3677_v4 = vpop.f32.mrb[136].mxu1  ;;  %v4172_v23 = vmul.f32 1.6732632, %v6225_v28  ;;  %v6226_v18 = vadd.f32 -1.0, %v7373_v38 }
 0x497   : > { %v3678_v10 = vadd.f32 %v9330_v53, %v3677_v4  ;;  %v3679_v39 = vpop.f32.mrb[137].mxu1 }
 0x498   : > { %v3680_v11 = vpop.f32.mrb[138].mxu1  ;;  %v4236_v17 = vsel %vm3916_vm0, %v3662_v63, %v4172_v23  ;;  %v4173_v52 = vmul.f32 1.6732632, %v6226_v18 }
 0x499   : > { %v3988_v21 = vmul.f32 1.442695, %v3678_v10  ;;  %v3681_v34 = vadd.f32 %v9330_v53, %v3680_v11  ;;  %v3682_v25 = vpop.f32.mrb[139].mxu1  ;;  %v4300_v0 = vmul.f32 1.050701, %v4236_v17  ;;  %vm3920_vm4 = vcmp.gt.f32.partialorder %v3678_v10, 0.0 }
 0x49a   : > { %v4237_v26 = vsel %vm3917_vm1, %v3665_v58, %v4173_v52 }
 0x49b   : > { %7378 = vpow2.f32 %v3988_v21  ;;  %v3990_v57 = vmul.f32 1.442695, %v3681_v34  ;;  %v7375_v46 = vpop.eup %7374  ;;  %v4301_v7 = vmul.f32 1.050701, %v4237_v26  ;;  %vm3921_vm5 = vcmp.gt.f32.partialorder %v3681_v34, 0.0 }
 0x49c   : > { %v6227_v44 = vadd.f32 -1.0, %v7375_v46  ;;  %3892 = vmatmul.mubr.bf16.gmra.mrb[244].mxu1 %v10281_v20 }
 0x49d   : > { %7380 = vpow2.f32 %v3990_v57  ;;  %v7377_v40 = vpop.eup %7376  ;;  %3899 = vmatprep.mubr.bf16.mxu1 %v9276_v6  ;;  %v4364_v5 = vpack.c.bf16 %v4301_v7, %v4300_v0 }
 0x49e   : > { %v3685_v16 = vpop.f32.mrb[140].mxu1  ;;  %v4174_v56 = vmul.f32 1.6732632, %v6227_v44  ;;  %v6228_v41 = vadd.f32 -1.0, %v7377_v40 }
 0x49f   : > { %v9355_v61 = vadd.f32 %v9330_v53, %v3685_v16  ;;  %v3687_v49 = vpop.f32.mrb[141].mxu1  ;;  %6689 = vmatprep.mubr.bf16.mxu0 %v4364_v5 }
 0x4a0   : > { %v3688_v50 = vpop.f32.mrb[142].mxu1  ;;  %v4238_v59 = vsel %vm3918_vm2, %v3670_v43, %v4174_v56  ;;  %v4175_v19 = vmul.f32 1.6732632, %v6228_v41 }
 0x4a1   : > { %v3992_v37 = vmul.f32 1.442695, %v9355_v61  ;;  %v3689_v1 = vadd.f32 %v9330_v53, %v3688_v50  ;;  %v3690_v24 = vpop.f32.mrb[143].mxu1  ;;  %v4302_v62 = vmul.f32 1.050701, %v4238_v59  ;;  %vm3922_vm6 = vcmp.gt.f32.partialorder %v9355_v61, 0.0 }
 0x4a2   : > { %v4239_v60 = vsel %vm3919_vm3, %v3673_v3, %v4175_v19 }
 0x4a3   : > { %7382 = vpow2.f32 %v3992_v37  ;;  %v3994_v6 = vmul.f32 1.442695, %v3689_v1  ;;  %v4303_v63 = vmul.f32 1.050701, %v4239_v60  ;;  %vm3923_vm7 = vcmp.gt.f32.partialorder %v3689_v1, 0.0 }
 0x4a4   : > { %3900 = vmatmul.mubr.bf16.gmra.mrb[248].mxu1 %v3442_v31 }
 0x4a5   : > { %v7379_v9 = vpop.eup %7378  ;;  %7384 = vpow2.f32 %v3994_v6  ;;  %v4365_v58 = vpack.c.bf16 %v4303_v63, %v4302_v62  ;;  %3907 = vmatprep.mubr.bf16.mxu1 %v9272_v35 }
 0x4a6   : > { %v6229_v15 = vadd.f32 -1.0, %v7379_v9  ;;  %v3693_v12 = vpop.f32.mrb[144].mxu1 }
 0x4a7   : > { %v7381_v22 = vpop.eup %7380  ;;  %v3694_v13 = vadd.f32 %v9330_v53, %v3693_v12  ;;  %v3695_v36 = vpop.f32.mrb[145].mxu1  ;;  %6690 = vmatmul.mubr.bf16.vlgmr.msra.gmra.mrb[128].mxu0 %v4365_v58 }
 0x4a8   : > { %v4176_v47 = vmul.f32 1.6732632, %v6229_v15  ;;  %v6230_v27 = vadd.f32 -1.0, %v7381_v22  ;;  %v3696_v30 = vpop.f32.mrb[146].mxu1 }
 0x4a9   : > { %v3996_v8 = vmul.f32 1.442695, %v3694_v13  ;;  %v3697_v43 = vadd.f32 %v9330_v53, %v3696_v30  ;;  %v3698_v32 = vpop.f32.mrb[147].mxu1  ;;  %vm3924_vm8 = vcmp.gt.f32.partialorder %v3694_v13, 0.0 }
 0x4aa   : > { %v4240_v14 = vsel %vm3920_vm4, %v3678_v10, %v4176_v47  ;;  %v4177_v45 = vmul.f32 1.6732632, %v6230_v27 }
 0x4ab   : > { %7386 = vpow2.f32 %v3996_v8  ;;  %v3998_v55 = vmul.f32 1.442695, %v3697_v43  ;;  %v4304_v35 = vmul.f32 1.050701, %v4240_v14  ;;  %vm3925_vm9 = vcmp.gt.f32.partialorder %v3697_v43, 0.0 }
 0x4ac   : > { %v4241_v31 = vsel %vm3921_vm5, %v3681_v34, %v4177_v45  ;;  %3908 = vmatmul.mubr.bf16.gmra.mrb[252].mxu1 %v3443_v51 }
 0x4ad   : > { %v7383_v2 = vpop.eup %7382  ;;  %v4305_v3 = vmul.f32 1.050701, %v4241_v31  ;;  %7388 = vpow2.f32 %v3998_v55 }
 0x4ae   : > { %v6231_v54 = vadd.f32 -1.0, %v7383_v2  ;;  %v3701_v29 = vpop.f32.mrb[148].mxu1 }
 0x4af   : > { %v7385_v42 = vpop.eup %7384  ;;  %v3702_v28 = vadd.f32 %v9330_v53, %v3701_v29  ;;  %v3703_v4 = vpop.f32.mrb[149].mxu1  ;;  %v4366_v38 = vpack.c.bf16 %v4305_v3, %v4304_v35 }
 0x4b0   : > { %v4178_v10 = vmul.f32 1.6732632, %v6231_v54  ;;  %v6232_v39 = vadd.f32 -1.0, %v7385_v42  ;;  %v3704_v23 = vpop.f32.mrb[150].mxu1 }
 0x4b1   : > { %v4000_v18 = vmul.f32 1.442695, %v3702_v28  ;;  %v3705_v11 = vadd.f32 %v9330_v53, %v3704_v23  ;;  %v3706_v21 = vpop.f32.mrb[151].mxu1  ;;  %6693 = vmatprep.mubr.bf16.mxu0 %v4366_v38  ;;  %vm3926_vm10 = vcmp.gt.f32.partialorder %v3702_v28, 0.0 }
 0x4b2   : > { %v4242_v34 = vsel %vm3922_vm6, %v9355_v61, %v4178_v10  ;;  %v4179_v48 = vmul.f32 1.6732632, %v6232_v39 }
 0x4b3   : > { %7390 = vpow2.f32 %v4000_v18  ;;  %v4002_v33 = vmul.f32 1.442695, %v3705_v11  ;;  %v4306_v17 = vmul.f32 1.050701, %v4242_v34  ;;  %vm3927_vm11 = vcmp.gt.f32.partialorder %v3705_v11, 0.0 }
 0x4b4   : > { %v4243_v51 = vsel %vm3923_vm7, %v3689_v1, %v4179_v48 }
 0x4b5   : > { %v7387_v25 = vpop.eup %7386  ;;  %v4307_v52 = vmul.f32 1.050701, %v4243_v51  ;;  %7392 = vpow2.f32 %v4002_v33 }
 0x4b6   : > { %v6233_v57 = vadd.f32 -1.0, %v7387_v25  ;;  %v3709_v26 = vpop.f32.mrb[152].mxu1 }
 0x4b7   : > { %v7389_v46 = vpop.eup %7388  ;;  %v3710_v0 = vadd.f32 %v9330_v53, %v3709_v26  ;;  %v3711_v7 = vpop.f32.mrb[153].mxu1  ;;  %v4367_v44 = vpack.c.bf16 %v4307_v52, %v4306_v17 }
 0x4b8   : > { %v4180_v20 = vmul.f32 1.6732632, %v6233_v57  ;;  %v6234_v16 = vadd.f32 -1.0, %v7389_v46  ;;  %v3712_v40 = vpop.f32.mrb[154].mxu1 }
 0x4b9   : > { %v4004_v61 = vmul.f32 1.442695, %v3710_v0  ;;  %v3713_v49 = vadd.f32 %v9330_v53, %v3712_v40  ;;  %v3714_v5 = vpop.f32.mrb[155].mxu1  ;;  %6694 = vmatmul.mubr.bf16.gmra.mrb[132].mxu0 %v4367_v44  ;;  %vm3928_vm12 = vcmp.gt.f32.partialorder %v3710_v0, 0.0 }
 0x4ba   : > { %v4244_v56 = vsel %vm3924_vm8, %v3694_v13, %v4180_v20  ;;  %v4181_v41 = vmul.f32 1.6732632, %v6234_v16 }
 0x4bb   : > { %7394 = vpow2.f32 %v4004_v61  ;;  %v4006_v50 = vmul.f32 1.442695, %v3713_v49  ;;  %v4308_v24 = vmul.f32 1.050701, %v4244_v56  ;;  %vm3929_vm13 = vcmp.gt.f32.partialorder %v3713_v49, 0.0 }
 0x4bc   : > { %v4245_v37 = vsel %vm3925_vm9, %v3697_v43, %v4181_v41 }
 0x4bd   : > { %v7391_v1 = vpop.eup %7390  ;;  %v4309_v59 = vmul.f32 1.050701, %v4245_v37  ;;  %7396 = vpow2.f32 %v4006_v50 }
 0x4be   : > { %v6235_v19 = vadd.f32 -1.0, %v7391_v1  ;;  %v3717_v6 = vpop.f32.mrb[156].mxu1 }
 0x4bf   : > { %v7393_v60 = vpop.eup %7392  ;;  %v3718_v9 = vadd.f32 %v9330_v53, %v3717_v6  ;;  %v3719_v62 = vpop.f32.mrb[157].mxu1  ;;  %v4368_v63 = vpack.c.bf16 %v4309_v59, %v4308_v24 }
 0x4c0   : > { %v4182_v15 = vmul.f32 1.6732632, %v6235_v19  ;;  %v6236_v12 = vadd.f32 -1.0, %v7393_v60  ;;  %v3720_v22 = vpop.f32.mrb[158].mxu1 }
 0x4c1   : > { %v4008_v58 = vmul.f32 1.442695, %v3718_v9  ;;  %v3721_v13 = vadd.f32 %v9330_v53, %v3720_v22  ;;  %v3722_v36 = vpop.f32.mrb[159].mxu1  ;;  %6697 = vmatprep.mubr.bf16.mxu0 %v4368_v63  ;;  %vm3930_vm14 = vcmp.gt.f32.partialorder %v3718_v9, 0.0 }
 0x4c2   : > { %v4246_v47 = vsel %vm3926_vm10, %v3702_v28, %v4182_v15  ;;  %v4183_v27 = vmul.f32 1.6732632, %v6236_v12 }
 0x4c3   : > { %7398 = vpow2.f32 %v4008_v58  ;;  %v4010_v30 = vmul.f32 1.442695, %v3721_v13  ;;  %v4310_v32 = vmul.f32 1.050701, %v4246_v47  ;;  %vm3931_vm15 = vcmp.gt.f32.partialorder %v3721_v13, 0.0 }
 0x4c4   : > { %v4247_v8 = vsel %vm3927_vm11, %v3705_v11, %v4183_v27 }
 0x4c5   : > { %v7395_v43 = vpop.eup %7394  ;;  %v4311_v14 = vmul.f32 1.050701, %v4247_v8  ;;  %7400 = vpow2.f32 %v4010_v30 }
 0x4c6   : > { %v6237_v45 = vadd.f32 -1.0, %v7395_v43  ;;  %v3725_v3 = vpop.f32.mrb[160].mxu1 }
 0x4c7   : > { %v7397_v55 = vpop.eup %7396  ;;  %v4369_v31 = vpack.c.bf16 %v4311_v14, %v4310_v32  ;;  %v3726_v54 = vadd.f32 %v9330_v53, %v3725_v3  ;;  %v3727_v29 = vpop.f32.mrb[161].mxu1 }
 0x4c8   : > { %v4184_v2 = vmul.f32 1.6732632, %v6237_v45  ;;  %v6238_v35 = vadd.f32 -1.0, %v7397_v55  ;;  %v3728_v4 = vpop.f32.mrb[162].mxu1 }
 0x4c9   : > { %6698 = vmatmul.mubr.bf16.gmra.mrb[136].mxu0 %v4369_v31  ;;  %v4012_v38 = vmul.f32 1.442695, %v3726_v54  ;;  %v3729_v10 = vadd.f32 %v9330_v53, %v3728_v4  ;;  %v3730_v39 = vpop.f32.mrb[163].mxu1  ;;  %vm3932_vm0 = vcmp.gt.f32.partialorder %v3726_v54, 0.0 }
 0x4ca   : > { %v4248_v42 = vsel %vm3928_vm12, %v3710_v0, %v4184_v2  ;;  %v4185_v28 = vmul.f32 1.6732632, %v6238_v35 }
 0x4cb   : > { %v4312_v11 = vmul.f32 1.050701, %v4248_v42  ;;  %7402 = vpow2.f32 %v4012_v38  ;;  %v4014_v34 = vmul.f32 1.442695, %v3729_v10  ;;  %vm3933_vm1 = vcmp.gt.f32.partialorder %v3729_v10, 0.0 }
 0x4cc   : > { %v4249_v23 = vsel %vm3929_vm13, %v3713_v49, %v4185_v28 }
 0x4cd   : > { %v7399_v18 = vpop.eup %7398  ;;  %v4313_v21 = vmul.f32 1.050701, %v4249_v23  ;;  %7404 = vpow2.f32 %v4014_v34 }
 0x4ce   : > { %v6239_v48 = vadd.f32 -1.0, %v7399_v18 }
 0x4cf   : > { %v7401_v33 = vpop.eup %7400  ;;  %v4370_v51 = vpack.c.bf16 %v4313_v21, %v4312_v11  ;;  %v3733_v52 = vpop.f32.mrb[164].mxu1 }
 0x4d0   : > { %v4186_v25 = vmul.f32 1.6732632, %v6239_v48  ;;  %v6240_v17 = vadd.f32 -1.0, %v7401_v33  ;;  %v3734_v57 = vadd.f32 %v9330_v53, %v3733_v52  ;;  %v3735_v26 = vpop.f32.mrb[165].mxu1 }
 0x4d1   : > { %6701 = vmatprep.mubr.bf16.mxu0 %v4370_v51  ;;  %v3736_v7 = vpop.f32.mrb[166].mxu1 }
 0x4d2   : > { %v4250_v46 = vsel %vm3930_vm14, %v3718_v9, %v4186_v25  ;;  %v4187_v0 = vmul.f32 1.6732632, %v6240_v17  ;;  %v4016_v44 = vmul.f32 1.442695, %v3734_v57  ;;  %v3737_v20 = vadd.f32 %v9330_v53, %v3736_v7  ;;  %v3738_v16 = vpop.f32.mrb[167].mxu1 }
 0x4d3   : > { %v4314_v61 = vmul.f32 1.050701, %v4250_v46  ;;  %vm3934_vm2 = vcmp.gt.f32.partialorder %v3734_v57, 0.0 }
 0x4d4   : > { %v4251_v40 = vsel %vm3931_vm15, %v3721_v13, %v4187_v0  ;;  %7406 = vpow2.f32 %v4016_v44  ;;  %v4018_v5 = vmul.f32 1.442695, %v3737_v20  ;;  %vm3935_vm3 = vcmp.gt.f32.partialorder %v3737_v20, 0.0 }
 0x4d5   : > { %v4315_v49 = vmul.f32 1.050701, %v4251_v40  ;;  %v7403_v56 = vpop.eup %7402 }
 0x4d6   : > { %7408 = vpow2.f32 %v4018_v5  ;;  %v6241_v50 = vadd.f32 -1.0, %v7403_v56 }
 0x4d7   : > { %v4371_v41 = vpack.c.bf16 %v4315_v49, %v4314_v61  ;;  %v3741_v37 = vpop.f32.mrb[168].mxu1  ;;  %v7405_v1 = vpop.eup %7404 }
 0x4d8   : > { %v3742_v24 = vadd.f32 %v9330_v53, %v3741_v37  ;;  %v3743_v59 = vpop.f32.mrb[169].mxu1  ;;  %v4188_v19 = vmul.f32 1.6732632, %v6241_v50  ;;  %v6242_v6 = vadd.f32 -1.0, %v7405_v1 }
 0x4d9   : > { %6702 = vmatmul.mubr.bf16.gmra.mrb[140].mxu0 %v4371_v41  ;;  %v3744_v60 = vpop.f32.mrb[170].mxu1 }
 0x4da   : > { %v4020_v9 = vmul.f32 1.442695, %v3742_v24  ;;  %v3745_v62 = vadd.f32 %v9330_v53, %v3744_v60  ;;  %v3746_v63 = vpop.f32.mrb[171].mxu1  ;;  %v4252_v15 = vsel %vm3932_vm0, %v3726_v54, %v4188_v19  ;;  %v4189_v12 = vmul.f32 1.6732632, %v6242_v6 }
 0x4db   : > { %v4316_v36 = vmul.f32 1.050701, %v4252_v15  ;;  %vm3936_vm4 = vcmp.gt.f32.partialorder %v3742_v24, 0.0 }
 0x4dc   : > { %7410 = vpow2.f32 %v4020_v9  ;;  %v4022_v22 = vmul.f32 1.442695, %v3745_v62  ;;  %v4253_v58 = vsel %vm3933_vm1, %v3729_v10, %v4189_v12  ;;  %vm3937_vm5 = vcmp.gt.f32.partialorder %v3745_v62, 0.0 }
 0x4dd   : > { %v4317_v47 = vmul.f32 1.050701, %v4253_v58 }
 0x4de   : > { %v7407_v13 = vpop.eup %7406  ;;  %7412 = vpow2.f32 %v4022_v22 }
 0x4df   : > { %v6243_v27 = vadd.f32 -1.0, %v7407_v13  ;;  %v3749_v30 = vpop.f32.mrb[172].mxu1  ;;  %v4372_v14 = vpack.c.bf16 %v4317_v47, %v4316_v36  ;;  %v6964_v47 = vld [vmem:[%s10225_s11 + $0x4] ss:$8 sps:$4 sm:$0xff]  }
 0x4e0   : > { %v7409_v8 = vpop.eup %7408  ;;  %v3750_v43 = vadd.f32 %v9330_v53, %v3749_v30  ;;  %v3751_v32 = vpop.f32.mrb[173].mxu1  ;;  %5344 = vmatprep.subr.bf16.mxu0 %v6964_v47 }
 0x4e1   : > { %v4190_v45 = vmul.f32 1.6732632, %v6243_v27  ;;  %v6244_v55 = vadd.f32 -1.0, %v7409_v8  ;;  %v3752_v31 = vpop.f32.mrb[174].mxu1  ;;  %6705 = vmatprep.mubr.bf16.mxu0 %v4372_v14 }
 0x4e2   : > { %v4024_v2 = vmul.f32 1.442695, %v3750_v43  ;;  %v3753_v35 = vadd.f32 %v9330_v53, %v3752_v31  ;;  %v3754_v3 = vpop.f32.mrb[175].mxu1  ;;  %vm3938_vm6 = vcmp.gt.f32.partialorder %v3750_v43, 0.0  ;;  %v10282_v31 = vmov 0  }
 0x4e3   : > { %v4254_v54 = vsel %vm3934_vm2, %v3734_v57, %v4190_v45  ;;  %v4191_v29 = vmul.f32 1.6732632, %v6244_v55 }
 0x4e4   : > { %7414 = vpow2.f32 %v4024_v2  ;;  %v4026_v42 = vmul.f32 1.442695, %v3753_v35  ;;  %v4318_v38 = vmul.f32 1.050701, %v4254_v54  ;;  %vm3939_vm7 = vcmp.gt.f32.partialorder %v3753_v35, 0.0 }
 0x4e5   : > { %v4255_v28 = vsel %vm3935_vm3, %v3737_v20, %v4191_v29  ;;  %v6965_v54 = vld [vmem:[%s10225_s11 + $0x10] ss:$8 sps:$4 sm:$0xff]   ;;  %v6967_v29 = vld [vmem:[%s10225_s11 + $0x14] ss:$8 sps:$4 sm:$0xff]  }
 0x4e6   : > { %v7411_v4 = vpop.eup %7410  ;;  %v4319_v10 = vmul.f32 1.050701, %v4255_v28  ;;  %7416 = vpow2.f32 %v4026_v42 }
 0x4e7   : > { %v6245_v39 = vadd.f32 -1.0, %v7411_v4  ;;  %v3757_v18 = vpop.f32.mrb[176].mxu1 }
 0x4e8   : > { %v7413_v23 = vpop.eup %7412  ;;  %v4373_v11 = vpack.c.bf16 %v4319_v10, %v4318_v38  ;;  %v3758_v48 = vadd.f32 %v9330_v53, %v3757_v18  ;;  %v3759_v33 = vpop.f32.mrb[177].mxu1 }
 0x4e9   : > { %v4192_v21 = vmul.f32 1.6732632, %v6245_v39  ;;  %v6246_v34 = vadd.f32 -1.0, %v7413_v23  ;;  %v3760_v51 = vpop.f32.mrb[178].mxu1 }
 0x4ea   : > { %6706 = vmatmul.mubr.bf16.gmra.mrb[144].mxu0 %v4373_v11  ;;  %v4028_v52 = vmul.f32 1.442695, %v3758_v48  ;;  %v3762_v57 = vpop.f32.mrb[179].mxu1  ;;  %v3761_v26 = vadd.f32 %v9330_v53, %v3760_v51  ;;  %vm3940_vm8 = vcmp.gt.f32.partialorder %v3758_v48, 0.0  ;;  %v6970_v11 = vld [vmem:[%s10225_s11 + $0x24] ss:$8 sps:$4 sm:$0xff]  }
 0x4eb   : > { %v4256_v25 = vsel %vm3936_vm4, %v3742_v24, %v4192_v21  ;;  %v4193_v17 = vmul.f32 1.6732632, %v6246_v34  ;;  %v6968_v51 = vld [vmem:[%s10225_s11 + $0x20] ss:$8 sps:$4 sm:$0xff]  }
 0x4ec   : > { %7418 = vpow2.f32 %v4028_v52  ;;  %v4320_v7 = vmul.f32 1.050701, %v4256_v25  ;;  %v4030_v20 = vmul.f32 1.442695, %v3761_v26  ;;  %vm3941_vm9 = vcmp.gt.f32.partialorder %v3761_v26, 0.0 }
 0x4ed   : > { %v4257_v46 = vsel %vm3937_vm5, %v3745_v62, %v4193_v17 }
 0x4ee   : > { %v7415_v0 = vpop.eup %7414  ;;  %v4321_v44 = vmul.f32 1.050701, %v4257_v46  ;;  %7420 = vpow2.f32 %v4030_v20 }
 0x4ef   : > { %v6247_v16 = vadd.f32 -1.0, %v7415_v0  ;;  %v3765_v61 = vpop.f32.mrb[180].mxu1 }
 0x4f0   : > { %v7417_v40 = vpop.eup %7416  ;;  %v4374_v49 = vpack.c.bf16 %v4321_v44, %v4320_v7  ;;  %v9387_v41 = vadd.f32 %v9330_v53, %v3765_v61  ;;  %v3767_v50 = vpop.f32.mrb[181].mxu1  ;;  %v6971_v7 = vld [vmem:[%s10225_s11 + $0x30] ss:$8 sps:$4 sm:$0xff]   ;;  %v6973_v44 = vld [vmem:[%s10225_s11 + $0x34] ss:$8 sps:$4 sm:$0xff]  }
 0x4f1   : > { %v4194_v5 = vmul.f32 1.6732632, %v6247_v16  ;;  %v6248_v56 = vadd.f32 -1.0, %v7417_v40  ;;  %v3768_v37 = vpop.f32.mrb[182].mxu1  ;;  %v6976_v50 = vld [vmem:[%s10225_s11 + $0x44] ss:$8 sps:$4 sm:$0xff]  }
 0x4f2   : > { %6709 = vmatprep.mubr.bf16.mxu0 %v4374_v49  ;;  %v4032_v59 = vmul.f32 1.442695, %v9387_v41  ;;  %v3770_v19 = vpop.f32.mrb[183].mxu1  ;;  %v9391_v6 = vadd.f32 %v9330_v53, %v3768_v37  ;;  %vm3942_vm10 = vcmp.gt.f32.partialorder %v9387_v41, 0.0 }
 0x4f3   : > { %v4258_v1 = vsel %vm3938_vm6, %v3750_v43, %v4194_v5  ;;  %v4195_v24 = vmul.f32 1.6732632, %v6248_v56  ;;  %v6962_v43 = vld [vmem:[%s10225_s11] ss:$8 sps:$4 sm:$0xff]  }
 0x4f4   : > { %7422 = vpow2.f32 %v4032_v59  ;;  %v4322_v9 = vmul.f32 1.050701, %v4258_v1  ;;  %v4034_v63 = vmul.f32 1.442695, %v9391_v6  ;;  %5345 = vmatpush1.bf16.msra.mxu0 %v6962_v43  ;;  %vm3943_vm11 = vcmp.gt.f32.partialorder %v9391_v6, 0.0 }
 0x4f5   : > { %v4259_v60 = vsel %vm3939_vm7, %v3753_v35, %v4195_v24  ;;  %5346 = vmatprep.subr.bf16.mxu0 %v6967_v29  ;;  %v6974_v19 = vld [vmem:[%s10225_s11 + $0x40] ss:$8 sps:$4 sm:$0xff]  }
 0x4f6   : > { %v4323_v62 = vmul.f32 1.050701, %v4259_v60  ;;  %v7419_v15 = vpop.eup %7418  ;;  %7424 = vpow2.f32 %v4034_v63 }
 0x4f7   : > { %v6249_v12 = vadd.f32 -1.0, %v7419_v15  ;;  %v3773_v22 = vpop.f32.mrb[184].mxu1 }
 0x4f8   : > { %v4375_v58 = vpack.c.bf16 %v4323_v62, %v4322_v9  ;;  %v9395_v13 = vadd.f32 %v9330_v53, %v3773_v22  ;;  %v3775_v36 = vpop.f32.mrb[185].mxu1  ;;  %v7421_v27 = vpop.eup %7420  ;;  %5347 = vmatpush1.bf16.msra.mxu0 %v6965_v54  ;;  %v6977_v22 = vld [vmem:[%s10225_s11 + $0x50] ss:$8 sps:$4 sm:$0xff]  }
 0x4f9   : > { %v4196_v30 = vmul.f32 1.6732632, %v6249_v12  ;;  %v3776_v8 = vpop.f32.mrb[186].mxu1  ;;  %v6250_v32 = vadd.f32 -1.0, %v7421_v27  ;;  %5348 = vmatprep.subr.bf16.mxu0 %v6970_v11 }
 0x4fa   : > { %6710 = vmatmul.mubr.bf16.gmra.mrb[148].mxu0 %v4375_v58  ;;  %v4036_v14 = vmul.f32 1.442695, %v9395_v13  ;;  %v9405_v45 = vadd.f32 %v9330_v53, %v3776_v8  ;;  %v3778_v55 = vpop.f32.mrb[187].mxu1  ;;  %vm3944_vm12 = vcmp.gt.f32.partialorder %v9395_v13, 0.0  ;;  %v6979_v58 = vld [vmem:[%s10225_s11 + $0x54] ss:$8 sps:$4 sm:$0xff]  }
 0x4fb   : > { %5376 = vmatprep.mubr.bf16.mxu0 %v10282_v31  ;;  %v4260_v2 = vsel %vm3940_vm8, %v3758_v48, %v4196_v30  ;;  %v4197_v35 = vmul.f32 1.6732632, %v6250_v32 }
 0x4fc   : > { %7426 = vpow2.f32 %v4036_v14  ;;  %v4038_v3 = vmul.f32 1.442695, %v9405_v45  ;;  %v4324_v4 = vmul.f32 1.050701, %v4260_v2  ;;  %5349 = vmatpush1.bf16.msra.mxu0 %v6968_v51  ;;  %vm3945_vm13 = vcmp.gt.f32.partialorder %v9405_v45, 0.0 }
 0x4fd   : > { %v4261_v28 = vsel %vm3941_vm9, %v3761_v26, %v4197_v35  ;;  %5350 = vmatprep.subr.bf16.mxu0 %v6973_v44  ;;  %v6982_v14 = vld [vmem:[%s10225_s11 + $0x64] ss:$8 sps:$4 sm:$0xff]  }
 0x4fe   : > { %v7423_v42 = vpop.eup %7422  ;;  %v4325_v38 = vmul.f32 1.050701, %v4261_v28  ;;  %7428 = vpow2.f32 %v4038_v3 }
 0x4ff   : > { %v6251_v10 = vadd.f32 -1.0, %v7423_v42  ;;  %v3781_v39 = vpop.f32.mrb[188].mxu1 }
 0x500   : > { %v9416_v23 = vadd.f32 %v9330_v53, %v3781_v39  ;;  %v3783_v18 = vpop.f32.mrb[189].mxu1  ;;  %v7425_v21 = vpop.eup %7424  ;;  %v4376_v33 = vpack.c.bf16 %v4325_v38, %v4324_v4  ;;  %5351 = vmatpush1.bf16.msra.mxu0 %v6971_v7 }
 0x501   : > { %v4198_v34 = vmul.f32 1.6732632, %v6251_v10  ;;  %v3784_v48 = vpop.f32.mrb[190].mxu1  ;;  %v6252_v25 = vadd.f32 -1.0, %v7425_v21  ;;  %5352 = vmatprep.subr.bf16.mxu0 %v6976_v50 }
 0x502   : > { %v4040_v17 = vmul.f32 1.442695, %v9416_v23  ;;  %v9426_v52 = vadd.f32 %v9330_v53, %v3784_v48  ;;  %v3786_v57 = vpop.f32.mrb[191].mxu1  ;;  %6713 = vmatprep.mubr.bf16.mxu1 %v4376_v33  ;;  %vm3946_vm14 = vcmp.gt.f32.partialorder %v9416_v23, 0.0 }
 0x503   : > { %v4262_v26 = vsel %vm3942_vm10, %v9387_v41, %v4198_v34  ;;  %v4199_v46 = vmul.f32 1.6732632, %v6252_v25 }
 0x504   : > { %7430 = vpow2.f32 %v4040_v17  ;;  %v4042_v0 = vmul.f32 1.442695, %v9426_v52  ;;  %v4326_v40 = vmul.f32 1.050701, %v4262_v26  ;;  %5353 = vmatpush1.bf16.msra.mxu0 %v6974_v19  ;;  %vm3947_vm15 = vcmp.gt.f32.partialorder %v9426_v52, 0.0 }
 0x505   : > { %v4263_v16 = vsel %vm3943_vm11, %v9391_v6, %v4199_v46  ;;  %5354 = vmatprep.subr.bf16.mxu0 %v6979_v58 }
 0x506   : > { %v7427_v20 = vpop.eup %7426  ;;  %v4327_v61 = vmul.f32 1.050701, %v4263_v16  ;;  %7432 = vpow2.f32 %v4042_v0 }
 0x507   : > { %v6253_v49 = vadd.f32 -1.0, %v7427_v20  ;;  %v3789_v5 = vpop.f32.mrb[192].mxu1 }
 0x508   : > { %v9440_v56 = vadd.f32 %v9330_v53, %v3789_v5  ;;  %v3791_v41 = vpop.f32.mrb[193].mxu1  ;;  %v7429_v37 = vpop.eup %7428  ;;  %v4377_v1 = vpack.c.bf16 %v4327_v61, %v4326_v40  ;;  %5355 = vmatpush1.bf16.msra.mxu0 %v6977_v22 }
 0x509   : > { %v4200_v24 = vmul.f32 1.6732632, %v6253_v49  ;;  %v3792_v59 = vpop.f32.mrb[194].mxu1  ;;  %v6254_v6 = vadd.f32 -1.0, %v7429_v37  ;;  %5356 = vmatprep.subr.bf16.mxu0 %v6982_v14 }
 0x50a   : > { %v4044_v60 = vmul.f32 1.442695, %v9440_v56  ;;  %v9450_v9 = vadd.f32 %v9330_v53, %v3792_v59  ;;  %v3794_v62 = vpop.f32.mrb[195].mxu1  ;;  %6714 = vmatmul.mubr.bf16.vlgmr.msra.gmra.mrb[0].mxu1 %v4377_v1  ;;  %vm3948_vm0 = vcmp.gt.f32.partialorder %v9440_v56, 0.0 }
 0x50b   : > { %v4264_v63 = vsel %vm3944_vm12, %v9395_v13, %v4200_v24  ;;  %v4201_v15 = vmul.f32 1.6732632, %v6254_v6 }
 0x50c   : > { %7434 = vpow2.f32 %v4044_v60  ;;  %v4046_v12 = vmul.f32 1.442695, %v9450_v9  ;;  %v4328_v27 = vmul.f32 1.050701, %v4264_v63  ;;  %vm3949_vm1 = vcmp.gt.f32.partialorder %v9450_v9, 0.0 }
 0x50d   : > { %v4265_v47 = vsel %vm3945_vm13, %v9405_v45, %v4201_v15  ;;  %v6980_v45 = vld [vmem:[%s10225_s11 + $0x60] ss:$8 sps:$4 sm:$0xff]  }
 0x50e   : > { %v7431_v36 = vpop.eup %7430  ;;  %v4329_v13 = vmul.f32 1.050701, %v4265_v47  ;;  %7436 = vpow2.f32 %v4046_v12  ;;  %5357 = vmatpush1.bf16.msra.mxu0 %v6980_v45 }
 0x50f   : > { %v6255_v30 = vadd.f32 -1.0, %v7431_v36  ;;  %v3797_v8 = vpop.f32.mrb[196].mxu1 }
 0x510   : > { %v9464_v43 = vadd.f32 %v9330_v53, %v3797_v8  ;;  %v3799_v32 = vpop.f32.mrb[197].mxu1  ;;  %v7433_v55 = vpop.eup %7432  ;;  %v4378_v3 = vpack.c.bf16 %v4329_v13, %v4328_v27 }
 0x511   : > { %v4202_v2 = vmul.f32 1.6732632, %v6255_v30  ;;  %v3800_v35 = vpop.f32.mrb[198].mxu1  ;;  %v6256_v54 = vadd.f32 -1.0, %v7433_v55 }
 0x512   : > { %v4048_v29 = vmul.f32 1.442695, %v9464_v43  ;;  %v9474_v42 = vadd.f32 %v9330_v53, %v3800_v35  ;;  %v3802_v28 = vpop.f32.mrb[199].mxu1  ;;  %6717 = vmatprep.mubr.bf16.mxu1 %v4378_v3  ;;  %vm3950_vm2 = vcmp.gt.f32.partialorder %v9464_v43, 0.0 }
 0x513   : > { %v4266_v4 = vsel %vm3946_vm14, %v9416_v23, %v4202_v2  ;;  %v4203_v38 = vmul.f32 1.6732632, %v6256_v54  ;;  %v6985_v23 = vld [vmem:[%s10225_s11 + $0x74] ss:$8 sps:$4 sm:$0xff]  }
 0x514   : > { %7438 = vpow2.f32 %v4048_v29  ;;  %v4050_v10 = vmul.f32 1.442695, %v9474_v42  ;;  %v4330_v11 = vmul.f32 1.050701, %v4266_v4  ;;  %5358 = vmatprep.subr.bf16.mxu0 %v6985_v23  ;;  %vm3951_vm3 = vcmp.gt.f32.partialorder %v9474_v42, 0.0 }
 0x515   : > { %v4267_v18 = vsel %vm3947_vm15, %v9426_v52, %v4203_v38  ;;  %v6983_v52 = vld [vmem:[%s10225_s11 + $0x70] ss:$8 sps:$4 sm:$0xff]  }
 0x516   : > { %v7435_v39 = vpop.eup %7434  ;;  %v4331_v21 = vmul.f32 1.050701, %v4267_v18  ;;  %7440 = vpow2.f32 %v4050_v10  ;;  %5359 = vmatpush1.bf16.msra.mxu0 %v6983_v52 }
 0x517   : > { %v6257_v34 = vadd.f32 -1.0, %v7435_v39  ;;  %v3805_v48 = vpop.f32.mrb[200].mxu1 }
 0x518   : > { %v9482_v33 = vadd.f32 %v9330_v53, %v3805_v48  ;;  %v3807_v51 = vpop.f32.mrb[201].mxu1  ;;  %v7437_v25 = vpop.eup %7436  ;;  %v4379_v17 = vpack.c.bf16 %v4331_v21, %v4330_v11 }
 0x519   : > { %v4204_v57 = vmul.f32 1.6732632, %v6257_v34  ;;  %v3808_v26 = vpop.f32.mrb[202].mxu1  ;;  %v6258_v46 = vadd.f32 -1.0, %v7437_v25 }
 0x51a   : > { %v4052_v0 = vmul.f32 1.442695, %v9482_v33  ;;  %v3809_v7 = vadd.f32 %v9330_v53, %v3808_v26  ;;  %v3810_v44 = vpop.f32.mrb[203].mxu1  ;;  %6718 = vmatmul.mubr.bf16.gmra.mrb[4].mxu1 %v4379_v17  ;;  %vm3952_vm4 = vcmp.gt.f32.partialorder %v9482_v33, 0.0 }
 0x51b   : > { %v4268_v20 = vsel %vm3948_vm0, %v9440_v56, %v4204_v57  ;;  %v4205_v16 = vmul.f32 1.6732632, %v6258_v46 }
 0x51c   : > { %7442 = vpow2.f32 %v4052_v0  ;;  %v4054_v40 = vmul.f32 1.442695, %v3809_v7  ;;  %v4332_v5 = vmul.f32 1.050701, %v4268_v20  ;;  %vm3953_vm5 = vcmp.gt.f32.partialorder %v3809_v7, 0.0 }
 0x51d   : > { %v4269_v49 = vsel %vm3949_vm1, %v9450_v9, %v4205_v16 }
 0x51e   : > { %v7439_v61 = vpop.eup %7438  ;;  %v4333_v41 = vmul.f32 1.050701, %v4269_v49  ;;  %7444 = vpow2.f32 %v4054_v40 }
 0x51f   : > { %v6259_v50 = vadd.f32 -1.0, %v7439_v61  ;;  %v3813_v37 = vpop.f32.mrb[204].mxu1 }
 0x520   : > { %v3814_v1 = vadd.f32 %v9330_v53, %v3813_v37  ;;  %v3815_v24 = vpop.f32.mrb[205].mxu1  ;;  %v7441_v59 = vpop.eup %7440  ;;  %v4380_v56 = vpack.c.bf16 %v4333_v41, %v4332_v5 }
 0x521   : > { %v4206_v19 = vmul.f32 1.6732632, %v6259_v50  ;;  %v3816_v6 = vpop.f32.mrb[206].mxu1  ;;  %v6260_v60 = vadd.f32 -1.0, %v7441_v59 }
 0x522   : > { %v4056_v62 = vmul.f32 1.442695, %v3814_v1  ;;  %v3817_v63 = vadd.f32 %v9330_v53, %v3816_v6  ;;  %v3818_v15 = vpop.f32.mrb[207].mxu1  ;;  %6721 = vmatprep.mubr.bf16.mxu1 %v4380_v56  ;;  %vm3954_vm6 = vcmp.gt.f32.partialorder %v3814_v1, 0.0 }
 0x523   : > { %v4270_v9 = vsel %vm3950_vm2, %v9464_v43, %v4206_v19  ;;  %v4207_v12 = vmul.f32 1.6732632, %v6260_v60 }
 0x524   : > { %7446 = vpow2.f32 %v4056_v62  ;;  %v4058_v22 = vmul.f32 1.442695, %v3817_v63  ;;  %v4334_v47 = vmul.f32 1.050701, %v4270_v9  ;;  %vm3955_vm7 = vcmp.gt.f32.partialorder %v3817_v63, 0.0 }
 0x525   : > { %v4271_v36 = vsel %vm3951_vm3, %v9474_v42, %v4207_v12 }
 0x526   : > { %v7443_v58 = vpop.eup %7442  ;;  %v4335_v27 = vmul.f32 1.050701, %v4271_v36  ;;  %7448 = vpow2.f32 %v4058_v22 }
 0x527   : > { %v6261_v13 = vadd.f32 -1.0, %v7443_v58  ;;  %v3821_v30 = vpop.f32.mrb[208].mxu1 }
 0x528   : > { %v3822_v8 = vadd.f32 %v9330_v53, %v3821_v30  ;;  %v3823_v32 = vpop.f32.mrb[209].mxu1  ;;  %v7445_v14 = vpop.eup %7444  ;;  %v4381_v55 = vpack.c.bf16 %v4335_v27, %v4334_v47 }
 0x529   : > { %v4208_v2 = vmul.f32 1.6732632, %v6261_v13  ;;  %v3824_v43 = vpop.f32.mrb[210].mxu1  ;;  %v6262_v35 = vadd.f32 -1.0, %v7445_v14 }
 0x52a   : > { %v4060_v3 = vmul.f32 1.442695, %v3822_v8  ;;  %v3825_v45 = vadd.f32 %v9330_v53, %v3824_v43  ;;  %v3826_v54 = vpop.f32.mrb[211].mxu1  ;;  %6722 = vmatmul.mubr.bf16.gmra.mrb[8].mxu1 %v4381_v55  ;;  %v9509_v53 = vld [vmem:[%s10222_s8] ss:$0 sm:$0xff]  ;;  %vm3956_vm8 = vcmp.gt.f32.partialorder %v3822_v8, 0.0 }
 0x52b   : > { %v4272_v29 = vsel %vm3952_vm4, %v9482_v33, %v4208_v2  ;;  %v4209_v42 = vmul.f32 1.6732632, %v6262_v35 }
 0x52c   : > { %7450 = vpow2.f32 %v4060_v3  ;;  %v4062_v28 = vmul.f32 1.442695, %v3825_v45  ;;  %v4336_v10 = vmul.f32 1.050701, %v4272_v29  ;;  %vm3957_vm9 = vcmp.gt.f32.partialorder %v3825_v45, 0.0 }
 0x52d   : > { %v4273_v38 = vsel %vm3953_vm5, %v3809_v7, %v4209_v42 }
 0x52e   : > { %v7447_v4 = vpop.eup %7446  ;;  %v4337_v39 = vmul.f32 1.050701, %v4273_v38  ;;  %7452 = vpow2.f32 %v4062_v28 }
 0x52f   : > { %v6263_v18 = vadd.f32 -1.0, %v7447_v4  ;;  %v3829_v11 = vpop.f32.mrb[212].mxu1 }
 0x530   : > { %v3830_v21 = vadd.f32 %v9509_v53, %v3829_v11  ;;  %v3831_v34 = vpop.f32.mrb[213].mxu1  ;;  %v7449_v48 = vpop.eup %7448  ;;  %v4382_v23 = vpack.c.bf16 %v4337_v39, %v4336_v10 }
 0x531   : > { %v4210_v33 = vmul.f32 1.6732632, %v6263_v18  ;;  %v3832_v51 = vpop.f32.mrb[214].mxu1  ;;  %v6264_v25 = vadd.f32 -1.0, %v7449_v48 }
 0x532   : > { %v4064_v17 = vmul.f32 1.442695, %v3830_v21  ;;  %v3833_v57 = vadd.f32 %v9509_v53, %v3832_v51  ;;  %v3834_v26 = vpop.f32.mrb[215].mxu1  ;;  %6725 = vmatprep.mubr.bf16.mxu1 %v4382_v23  ;;  %vm3958_vm10 = vcmp.gt.f32.partialorder %v3830_v21, 0.0 }
 0x533   : > { %v4274_v52 = vsel %vm3954_vm6, %v3814_v1, %v4210_v33  ;;  %v4211_v46 = vmul.f32 1.6732632, %v6264_v25 }
 0x534   : > { %7454 = vpow2.f32 %v4064_v17  ;;  %v4066_v0 = vmul.f32 1.442695, %v3833_v57  ;;  %v4338_v20 = vmul.f32 1.050701, %v4274_v52  ;;  %vm3959_vm11 = vcmp.gt.f32.partialorder %v3833_v57, 0.0 }
 0x535   : > { %v4275_v44 = vsel %vm3955_vm7, %v3817_v63, %v4211_v46 }
 0x536   : > { %v7451_v7 = vpop.eup %7450  ;;  %v4339_v16 = vmul.f32 1.050701, %v4275_v44  ;;  %7456 = vpow2.f32 %v4066_v0 }
 0x537   : > { %v6265_v40 = vadd.f32 -1.0, %v7451_v7  ;;  %v3837_v61 = vpop.f32.mrb[216].mxu1 }
 0x538   : > { %v3838_v49 = vadd.f32 %v9509_v53, %v3837_v61  ;;  %v3839_v5 = vpop.f32.mrb[217].mxu1  ;;  %v7453_v41 = vpop.eup %7452  ;;  %v4383_v50 = vpack.c.bf16 %v4339_v16, %v4338_v20 }
 0x539   : > { %v4212_v37 = vmul.f32 1.6732632, %v6265_v40  ;;  %v3840_v24 = vpop.f32.mrb[218].mxu1  ;;  %v6266_v59 = vadd.f32 -1.0, %v7453_v41 }
 0x53a   : > { %v4068_v1 = vmul.f32 1.442695, %v3838_v49  ;;  %v3841_v19 = vadd.f32 %v9509_v53, %v3840_v24  ;;  %v3842_v6 = vpop.f32.mrb[219].mxu1  ;;  %6726 = vmatmul.mubr.bf16.gmra.mrb[12].mxu1 %v4383_v50  ;;  %vm3960_vm12 = vcmp.gt.f32.partialorder %v3838_v49, 0.0 }
 0x53b   : > { %v4276_v56 = vsel %vm3956_vm8, %v3822_v8, %v4212_v37  ;;  %v4213_v60 = vmul.f32 1.6732632, %v6266_v59 }
 0x53c   : > { %7458 = vpow2.f32 %v4068_v1  ;;  %v4070_v62 = vmul.f32 1.442695, %v3841_v19  ;;  %v4340_v9 = vmul.f32 1.050701, %v4276_v56  ;;  %vm3961_vm13 = vcmp.gt.f32.partialorder %v3841_v19, 0.0 }
 0x53d   : > { %v4277_v15 = vsel %vm3957_vm9, %v3825_v45, %v4213_v60 }
 0x53e   : > { %v7455_v63 = vpop.eup %7454  ;;  %v4341_v12 = vmul.f32 1.050701, %v4277_v15  ;;  %7460 = vpow2.f32 %v4070_v62 }
 0x53f   : > { %v6267_v22 = vadd.f32 -1.0, %v7455_v63  ;;  %v3845_v58 = vpop.f32.mrb[220].mxu1 }
 0x540   : > { %v3846_v36 = vadd.f32 %v9509_v53, %v3845_v58  ;;  %v3847_v47 = vpop.f32.mrb[221].mxu1  ;;  %v7457_v27 = vpop.eup %7456  ;;  %v4384_v32 = vpack.c.bf16 %v4341_v12, %v4340_v9 }
 0x541   : > { %v4214_v13 = vmul.f32 1.6732632, %v6267_v22  ;;  %v3848_v30 = vpop.f32.mrb[222].mxu1  ;;  %v6268_v14 = vadd.f32 -1.0, %v7457_v27 }
 0x542   : > { %v4072_v8 = vmul.f32 1.442695, %v3846_v36  ;;  %v3849_v55 = vadd.f32 %v9509_v53, %v3848_v30  ;;  %v3850_v2 = vpop.f32.mrb[223].mxu1  ;;  %6729 = vmatprep.mubr.bf16.mxu1 %v4384_v32  ;;  %vm3962_vm14 = vcmp.gt.f32.partialorder %v3846_v36, 0.0 }
 0x543   : > { %v4278_v43 = vsel %vm3958_vm10, %v3830_v21, %v4214_v13  ;;  %v4215_v35 = vmul.f32 1.6732632, %v6268_v14 }
 0x544   : > { %7462 = vpow2.f32 %v4072_v8  ;;  %v4074_v3 = vmul.f32 1.442695, %v3849_v55  ;;  %v4342_v29 = vmul.f32 1.050701, %v4278_v43  ;;  %vm3963_vm15 = vcmp.gt.f32.partialorder %v3849_v55, 0.0 }
 0x545   : > { %v4279_v54 = vsel %vm3959_vm11, %v3833_v57, %v4215_v35 }
 0x546   : > { %v7459_v45 = vpop.eup %7458  ;;  %v4343_v42 = vmul.f32 1.050701, %v4279_v54  ;;  %7464 = vpow2.f32 %v4074_v3 }
 0x547   : > { %v6269_v28 = vadd.f32 -1.0, %v7459_v45  ;;  %v3853_v4 = vpop.f32.mrb[224].mxu1 }
 0x548   : > { %v3854_v38 = vadd.f32 %v9509_v53, %v3853_v4  ;;  %v3855_v10 = vpop.f32.mrb[225].mxu1  ;;  %v7461_v39 = vpop.eup %7460  ;;  %v4385_v18 = vpack.c.bf16 %v4343_v42, %v4342_v29 }
 0x549   : > { %v4216_v11 = vmul.f32 1.6732632, %v6269_v28  ;;  %v3856_v34 = vpop.f32.mrb[226].mxu1  ;;  %v6270_v48 = vadd.f32 -1.0, %v7461_v39 }
 0x54a   : > { %v4076_v21 = vmul.f32 1.442695, %v3854_v38  ;;  %v3857_v33 = vadd.f32 %v9509_v53, %v3856_v34  ;;  %v3858_v51 = vpop.f32.mrb[227].mxu1  ;;  %6730 = vmatmul.mubr.bf16.gmra.mrb[16].mxu1 %v4385_v18  ;;  %vm3964_vm0 = vcmp.gt.f32.partialorder %v3854_v38, 0.0 }
 0x54b   : > { %v4280_v23 = vsel %vm3960_vm12, %v3838_v49, %v4216_v11  ;;  %v4217_v25 = vmul.f32 1.6732632, %v6270_v48 }
 0x54c   : > { %7466 = vpow2.f32 %v4076_v21  ;;  %v4078_v17 = vmul.f32 1.442695, %v3857_v33  ;;  %v4344_v52 = vmul.f32 1.050701, %v4280_v23  ;;  %vm3965_vm1 = vcmp.gt.f32.partialorder %v3857_v33, 0.0 }
 0x54d   : > { %v4281_v26 = vsel %vm3961_vm13, %v3841_v19, %v4217_v25 }
 0x54e   : > { %v7463_v57 = vpop.eup %7462  ;;  %v4345_v46 = vmul.f32 1.050701, %v4281_v26  ;;  %7468 = vpow2.f32 %v4078_v17 }
 0x54f   : > { %v6271_v0 = vadd.f32 -1.0, %v7463_v57  ;;  %v3861_v7 = vpop.f32.mrb[228].mxu1 }
 0x550   : > { %v3862_v44 = vadd.f32 %v9509_v53, %v3861_v7  ;;  %v3863_v20 = vpop.f32.mrb[229].mxu1  ;;  %v7465_v16 = vpop.eup %7464  ;;  %v4386_v5 = vpack.c.bf16 %v4345_v46, %v4344_v52 }
 0x551   : > { %v4218_v40 = vmul.f32 1.6732632, %v6271_v0  ;;  %v3864_v61 = vpop.f32.mrb[230].mxu1  ;;  %v6272_v41 = vadd.f32 -1.0, %v7465_v16 }
 0x552   : > { %v4080_v49 = vmul.f32 1.442695, %v3862_v44  ;;  %v3865_v50 = vadd.f32 %v9509_v53, %v3864_v61  ;;  %v3866_v37 = vpop.f32.mrb[231].mxu1  ;;  %6733 = vmatprep.mubr.bf16.mxu1 %v4386_v5  ;;  %vm3966_vm2 = vcmp.gt.f32.partialorder %v3862_v44, 0.0 }
 0x553   : > { %v4282_v24 = vsel %vm3962_vm14, %v3846_v36, %v4218_v40  ;;  %v4219_v59 = vmul.f32 1.6732632, %v6272_v41 }
 0x554   : > { %7470 = vpow2.f32 %v4080_v49  ;;  %v4082_v1 = vmul.f32 1.442695, %v3865_v50  ;;  %v4346_v56 = vmul.f32 1.050701, %v4282_v24  ;;  %vm3967_vm3 = vcmp.gt.f32.partialorder %v3865_v50, 0.0 }
 0x555   : > { %v4283_v6 = vsel %vm3963_vm15, %v3849_v55, %v4219_v59 }
 0x556   : > { %v7467_v19 = vpop.eup %7466  ;;  %v4347_v60 = vmul.f32 1.050701, %v4283_v6  ;;  %7472 = vpow2.f32 %v4082_v1 }
 0x557   : > { %v6273_v62 = vadd.f32 -1.0, %v7467_v19  ;;  %v3869_v63 = vpop.f32.mrb[232].mxu1 }
 0x558   : > { %v3870_v15 = vadd.f32 %v9509_v53, %v3869_v63  ;;  %v3871_v9 = vpop.f32.mrb[233].mxu1  ;;  %v7469_v12 = vpop.eup %7468  ;;  %v4387_v22 = vpack.c.bf16 %v4347_v60, %v4346_v56 }
 0x559   : > { %v4220_v58 = vmul.f32 1.6732632, %v6273_v62  ;;  %v3872_v47 = vpop.f32.mrb[234].mxu1  ;;  %v6274_v27 = vadd.f32 -1.0, %v7469_v12 }
 0x55a   : > { %v4084_v36 = vmul.f32 1.442695, %v3870_v15  ;;  %v3873_v13 = vadd.f32 %v9509_v53, %v3872_v47  ;;  %v3874_v30 = vpop.f32.mrb[235].mxu1  ;;  %6734 = vmatmul.mubr.bf16.gmra.mrb[20].mxu1 %v4387_v22  ;;  %vm3968_vm4 = vcmp.gt.f32.partialorder %v3870_v15, 0.0 }
 0x55b   : > { %v4284_v32 = vsel %vm3964_vm0, %v3854_v38, %v4220_v58  ;;  %v4221_v14 = vmul.f32 1.6732632, %v6274_v27 }
 0x55c   : > { %7474 = vpow2.f32 %v4084_v36  ;;  %v4086_v8 = vmul.f32 1.442695, %v3873_v13  ;;  %v4348_v43 = vmul.f32 1.050701, %v4284_v32  ;;  %vm3969_vm5 = vcmp.gt.f32.partialorder %v3873_v13, 0.0 }
 0x55d   : > { %v4285_v2 = vsel %vm3965_vm1, %v3857_v33, %v4221_v14 }
 0x55e   : > { %v7471_v55 = vpop.eup %7470  ;;  %v4349_v35 = vmul.f32 1.050701, %v4285_v2  ;;  %7476 = vpow2.f32 %v4086_v8 }
 0x55f   : > { %v6275_v3 = vadd.f32 -1.0, %v7471_v55  ;;  %v3877_v45 = vpop.f32.mrb[236].mxu1 }
 0x560   : > { %v3878_v54 = vadd.f32 %v9509_v53, %v3877_v45  ;;  %v3879_v29 = vpop.f32.mrb[237].mxu1  ;;  %v7473_v42 = vpop.eup %7472  ;;  %v4388_v10 = vpack.c.bf16 %v4349_v35, %v4348_v43  ;;  %v9544_v35 = vld [vmem:[%s10224_s10] ss:$0 sm:$0xff] }
 0x561   : > { %v4222_v28 = vmul.f32 1.6732632, %v6275_v3  ;;  %v3880_v4 = vpop.f32.mrb[238].mxu1  ;;  %v6276_v39 = vadd.f32 -1.0, %v7473_v42 }
 0x562   : > { %v4088_v38 = vmul.f32 1.442695, %v3878_v54  ;;  %v3881_v18 = vadd.f32 %v9509_v53, %v3880_v4  ;;  %v3882_v11 = vpop.f32.mrb[239].mxu1  ;;  %6737 = vmatprep.mubr.bf16.mxu1 %v4388_v10  ;;  %vm3970_vm6 = vcmp.gt.f32.partialorder %v3878_v54, 0.0 }
 0x563   : > { %v4286_v34 = vsel %vm3966_vm2, %v3862_v44, %v4222_v28  ;;  %v4223_v48 = vmul.f32 1.6732632, %v6276_v39 }
 0x564   : > { %7478 = vpow2.f32 %v4088_v38  ;;  %v4090_v21 = vmul.f32 1.442695, %v3881_v18  ;;  %v4350_v23 = vmul.f32 1.050701, %v4286_v34  ;;  %vm3971_vm7 = vcmp.gt.f32.partialorder %v3881_v18, 0.0 }
 0x565   : > { %v4287_v51 = vsel %vm3967_vm3, %v3865_v50, %v4223_v48 }
 0x566   : > { %v7475_v33 = vpop.eup %7474  ;;  %v4351_v25 = vmul.f32 1.050701, %v4287_v51  ;;  %7480 = vpow2.f32 %v4090_v21 }
 0x567   : > { %v6277_v17 = vadd.f32 -1.0, %v7475_v33  ;;  %v3885_v57 = vpop.f32.mrb[240].mxu1 }
 0x568   : > { %v3886_v26 = vadd.f32 %v9509_v53, %v3885_v57  ;;  %v3887_v52 = vpop.f32.mrb[241].mxu1  ;;  %v7477_v46 = vpop.eup %7476  ;;  %v4389_v0 = vpack.c.bf16 %v4351_v25, %v4350_v23 }
 0x569   : > { %v4224_v7 = vmul.f32 1.6732632, %v6277_v17  ;;  %v3888_v20 = vpop.f32.mrb[242].mxu1  ;;  %v6278_v16 = vadd.f32 -1.0, %v7477_v46 }
 0x56a   : > { %v4092_v44 = vmul.f32 1.442695, %v3886_v26  ;;  %v9527_v40 = vadd.f32 %v9509_v53, %v3888_v20  ;;  %v3890_v61 = vpop.f32.mrb[243].mxu1  ;;  %6738 = vmatmul.mubr.bf16.gmra.mrb[24].mxu1 %v4389_v0  ;;  %vm3972_vm8 = vcmp.gt.f32.partialorder %v3886_v26, 0.0 }
 0x56b   : > { %v4288_v5 = vsel %vm3968_vm4, %v3870_v15, %v4224_v7  ;;  %v4225_v41 = vmul.f32 1.6732632, %v6278_v16 }
 0x56c   : > { %7482 = vpow2.f32 %v4092_v44  ;;  %v4094_v49 = vmul.f32 1.442695, %v9527_v40  ;;  %v4352_v24 = vmul.f32 1.050701, %v4288_v5  ;;  %vm3973_vm9 = vcmp.gt.f32.partialorder %v9527_v40, 0.0 }
 0x56d   : > { %v4289_v37 = vsel %vm3969_vm5, %v3873_v13, %v4225_v41 }
 0x56e   : > { %v7479_v50 = vpop.eup %7478  ;;  %v4353_v59 = vmul.f32 1.050701, %v4289_v37  ;;  %7484 = vpow2.f32 %v4094_v49 }
 0x56f   : > { %v6279_v1 = vadd.f32 -1.0, %v7479_v50  ;;  %v3893_v19 = vpop.f32.mrb[244].mxu1 }
 0x570   : > { %v9531_v6 = vadd.f32 %v9509_v53, %v3893_v19  ;;  %v3895_v56 = vpop.f32.mrb[245].mxu1  ;;  %v7481_v60 = vpop.eup %7480  ;;  %v4390_v15 = vpack.c.bf16 %v4353_v59, %v4352_v24 }
 0x571   : > { %v4226_v62 = vmul.f32 1.6732632, %v6279_v1  ;;  %v3896_v63 = vpop.f32.mrb[246].mxu1  ;;  %v6280_v9 = vadd.f32 -1.0, %v7481_v60 }
 0x572   : > { %v4096_v12 = vmul.f32 1.442695, %v9531_v6  ;;  %v9535_v22 = vadd.f32 %v9509_v53, %v3896_v63  ;;  %v3898_v58 = vpop.f32.mrb[247].mxu1  ;;  %6741 = vmatprep.mubr.bf16.mxu1 %v4390_v15  ;;  %vm3974_vm10 = vcmp.gt.f32.partialorder %v9531_v6, 0.0 }
 0x573   : > { %v4290_v47 = vsel %vm3970_vm6, %v3878_v54, %v4226_v62  ;;  %v4227_v27 = vmul.f32 1.6732632, %v6280_v9 }
 0x574   : > { %7486 = vpow2.f32 %v4096_v12  ;;  %v4098_v36 = vmul.f32 1.442695, %v9535_v22  ;;  %v4354_v32 = vmul.f32 1.050701, %v4290_v47  ;;  %vm3975_vm11 = vcmp.gt.f32.partialorder %v9535_v22, 0.0 }
 0x575   : > { %v4291_v30 = vsel %vm3971_vm7, %v3881_v18, %v4227_v27 }
 0x576   : > { %v7483_v13 = vpop.eup %7482  ;;  %v4355_v14 = vmul.f32 1.050701, %v4291_v30  ;;  %7488 = vpow2.f32 %v4098_v36 }
 0x577   : > { %v6281_v8 = vadd.f32 -1.0, %v7483_v13  ;;  %v3901_v55 = vpop.f32.mrb[248].mxu1 }
 0x578   : > { %v9539_v2 = vadd.f32 %v9509_v53, %v3901_v55  ;;  %v3903_v43 = vpop.f32.mrb[249].mxu1  ;;  %v7485_v3 = vpop.eup %7484  ;;  %v4391_v45 = vpack.c.bf16 %v4355_v14, %v4354_v32 }
 0x579   : > { %v4228_v54 = vmul.f32 1.6732632, %v6281_v8  ;;  %v3904_v29 = vpop.f32.mrb[250].mxu1  ;;  %v6282_v42 = vadd.f32 -1.0, %v7485_v3 }
 0x57a   : > { %v4100_v28 = vmul.f32 1.442695, %v9539_v2  ;;  %v9548_v4 = vadd.f32 %v9509_v53, %v3904_v29  ;;  %v3906_v10 = vpop.f32.mrb[251].mxu1  ;;  %v6691_v39 = vpop.f32.mrb[128].mxu0  ;;  %6742 = vmatmul.mubr.bf16.gmra.mrb[28].mxu1 %v4391_v45  ;;  %vm3976_vm12 = vcmp.gt.f32.partialorder %v9539_v2, 0.0 }
 0x57b   : > { %v4292_v38 = vsel %vm3972_vm8, %v3886_v26, %v4228_v54  ;;  %v9551_v18 = vadd.f32 %v6691_v39, %v9544_v35  ;;  %v4501_v11 = vpop.f32.mrb[129].mxu0  ;;  %v4229_v34 = vmul.f32 1.6732632, %v6282_v42 }
 0x57c   : > { %7490 = vpow2.f32 %v4100_v28  ;;  %v6692_v48 = vpop.f32.mrb[130].mxu0  ;;  %v4102_v21 = vmul.f32 1.442695, %v9548_v4  ;;  %v9557_v51 = vadd.f32 %v9544_v35, %v4501_v11  ;;  %v4356_v17 = vmul.f32 1.050701, %v4292_v38 }
 0x57d   : > { %v4824_v33 = vmul.f32 1.442695, %v9551_v18  ;;  %v4504_v23 = vpop.f32.mrb[131].mxu0  ;;  %v4293_v57 = vsel %vm3973_vm9, %v9527_v40, %v4229_v34  ;;  %v9561_v26 = vadd.f32 %v6692_v48, %v9544_v35  ;;  %vm3977_vm13 = vcmp.gt.f32.partialorder %v9548_v4, 0.0 }
 0x57e   : > { %v7487_v25 = vpop.eup %7486  ;;  %v4357_v52 = vmul.f32 1.050701, %v4293_v57  ;;  %7492 = vpow2.f32 %v4102_v21  ;;  %v9564_v7 = vadd.f32 %v9544_v35, %v4504_v23  ;;  %v4820_v20 = vmul.f32 1.442695, %v9557_v51 }
 0x57f   : > { %v6283_v46 = vadd.f32 -1.0, %v7487_v25  ;;  %v3909_v0 = vpop.f32.mrb[252].mxu1  ;;  %7494 = vpow2.f32 %v4824_v33  ;;  %v4826_v40 = vmul.f32 1.442695, %v9561_v26  ;;  %vm4758_vm14 = vcmp.gt.f32.partialorder %v9551_v18, 0.0 }
 0x580   : > { %v9568_v16 = vadd.f32 %v9509_v53, %v3909_v0  ;;  %v3911_v44 = vpop.f32.mrb[253].mxu1  ;;  %v7489_v61 = vpop.eup %7488  ;;  %v4392_v49 = vpack.c.bf16 %v4357_v52, %v4356_v17  ;;  %7496 = vpow2.f32 %v4820_v20  ;;  %v4822_v59 = vmul.f32 1.442695, %v9564_v7 }
 0x581   : > { %v4230_v5 = vmul.f32 1.6732632, %v6283_v46  ;;  %v3912_v41 = vpop.f32.mrb[254].mxu1  ;;  %v6284_v50 = vadd.f32 -1.0, %v7489_v61  ;;  %7498 = vpow2.f32 %v4826_v40  ;;  %vm4756_vm15 = vcmp.gt.f32.partialorder %v9557_v51, 0.0 }
 0x582   : > { %v4104_v37 = vmul.f32 1.442695, %v9568_v16  ;;  %v3914_v24 = vpop.f32.mrb[255].mxu1  ;;  %v9575_v1 = vadd.f32 %v9509_v53, %v3912_v41  ;;  %6745 = vmatprep.mubr.bf16.mxu1 %v4392_v49  ;;  %vm4759_vm0 = vcmp.gt.f32.partialorder %v9561_v26, 0.0  ;;  %vm4757_vm1 = vcmp.gt.f32.partialorder %v9564_v7, 0.0 }
 0x583   : > { %v4294_v19 = vsel %vm3974_vm10, %v9531_v6, %v4230_v5  ;;  %v4231_v56 = vmul.f32 1.6732632, %v6284_v50  ;;  %vm3978_vm2 = vcmp.gt.f32.partialorder %v9568_v16, 0.0 }
 0x584   : > { %7500 = vpow2.f32 %v4104_v37  ;;  %v4106_v60 = vmul.f32 1.442695, %v9575_v1  ;;  %v4358_v15 = vmul.f32 1.050701, %v4294_v19  ;;  %vm3979_vm3 = vcmp.gt.f32.partialorder %v9575_v1, 0.0 }
 0x585   : > { %7502 = vpow2.f32 %v4822_v59  ;;  %v4295_v63 = vsel %vm3975_vm11, %v9535_v22, %v4231_v56 }
 0x586   : > { %v7491_v62 = vpop.eup %7490  ;;  %v4359_v9 = vmul.f32 1.050701, %v4295_v63  ;;  %7504 = vpow2.f32 %v4106_v60 }
 0x587   : > { %v6285_v12 = vadd.f32 -1.0, %v7491_v62 }
 0x588   : > { %v7493_v58 = vpop.eup %7492  ;;  %v4393_v53 = vpack.c.bf16 %v4359_v9, %v4358_v15 }
 0x589   : > { %v4232_v47 = vmul.f32 1.6732632, %v6285_v12  ;;  %v7495_v27 = vpop.eup %7494  ;;  %v6286_v6 = vadd.f32 -1.0, %v7493_v58 }
 0x58a   : > { %v6300_v13 = vadd.f32 -1.0, %v7495_v27  ;;  %6746 = vmatmul.mubr.bf16.gmra.mrb[32].mxu1 %v4393_v53  ;;  %v7497_v32 = vpop.eup %7496 }
 0x58b   : > { %v4296_v14 = vsel %vm3976_vm12, %v9539_v2, %v4232_v47  ;;  %v4233_v8 = vmul.f32 1.6732632, %v6286_v6  ;;  %v7499_v3 = vpop.eup %7498  ;;  %v6298_v54 = vadd.f32 -1.0, %v7497_v32 }
 0x58c   : > { %v6695_v36 = vpop.f32.mrb[132].mxu0  ;;  %v5014_v45 = vmul.f32 1.6732632, %v6300_v13  ;;  %v6301_v2 = vadd.f32 -1.0, %v7499_v3  ;;  %v4360_v11 = vmul.f32 1.050701, %v4296_v14 }
 0x58d   : > { %v9587_v22 = vadd.f32 %v6695_v36, %v9544_v35  ;;  %v4517_v30 = vpop.f32.mrb[133].mxu0  ;;  %v4297_v28 = vsel %vm3977_vm13, %v9548_v4, %v4233_v8  ;;  %v5012_v48 = vmul.f32 1.6732632, %v6298_v54 }
 0x58e   : > { %v9592_v55 = vadd.f32 %v9544_v35, %v4517_v30  ;;  %v6696_v43 = vpop.f32.mrb[134].mxu0  ;;  %v7501_v42 = vpop.eup %7500  ;;  %v5078_v34 = vsel %vm4758_vm14, %v9551_v18, %v5014_v45  ;;  %v4361_v33 = vmul.f32 1.050701, %v4297_v28  ;;  %v5015_v23 = vmul.f32 1.6732632, %v6301_v2 }
 0x58f   : > { %v4832_v29 = vmul.f32 1.442695, %v9587_v22  ;;  %v4520_v39 = vpop.f32.mrb[135].mxu0  ;;  %v7503_v38 = vpop.eup %7502  ;;  %v6287_v21 = vadd.f32 -1.0, %v7501_v42  ;;  %v5076_v4 = vsel %vm4756_vm15, %v9557_v51, %v5012_v48  ;;  %v4529_v52 = vadd.f32 %v6696_v43, %v9544_v35 }
 0x590   : > { %v4828_v10 = vmul.f32 1.442695, %v9592_v55  ;;  %v6299_v25 = vadd.f32 -1.0, %v7503_v38  ;;  %v7505_v17 = vpop.eup %7504  ;;  %v5142_v46 = vmul.f32 1.050701, %v5078_v34  ;;  %v5079_v18 = vsel %vm4759_vm0, %v9561_v26, %v5015_v23 }
 0x591   : > { %7506 = vpow2.f32 %v4832_v29  ;;  %v4234_v57 = vmul.f32 1.6732632, %v6287_v21  ;;  %v6288_v20 = vadd.f32 -1.0, %v7505_v17  ;;  %v5140_v44 = vmul.f32 1.050701, %v5076_v4 }
 0x592   : > { %7508 = vpow2.f32 %v4828_v10  ;;  %v5013_v0 = vmul.f32 1.6732632, %v6299_v25  ;;  %v5143_v61 = vmul.f32 1.050701, %v5079_v18  ;;  %v4834_v5 = vmul.f32 1.442695, %v4529_v52 }
 0x593   : > { %v4298_v40 = vsel %vm3978_vm2, %v9568_v16, %v4234_v57  ;;  %v4235_v41 = vmul.f32 1.6732632, %v6288_v20  ;;  %v4521_v49 = vadd.f32 %v9544_v35, %v4520_v39  ;;  %v4394_v37 = vpack.c.bf16 %v4361_v33, %v4360_v11 }
 0x594   : > { %v5077_v51 = vsel %vm4757_vm1, %v9564_v7, %v5013_v0  ;;  %7510 = vpow2.f32 %v4834_v5  ;;  %v5205_v26 = vpack.c.bf16 %v5143_v61, %v5142_v46  ;;  %v4362_v19 = vmul.f32 1.050701, %v4298_v40 }
 0x595   : > { %v5141_v50 = vmul.f32 1.050701, %v5077_v51  ;;  %v4299_v24 = vsel %vm3979_vm3, %v9575_v1, %v4235_v41  ;;  %v4830_v59 = vmul.f32 1.442695, %v4521_v49  ;;  %6749 = vmatprep.mubr.bf16.mxu1 %v4394_v37  ;;  %vm4762_vm4 = vcmp.gt.f32.partialorder %v9587_v22, 0.0 }
 0x596   : > { %v4363_v60 = vmul.f32 1.050701, %v4299_v24  ;;  %vm4763_vm5 = vcmp.gt.f32.partialorder %v4529_v52, 0.0  ;;  %vm4760_vm6 = vcmp.gt.f32.partialorder %v9592_v55, 0.0  ;;  %vm4761_vm7 = vcmp.gt.f32.partialorder %v4521_v49, 0.0 }
 0x597   : > { %v5204_v56 = vpack.c.bf16 %v5141_v50, %v5140_v44  ;;  %7512 = vpow2.f32 %v4830_v59 }
 0x598   : > { %v4395_v16 = vpack.c.bf16 %v4363_v60, %v4362_v19 }
 0x599   : > { %5377 = vmatmul.mubr.bf16.vlgmr.msra.gmra.mrb[152].mxu0 %v5204_v56 }
 0x59a   : > { %5386 = vmatprep.mubr.bf16.mxu0 %v10282_v31  ;;  %6750 = vmatmul.mubr.bf16.gmra.mrb[36].mxu1 %v4395_v16 }
 0x59b   : > { %v7507_v7 = vpop.eup %7506 }
 0x59c   : > { %v6699_v62 = vpop.f32.mrb[136].mxu0  ;;  %v7509_v63 = vpop.eup %7508  ;;  %v6304_v15 = vadd.f32 -1.0, %v7507_v7 }
 0x59d   : > { %v9623_v9 = vadd.f32 %v6699_v62, %v9544_v35  ;;  %v4533_v12 = vpop.f32.mrb[137].mxu0  ;;  %v6302_v53 = vadd.f32 -1.0, %v7509_v63 }
 0x59e   : > { %v9626_v1 = vadd.f32 %v9544_v35, %v4533_v12  ;;  %v6700_v58 = vpop.f32.mrb[138].mxu0  ;;  %v5018_v36 = vmul.f32 1.6732632, %v6304_v15  ;;  %v7511_v32 = vpop.eup %7510 }
 0x59f   : > { %v4840_v47 = vmul.f32 1.442695, %v9623_v9  ;;  %v9630_v27 = vadd.f32 %v6700_v58, %v9544_v35  ;;  %v4536_v6 = vpop.f32.mrb[139].mxu0  ;;  %v6305_v8 = vadd.f32 -1.0, %v7511_v32  ;;  %v5016_v43 = vmul.f32 1.6732632, %v6302_v53 }
 0x5a0   : > { %v4836_v13 = vmul.f32 1.442695, %v9626_v1  ;;  %v9634_v30 = vadd.f32 %v9544_v35, %v4536_v6  ;;  %v5082_v54 = vsel %vm4762_vm4, %v9587_v22, %v5018_v36  ;;  %vm4766_vm8 = vcmp.gt.f32.partialorder %v9623_v9, 0.0 }
 0x5a1   : > { %7514 = vpow2.f32 %v4840_v47  ;;  %v4842_v14 = vmul.f32 1.442695, %v9630_v27  ;;  %5387 = vmatmul.mubr.bf16.gmra.mrb[156].mxu0 %v5205_v26  ;;  %v7513_v45 = vpop.eup %7512  ;;  %v5019_v29 = vmul.f32 1.6732632, %v6305_v8  ;;  %v5146_v2 = vmul.f32 1.050701, %v5082_v54 }
 0x5a2   : > { %7516 = vpow2.f32 %v4836_v13  ;;  %v4838_v3 = vmul.f32 1.442695, %v9634_v30  ;;  %5396 = vmatprep.mubr.bf16.mxu0 %v10282_v31  ;;  %v6303_v42 = vadd.f32 -1.0, %v7513_v45  ;;  %v5080_v10 = vsel %vm4760_vm6, %v9592_v55, %v5016_v43 }
 0x5a3   : > { %7518 = vpow2.f32 %v4842_v14  ;;  %v5083_v28 = vsel %vm4763_vm5, %v4529_v52, %v5019_v29  ;;  %v5144_v48 = vmul.f32 1.050701, %v5080_v10  ;;  %vm4764_vm9 = vcmp.gt.f32.partialorder %v9626_v1, 0.0 }
 0x5a4   : > { %7520 = vpow2.f32 %v4838_v3  ;;  %v5147_v39 = vmul.f32 1.050701, %v5083_v28  ;;  %v5017_v38 = vmul.f32 1.6732632, %v6303_v42  ;;  %vm4767_vm10 = vcmp.gt.f32.partialorder %v9630_v27, 0.0 }
 0x5a5   : > { %vm4765_vm11 = vcmp.gt.f32.partialorder %v9634_v30, 0.0 }
 0x5a6   : > { %v5081_v11 = vsel %vm4761_vm7, %v4521_v49, %v5017_v38  ;;  %v5207_v34 = vpack.c.bf16 %v5147_v39, %v5146_v2 }
 0x5a7   : > { %v5145_v21 = vmul.f32 1.050701, %v5081_v11 }
 0x5a9   : > { %v5206_v25 = vpack.c.bf16 %v5145_v21, %v5144_v48 }
 0x5ab   : > { %v7515_v22 = vpop.eup %7514  ;;  %5397 = vmatmul.mubr.bf16.gmra.mrb[160].mxu0 %v5206_v25 }
 0x5ac   : > { %v7517_v33 = vpop.eup %7516  ;;  %v6308_v23 = vadd.f32 -1.0, %v7515_v22  ;;  %v6703_v17 = vpop.f32.mrb[140].mxu0  ;;  %5406 = vmatprep.mubr.bf16.mxu0 %v10282_v31 }
 0x5ad   : > { %v7519_v4 = vpop.eup %7518  ;;  %v6306_v57 = vadd.f32 -1.0, %v7517_v33  ;;  %v4558_v46 = vadd.f32 %v6703_v17, %v9544_v35  ;;  %v4549_v52 = vpop.f32.mrb[141].mxu0 }
 0x5ae   : > { %v5022_v18 = vmul.f32 1.6732632, %v6308_v23  ;;  %v6309_v0 = vadd.f32 -1.0, %v7519_v4  ;;  %v4550_v55 = vadd.f32 %v9544_v35, %v4549_v52  ;;  %v6704_v20 = vpop.f32.mrb[142].mxu0  ;;  %v7521_v44 = vpop.eup %7520 }
 0x5af   : > { %v5020_v61 = vmul.f32 1.6732632, %v6306_v57  ;;  %v4848_v5 = vmul.f32 1.442695, %v4558_v46  ;;  %v4561_v40 = vadd.f32 %v6704_v20, %v9544_v35  ;;  %v4552_v51 = vpop.f32.mrb[143].mxu0  ;;  %v6307_v49 = vadd.f32 -1.0, %v7521_v44 }
 0x5b0   : > { %v5023_v41 = vmul.f32 1.6732632, %v6309_v0  ;;  %v5086_v50 = vsel %vm4766_vm8, %v9623_v9, %v5022_v18  ;;  %v4844_v37 = vmul.f32 1.442695, %v4550_v55  ;;  %v4553_v60 = vadd.f32 %v9544_v35, %v4552_v51 }
 0x5b1   : > { %7522 = vpow2.f32 %v4848_v5  ;;  %v5084_v26 = vsel %vm4764_vm9, %v9626_v1, %v5020_v61  ;;  %v5021_v59 = vmul.f32 1.6732632, %v6307_v49  ;;  %v4850_v56 = vmul.f32 1.442695, %v4561_v40 }
 0x5b2   : > { %v5087_v24 = vsel %vm4767_vm10, %v9630_v27, %v5023_v41  ;;  %7524 = vpow2.f32 %v4844_v37  ;;  %v5150_v16 = vmul.f32 1.050701, %v5086_v50  ;;  %v5148_v62 = vmul.f32 1.050701, %v5084_v26 }
 0x5b3   : > { %v5151_v19 = vmul.f32 1.050701, %v5087_v24  ;;  %v5085_v7 = vsel %vm4765_vm11, %v9634_v30, %v5021_v59  ;;  %7526 = vpow2.f32 %v4850_v56  ;;  %v4846_v15 = vmul.f32 1.442695, %v4553_v60  ;;  %5407 = vmatmul.mubr.bf16.gmra.mrb[164].mxu0 %v5207_v34 }
 0x5b4   : > { %v5149_v63 = vmul.f32 1.050701, %v5085_v7  ;;  %5416 = vmatprep.mubr.bf16.mxu0 %v10282_v31  ;;  %vm4770_vm12 = vcmp.gt.f32.partialorder %v4558_v46, 0.0  ;;  %vm4768_vm13 = vcmp.gt.f32.partialorder %v4550_v55, 0.0  ;;  %vm4771_vm14 = vcmp.gt.f32.partialorder %v4561_v40, 0.0 }
 0x5b5   : > { %v5209_v9 = vpack.c.bf16 %v5151_v19, %v5150_v16  ;;  %7528 = vpow2.f32 %v4846_v15  ;;  %vm4769_vm15 = vcmp.gt.f32.partialorder %v4553_v60, 0.0 }
 0x5b6   : > { %v5208_v12 = vpack.c.bf16 %v5149_v63, %v5148_v62 }
 0x5bb   : > { %v7523_v1 = vpop.eup %7522  ;;  %5417 = vmatmul.mubr.bf16.gmra.mrb[168].mxu0 %v5208_v12 }
 0x5bc   : > { %v6312_v58 = vadd.f32 -1.0, %v7523_v1  ;;  %v7525_v53 = vpop.eup %7524  ;;  %5426 = vmatprep.mubr.bf16.mxu0 %v10282_v31 }
 0x5bd   : > { %v6310_v27 = vadd.f32 -1.0, %v7525_v53  ;;  %v6707_v6 = vpop.f32.mrb[144].mxu0  ;;  %v7527_v36 = vpop.eup %7526 }
 0x5be   : > { %v5026_v47 = vmul.f32 1.6732632, %v6312_v58  ;;  %v4574_v13 = vadd.f32 %v6707_v6, %v9544_v35  ;;  %v4565_v30 = vpop.f32.mrb[145].mxu0  ;;  %v6313_v14 = vadd.f32 -1.0, %v7527_v36 }
 0x5bf   : > { %v5024_v32 = vmul.f32 1.6732632, %v6310_v27  ;;  %v9660_v8 = vadd.f32 %v9544_v35, %v4565_v30  ;;  %v6708_v43 = vpop.f32.mrb[146].mxu0  ;;  %v7529_v3 = vpop.eup %7528 }
 0x5c0   : > { %v4856_v45 = vmul.f32 1.442695, %v4574_v13  ;;  %v4577_v54 = vadd.f32 %v6708_v43, %v9544_v35  ;;  %v4568_v29 = vpop.f32.mrb[147].mxu0  ;;  %v5090_v42 = vsel %vm4770_vm12, %v4558_v46, %v5026_v47  ;;  %v5027_v28 = vmul.f32 1.6732632, %v6313_v14 }
 0x5c1   : > { %v6311_v2 = vadd.f32 -1.0, %v7529_v3  ;;  %v5088_v10 = vsel %vm4768_vm13, %v4550_v55, %v5024_v32  ;;  %v4852_v39 = vmul.f32 1.442695, %v9660_v8  ;;  %v4569_v48 = vadd.f32 %v9544_v35, %v4568_v29 }
 0x5c2   : > { %7530 = vpow2.f32 %v4856_v45  ;;  %v5091_v38 = vsel %vm4771_vm14, %v4561_v40, %v5027_v28  ;;  %v4858_v34 = vmul.f32 1.442695, %v4577_v54  ;;  %v5154_v21 = vmul.f32 1.050701, %v5090_v42 }
 0x5c3   : > { %v5025_v11 = vmul.f32 1.6732632, %v6311_v2  ;;  %v5155_v22 = vmul.f32 1.050701, %v5091_v38  ;;  %7532 = vpow2.f32 %v4852_v39  ;;  %v4854_v23 = vmul.f32 1.442695, %v4569_v48  ;;  %5427 = vmatmul.mubr.bf16.gmra.mrb[172].mxu0 %v5209_v9 }
 0x5c4   : > { %7534 = vpow2.f32 %v4858_v34  ;;  %v5152_v25 = vmul.f32 1.050701, %v5088_v10  ;;  %5436 = vmatprep.mubr.bf16.mxu0 %v10282_v31  ;;  %vm4774_vm0 = vcmp.gt.f32.partialorder %v4574_v13, 0.0  ;;  %vm4772_vm1 = vcmp.gt.f32.partialorder %v9660_v8, 0.0 }
 0x5c5   : > { %v5089_v33 = vsel %vm4769_vm15, %v4553_v60, %v5025_v11  ;;  %v5211_v4 = vpack.c.bf16 %v5155_v22, %v5154_v21  ;;  %7536 = vpow2.f32 %v4854_v23  ;;  %vm4775_vm2 = vcmp.gt.f32.partialorder %v4577_v54, 0.0 }
 0x5c6   : > { %v5153_v17 = vmul.f32 1.050701, %v5089_v33  ;;  %vm4773_vm3 = vcmp.gt.f32.partialorder %v4569_v48, 0.0 }
 0x5c8   : > { %v5210_v57 = vpack.c.bf16 %v5153_v17, %v5152_v25 }
 0x5cb   : > { %5437 = vmatmul.mubr.bf16.gmra.mrb[176].mxu0 %v5210_v57 }
 0x5cc   : > { %v7531_v46 = vpop.eup %7530  ;;  %5446 = vmatprep.mubr.bf16.mxu0 %v10282_v31 }
 0x5cd   : > { %v6316_v52 = vadd.f32 -1.0, %v7531_v46  ;;  %v6711_v18 = vpop.f32.mrb[148].mxu0  ;;  %v7533_v0 = vpop.eup %7532 }
 0x5ce   : > { %v4590_v55 = vadd.f32 %v6711_v18, %v9544_v35  ;;  %v4581_v20 = vpop.f32.mrb[149].mxu0  ;;  %v7535_v44 = vpop.eup %7534  ;;  %v6314_v5 = vadd.f32 -1.0, %v7533_v0 }
 0x5cf   : > { %v5030_v61 = vmul.f32 1.6732632, %v6316_v52  ;;  %v9669_v40 = vadd.f32 %v9544_v35, %v4581_v20  ;;  %v6712_v51 = vpop.f32.mrb[150].mxu0  ;;  %v6317_v41 = vadd.f32 -1.0, %v7535_v44  ;;  %v7537_v26 = vpop.eup %7536 }
 0x5d0   : > { %v4864_v49 = vmul.f32 1.442695, %v4590_v55  ;;  %v4593_v50 = vadd.f32 %v6712_v51, %v9544_v35  ;;  %v4584_v37 = vpop.f32.mrb[151].mxu0  ;;  %v5028_v24 = vmul.f32 1.6732632, %v6314_v5  ;;  %v6315_v60 = vadd.f32 -1.0, %v7537_v26 }
 0x5d1   : > { %v4860_v59 = vmul.f32 1.442695, %v9669_v40  ;;  %v5094_v19 = vsel %vm4774_vm0, %v4574_v13, %v5030_v61  ;;  %v5031_v56 = vmul.f32 1.6732632, %v6317_v41  ;;  %v4585_v15 = vadd.f32 %v9544_v35, %v4584_v37 }
 0x5d2   : > { %7538 = vpow2.f32 %v4864_v49  ;;  %v4866_v16 = vmul.f32 1.442695, %v4593_v50  ;;  %v5092_v7 = vsel %vm4772_vm1, %v9660_v8, %v5028_v24  ;;  %v5029_v63 = vmul.f32 1.6732632, %v6315_v60 }
 0x5d3   : > { %7540 = vpow2.f32 %v4860_v59  ;;  %v5095_v62 = vsel %vm4775_vm2, %v4577_v54, %v5031_v56  ;;  %v5158_v9 = vmul.f32 1.050701, %v5094_v19  ;;  %5447 = vmatmul.mubr.bf16.gmra.mrb[180].mxu0 %v5211_v4  ;;  %v4862_v58 = vmul.f32 1.442695, %v4585_v15 }
 0x5d4   : > { %v5159_v12 = vmul.f32 1.050701, %v5095_v62  ;;  %7542 = vpow2.f32 %v4866_v16  ;;  %v5093_v1 = vsel %vm4773_vm3, %v4569_v48, %v5029_v63  ;;  %5456 = vmatprep.mubr.bf16.mxu0 %v10282_v31  ;;  %v5156_v53 = vmul.f32 1.050701, %v5092_v7 }
 0x5d5   : > { %v5157_v47 = vmul.f32 1.050701, %v5093_v1  ;;  %7544 = vpow2.f32 %v4862_v58  ;;  %vm4778_vm4 = vcmp.gt.f32.partialorder %v4590_v55, 0.0  ;;  %vm4776_vm5 = vcmp.gt.f32.partialorder %v9669_v40, 0.0 }
 0x5d6   : > { %v5213_v27 = vpack.c.bf16 %v5159_v12, %v5158_v9  ;;  %vm4779_vm6 = vcmp.gt.f32.partialorder %v4593_v50, 0.0  ;;  %vm4777_vm7 = vcmp.gt.f32.partialorder %v4585_v15, 0.0 }
 0x5d7   : > { %v5212_v6 = vpack.c.bf16 %v5157_v47, %v5156_v53 }
 0x5db   : > { %5457 = vmatmul.mubr.bf16.gmra.mrb[184].mxu0 %v5212_v6 }
 0x5dc   : > { %v7539_v36 = vpop.eup %7538  ;;  %5466 = vmatprep.mubr.bf16.mxu0 %v10282_v31 }
 0x5dd   : > { %v7541_v13 = vpop.eup %7540  ;;  %v6320_v30 = vadd.f32 -1.0, %v7539_v36  ;;  %v6715_v43 = vpop.f32.mrb[0].mxu1 }
 0x5de   : > { %v6318_v32 = vadd.f32 -1.0, %v7541_v13  ;;  %v7543_v14 = vpop.eup %7542  ;;  %v4606_v45 = vadd.f32 %v6715_v43, %v9544_v35  ;;  %v4597_v54 = vpop.f32.mrb[1].mxu1 }
 0x5df   : > { %v5034_v8 = vmul.f32 1.6732632, %v6320_v30  ;;  %v6321_v3 = vadd.f32 -1.0, %v7543_v14  ;;  %v4598_v28 = vadd.f32 %v9544_v35, %v4597_v54  ;;  %v6716_v2 = vpop.f32.mrb[2].mxu1  ;;  %v7545_v10 = vpop.eup %7544 }
 0x5e0   : > { %v5032_v42 = vmul.f32 1.6732632, %v6318_v32  ;;  %v4600_v38 = vpop.f32.mrb[3].mxu1  ;;  %v6319_v34 = vadd.f32 -1.0, %v7545_v10  ;;  %v4872_v48 = vmul.f32 1.442695, %v4606_v45  ;;  %v4609_v33 = vadd.f32 %v6716_v2, %v9544_v35 }
 0x5e1   : > { %v5098_v29 = vsel %vm4778_vm4, %v4590_v55, %v5034_v8  ;;  %v5035_v39 = vmul.f32 1.6732632, %v6321_v3  ;;  %v4868_v22 = vmul.f32 1.442695, %v4598_v28  ;;  %v4601_v23 = vadd.f32 %v9544_v35, %v4600_v38 }
 0x5e2   : > { %v5162_v11 = vmul.f32 1.050701, %v5098_v29  ;;  %v5096_v25 = vsel %vm4776_vm5, %v9669_v40, %v5032_v42  ;;  %v5033_v4 = vmul.f32 1.6732632, %v6319_v34  ;;  %7546 = vpow2.f32 %v4872_v48 }
 0x5e3   : > { %v5099_v21 = vsel %vm4779_vm6, %v4593_v50, %v5035_v39  ;;  %5467 = vmatmul.mubr.bf16.gmra.mrb[188].mxu0 %v5213_v27  ;;  %7548 = vpow2.f32 %v4868_v22  ;;  %v4874_v57 = vmul.f32 1.442695, %v4609_v33  ;;  %v4870_v52 = vmul.f32 1.442695, %v4601_v23 }
 0x5e4   : > { %v5163_v17 = vmul.f32 1.050701, %v5099_v21  ;;  %5476 = vmatprep.mubr.bf16.mxu0 %v10282_v31  ;;  %v5097_v46 = vsel %vm4777_vm7, %v4585_v15, %v5033_v4  ;;  %v5160_v0 = vmul.f32 1.050701, %v5096_v25  ;;  %vm4782_vm8 = vcmp.gt.f32.partialorder %v4606_v45, 0.0 }
 0x5e5   : > { %v5161_v55 = vmul.f32 1.050701, %v5097_v46  ;;  %7550 = vpow2.f32 %v4874_v57  ;;  %vm4780_vm9 = vcmp.gt.f32.partialorder %v4598_v28, 0.0  ;;  %vm4783_vm10 = vcmp.gt.f32.partialorder %v4609_v33, 0.0 }
 0x5e6   : > { %v5215_v18 = vpack.c.bf16 %v5163_v17, %v5162_v11  ;;  %7552 = vpow2.f32 %v4870_v52  ;;  %vm4781_vm11 = vcmp.gt.f32.partialorder %v4601_v23, 0.0 }
 0x5e7   : > { %v5214_v20 = vpack.c.bf16 %v5161_v55, %v5160_v0 }
 0x5eb   : > { %5477 = vmatmul.mubr.bf16.gmra.mrb[192].mxu0 %v5214_v20 }
 0x5ec   : > { %5486 = vmatprep.mubr.bf16.mxu0 %v10282_v31  ;;  %v7547_v44 = vpop.eup %7546 }
 0x5ed   : > { %v6719_v61 = vpop.f32.mrb[4].mxu1  ;;  %v7549_v5 = vpop.eup %7548  ;;  %v6324_v40 = vadd.f32 -1.0, %v7547_v44 }
 0x5ee   : > { %v9687_v51 = vadd.f32 %v6719_v61, %v9544_v35  ;;  %v4613_v41 = vpop.f32.mrb[5].mxu1  ;;  %v6322_v49 = vadd.f32 -1.0, %v7549_v5 }
 0x5ef   : > { %v9690_v50 = vadd.f32 %v9544_v35, %v4613_v41  ;;  %v6720_v37 = vpop.f32.mrb[6].mxu1  ;;  %v7551_v26 = vpop.eup %7550  ;;  %v5038_v24 = vmul.f32 1.6732632, %v6324_v40 }
 0x5f0   : > { %v4880_v59 = vmul.f32 1.442695, %v9687_v51  ;;  %v9694_v19 = vadd.f32 %v6720_v37, %v9544_v35  ;;  %v4616_v56 = vpop.f32.mrb[7].mxu1  ;;  %v7553_v60 = vpop.eup %7552  ;;  %v5036_v16 = vmul.f32 1.6732632, %v6322_v49  ;;  %v6325_v7 = vadd.f32 -1.0, %v7551_v26 }
 0x5f1   : > { %v4876_v62 = vmul.f32 1.442695, %v9690_v50  ;;  %v6323_v63 = vadd.f32 -1.0, %v7553_v60  ;;  %v5102_v15 = vsel %vm4782_vm8, %v4606_v45, %v5038_v24  ;;  %v4617_v53 = vadd.f32 %v9544_v35, %v4616_v56 }
 0x5f2   : > { %7554 = vpow2.f32 %v4880_v59  ;;  %v5039_v9 = vmul.f32 1.6732632, %v6325_v7  ;;  %v5100_v12 = vsel %vm4780_vm9, %v4598_v28, %v5036_v16  ;;  %v4882_v58 = vmul.f32 1.442695, %v9694_v19 }
 0x5f3   : > { %7556 = vpow2.f32 %v4876_v62  ;;  %5487 = vmatmul.mubr.bf16.gmra.mrb[196].mxu0 %v5215_v18  ;;  %v5037_v1 = vmul.f32 1.6732632, %v6323_v63  ;;  %v5166_v27 = vmul.f32 1.050701, %v5102_v15  ;;  %v5164_v13 = vmul.f32 1.050701, %v5100_v12 }
 0x5f4   : > { %5496 = vmatprep.mubr.bf16.mxu0 %v10282_v31  ;;  %v5103_v47 = vsel %vm4783_vm10, %v4609_v33, %v5039_v9  ;;  %7558 = vpow2.f32 %v4882_v58  ;;  %v4878_v32 = vmul.f32 1.442695, %v4617_v53  ;;  %vm4786_vm12 = vcmp.gt.f32.partialorder %v9687_v51, 0.0 }
 0x5f5   : > { %v5167_v6 = vmul.f32 1.050701, %v5103_v47  ;;  %v5101_v36 = vsel %vm4781_vm11, %v4601_v23, %v5037_v1  ;;  %vm4787_vm13 = vcmp.gt.f32.partialorder %v9694_v19, 0.0  ;;  %vm4784_vm14 = vcmp.gt.f32.partialorder %v9690_v50, 0.0 }
 0x5f6   : > { %v5165_v30 = vmul.f32 1.050701, %v5101_v36  ;;  %7560 = vpow2.f32 %v4878_v32  ;;  %vm4785_vm15 = vcmp.gt.f32.partialorder %v4617_v53, 0.0 }
 0x5f7   : > { %v5217_v14 = vpack.c.bf16 %v5167_v6, %v5166_v27 }
 0x5f8   : > { %v5216_v8 = vpack.c.bf16 %v5165_v30, %v5164_v13 }
 0x5fb   : > { %5497 = vmatmul.mubr.bf16.gmra.mrb[200].mxu0 %v5216_v8 }
 0x5fc   : > { %v7555_v43 = vpop.eup %7554  ;;  %5506 = vmatprep.mubr.bf16.mxu0 %v10282_v31 }
 0x5fd   : > { %v7557_v3 = vpop.eup %7556  ;;  %v6328_v45 = vadd.f32 -1.0, %v7555_v43  ;;  %v6723_v54 = vpop.f32.mrb[8].mxu1 }
 0x5fe   : > { %v6326_v29 = vadd.f32 -1.0, %v7557_v3  ;;  %v4638_v42 = vadd.f32 %v6723_v54, %v9544_v35  ;;  %v4629_v28 = vpop.f32.mrb[9].mxu1  ;;  %v7559_v38 = vpop.eup %7558 }
 0x5ff   : > { %v5042_v2 = vmul.f32 1.6732632, %v6328_v45  ;;  %v9703_v10 = vadd.f32 %v9544_v35, %v4629_v28  ;;  %v6724_v39 = vpop.f32.mrb[10].mxu1  ;;  %v6329_v21 = vadd.f32 -1.0, %v7559_v38 }
 0x600   : > { %v4888_v11 = vmul.f32 1.442695, %v4638_v42  ;;  %v4641_v34 = vadd.f32 %v6724_v39, %v9544_v35  ;;  %v4632_v48 = vpop.f32.mrb[11].mxu1  ;;  %v5040_v33 = vmul.f32 1.6732632, %v6326_v29  ;;  %v7561_v23 = vpop.eup %7560  ;;  %vm4790_vm0 = vcmp.gt.f32.partialorder %v4638_v42, 0.0 }
 0x601   : > { %v4884_v22 = vmul.f32 1.442695, %v9703_v10  ;;  %v5106_v25 = vsel %vm4786_vm12, %v9687_v51, %v5042_v2  ;;  %v5043_v17 = vmul.f32 1.6732632, %v6329_v21  ;;  %v6327_v57 = vadd.f32 -1.0, %v7561_v23 }
 0x602   : > { %7562 = vpow2.f32 %v4888_v11  ;;  %v4890_v4 = vmul.f32 1.442695, %v4641_v34  ;;  %v4633_v46 = vadd.f32 %v9544_v35, %v4632_v48  ;;  %v5170_v18 = vmul.f32 1.050701, %v5106_v25 }
 0x603   : > { %7564 = vpow2.f32 %v4884_v22  ;;  %5507 = vmatmul.mubr.bf16.gmra.mrb[204].mxu0 %v5217_v14  ;;  %v5107_v52 = vsel %vm4787_vm13, %v9694_v19, %v5043_v17  ;;  %v5104_v0 = vsel %vm4784_vm14, %v9690_v50, %v5040_v33  ;;  %v5041_v20 = vmul.f32 1.6732632, %v6327_v57  ;;  %v9742_v57 = vld [vmem:[%s10224_s10] ss:$0 sm:$0xff] }
 0x604   : > { %5516 = vmatprep.mubr.bf16.mxu0 %v10282_v31  ;;  %7566 = vpow2.f32 %v4890_v4  ;;  %v5171_v55 = vmul.f32 1.050701, %v5107_v52  ;;  %v4886_v44 = vmul.f32 1.442695, %v4633_v46  ;;  %v5168_v40 = vmul.f32 1.050701, %v5104_v0 }
 0x605   : > { %v5105_v61 = vsel %vm4785_vm15, %v4617_v53, %v5041_v20  ;;  %vm4791_vm1 = vcmp.gt.f32.partialorder %v4641_v34, 0.0  ;;  %vm4788_vm2 = vcmp.gt.f32.partialorder %v9703_v10, 0.0  ;;  %vm4789_vm3 = vcmp.gt.f32.partialorder %v4633_v46, 0.0 }
 0x606   : > { %v5219_v5 = vpack.c.bf16 %v5171_v55, %v5170_v18  ;;  %v5169_v51 = vmul.f32 1.050701, %v5105_v61  ;;  %7568 = vpow2.f32 %v4886_v44 }
 0x608   : > { %v5218_v41 = vpack.c.bf16 %v5169_v51, %v5168_v40 }
 0x60b   : > { %5517 = vmatmul.mubr.bf16.gmra.mrb[208].mxu0 %v5218_v41 }
 0x60c   : > { %v7563_v49 = vpop.eup %7562  ;;  %5526 = vmatprep.mubr.bf16.mxu0 %v10282_v31 }
 0x60d   : > { %v7565_v37 = vpop.eup %7564  ;;  %v6332_v26 = vadd.f32 -1.0, %v7563_v49  ;;  %v6727_v24 = vpop.f32.mrb[12].mxu1 }
 0x60e   : > { %v6330_v59 = vadd.f32 -1.0, %v7565_v37  ;;  %v9716_v19 = vadd.f32 %v6727_v24, %v9544_v35  ;;  %v4645_v50 = vpop.f32.mrb[13].mxu1  ;;  %v7567_v56 = vpop.eup %7566 }
 0x60f   : > { %v5046_v60 = vmul.f32 1.6732632, %v6332_v26  ;;  %v9720_v16 = vadd.f32 %v9544_v35, %v4645_v50  ;;  %v6728_v7 = vpop.f32.mrb[14].mxu1  ;;  %v6333_v62 = vadd.f32 -1.0, %v7567_v56 }
 0x610   : > { %v4896_v63 = vmul.f32 1.442695, %v9716_v19  ;;  %v4657_v9 = vadd.f32 %v6728_v7, %v9544_v35  ;;  %v4648_v12 = vpop.f32.mrb[15].mxu1  ;;  %v5044_v58 = vmul.f32 1.6732632, %v6330_v59  ;;  %v7569_v47 = vpop.eup %7568  ;;  %vm4794_vm4 = vcmp.gt.f32.partialorder %v9716_v19, 0.0 }
 0x611   : > { %v4892_v15 = vmul.f32 1.442695, %v9720_v16  ;;  %v5110_v1 = vsel %vm4790_vm0, %v4638_v42, %v5046_v60  ;;  %v5047_v53 = vmul.f32 1.6732632, %v6333_v62  ;;  %v6331_v36 = vadd.f32 -1.0, %v7569_v47 }
 0x612   : > { %7570 = vpow2.f32 %v4896_v63  ;;  %v4898_v27 = vmul.f32 1.442695, %v4657_v9  ;;  %v4649_v13 = vadd.f32 %v9544_v35, %v4648_v12  ;;  %v5174_v30 = vmul.f32 1.050701, %v5110_v1 }
 0x613   : > { %7572 = vpow2.f32 %v4892_v15  ;;  %v5111_v6 = vsel %vm4791_vm1, %v4641_v34, %v5047_v53  ;;  %5527 = vmatmul.mubr.bf16.gmra.mrb[212].mxu0 %v5219_v5  ;;  %v5108_v14 = vsel %vm4788_vm2, %v9703_v10, %v5044_v58  ;;  %v5045_v8 = vmul.f32 1.6732632, %v6331_v36 }
 0x614   : > { %v5175_v32 = vmul.f32 1.050701, %v5111_v6  ;;  %7574 = vpow2.f32 %v4898_v27  ;;  %v4894_v43 = vmul.f32 1.442695, %v4649_v13  ;;  %5536 = vmatprep.mubr.bf16.mxu0 %v10282_v31  ;;  %v5172_v54 = vmul.f32 1.050701, %v5108_v14 }
 0x615   : > { %v5109_v45 = vsel %vm4789_vm3, %v4633_v46, %v5045_v8  ;;  %vm4795_vm5 = vcmp.gt.f32.partialorder %v4657_v9, 0.0  ;;  %vm4792_vm6 = vcmp.gt.f32.partialorder %v9720_v16, 0.0  ;;  %vm4793_vm7 = vcmp.gt.f32.partialorder %v4649_v13, 0.0 }
 0x616   : > { %v5221_v3 = vpack.c.bf16 %v5175_v32, %v5174_v30  ;;  %7576 = vpow2.f32 %v4894_v43  ;;  %v5173_v29 = vmul.f32 1.050701, %v5109_v45 }
 0x618   : > { %v5220_v42 = vpack.c.bf16 %v5173_v29, %v5172_v54 }
 0x61b   : > { %5537 = vmatmul.mubr.bf16.gmra.mrb[216].mxu0 %v5220_v42 }
 0x61c   : > { %v7571_v28 = vpop.eup %7570  ;;  %5546 = vmatprep.mubr.bf16.mxu0 %v10282_v31 }
 0x61d   : > { %v7573_v2 = vpop.eup %7572  ;;  %v6336_v39 = vadd.f32 -1.0, %v7571_v28  ;;  %v6731_v38 = vpop.f32.mrb[16].mxu1 }
 0x61e   : > { %v6334_v11 = vadd.f32 -1.0, %v7573_v2  ;;  %v9730_v34 = vadd.f32 %v6731_v38, %v9544_v35  ;;  %v4661_v10 = vpop.f32.mrb[17].mxu1  ;;  %v7575_v48 = vpop.eup %7574 }
 0x61f   : > { %v5050_v21 = vmul.f32 1.6732632, %v6336_v39  ;;  %v9734_v22 = vadd.f32 %v9544_v35, %v4661_v10  ;;  %v6732_v33 = vpop.f32.mrb[18].mxu1  ;;  %v6337_v23 = vadd.f32 -1.0, %v7575_v48 }
 0x620   : > { %v4904_v25 = vmul.f32 1.442695, %v9730_v34  ;;  %v5048_v17 = vmul.f32 1.6732632, %v6334_v11  ;;  %v4673_v46 = vadd.f32 %v9742_v57, %v6732_v33  ;;  %v4664_v52 = vpop.f32.mrb[19].mxu1  ;;  %v7577_v18 = vpop.eup %7576  ;;  %vm4798_vm8 = vcmp.gt.f32.partialorder %v9730_v34, 0.0 }
 0x621   : > { %v4900_v4 = vmul.f32 1.442695, %v9734_v22  ;;  %v5114_v35 = vsel %vm4794_vm4, %v9716_v19, %v5050_v21  ;;  %v5051_v0 = vmul.f32 1.6732632, %v6337_v23  ;;  %v6335_v55 = vadd.f32 -1.0, %v7577_v18 }
 0x622   : > { %7578 = vpow2.f32 %v4904_v25  ;;  %v4906_v44 = vmul.f32 1.442695, %v4673_v46  ;;  %v4665_v61 = vadd.f32 %v9742_v57, %v4664_v52  ;;  %v5178_v5 = vmul.f32 1.050701, %v5114_v35 }
 0x623   : > { %7580 = vpow2.f32 %v4900_v4  ;;  %v5115_v20 = vsel %vm4795_vm5, %v4657_v9, %v5051_v0  ;;  %v5112_v40 = vsel %vm4792_vm6, %v9720_v16, %v5048_v17  ;;  %v5049_v41 = vmul.f32 1.6732632, %v6335_v55  ;;  %5547 = vmatmul.mubr.bf16.gmra.mrb[220].mxu0 %v5221_v3 }
 0x624   : > { %v5179_v51 = vmul.f32 1.050701, %v5115_v20  ;;  %7582 = vpow2.f32 %v4906_v44  ;;  %v4902_v49 = vmul.f32 1.442695, %v4665_v61  ;;  %5556 = vmatprep.mubr.bf16.mxu0 %v10282_v31  ;;  %v5176_v24 = vmul.f32 1.050701, %v5112_v40 }
 0x625   : > { %v5113_v37 = vsel %vm4793_vm7, %v4649_v13, %v5049_v41  ;;  %vm4796_vm9 = vcmp.gt.f32.partialorder %v9734_v22, 0.0  ;;  %vm4799_vm10 = vcmp.gt.f32.partialorder %v4673_v46, 0.0  ;;  %vm4797_vm11 = vcmp.gt.f32.partialorder %v4665_v61, 0.0 }
 0x626   : > { %v5223_v26 = vpack.c.bf16 %v5179_v51, %v5178_v5  ;;  %v5177_v59 = vmul.f32 1.050701, %v5113_v37  ;;  %7584 = vpow2.f32 %v4902_v49 }
 0x628   : > { %v5222_v19 = vpack.c.bf16 %v5177_v59, %v5176_v24 }
 0x62b   : > { %5557 = vmatmul.mubr.bf16.gmra.mrb[224].mxu0 %v5222_v19 }
 0x62c   : > { %v7579_v50 = vpop.eup %7578  ;;  %5566 = vmatprep.mubr.bf16.mxu0 %v10282_v31 }
 0x62d   : > { %v7581_v56 = vpop.eup %7580  ;;  %v6340_v60 = vadd.f32 -1.0, %v7579_v50  ;;  %v6735_v7 = vpop.f32.mrb[20].mxu1 }
 0x62e   : > { %v6338_v16 = vadd.f32 -1.0, %v7581_v56  ;;  %v9751_v62 = vadd.f32 %v9742_v57, %v6735_v7  ;;  %v4677_v63 = vpop.f32.mrb[21].mxu1  ;;  %v7583_v1 = vpop.eup %7582 }
 0x62f   : > { %v5054_v15 = vmul.f32 1.6732632, %v6340_v60  ;;  %v9755_v9 = vadd.f32 %v9742_v57, %v4677_v63  ;;  %v6736_v12 = vpop.f32.mrb[22].mxu1  ;;  %v6341_v6 = vadd.f32 -1.0, %v7583_v1 }
 0x630   : > { %v4912_v58 = vmul.f32 1.442695, %v9751_v62  ;;  %v9759_v53 = vadd.f32 %v9742_v57, %v6736_v12  ;;  %v4680_v47 = vpop.f32.mrb[23].mxu1  ;;  %v5052_v27 = vmul.f32 1.6732632, %v6338_v16  ;;  %v7585_v13 = vpop.eup %7584  ;;  %vm4802_vm12 = vcmp.gt.f32.partialorder %v9751_v62, 0.0 }
 0x631   : > { %v4908_v36 = vmul.f32 1.442695, %v9755_v9  ;;  %v5118_v30 = vsel %vm4798_vm8, %v9730_v34, %v5054_v15  ;;  %v5055_v32 = vmul.f32 1.6732632, %v6341_v6  ;;  %v6339_v14 = vadd.f32 -1.0, %v7585_v13 }
 0x632   : > { %7586 = vpow2.f32 %v4912_v58  ;;  %v4914_v8 = vmul.f32 1.442695, %v9759_v53  ;;  %v4681_v43 = vadd.f32 %v9742_v57, %v4680_v47  ;;  %v5116_v3 = vsel %vm4796_vm9, %v9734_v22, %v5052_v27 }
 0x633   : > { %7588 = vpow2.f32 %v4908_v36  ;;  %v5119_v45 = vsel %vm4799_vm10, %v4673_v46, %v5055_v32  ;;  %v5053_v54 = vmul.f32 1.6732632, %v6339_v14  ;;  %5567 = vmatmul.mubr.bf16.gmra.mrb[228].mxu0 %v5223_v26  ;;  %v5182_v29 = vmul.f32 1.050701, %v5118_v30 }
 0x634   : > { %v5183_v42 = vmul.f32 1.050701, %v5119_v45  ;;  %7590 = vpow2.f32 %v4914_v8  ;;  %v4910_v28 = vmul.f32 1.442695, %v4681_v43  ;;  %5576 = vmatprep.mubr.bf16.mxu0 %v10282_v31  ;;  %v5180_v39 = vmul.f32 1.050701, %v5116_v3 }
 0x635   : > { %v5117_v2 = vsel %vm4797_vm11, %v4665_v61, %v5053_v54  ;;  %vm4800_vm13 = vcmp.gt.f32.partialorder %v9755_v9, 0.0  ;;  %vm4803_vm14 = vcmp.gt.f32.partialorder %v9759_v53, 0.0  ;;  %vm4801_vm15 = vcmp.gt.f32.partialorder %v4681_v43, 0.0 }
 0x636   : > { %v5181_v38 = vmul.f32 1.050701, %v5117_v2  ;;  %7592 = vpow2.f32 %v4910_v28  ;;  %v5225_v11 = vpack.c.bf16 %v5183_v42, %v5182_v29 }
 0x638   : > { %v5224_v34 = vpack.c.bf16 %v5181_v38, %v5180_v39 }
 0x63b   : > { %5577 = vmatmul.mubr.bf16.gmra.mrb[232].mxu0 %v5224_v34 }
 0x63c   : > { %v7587_v10 = vpop.eup %7586  ;;  %5586 = vmatprep.mubr.bf16.mxu0 %v10282_v31 }
 0x63d   : > { %v7589_v48 = vpop.eup %7588  ;;  %v6344_v21 = vadd.f32 -1.0, %v7587_v10  ;;  %v6739_v22 = vpop.f32.mrb[24].mxu1 }
 0x63e   : > { %v6342_v33 = vadd.f32 -1.0, %v7589_v48  ;;  %v9770_v23 = vadd.f32 %v9742_v57, %v6739_v22  ;;  %v4693_v25 = vpop.f32.mrb[25].mxu1  ;;  %v7591_v52 = vpop.eup %7590 }
 0x63f   : > { %v5058_v17 = vmul.f32 1.6732632, %v6344_v21  ;;  %v9774_v4 = vadd.f32 %v9742_v57, %v4693_v25  ;;  %v6740_v46 = vpop.f32.mrb[26].mxu1  ;;  %v6345_v20 = vadd.f32 -1.0, %v7591_v52  ;;  %v5254_v25 = vlaneseq }
 0x640   : > { %v4920_v18 = vmul.f32 1.442695, %v9770_v23  ;;  %v9778_v35 = vadd.f32 %v9742_v57, %v6740_v46  ;;  %v4696_v0 = vpop.f32.mrb[27].mxu1  ;;  %v5056_v55 = vmul.f32 1.6732632, %v6342_v33  ;;  %v7593_v61 = vpop.eup %7592  ;;  %vm4806_vm0 = vcmp.gt.f32.partialorder %v9770_v23, 0.0 }
 0x641   : > { %v4916_v44 = vmul.f32 1.442695, %v9774_v4  ;;  %v5122_v5 = vsel %vm4802_vm12, %v9751_v62, %v5058_v17  ;;  %v5059_v40 = vmul.f32 1.6732632, %v6345_v20  ;;  %v6343_v51 = vadd.f32 -1.0, %v7593_v61 }
 0x642   : > { %7594 = vpow2.f32 %v4920_v18  ;;  %v4922_v41 = vmul.f32 1.442695, %v9778_v35  ;;  %v4697_v49 = vadd.f32 %v9742_v57, %v4696_v0  ;;  %v5120_v37 = vsel %vm4800_vm13, %v9755_v9, %v5056_v55 }
 0x643   : > { %7596 = vpow2.f32 %v4916_v44  ;;  %v5123_v26 = vsel %vm4803_vm14, %v9759_v53, %v5059_v40  ;;  %v5057_v24 = vmul.f32 1.6732632, %v6343_v51  ;;  %5587 = vmatmul.mubr.bf16.gmra.mrb[236].mxu0 %v5225_v11  ;;  %v5186_v59 = vmul.f32 1.050701, %v5122_v5 }
 0x644   : > { %v5187_v19 = vmul.f32 1.050701, %v5123_v26  ;;  %7598 = vpow2.f32 %v4922_v41  ;;  %v4918_v50 = vmul.f32 1.442695, %v4697_v49  ;;  %5596 = vmatprep.mubr.bf16.mxu0 %v10282_v31  ;;  %v5184_v60 = vmul.f32 1.050701, %v5120_v37 }
 0x645   : > { %v5121_v56 = vsel %vm4801_vm15, %v4681_v43, %v5057_v24  ;;  %vm4804_vm1 = vcmp.gt.f32.partialorder %v9774_v4, 0.0  ;;  %vm4807_vm2 = vcmp.gt.f32.partialorder %v9778_v35, 0.0  ;;  %vm4805_vm3 = vcmp.gt.f32.partialorder %v4697_v49, 0.0 }
 0x646   : > { %v5185_v7 = vmul.f32 1.050701, %v5121_v56  ;;  %7600 = vpow2.f32 %v4918_v50  ;;  %v5227_v16 = vpack.c.bf16 %v5187_v19, %v5186_v59  ;;  %v5255_v55 = vshrl.u32 %v5254_v25, 7 }
 0x648   : > { %v5226_v62 = vpack.c.bf16 %v5185_v7, %v5184_v60  ;;  %v5256_v59 = vsub.s32 0, %v5255_v55  ;;  %v5260_v19 = vsub.s32 1, %v5255_v55 }
 0x64b   : > { %5597 = vmatmul.mubr.bf16.gmra.mrb[240].mxu0 %v5226_v62  ;;  %v5252_v62 = vld [vmem:[%s10226_s12] sm:$0x3] }
 0x64c   : > { %v7595_v63 = vpop.eup %7594  ;;  %5606 = vmatprep.mubr.bf16.mxu0 %v10282_v31 }
 0x64d   : > { %v7597_v15 = vpop.eup %7596  ;;  %v6348_v9 = vadd.f32 -1.0, %v7595_v63  ;;  %v6743_v12 = vpop.f32.mrb[28].mxu1 }
 0x64e   : > { %v6346_v1 = vadd.f32 -1.0, %v7597_v15  ;;  %v9791_v58 = vadd.f32 %v9742_v57, %v6743_v12  ;;  %v4709_v53 = vpop.f32.mrb[29].mxu1  ;;  %v7599_v36 = vpop.eup %7598 }
 0x64f   : > { %v5062_v47 = vmul.f32 1.6732632, %v6348_v9  ;;  %v9795_v27 = vadd.f32 %v9742_v57, %v4709_v53  ;;  %v6744_v6 = vpop.f32.mrb[30].mxu1  ;;  %v6349_v8 = vadd.f32 -1.0, %v7599_v36 }
 0x650   : > { %v4928_v13 = vmul.f32 1.442695, %v9791_v58  ;;  %v9799_v30 = vadd.f32 %v9742_v57, %v6744_v6  ;;  %v4712_v32 = vpop.f32.mrb[31].mxu1  ;;  %v5060_v14 = vmul.f32 1.6732632, %v6346_v1  ;;  %v7601_v3 = vpop.eup %7600  ;;  %vm4810_vm4 = vcmp.gt.f32.partialorder %v9791_v58, 0.0 }
 0x651   : > { %v4924_v43 = vmul.f32 1.442695, %v9795_v27  ;;  %v5126_v45 = vsel %vm4806_vm0, %v9770_v23, %v5062_v47  ;;  %v5063_v54 = vmul.f32 1.6732632, %v6349_v8  ;;  %v6347_v29 = vadd.f32 -1.0, %v7601_v3 }
 0x652   : > { %7602 = vpow2.f32 %v4928_v13  ;;  %v4930_v42 = vmul.f32 1.442695, %v9799_v30  ;;  %v9808_v28 = vadd.f32 %v9742_v57, %v4712_v32  ;;  %v5124_v2 = vsel %vm4804_vm1, %v9774_v4, %v5060_v14 }
 0x653   : > { %7604 = vpow2.f32 %v4924_v43  ;;  %v5127_v39 = vsel %vm4807_vm2, %v9778_v35, %v5063_v54  ;;  %v5061_v38 = vmul.f32 1.6732632, %v6347_v29  ;;  %5607 = vmatmul.mubr.bf16.gmra.mrb[244].mxu0 %v5227_v16  ;;  %v5190_v11 = vmul.f32 1.050701, %v5126_v45 }
 0x654   : > { %v5191_v34 = vmul.f32 1.050701, %v5127_v39  ;;  %7606 = vpow2.f32 %v4930_v42  ;;  %v4926_v10 = vmul.f32 1.442695, %v9808_v28  ;;  %5616 = vmatprep.mubr.bf16.mxu0 %v10282_v31  ;;  %v5188_v21 = vmul.f32 1.050701, %v5124_v2 }
 0x655   : > { %v5125_v48 = vsel %vm4805_vm3, %v4697_v49, %v5061_v38  ;;  %vm4808_vm5 = vcmp.gt.f32.partialorder %v9795_v27, 0.0  ;;  %vm4811_vm6 = vcmp.gt.f32.partialorder %v9799_v30, 0.0  ;;  %vm4809_vm7 = vcmp.gt.f32.partialorder %v9808_v28, 0.0 }
 0x656   : > { %v5189_v22 = vmul.f32 1.050701, %v5125_v48  ;;  %7608 = vpow2.f32 %v4926_v10  ;;  %v5229_v33 = vpack.c.bf16 %v5191_v34, %v5190_v11  ;;  %v9848_v47 = vrot.slane %v5252_v62, %v5256_v59 }
 0x657   : > { %v9854_v13 = vrot.slane %v5252_v62, %v5260_v19 }
 0x658   : > { %v5228_v23 = vpack.c.bf16 %v5189_v22, %v5188_v21 }
 0x65b   : > { %5617 = vmatmul.mubr.bf16.gmra.mrb[248].mxu0 %v5228_v23 }
 0x65c   : > { %v7603_v17 = vpop.eup %7602  ;;  %5626 = vmatprep.mubr.bf16.mxu0 %v10282_v31 }
 0x65d   : > { %v7605_v4 = vpop.eup %7604  ;;  %v6352_v46 = vadd.f32 -1.0, %v7603_v17  ;;  %v6747_v52 = vpop.f32.mrb[32].mxu1 }
 0x65e   : > { %v6350_v18 = vadd.f32 -1.0, %v7605_v4  ;;  %v9815_v35 = vadd.f32 %v9742_v57, %v6747_v52  ;;  %v4725_v0 = vpop.f32.mrb[33].mxu1  ;;  %v7607_v5 = vpop.eup %7606 }
 0x65f   : > { %v5066_v20 = vmul.f32 1.6732632, %v6352_v46  ;;  %v9819_v44 = vadd.f32 %v9742_v57, %v4725_v0  ;;  %v6748_v61 = vpop.f32.mrb[34].mxu1  ;;  %v6353_v37 = vadd.f32 -1.0, %v7607_v5 }
 0x660   : > { %v4936_v40 = vmul.f32 1.442695, %v9815_v35  ;;  %v9823_v51 = vadd.f32 %v9742_v57, %v6748_v61  ;;  %v4728_v41 = vpop.f32.mrb[35].mxu1  ;;  %v5064_v49 = vmul.f32 1.6732632, %v6350_v18  ;;  %v7609_v24 = vpop.eup %7608  ;;  %vm4814_vm8 = vcmp.gt.f32.partialorder %v9815_v35, 0.0 }
 0x661   : > { %v4932_v26 = vmul.f32 1.442695, %v9819_v44  ;;  %v5130_v50 = vsel %vm4810_vm4, %v9791_v58, %v5066_v20  ;;  %v5067_v56 = vmul.f32 1.6732632, %v6353_v37  ;;  %v6351_v60 = vadd.f32 -1.0, %v7609_v24 }
 0x662   : > { %7610 = vpow2.f32 %v4936_v40  ;;  %v4938_v7 = vmul.f32 1.442695, %v9823_v51  ;;  %v9832_v16 = vadd.f32 %v9742_v57, %v4728_v41  ;;  %v5128_v63 = vsel %vm4808_vm5, %v9795_v27, %v5064_v49 }
 0x663   : > { %7612 = vpow2.f32 %v4932_v26  ;;  %v5131_v15 = vsel %vm4811_vm6, %v9799_v30, %v5067_v56  ;;  %v5065_v9 = vmul.f32 1.6732632, %v6351_v60  ;;  %5627 = vmatmul.mubr.bf16.gmra.mrb[252].mxu0 %v5229_v33  ;;  %v9841_v12 = vmul.f32 1.050701, %v5130_v50 }
 0x664   : > { %v9843_v1 = vmul.f32 1.050701, %v5131_v15  ;;  %7614 = vpow2.f32 %v4938_v7  ;;  %v4934_v58 = vmul.f32 1.442695, %v9832_v16  ;;  %5636 = vmatprep.mubr.bf16.mxu0 %v10282_v31  ;;  %v5192_v27 = vmul.f32 1.050701, %v5128_v63 }
 0x665   : > { %v5129_v53 = vsel %vm4809_vm7, %v9808_v28, %v5065_v9  ;;  %vm4812_vm9 = vcmp.gt.f32.partialorder %v9819_v44, 0.0  ;;  %vm4815_vm10 = vcmp.gt.f32.partialorder %v9823_v51, 0.0  ;;  %vm4813_vm11 = vcmp.gt.f32.partialorder %v9832_v16, 0.0 }
 0x666   : > { %v5231_v6 = vpack.c.bf16 %v9843_v1, %v9841_v12  ;;  %v5193_v36 = vmul.f32 1.050701, %v5129_v53  ;;  %7616 = vpow2.f32 %v4934_v58 }
 0x668   : > { %v5230_v30 = vpack.c.bf16 %v5193_v36, %v5192_v27 }
 0x66b   : > { %5637 = vmatmul.mubr.bf16.gmra.mrb[0].mxu0 %v5230_v30 }
 0x66c   : > { %v5378_v32 = vpop.f32.mrb[152].mxu0  ;;  %v7611_v14 = vpop.eup %7610  ;;  %5646 = vmatprep.mubr.bf16.mxu0 %v10282_v31 }
 0x66d   : > { %v5379_v8 = vadd.f32 %v5378_v32, %v9848_v47  ;;  %v5380_v43 = vpop.f32.mrb[153].mxu0  ;;  %v7613_v3 = vpop.eup %7612  ;;  %v6356_v45 = vadd.f32 -1.0, %v7611_v14 }
 0x66e   : > { %v6751_v54 = vpop.f32.mrb[36].mxu1  ;;  %v5381_v29 = vadd.f32 %v5380_v43, %v9854_v13  ;;  %v5382_v42 = vpop.f32.mrb[154].mxu0  ;;  %v6354_v28 = vadd.f32 -1.0, %v7613_v3 }
 0x66f   : > { %5697 = vst [vmem:[%s9858_s17] sm:$0xff] %v5379_v8  ;;  %v9862_v2 = vadd.f32 %v9742_v57, %v6751_v54  ;;  %v4741_v39 = vpop.f32.mrb[37].mxu1  ;;  %v5383_v38 = vadd.f32 %v5382_v42, %v9848_v47  ;;  %v5384_v11 = vpop.f32.mrb[155].mxu0  ;;  %v5070_v34 = vmul.f32 1.6732632, %v6356_v45 }
 0x670   : > { %5698 = vst [vmem:[%s9858_s17 + $0x8] sm:$0xff] %v5381_v29  ;;  %v9868_v10 = vadd.f32 %v9742_v57, %v4741_v39  ;;  %v6752_v48 = vpop.f32.mrb[38].mxu1  ;;  %v5385_v21 = vadd.f32 %v5384_v11, %v9854_v13  ;;  %v7615_v22 = vpop.eup %7614  ;;  %v5068_v4 = vmul.f32 1.6732632, %v6354_v28 }
 0x671   : > { %v4944_v33 = vmul.f32 1.442695, %v9862_v2  ;;  %5699 = vst [vmem:[%s9858_s17 + $0x20] sm:$0xff] %v5383_v38  ;;  %v9875_v23 = vadd.f32 %v9742_v57, %v6752_v48  ;;  %v4744_v25 = vpop.f32.mrb[39].mxu1  ;;  %v5134_v17 = vsel %vm4814_vm8, %v9815_v35, %v5070_v34  ;;  %v6357_v46 = vadd.f32 -1.0, %v7615_v22  ;;  %v7617_v18 = vpop.eup %7616 }
 0x672   : > { %v4940_v52 = vmul.f32 1.442695, %v9868_v10  ;;  %5700 = vst [vmem:[%s9858_s17 + $0x28] sm:$0xff] %v5385_v21  ;;  %v6355_v55 = vadd.f32 -1.0, %v7617_v18  ;;  %v5198_v61 = vmul.f32 1.050701, %v5134_v17  ;;  %v9884_v35 = vadd.f32 %v9742_v57, %v4744_v25 }
 0x673   : > { %7618 = vpow2.f32 %v4944_v33  ;;  %v5071_v0 = vmul.f32 1.6732632, %v6357_v46  ;;  %v4946_v5 = vmul.f32 1.442695, %v9875_v23  ;;  %v5132_v49 = vsel %vm4812_vm9, %v9819_v44, %v5068_v4  ;;  %5647 = vmatmul.mubr.bf16.gmra.mrb[4].mxu0 %v5231_v6 }
 0x674   : > { %7620 = vpow2.f32 %v4940_v52  ;;  %v5388_v20 = vpop.f32.mrb[156].mxu0  ;;  %v5069_v26 = vmul.f32 1.6732632, %v6355_v55  ;;  %v4942_v57 = vmul.f32 1.442695, %v9884_v35  ;;  %5656 = vmatprep.mubr.bf16.mxu0 %v10282_v31  ;;  %vm4818_vm12 = vcmp.gt.f32.partialorder %v9862_v2, 0.0 }
 0x675   : > { %v5389_v40 = vadd.f32 %v5388_v20, %v9848_v47  ;;  %v5390_v41 = vpop.f32.mrb[157].mxu0  ;;  %v5135_v37 = vsel %vm4815_vm10, %v9823_v51, %v5071_v0  ;;  %7622 = vpow2.f32 %v4946_v5  ;;  %v5196_v60 = vmul.f32 1.050701, %v5132_v49 }
 0x676   : > { %v5391_v24 = vadd.f32 %v5390_v41, %v9854_v13  ;;  %v5392_v59 = vpop.f32.mrb[158].mxu0  ;;  %v5199_v19 = vmul.f32 1.050701, %v5135_v37  ;;  %v5133_v44 = vsel %vm4813_vm11, %v9832_v16, %v5069_v26  ;;  %7624 = vpow2.f32 %v4942_v57 }
 0x677   : > { %5701 = vst [vmem:[%s9858_s17 + $0x40] sm:$0xff] %v5389_v40  ;;  %v5394_v50 = vpop.f32.mrb[159].mxu0  ;;  %v5393_v51 = vadd.f32 %v5392_v59, %v9848_v47  ;;  %v5197_v62 = vmul.f32 1.050701, %v5133_v44  ;;  %vm4816_vm13 = vcmp.gt.f32.partialorder %v9868_v10, 0.0  ;;  %vm4819_vm14 = vcmp.gt.f32.partialorder %v9875_v23, 0.0 }
 0x678   : > { %5702 = vst [vmem:[%s9858_s17 + $0x48] sm:$0xff] %v5391_v24  ;;  %v5395_v56 = vadd.f32 %v5394_v50, %v9854_v13  ;;  %v5233_v7 = vpack.c.bf16 %v5199_v19, %v5198_v61  ;;  %vm4817_vm15 = vcmp.gt.f32.partialorder %v9884_v35, 0.0 }
 0x679   : > { %5703 = vst [vmem:[%s9858_s17 + $0x60] sm:$0xff] %v5393_v51  ;;  %v5232_v63 = vpack.c.bf16 %v5197_v62, %v5196_v60 }
 0x67a   : > { %5704 = vst [vmem:[%s9858_s17 + $0x68] sm:$0xff] %v5395_v56 }
 0x67b   : > { %5657 = vmatmul.mubr.bf16.gmra.mrb[8].mxu0 %v5232_v63 }
 0x67c   : > { %5666 = vmatprep.mubr.bf16.mxu0 %v10282_v31 }
 0x67d   : > { %v7619_v15 = vpop.eup %7618 }
 0x67e   : > { %v7621_v9 = vpop.eup %7620  ;;  %v6360_v12 = vadd.f32 -1.0, %v7619_v15  ;;  %v5398_v16 = vpop.f32.mrb[160].mxu0 }
 0x67f   : > { %v6358_v1 = vadd.f32 -1.0, %v7621_v9  ;;  %v5399_v53 = vadd.f32 %v5398_v16, %v9848_v47  ;;  %v5400_v27 = vpop.f32.mrb[161].mxu0  ;;  %v7623_v6 = vpop.eup %7622 }
 0x680   : > { %v5074_v58 = vmul.f32 1.6732632, %v6360_v12  ;;  %v5401_v36 = vadd.f32 %v5400_v27, %v9854_v13  ;;  %v5402_v30 = vpop.f32.mrb[162].mxu0  ;;  %v6361_v14 = vadd.f32 -1.0, %v7623_v6  ;;  %v7625_v3 = vpop.eup %7624 }
 0x681   : > { %v5072_v32 = vmul.f32 1.6732632, %v6358_v1  ;;  %5705 = vst [vmem:[%s9858_s17 + $0x80] sm:$0xff] %v5399_v53  ;;  %v5403_v8 = vadd.f32 %v5402_v30, %v9848_v47  ;;  %v5404_v43 = vpop.f32.mrb[163].mxu0  ;;  %v6359_v42 = vadd.f32 -1.0, %v7625_v3 }
 0x682   : > { %5706 = vst [vmem:[%s9858_s17 + $0x88] sm:$0xff] %v5401_v36  ;;  %v5405_v45 = vadd.f32 %v5404_v43, %v9854_v13  ;;  %v5138_v54 = vsel %vm4818_vm12, %v9862_v2, %v5074_v58  ;;  %v5075_v29 = vmul.f32 1.6732632, %v6361_v14 }
 0x683   : > { %5707 = vst [vmem:[%s9858_s17 + $0xa0] sm:$0xff] %v5403_v8  ;;  %v5136_v28 = vsel %vm4816_vm13, %v9868_v10, %v5072_v32  ;;  %v5073_v38 = vmul.f32 1.6732632, %v6359_v42  ;;  %5667 = vmatmul.mubr.bf16.gmra.mrb[12].mxu0 %v5233_v7  ;;  %v5202_v11 = vmul.f32 1.050701, %v5138_v54 }
 0x684   : > { %5708 = vst [vmem:[%s9858_s17 + $0xa8] sm:$0xff] %v5405_v45  ;;  %v5139_v39 = vsel %vm4819_vm14, %v9875_v23, %v5075_v29  ;;  %5676 = vmatprep.mubr.bf16.mxu0 %v10282_v31  ;;  %v5200_v22 = vmul.f32 1.050701, %v5136_v28 }
 0x685   : > { %v5203_v34 = vmul.f32 1.050701, %v5139_v39  ;;  %v5137_v48 = vsel %vm4817_vm15, %v9884_v35, %v5073_v38 }
 0x686   : > { %v5408_v2 = vpop.f32.mrb[164].mxu0  ;;  %v5201_v23 = vmul.f32 1.050701, %v5137_v48 }
 0x687   : > { %v5409_v21 = vadd.f32 %v5408_v2, %v9848_v47  ;;  %v5410_v10 = vpop.f32.mrb[165].mxu0  ;;  %v5235_v33 = vpack.c.bf16 %v5203_v34, %v5202_v11 }
 0x688   : > { %v5411_v25 = vadd.f32 %v5410_v10, %v9854_v13  ;;  %v5412_v17 = vpop.f32.mrb[166].mxu0  ;;  %v5234_v52 = vpack.c.bf16 %v5201_v23, %v5200_v22 }
 0x689   : > { %5709 = vst [vmem:[%s9858_s17 + $0xc0] sm:$0xff] %v5409_v21  ;;  %v5413_v4 = vadd.f32 %v5412_v17, %v9848_v47  ;;  %v5414_v46 = vpop.f32.mrb[167].mxu0 }
 0x68a   : > { %5710 = vst [vmem:[%s9858_s17 + $0xc8] sm:$0xff] %v5411_v25  ;;  %v5415_v18 = vadd.f32 %v5414_v46, %v9854_v13 }
 0x68b   : > { %5711 = vst [vmem:[%s9858_s17 + $0xe0] sm:$0xff] %v5413_v4  ;;  %5677 = vmatmul.mubr.bf16.gmra.mrb[16].mxu0 %v5234_v52 }
 0x68c   : > { %5712 = vst [vmem:[%s9858_s17 + $0xe8] sm:$0xff] %v5415_v18  ;;  %5686 = vmatprep.mubr.bf16.mxu0 %v10282_v31 }
 0x68e   : > { %v5418_v0 = vpop.f32.mrb[168].mxu0 }
 0x68f   : > { %v5419_v55 = vadd.f32 %v5418_v0, %v9848_v47  ;;  %v5420_v20 = vpop.f32.mrb[169].mxu0 }
 0x690   : > { %v5421_v61 = vadd.f32 %v5420_v20, %v9854_v13  ;;  %v5422_v5 = vpop.f32.mrb[170].mxu0 }
 0x691   : > { %5713 = vst [vmem:[%s9858_s17 + $0x100] sm:$0xff] %v5419_v55  ;;  %v5423_v35 = vadd.f32 %v5422_v5, %v9848_v47  ;;  %v5424_v40 = vpop.f32.mrb[171].mxu0 }
 0x692   : > { %5714 = vst [vmem:[%s9858_s17 + $0x108] sm:$0xff] %v5421_v61  ;;  %v5425_v41 = vadd.f32 %v5424_v40, %v9854_v13 }
 0x693   : > { %5715 = vst [vmem:[%s9858_s17 + $0x120] sm:$0xff] %v5423_v35  ;;  %5687 = vmatmul.mubr.bf16.gmra.mrb[20].mxu0 %v5235_v33 }
 0x694   : > { %5716 = vst [vmem:[%s9858_s17 + $0x128] sm:$0xff] %v5425_v41 }
 0x696   : > { %v5428_v31 = vpop.f32.mrb[172].mxu0 }
 0x697   : > { %v5429_v49 = vadd.f32 %v5428_v31, %v9848_v47  ;;  %v5430_v37 = vpop.f32.mrb[173].mxu0 }
 0x698   : > { %v5431_v26 = vadd.f32 %v5430_v37, %v9854_v13  ;;  %v5432_v24 = vpop.f32.mrb[174].mxu0 }
 0x699   : > { %5717 = vst [vmem:[%s9858_s17 + $0x140] sm:$0xff] %v5429_v49  ;;  %v5433_v59 = vadd.f32 %v5432_v24, %v9848_v47  ;;  %v5434_v19 = vpop.f32.mrb[175].mxu0 }
 0x69a   : > { %5718 = vst [vmem:[%s9858_s17 + $0x148] sm:$0xff] %v5431_v26  ;;  %v5435_v57 = vadd.f32 %v5434_v19, %v9854_v13 }
 0x69b   : > { %5719 = vst [vmem:[%s9858_s17 + $0x160] sm:$0xff] %v5433_v59 }
 0x69c   : > { %5720 = vst [vmem:[%s9858_s17 + $0x168] sm:$0xff] %v5435_v57 }
 0x69e   : > { %v5438_v50 = vpop.f32.mrb[176].mxu0 }
 0x69f   : > { %v5439_v44 = vadd.f32 %v5438_v50, %v9848_v47  ;;  %v5440_v51 = vpop.f32.mrb[177].mxu0 }
 0x6a0   : > { %v5441_v56 = vadd.f32 %v5440_v51, %v9854_v13  ;;  %v5442_v60 = vpop.f32.mrb[178].mxu0 }
 0x6a1   : > { %5721 = vst [vmem:[%s9858_s17 + $0x180] sm:$0xff] %v5439_v44  ;;  %v5443_v7 = vadd.f32 %v5442_v60, %v9848_v47  ;;  %v5444_v62 = vpop.f32.mrb[179].mxu0 }
 0x6a2   : > { %5722 = vst [vmem:[%s9858_s17 + $0x188] sm:$0xff] %v5441_v56  ;;  %v5445_v63 = vadd.f32 %v5444_v62, %v9854_v13 }
 0x6a3   : > { %5723 = vst [vmem:[%s9858_s17 + $0x1a0] sm:$0xff] %v5443_v7 }
 0x6a4   : > { %5724 = vst [vmem:[%s9858_s17 + $0x1a8] sm:$0xff] %v5445_v63 }
 0x6a6   : > { %v5448_v15 = vpop.f32.mrb[180].mxu0 }
 0x6a7   : > { %v5449_v9 = vadd.f32 %v5448_v15, %v9848_v47  ;;  %v5450_v12 = vpop.f32.mrb[181].mxu0 }
 0x6a8   : > { %v5451_v1 = vadd.f32 %v5450_v12, %v9854_v13  ;;  %v5452_v16 = vpop.f32.mrb[182].mxu0 }
 0x6a9   : > { %5725 = vst [vmem:[%s9858_s17 + $0x1c0] sm:$0xff] %v5449_v9  ;;  %v5453_v58 = vadd.f32 %v5452_v16, %v9848_v47  ;;  %v5454_v53 = vpop.f32.mrb[183].mxu0 }
 0x6aa   : > { %5726 = vst [vmem:[%s9858_s17 + $0x1c8] sm:$0xff] %v5451_v1  ;;  %v5455_v27 = vadd.f32 %v5454_v53, %v9854_v13 }
 0x6ab   : > { %5727 = vst [vmem:[%s9858_s17 + $0x1e0] sm:$0xff] %v5453_v58 }
 0x6ac   : > { %5728 = vst [vmem:[%s9858_s17 + $0x1e8] sm:$0xff] %v5455_v27 }
 0x6ae   : > { %v5458_v6 = vpop.f32.mrb[184].mxu0 }
 0x6af   : > { %v5459_v36 = vadd.f32 %v5458_v6, %v9848_v47  ;;  %v5460_v30 = vpop.f32.mrb[185].mxu0 }
 0x6b0   : > { %v5461_v32 = vadd.f32 %v5460_v30, %v9854_v13  ;;  %v5462_v14 = vpop.f32.mrb[186].mxu0 }
 0x6b1   : > { %5729 = vst [vmem:[%s9858_s17 + $0x200] sm:$0xff] %v5459_v36  ;;  %v5463_v8 = vadd.f32 %v5462_v14, %v9848_v47  ;;  %v5464_v43 = vpop.f32.mrb[187].mxu0 }
 0x6b2   : > { %5730 = vst [vmem:[%s9858_s17 + $0x208] sm:$0xff] %v5461_v32  ;;  %v5465_v3 = vadd.f32 %v5464_v43, %v9854_v13 }
 0x6b3   : > { %5731 = vst [vmem:[%s9858_s17 + $0x220] sm:$0xff] %v5463_v8 }
 0x6b4   : > { %5732 = vst [vmem:[%s9858_s17 + $0x228] sm:$0xff] %v5465_v3 }
 0x6b6   : > { %v5468_v45 = vpop.f32.mrb[188].mxu0 }
 0x6b7   : > { %v5469_v54 = vadd.f32 %v5468_v45, %v9848_v47  ;;  %v5470_v29 = vpop.f32.mrb[189].mxu0 }
 0x6b8   : > { %v5471_v42 = vadd.f32 %v5470_v29, %v9854_v13  ;;  %v5472_v28 = vpop.f32.mrb[190].mxu0 }
 0x6b9   : > { %5733 = vst [vmem:[%s9858_s17 + $0x240] sm:$0xff] %v5469_v54  ;;  %v5473_v39 = vadd.f32 %v5472_v28, %v9848_v47  ;;  %v5474_v38 = vpop.f32.mrb[191].mxu0 }
 0x6ba   : > { %5734 = vst [vmem:[%s9858_s17 + $0x248] sm:$0xff] %v5471_v42  ;;  %v5475_v11 = vadd.f32 %v5474_v38, %v9854_v13 }
 0x6bb   : > { %5735 = vst [vmem:[%s9858_s17 + $0x260] sm:$0xff] %v5473_v39 }
 0x6bc   : > { %5736 = vst [vmem:[%s9858_s17 + $0x268] sm:$0xff] %v5475_v11 }
 0x6be   : > { %v5478_v34 = vpop.f32.mrb[192].mxu0 }
 0x6bf   : > { %v5479_v2 = vadd.f32 %v5478_v34, %v9848_v47  ;;  %v5480_v48 = vpop.f32.mrb[193].mxu0 }
 0x6c0   : > { %v5481_v21 = vadd.f32 %v5480_v48, %v9854_v13  ;;  %v5482_v10 = vpop.f32.mrb[194].mxu0 }
 0x6c1   : > { %5737 = vst [vmem:[%s9858_s17 + $0x280] sm:$0xff] %v5479_v2  ;;  %v5483_v22 = vadd.f32 %v5482_v10, %v9848_v47  ;;  %v5484_v33 = vpop.f32.mrb[195].mxu0 }
 0x6c2   : > { %5738 = vst [vmem:[%s9858_s17 + $0x288] sm:$0xff] %v5481_v21  ;;  %v5485_v23 = vadd.f32 %v5484_v33, %v9854_v13 }
 0x6c3   : > { %5739 = vst [vmem:[%s9858_s17 + $0x2a0] sm:$0xff] %v5483_v22 }
 0x6c4   : > { %5740 = vst [vmem:[%s9858_s17 + $0x2a8] sm:$0xff] %v5485_v23 }
 0x6c6   : > { %v5488_v25 = vpop.f32.mrb[196].mxu0 }
 0x6c7   : > { %v5489_v17 = vadd.f32 %v5488_v25, %v9848_v47  ;;  %v5490_v4 = vpop.f32.mrb[197].mxu0 }
 0x6c8   : > { %v5491_v46 = vadd.f32 %v5490_v4, %v9854_v13  ;;  %v5492_v52 = vpop.f32.mrb[198].mxu0 }
 0x6c9   : > { %5741 = vst [vmem:[%s9858_s17 + $0x2c0] sm:$0xff] %v5489_v17  ;;  %v5493_v18 = vadd.f32 %v5492_v52, %v9848_v47  ;;  %v5494_v0 = vpop.f32.mrb[199].mxu0 }
 0x6ca   : > { %5742 = vst [vmem:[%s9858_s17 + $0x2c8] sm:$0xff] %v5491_v46  ;;  %v5495_v55 = vadd.f32 %v5494_v0, %v9854_v13 }
 0x6cb   : > { %5743 = vst [vmem:[%s9858_s17 + $0x2e0] sm:$0xff] %v5493_v18 }
 0x6cc   : > { %5744 = vst [vmem:[%s9858_s17 + $0x2e8] sm:$0xff] %v5495_v55 }
 0x6ce   : > { %v5498_v20 = vpop.f32.mrb[200].mxu0 }
 0x6cf   : > { %v5499_v61 = vadd.f32 %v5498_v20, %v9848_v47  ;;  %v5500_v5 = vpop.f32.mrb[201].mxu0 }
 0x6d0   : > { %v5501_v35 = vadd.f32 %v5500_v5, %v9854_v13  ;;  %v5502_v40 = vpop.f32.mrb[202].mxu0 }
 0x6d1   : > { %5745 = vst [vmem:[%s9858_s17 + $0x300] sm:$0xff] %v5499_v61  ;;  %v5503_v41 = vadd.f32 %v5502_v40, %v9848_v47  ;;  %v5504_v31 = vpop.f32.mrb[203].mxu0 }
 0x6d2   : > { %5746 = vst [vmem:[%s9858_s17 + $0x308] sm:$0xff] %v5501_v35  ;;  %v5505_v49 = vadd.f32 %v5504_v31, %v9854_v13 }
 0x6d3   : > { %5747 = vst [vmem:[%s9858_s17 + $0x320] sm:$0xff] %v5503_v41 }
 0x6d4   : > { %5748 = vst [vmem:[%s9858_s17 + $0x328] sm:$0xff] %v5505_v49 }
 0x6d6   : > { %v5508_v37 = vpop.f32.mrb[204].mxu0 }
 0x6d7   : > { %v5509_v26 = vadd.f32 %v5508_v37, %v9848_v47  ;;  %v5510_v24 = vpop.f32.mrb[205].mxu0 }
 0x6d8   : > { %v5511_v59 = vadd.f32 %v5510_v24, %v9854_v13  ;;  %v5512_v19 = vpop.f32.mrb[206].mxu0 }
 0x6d9   : > { %5749 = vst [vmem:[%s9858_s17 + $0x340] sm:$0xff] %v5509_v26  ;;  %v5513_v57 = vadd.f32 %v5512_v19, %v9848_v47  ;;  %v5514_v50 = vpop.f32.mrb[207].mxu0 }
 0x6da   : > { %5750 = vst [vmem:[%s9858_s17 + $0x348] sm:$0xff] %v5511_v59  ;;  %v5515_v44 = vadd.f32 %v5514_v50, %v9854_v13 }
 0x6db   : > { %5751 = vst [vmem:[%s9858_s17 + $0x360] sm:$0xff] %v5513_v57 }
 0x6dc   : > { %5752 = vst [vmem:[%s9858_s17 + $0x368] sm:$0xff] %v5515_v44 }
 0x6de   : > { %v5518_v51 = vpop.f32.mrb[208].mxu0 }
 0x6df   : > { %v5519_v56 = vadd.f32 %v5518_v51, %v9848_v47  ;;  %v5520_v60 = vpop.f32.mrb[209].mxu0 }
 0x6e0   : > { %v5521_v7 = vadd.f32 %v5520_v60, %v9854_v13  ;;  %v5522_v62 = vpop.f32.mrb[210].mxu0 }
 0x6e1   : > { %5753 = vst [vmem:[%s9858_s17 + $0x380] sm:$0xff] %v5519_v56  ;;  %v5523_v63 = vadd.f32 %v5522_v62, %v9848_v47  ;;  %v5524_v15 = vpop.f32.mrb[211].mxu0 }
 0x6e2   : > { %5754 = vst [vmem:[%s9858_s17 + $0x388] sm:$0xff] %v5521_v7  ;;  %v5525_v9 = vadd.f32 %v5524_v15, %v9854_v13 }
 0x6e3   : > { %5755 = vst [vmem:[%s9858_s17 + $0x3a0] sm:$0xff] %v5523_v63 }
 0x6e4   : > { %5756 = vst [vmem:[%s9858_s17 + $0x3a8] sm:$0xff] %v5525_v9 }
 0x6e6   : > { %v5528_v12 = vpop.f32.mrb[212].mxu0 }
 0x6e7   : > { %v5529_v1 = vadd.f32 %v5528_v12, %v9848_v47  ;;  %v5530_v16 = vpop.f32.mrb[213].mxu0 }
 0x6e8   : > { %v5531_v58 = vadd.f32 %v5530_v16, %v9854_v13  ;;  %v5532_v53 = vpop.f32.mrb[214].mxu0 }
 0x6e9   : > { %5757 = vst [vmem:[%s9858_s17 + $0x3c0] sm:$0xff] %v5529_v1  ;;  %v5533_v27 = vadd.f32 %v5532_v53, %v9848_v47  ;;  %v5534_v6 = vpop.f32.mrb[215].mxu0 }
 0x6ea   : > { %5758 = vst [vmem:[%s9858_s17 + $0x3c8] sm:$0xff] %v5531_v58  ;;  %v5535_v36 = vadd.f32 %v5534_v6, %v9854_v13 }
 0x6eb   : > { %5759 = vst [vmem:[%s9858_s17 + $0x3e0] sm:$0xff] %v5533_v27 }
 0x6ec   : > { %5760 = vst [vmem:[%s9858_s17 + $0x3e8] sm:$0xff] %v5535_v36 }
 0x6ee   : > { %v5538_v30 = vpop.f32.mrb[216].mxu0 }
 0x6ef   : > { %v5539_v32 = vadd.f32 %v5538_v30, %v9848_v47  ;;  %v5540_v14 = vpop.f32.mrb[217].mxu0 }
 0x6f0   : > { %v5541_v8 = vadd.f32 %v5540_v14, %v9854_v13  ;;  %v5542_v43 = vpop.f32.mrb[218].mxu0 }
 0x6f1   : > { %5761 = vst [vmem:[%s9858_s17 + $0x10] sm:$0xff] %v5539_v32  ;;  %v5543_v3 = vadd.f32 %v5542_v43, %v9848_v47  ;;  %v5544_v45 = vpop.f32.mrb[219].mxu0 }
 0x6f2   : > { %5762 = vst [vmem:[%s9858_s17 + $0x18] sm:$0xff] %v5541_v8  ;;  %v5545_v54 = vadd.f32 %v5544_v45, %v9854_v13 }
 0x6f3   : > { %5763 = vst [vmem:[%s9858_s17 + $0x30] sm:$0xff] %v5543_v3 }
 0x6f4   : > { %5764 = vst [vmem:[%s9858_s17 + $0x38] sm:$0xff] %v5545_v54 }
 0x6f6   : > { %v5548_v29 = vpop.f32.mrb[220].mxu0 }
 0x6f7   : > { %v5549_v42 = vadd.f32 %v5548_v29, %v9848_v47  ;;  %v5550_v28 = vpop.f32.mrb[221].mxu0 }
 0x6f8   : > { %v5551_v39 = vadd.f32 %v5550_v28, %v9854_v13  ;;  %v5552_v38 = vpop.f32.mrb[222].mxu0 }
 0x6f9   : > { %5765 = vst [vmem:[%s9858_s17 + $0x50] sm:$0xff] %v5549_v42  ;;  %v5553_v11 = vadd.f32 %v5552_v38, %v9848_v47  ;;  %v5554_v34 = vpop.f32.mrb[223].mxu0 }
 0x6fa   : > { %5766 = vst [vmem:[%s9858_s17 + $0x58] sm:$0xff] %v5551_v39  ;;  %v5555_v2 = vadd.f32 %v5554_v34, %v9854_v13 }
 0x6fb   : > { %5767 = vst [vmem:[%s9858_s17 + $0x70] sm:$0xff] %v5553_v11 }
 0x6fc   : > { %5768 = vst [vmem:[%s9858_s17 + $0x78] sm:$0xff] %v5555_v2 }
 0x6fe   : > { %v5558_v48 = vpop.f32.mrb[224].mxu0 }
 0x6ff   : > { %v5559_v21 = vadd.f32 %v5558_v48, %v9848_v47  ;;  %v5560_v10 = vpop.f32.mrb[225].mxu0 }
 0x700   : > { %v5561_v22 = vadd.f32 %v5560_v10, %v9854_v13  ;;  %v5562_v33 = vpop.f32.mrb[226].mxu0 }
 0x701   : > { %5769 = vst [vmem:[%s9858_s17 + $0x90] sm:$0xff] %v5559_v21  ;;  %v5563_v23 = vadd.f32 %v5562_v33, %v9848_v47  ;;  %v5564_v25 = vpop.f32.mrb[227].mxu0 }
 0x702   : > { %5770 = vst [vmem:[%s9858_s17 + $0x98] sm:$0xff] %v5561_v22  ;;  %v5565_v17 = vadd.f32 %v5564_v25, %v9854_v13 }
 0x703   : > { %5771 = vst [vmem:[%s9858_s17 + $0xb0] sm:$0xff] %v5563_v23 }
 0x704   : > { %5772 = vst [vmem:[%s9858_s17 + $0xb8] sm:$0xff] %v5565_v17 }
 0x706   : > { %v5568_v4 = vpop.f32.mrb[228].mxu0 }
 0x707   : > { %v5569_v46 = vadd.f32 %v5568_v4, %v9848_v47  ;;  %v5570_v52 = vpop.f32.mrb[229].mxu0 }
 0x708   : > { %v5571_v18 = vadd.f32 %v5570_v52, %v9854_v13  ;;  %v5572_v0 = vpop.f32.mrb[230].mxu0 }
 0x709   : > { %5773 = vst [vmem:[%s9858_s17 + $0xd0] sm:$0xff] %v5569_v46  ;;  %v5573_v55 = vadd.f32 %v5572_v0, %v9848_v47  ;;  %v5574_v20 = vpop.f32.mrb[231].mxu0 }
 0x70a   : > { %5774 = vst [vmem:[%s9858_s17 + $0xd8] sm:$0xff] %v5571_v18  ;;  %v5575_v61 = vadd.f32 %v5574_v20, %v9854_v13 }
 0x70b   : > { %5775 = vst [vmem:[%s9858_s17 + $0xf0] sm:$0xff] %v5573_v55 }
 0x70c   : > { %5776 = vst [vmem:[%s9858_s17 + $0xf8] sm:$0xff] %v5575_v61 }
 0x70e   : > { %v5578_v5 = vpop.f32.mrb[232].mxu0 }
 0x70f   : > { %v5579_v35 = vadd.f32 %v5578_v5, %v9848_v47  ;;  %v5580_v40 = vpop.f32.mrb[233].mxu0 }
 0x710   : > { %v5581_v41 = vadd.f32 %v5580_v40, %v9854_v13  ;;  %v5582_v31 = vpop.f32.mrb[234].mxu0 }
 0x711   : > { %5777 = vst [vmem:[%s9858_s17 + $0x110] sm:$0xff] %v5579_v35  ;;  %v5583_v49 = vadd.f32 %v5582_v31, %v9848_v47  ;;  %v5584_v37 = vpop.f32.mrb[235].mxu0 }
 0x712   : > { %5778 = vst [vmem:[%s9858_s17 + $0x118] sm:$0xff] %v5581_v41  ;;  %v5585_v26 = vadd.f32 %v5584_v37, %v9854_v13 }
 0x713   : > { %5779 = vst [vmem:[%s9858_s17 + $0x130] sm:$0xff] %v5583_v49 }
 0x714   : > { %5780 = vst [vmem:[%s9858_s17 + $0x138] sm:$0xff] %v5585_v26 }
 0x716   : > { %v5588_v24 = vpop.f32.mrb[236].mxu0 }
 0x717   : > { %v5589_v59 = vadd.f32 %v5588_v24, %v9848_v47  ;;  %v5590_v19 = vpop.f32.mrb[237].mxu0 }
 0x718   : > { %v5591_v57 = vadd.f32 %v5590_v19, %v9854_v13  ;;  %v5592_v50 = vpop.f32.mrb[238].mxu0 }
 0x719   : > { %5781 = vst [vmem:[%s9858_s17 + $0x150] sm:$0xff] %v5589_v59  ;;  %v5593_v44 = vadd.f32 %v5592_v50, %v9848_v47  ;;  %v5594_v51 = vpop.f32.mrb[239].mxu0 }
 0x71a   : > { %5782 = vst [vmem:[%s9858_s17 + $0x158] sm:$0xff] %v5591_v57  ;;  %v5595_v56 = vadd.f32 %v5594_v51, %v9854_v13 }
 0x71b   : > { %5783 = vst [vmem:[%s9858_s17 + $0x170] sm:$0xff] %v5593_v44 }
 0x71c   : > { %5784 = vst [vmem:[%s9858_s17 + $0x178] sm:$0xff] %v5595_v56 }
 0x71e   : > { %v5598_v60 = vpop.f32.mrb[240].mxu0 }
 0x71f   : > { %v5599_v7 = vadd.f32 %v5598_v60, %v9848_v47  ;;  %v5600_v62 = vpop.f32.mrb[241].mxu0 }
 0x720   : > { %v5601_v63 = vadd.f32 %v5600_v62, %v9854_v13  ;;  %v5602_v15 = vpop.f32.mrb[242].mxu0 }
 0x721   : > { %5785 = vst [vmem:[%s9858_s17 + $0x190] sm:$0xff] %v5599_v7  ;;  %v5603_v9 = vadd.f32 %v5602_v15, %v9848_v47  ;;  %v5604_v12 = vpop.f32.mrb[243].mxu0 }
 0x722   : > { %5786 = vst [vmem:[%s9858_s17 + $0x198] sm:$0xff] %v5601_v63  ;;  %v5605_v1 = vadd.f32 %v5604_v12, %v9854_v13 }
 0x723   : > { %5787 = vst [vmem:[%s9858_s17 + $0x1b0] sm:$0xff] %v5603_v9 }
 0x724   : > { %5788 = vst [vmem:[%s9858_s17 + $0x1b8] sm:$0xff] %v5605_v1 }
 0x726   : > { %v5608_v16 = vpop.f32.mrb[244].mxu0 }
 0x727   : > { %v5609_v58 = vadd.f32 %v5608_v16, %v9848_v47  ;;  %v5610_v53 = vpop.f32.mrb[245].mxu0 }
 0x728   : > { %v5611_v27 = vadd.f32 %v5610_v53, %v9854_v13  ;;  %v5612_v6 = vpop.f32.mrb[246].mxu0 }
 0x729   : > { %5789 = vst [vmem:[%s9858_s17 + $0x1d0] sm:$0xff] %v5609_v58  ;;  %v5613_v36 = vadd.f32 %v5612_v6, %v9848_v47  ;;  %v5614_v30 = vpop.f32.mrb[247].mxu0 }
 0x72a   : > { %5790 = vst [vmem:[%s9858_s17 + $0x1d8] sm:$0xff] %v5611_v27  ;;  %v5615_v32 = vadd.f32 %v5614_v30, %v9854_v13 }
 0x72b   : > { %5791 = vst [vmem:[%s9858_s17 + $0x1f0] sm:$0xff] %v5613_v36 }
 0x72c   : > { %5792 = vst [vmem:[%s9858_s17 + $0x1f8] sm:$0xff] %v5615_v32 }
 0x72e   : > { %v5618_v14 = vpop.f32.mrb[248].mxu0 }
 0x72f   : > { %v5619_v8 = vadd.f32 %v5618_v14, %v9848_v47  ;;  %v5620_v43 = vpop.f32.mrb[249].mxu0 }
 0x730   : > { %v5621_v3 = vadd.f32 %v5620_v43, %v9854_v13  ;;  %v5622_v45 = vpop.f32.mrb[250].mxu0 }
 0x731   : > { %5793 = vst [vmem:[%s9858_s17 + $0x210] sm:$0xff] %v5619_v8  ;;  %v5623_v54 = vadd.f32 %v5622_v45, %v9848_v47  ;;  %v5624_v29 = vpop.f32.mrb[251].mxu0 }
 0x732   : > { %5794 = vst [vmem:[%s9858_s17 + $0x218] sm:$0xff] %v5621_v3  ;;  %v5625_v42 = vadd.f32 %v5624_v29, %v9854_v13 }
 0x733   : > { %5795 = vst [vmem:[%s9858_s17 + $0x230] sm:$0xff] %v5623_v54 }
 0x734   : > { %5796 = vst [vmem:[%s9858_s17 + $0x238] sm:$0xff] %v5625_v42 }
 0x736   : > { %v5628_v28 = vpop.f32.mrb[252].mxu0 }
 0x737   : > { %v5629_v39 = vadd.f32 %v5628_v28, %v9848_v47  ;;  %v5630_v38 = vpop.f32.mrb[253].mxu0 }
 0x738   : > { %v5631_v11 = vadd.f32 %v5630_v38, %v9854_v13  ;;  %v5632_v34 = vpop.f32.mrb[254].mxu0 }
 0x739   : > { %5797 = vst [vmem:[%s9858_s17 + $0x250] sm:$0xff] %v5629_v39  ;;  %v5633_v2 = vadd.f32 %v5632_v34, %v9848_v47  ;;  %v5634_v48 = vpop.f32.mrb[255].mxu0 }
 0x73a   : > { %5798 = vst [vmem:[%s9858_s17 + $0x258] sm:$0xff] %v5631_v11  ;;  %v5635_v21 = vadd.f32 %v5634_v48, %v9854_v13 }
 0x73b   : > { %5799 = vst [vmem:[%s9858_s17 + $0x270] sm:$0xff] %v5633_v2 }
 0x73c   : > { %5800 = vst [vmem:[%s9858_s17 + $0x278] sm:$0xff] %v5635_v21 }
 0x73e   : > { %v5638_v10 = vpop.f32.mrb[0].mxu0 }
 0x73f   : > { %v5639_v22 = vadd.f32 %v5638_v10, %v9848_v47  ;;  %v5640_v33 = vpop.f32.mrb[1].mxu0 }
 0x740   : > { %v5641_v23 = vadd.f32 %v5640_v33, %v9854_v13  ;;  %v5642_v25 = vpop.f32.mrb[2].mxu0 }
 0x741   : > { %5801 = vst [vmem:[%s9858_s17 + $0x290] sm:$0xff] %v5639_v22  ;;  %v5643_v17 = vadd.f32 %v5642_v25, %v9848_v47  ;;  %v5644_v4 = vpop.f32.mrb[3].mxu0 }
 0x742   : > { %5802 = vst [vmem:[%s9858_s17 + $0x298] sm:$0xff] %v5641_v23  ;;  %v5645_v46 = vadd.f32 %v5644_v4, %v9854_v13 }
 0x743   : > { %5803 = vst [vmem:[%s9858_s17 + $0x2b0] sm:$0xff] %v5643_v17 }
 0x744   : > { %5804 = vst [vmem:[%s9858_s17 + $0x2b8] sm:$0xff] %v5645_v46 }
 0x746   : > { %v5648_v52 = vpop.f32.mrb[4].mxu0 }
 0x747   : > { %v5649_v18 = vadd.f32 %v5648_v52, %v9848_v47  ;;  %v5650_v0 = vpop.f32.mrb[5].mxu0 }
 0x748   : > { %v5651_v55 = vadd.f32 %v5650_v0, %v9854_v13  ;;  %v5652_v20 = vpop.f32.mrb[6].mxu0 }
 0x749   : > { %5805 = vst [vmem:[%s9858_s17 + $0x2d0] sm:$0xff] %v5649_v18  ;;  %v5653_v61 = vadd.f32 %v5652_v20, %v9848_v47  ;;  %v5654_v5 = vpop.f32.mrb[7].mxu0 }
 0x74a   : > { %5806 = vst [vmem:[%s9858_s17 + $0x2d8] sm:$0xff] %v5651_v55  ;;  %v5655_v35 = vadd.f32 %v5654_v5, %v9854_v13 }
 0x74b   : > { %5807 = vst [vmem:[%s9858_s17 + $0x2f0] sm:$0xff] %v5653_v61 }
 0x74c   : > { %5808 = vst [vmem:[%s9858_s17 + $0x2f8] sm:$0xff] %v5655_v35 }
 0x74e   : > { %v5658_v40 = vpop.f32.mrb[8].mxu0 }
 0x74f   : > { %v5659_v41 = vadd.f32 %v5658_v40, %v9848_v47  ;;  %v5660_v31 = vpop.f32.mrb[9].mxu0 }
 0x750   : > { %v5661_v49 = vadd.f32 %v5660_v31, %v9854_v13  ;;  %v5662_v37 = vpop.f32.mrb[10].mxu0 }
 0x751   : > { %5809 = vst [vmem:[%s9858_s17 + $0x310] sm:$0xff] %v5659_v41  ;;  %v5663_v26 = vadd.f32 %v5662_v37, %v9848_v47  ;;  %v5664_v24 = vpop.f32.mrb[11].mxu0 }
 0x752   : > { %5810 = vst [vmem:[%s9858_s17 + $0x318] sm:$0xff] %v5661_v49  ;;  %v5665_v59 = vadd.f32 %v5664_v24, %v9854_v13 }
 0x753   : > { %5811 = vst [vmem:[%s9858_s17 + $0x330] sm:$0xff] %v5663_v26 }
 0x754   : > { %5812 = vst [vmem:[%s9858_s17 + $0x338] sm:$0xff] %v5665_v59 }
 0x756   : > { %v5668_v19 = vpop.f32.mrb[12].mxu0 }
 0x757   : > { %v5669_v57 = vadd.f32 %v5668_v19, %v9848_v47  ;;  %v5670_v50 = vpop.f32.mrb[13].mxu0 }
 0x758   : > { %v5671_v44 = vadd.f32 %v5670_v50, %v9854_v13  ;;  %v5672_v51 = vpop.f32.mrb[14].mxu0 }
 0x759   : > { %5813 = vst [vmem:[%s9858_s17 + $0x350] sm:$0xff] %v5669_v57  ;;  %v5673_v56 = vadd.f32 %v5672_v51, %v9848_v47  ;;  %v5674_v60 = vpop.f32.mrb[15].mxu0 }
 0x75a   : > { %5814 = vst [vmem:[%s9858_s17 + $0x358] sm:$0xff] %v5671_v44  ;;  %v5675_v7 = vadd.f32 %v5674_v60, %v9854_v13 }
 0x75b   : > { %5815 = vst [vmem:[%s9858_s17 + $0x370] sm:$0xff] %v5673_v56 }
 0x75c   : > { %5816 = vst [vmem:[%s9858_s17 + $0x378] sm:$0xff] %v5675_v7 }
 0x75e   : > { %v5678_v62 = vpop.f32.mrb[16].mxu0 }
 0x75f   : > { %v5679_v63 = vadd.f32 %v5678_v62, %v9848_v47  ;;  %v5680_v15 = vpop.f32.mrb[17].mxu0 }
 0x760   : > { %v5681_v9 = vadd.f32 %v5680_v15, %v9854_v13  ;;  %v5682_v12 = vpop.f32.mrb[18].mxu0 }
 0x761   : > { %5817 = vst [vmem:[%s9858_s17 + $0x390] sm:$0xff] %v5679_v63  ;;  %v5683_v1 = vadd.f32 %v5682_v12, %v9848_v47  ;;  %v5684_v16 = vpop.f32.mrb[19].mxu0 }
 0x762   : > { %5818 = vst [vmem:[%s9858_s17 + $0x398] sm:$0xff] %v5681_v9  ;;  %v5685_v58 = vadd.f32 %v5684_v16, %v9854_v13 }
 0x763   : > { %5819 = vst [vmem:[%s9858_s17 + $0x3b0] sm:$0xff] %v5683_v1 }
 0x764   : > { %5820 = vst [vmem:[%s9858_s17 + $0x3b8] sm:$0xff] %v5685_v58 }
 0x766   : > { %v5688_v53 = vpop.f32.mrb[20].mxu0  ;;  %5832 = sbr.rel (!%p7807_p5) target bundleno = 1929 (0x789), region = 76 }
 0x767   : > { %v5689_v27 = vadd.f32 %v5688_v53, %v9848_v47  ;;  %v5690_v6 = vpop.f32.mrb[21].mxu0 }
 0x768   : > { %v5691_v36 = vadd.f32 %v5690_v6, %v9854_v13  ;;  %v5692_v30 = vpop.f32.mrb[22].mxu0 }
 0x769   : > { %5821 = vst [vmem:[%s9858_s17 + $0x3d0] sm:$0xff] %v5689_v27  ;;  %v5693_v32 = vadd.f32 %v5692_v30, %v9848_v47  ;;  %v5694_v14 = vpop.f32.mrb[23].mxu0 }
 0x76a   : > { %5822 = vst [vmem:[%s9858_s17 + $0x3d8] sm:$0xff] %v5691_v36  ;;  %v5695_v8 = vadd.f32 %v5694_v14, %v9854_v13 }
 0x76b   : > { %5823 = vst [vmem:[%s9858_s17 + $0x3f0] sm:$0xff] %v5693_v32 }
 0x76c   : > { %5824 = vst [vmem:[%s9858_s17 + $0x3f8] sm:$0xff] %v5695_v8 }
 0x76d   : > { %s10289_s30 = smov (!%p5835_p11, %s5834_s30), 32 }
 0x76e   : > { %s10158_s27 = sshll.u32 %s10289_s30, 9 }
 0x76f   : > { %s5840_s14 = ssub.s32 16384, %s10158_s27 }
 0x770   : > { %5841 = vsyncadd %s10153_s16, %s5840_s14  ;;  %p6382_p12 = scmp.ne.s32.totalorder %s10158_s27, 0  ;;  %s6392_s21 = sshll.u32 %s7790_s29, 14 }
 0x771   : > { %s10167_s24 = scalar_lea.hbm %s10227_s13, %s6392_s21  ;;  %s5847_s22 = sshll.u32 %s9858_s17, 4  ;;  %s10170_s22 = int_to_ptr.vmem [resolvable:$true] %s5847_s22 }
 0x772   : > { %s7631_s15 = scalar_lea.vmem %s10170_s22, %s10158_s27  ;;  %s7696_s20 = smov [#allocation2]  }
 0x773   : > { %p7632_p13 = scmp.ne.s32.totalorder %s10170_s22, %s7631_s15  ;;  %s7635_s30 = sshll.u32 %s7696_s20, 4  ;;  %s7636_s30 = int_to_ptr.vmem [resolvable:$false] %s7635_s30 }
 0x774   : > { %s7637_s29 = scalar_lea.vmem %s7636_s30, 32768  ;;  %p7638_p2 = scmp.lt.s32.totalorder %s10170_s22, %s7636_s30 }
 0x775   : > { %p7633_p0 = pnand %p7632_p13, %p6382_p12  ;;  %p7639_p3 = scmp.lt.s32.totalorder %s7637_s29, %s7631_s15 }
 0x777   : > { %p7634_p1 = pneg %p7633_p0  ;;  %p7640_p4 = por %p7639_p3, %p7638_p2 }
 0x779   : > { %p7641_p5 = pnand %p7640_p4, %p7634_p1 }
 0x77b   : > { %7644 = shalt.err (!%p7641_p5)
}
 0x77c   : > { %s7645_s17 = scalar_lea.hbm %s10167_s24, %s10158_s27  ;;  %s7649_s23 = scalar_lea.hbm %s10227_s13, 38400 }
 0x77d   : > { %p7646_p7 = scmp.ne.s32.totalorder %s10167_s24, %s7645_s17  ;;  %p7650_p10 = scmp.lt.u32.totalorder %s10167_s24, %s10227_s13 }
 0x77e   : > { %p7651_p11 = scmp.lt.u32.totalorder %s7649_s23, %s7645_s17  ;;  %p7653_p0 = scmp.lt.u32.totalorder %s7645_s17, %s10167_s24 }
 0x77f   : > { %p7647_p8 = pnand %p7646_p7, %p6382_p12 }
 0x780   : > { %p7652_p13 = por %p7651_p11, %p7650_p10 }
 0x781   : > { %p7648_p9 = pneg %p7647_p8 }
 0x782   : > { %p7654_p1 = por %p7653_p0, %p7652_p13 }
 0x784   : > { %p7655_p2 = pnand %p7654_p1, %p7648_p9 }
 0x786   : > { %7658 = shalt.err (!%p7655_p2)
}
 0x787   : > { %s7697_s20 = smov 512   ;;  %s7698_s30 = smov 32  }
 0x788   : > { %5853 = dma.vmem_to_hbm [thread:$0]  (%p6382_p12), %s10170_s22, %s10158_s27, %s10167_s24, %s10153_s16, %s7697_s20, %s7697_s20, %s7698_s30  }
 0x789 PF: > { %p6774_p3 = scmp.ge.s32.totalorder %s7693_s28, 2  ;;  %s5862_s29 = sand.u32 1, %s7681_s25  }
 0x78a   : > { %s5863_s17 = scalar_lea.sflag [#allocation3], %s5862_s29 }
 0x78b   : > { %p6771_p4 = pnand %p6774_p3, %p7811_p6 }
 0x78d   : > { %7676 = dma.done.wait (!%p6771_p4), %s5863_s17, 16384  }
 0x78e   : > { %7678 = vsyncadd (!%p6771_p4), %s5863_s17, 4294950912  ;;  %s10283_s28 = sld [smem:[#allocation6_spill]]  ;;  %s10284_s14 = sld [smem:[#allocation5_spill]] }
 0x78f   : > { %s10285_s27 = sld [smem:[#allocation7_spill]]  ;;  %s10286_s25 = smov %s7685_s26 }
 0x794   : > { %p23_p5 = scmp.ge.s32.totalorder %s10283_s28, 5   ;;  %s10287_s26 = smov %s10284_s14 }
 0x796   :  { %25 = sbr.rel (!%p23_p5) target bundleno = 3 (0x3), region = 107 }
 0x79d   :  { %5868 = vsyncpa [#allocation3], 1 }
 0x79e   :  { %5870 = vsyncpa [#allocation3 + $0x1], 1 }

</bundles_post_ra>
